<compile_context>
chip_gen: v6e
topology: v6e:2x2x1
jax: 0.10.0
libtpu: 0.0.40
codegen_flags: <defaults>
</compile_context>

<pallas_src>
import math

import jax
import jax.numpy as jnp
from jax.experimental import pallas as pl
from jax.experimental.pallas import tpu as pltpu

# ---- small, forward-consistent config -------------------------------------
IMG = 16          # img_size
PATCH = 4         # patch_size
CIN = 3           # in_chans
DIM = 32          # embed_dim
DEPTH = 2         # depth
HEADS = 4         # num_heads
HD = DIM // HEADS # head_dim
MLP = int(DIM * 4.0)
NUM_CLASSES = 10
NP = (IMG // PATCH) * (IMG // PATCH)   # num_patches = 16
N = NP + 1                             # tokens incl. cls = 17
K = CIN * PATCH * PATCH                # patch vector length = 48
KPAD = 128                             # lane-dense padded patch vector
NCPAD = 128                            # lane-dense padded logits
EPS = 1e-6
SCALE = HD ** (-0.5)
NEG_INF = -1e30

DATA_MEAN = (0.485, 0.456, 0.406)
DATA_STD = (0.229, 0.224, 0.225)


# ---------------------------------------------------------------------------
# Fused kernel
# ---------------------------------------------------------------------------
def _layernorm(v, w, b):
    mu = jnp.mean(v, axis=-1, keepdims=True)
    var = jnp.mean((v - mu) ** 2, axis=-1, keepdims=True)
    return (v - mu) * jax.lax.rsqrt(var + EPS) * w + b


def vit_kernel(patches_ref, bias_ref, pe_w_ref, misc128_ref, miscd_ref, pos_ref,
               w_qkv_ref, b_qkv_ref, w_proj_ref, lnv_ref,
               fc1_w_ref, fc1_b_ref, fc2_w_ref, head_w_ref, o_ref):
    B = patches_ref.shape[0] // NP
    BN = B * N

    m128 = misc128_ref[...]            # (8, 128): mean, std, head_bias (padded)
    mean = m128[0:1, :]
    std = m128[1:2, :]
    head_b = m128[2:3, :]

    md = miscd_ref[...]                # (8, DIM): pe_b, cls, norm_w, norm_b
    pe_b = md[0:1, :]
    cls_tok = md[1:2, :]
    norm_w = md[2:3, :]
    norm_b = md[3:4, :]

    # --- DataNorm + patch embedding (stride==kernel conv == matmul on im2col) ---
    p = (patches_ref[...] - mean) / std                       # (B*NP, 128)
    tok = jnp.dot(p, pe_w_ref[...],
                  preferred_element_type=jnp.float32) + pe_b  # (B*NP, DIM)

    # --- assemble [cls | patch tokens] per image + positional embedding ---
    pos = pos_ref[...]                                        # (N, DIM)
    cls_row = cls_tok + pos[0:1, :]
    parts = []
    for b in range(B):
        parts.append(cls_row)
        parts.append(tok[b * NP:(b + 1) * NP, :] + pos[1:, :])
    x = jnp.concatenate(parts, axis=0)                        # (B*N, DIM)

    attn_bias = bias_ref[...]          # (B*N, B*N): 0 within image, -1e30 across

    for l in range(DEPTH):
        lv = lnv_ref[l]                # (8, DIM) packed per-layer vectors
        ln1_w, ln1_b = lv[0:1, :], lv[1:2, :]
        ln2_w, ln2_b = lv[2:3, :], lv[3:4, :]
        proj_b, fc2_b = lv[4:5, :], lv[5:6, :]

        # --- attention (r_std == 0.0 path, so R == 0) ---
        xn = _layernorm(x, ln1_w, ln1_b)
        att = jnp.zeros((BN, DIM), jnp.float32)
        for h in range(HEADS):
            qh = jnp.dot(xn, w_qkv_ref[l, 0, h],
                         preferred_element_type=jnp.float32) + b_qkv_ref[l, 0, h]
            kh = jnp.dot(xn, w_qkv_ref[l, 1, h],
                         preferred_element_type=jnp.float32) + b_qkv_ref[l, 1, h]
            vh = jnp.dot(xn, w_qkv_ref[l, 2, h],
                         preferred_element_type=jnp.float32) + b_qkv_ref[l, 2, h]
            s = jnp.dot(qh, kh.T, preferred_element_type=jnp.float32) * SCALE
            s = s + attn_bias
            s = s - jnp.max(s, axis=-1, keepdims=True)
            e = jnp.exp(s)
            a = e * pl.reciprocal(jnp.sum(e, axis=-1, keepdims=True), approx=True)
            oh = jnp.dot(a, vh, preferred_element_type=jnp.float32)      # (BN, HD)
            # head-concat folded into per-head projection (accumulate)
            att = att + jnp.dot(oh, w_proj_ref[l, h],
                                preferred_element_type=jnp.float32)
        # TODO(synk): r_std != 0 branch (compute_R / get_R_testing with autograd)
        # has no Pallas equivalent here; R == 0 path implemented.
        x = x + att + proj_b

        # --- MLP (exact erf GELU, matching torch.nn.GELU default) ---
        x1n = _layernorm(x, ln2_w, ln2_b)
        h1 = jnp.dot(x1n, fc1_w_ref[l],
                     preferred_element_type=jnp.float32) + fc1_b_ref[l]
        h1 = 0.5 * h1 * (1.0 + jax.lax.erf(h1 * (1.0 / math.sqrt(2.0))))
        x = x + jnp.dot(h1, fc2_w_ref[l],
                        preferred_element_type=jnp.float32) + fc2_b

    # --- final LayerNorm on cls tokens + classifier head (lane-dense output) ---
    cls_rows = jnp.concatenate([x[b * N:b * N + 1, :] for b in range(B)], axis=0)
    cn = _layernorm(cls_rows, norm_w, norm_b)
    o_ref[...] = jnp.dot(cn, head_w_ref[...],
                         preferred_element_type=jnp.float32) + head_b


def _full_spec(shape):
    rank = len(shape)
    return pl.BlockSpec(tuple(shape), lambda i, _r=rank: (0,) * _r)


# ---------------------------------------------------------------------------
# Wrapper: im2col patch extraction + single fused pallas_call
# ---------------------------------------------------------------------------
def patchify(x):
    # x: [B, C, H, W] -> [B*NP, C*p*p] with (C, ph, pw) flattening order,
    # matching Conv2d(weight: [D, C, p, p]) reduction order.
    B = x.shape[0]
    g = IMG // PATCH
    x = x.reshape(B, CIN, g, PATCH, g, PATCH)
    x = x.transpose(0, 2, 4, 1, 3, 5)  # B, gh, gw, C, ph, pw
    return x.reshape(B * NP, K)


def vit_forward(x, params):
    B = x.shape[0]
    patches = patchify(x)
    patches = jnp.pad(patches, ((0, 0), (0, KPAD - K)))       # lane-dense (B*NP, 128)

    # block-diagonal additive bias so each image only attends to its own tokens
    ids = jnp.arange(B * N, dtype=jnp.int32) // N
    attn_bias = jnp.where(ids[:, None] == ids[None, :], 0.0, NEG_INF).astype(jnp.float32)

    operands = [patches, attn_bias, params["pe_w"], params["misc128"],
                params["miscd"], params["pos"], params["w_qkv"], params["b_qkv"],
                params["w_proj"], params["lnv"], params["fc1_w"], params["fc1_b"],
                params["fc2_w"], params["head_w"]]

    logits_pad = pl.pallas_call(
        vit_kernel,
        out_shape=jax.ShapeDtypeStruct((B, NCPAD), jnp.float32),
        grid=(1,),
        in_specs=[_full_spec(op.shape) for op in operands],
        out_specs=_full_spec((B, NCPAD)),
        compiler_params=pltpu.CompilerParams(dimension_semantics=("arbitrary",)),
    )(*operands)
    return logits_pad[:, :NUM_CLASSES]


# ---------------------------------------------------------------------------
# Deterministic parameter construction (packed / lane-dense layout)
# ---------------------------------------------------------------------------
def init_params(key):
    keys = iter(jax.random.split(key, 32))
    rnd = lambda shape, s=0.02: s * jax.random.normal(next(keys), shape, jnp.float32)
    zd = jnp.zeros((DIM,), jnp.float32)
    zk = jnp.zeros((KPAD,), jnp.float32)

    mean = jnp.repeat(jnp.asarray(DATA_MEAN, jnp.float32), PATCH * PATCH)   # (K,)
    std = jnp.repeat(jnp.asarray(DATA_STD, jnp.float32), PATCH * PATCH)
    mean_p = jnp.zeros((KPAD,), jnp.float32).at[:K].set(mean)
    std_p = jnp.ones((KPAD,), jnp.float32).at[:K].set(std)                  # pad=1 (no-op)
    head_b = jnp.zeros((NCPAD,), jnp.float32).at[:NUM_CLASSES].set(rnd((NUM_CLASSES,)))
    misc128 = jnp.stack([mean_p, std_p, head_b, zk, zk, zk, zk, zk])        # (8, 128)

    pe_b = rnd((DIM,))
    cls_token = rnd((DIM,))   # module inits to 0; random here for a non-trivial test
    norm_w = jnp.ones((DIM,), jnp.float32)
    norm_b = jnp.zeros((DIM,), jnp.float32)
    miscd = jnp.stack([pe_b, cls_token, norm_w, norm_b, zd, zd, zd, zd])    # (8, DIM)

    # Conv2d weight [D, C, p, p] flattened & transposed -> (K, D), zero-padded to 128
    pe_w = jnp.zeros((KPAD, DIM), jnp.float32).at[:K, :].set(rnd((K, DIM)))
    pos = rnd((N, DIM))

    # per-head weight layout: q/k/v columns and proj rows split by head so the
    # kernel never lane-slices activations.
    w_qkv = rnd((DEPTH, 3, HEADS, DIM, HD))
    b_qkv = rnd((DEPTH, 3, HEADS, 1, HD))
    w_proj = rnd((DEPTH, HEADS, HD, DIM))

    lnv_layers = []
    for _ in range(DEPTH):
        ln1_w = jnp.ones((DIM,), jnp.float32)   # nn.LayerNorm init: weight=1, bias=0
        ln1_b = zd
        ln2_w = jnp.ones((DIM,), jnp.float32)
        ln2_b = zd
        proj_b = rnd((DIM,))
        fc2_b = rnd((DIM,))
        lnv_layers.append(jnp.stack([ln1_w, ln1_b, ln2_w, ln2_b, proj_b, fc2_b, zd, zd]))
    lnv = jnp.stack(lnv_layers)                                             # (DEPTH, 8, DIM)

    fc1_w = rnd((DEPTH, DIM, MLP))
    fc1_b = rnd((DEPTH, 1, MLP))
    fc2_w = rnd((DEPTH, MLP, DIM))

    # module inits head to 0; random for non-trivial output.  Padded to 128 lanes.
    head_w = jnp.zeros((DIM, NCPAD), jnp.float32).at[:, :NUM_CLASSES].set(
        rnd((DIM, NUM_CLASSES)))

    return dict(misc128=misc128, miscd=miscd, pe_w=pe_w, pos=pos,
                w_qkv=w_qkv, b_qkv=b_qkv, w_proj=w_proj, lnv=lnv,
                fc1_w=fc1_w, fc1_b=fc1_b, fc2_w=fc2_w, head_w=head_w)


if __name__ == "__main__":
    x = jax.random.normal(jax.random.PRNGKey(0), (2, CIN, IMG, IMG), jnp.float32)
    params = init_params(jax.random.PRNGKey(1))

    out = jax.jit(vit_forward)(x, params)
    out = jax.block_until_ready(out)
    assert out.shape == (2, NUM_CLASSES)
    assert bool(jnp.all(jnp.isfinite(out)))
    print("KERNEL_OK")
</pallas_src>

<mosaic_0001>
module attributes {stable_mosaic.version = 11 : i64} {
  func.func @vit_kernel(%arg0: i32, %arg1: memref<32x128xf32, #tpu.memory_space<vmem>>, %arg2: memref<34x34xf32, #tpu.memory_space<vmem>>, %arg3: memref<128x32xf32, #tpu.memory_space<vmem>>, %arg4: memref<8x128xf32, #tpu.memory_space<vmem>>, %arg5: memref<8x32xf32, #tpu.memory_space<vmem>>, %arg6: memref<17x32xf32, #tpu.memory_space<vmem>>, %arg7: memref<2x3x4x32x8xf32, #tpu.memory_space<vmem>>, %arg8: memref<2x3x4x1x8xf32, #tpu.memory_space<vmem>>, %arg9: memref<2x4x8x32xf32, #tpu.memory_space<vmem>>, %arg10: memref<2x8x32xf32, #tpu.memory_space<vmem>>, %arg11: memref<2x32x128xf32, #tpu.memory_space<vmem>>, %arg12: memref<2x1x128xf32, #tpu.memory_space<vmem>>, %arg13: memref<2x128x32xf32, #tpu.memory_space<vmem>>, %arg14: memref<32x128xf32, #tpu.memory_space<vmem>>, %arg15: memref<2x128xf32, #tpu.memory_space<vmem>>) attributes {dimension_semantics = [#tpu.dimension_semantics<arbitrary>], iteration_bounds = array<i64: 1>, scalar_prefetch = 0 : i64, scratch_operands = 0 : i64, tpu.core_type = #tpu.core_type<tc>, window_params = [{pipeline_mode = #tpu.pipeline_mode<synchronous>, transform_indices = @transform_0, window_bounds = array<i64: 32, 128>}, {pipeline_mode = #tpu.pipeline_mode<synchronous>, transform_indices = @transform_1, window_bounds = array<i64: 34, 34>}, {pipeline_mode = #tpu.pipeline_mode<synchronous>, transform_indices = @transform_2, window_bounds = array<i64: 128, 32>}, {pipeline_mode = #tpu.pipeline_mode<synchronous>, transform_indices = @transform_3, window_bounds = array<i64: 8, 128>}, {pipeline_mode = #tpu.pipeline_mode<synchronous>, transform_indices = @transform_4, window_bounds = array<i64: 8, 32>}, {pipeline_mode = #tpu.pipeline_mode<synchronous>, transform_indices = @transform_5, window_bounds = array<i64: 17, 32>}, {pipeline_mode = #tpu.pipeline_mode<synchronous>, transform_indices = @transform_6, window_bounds = array<i64: 2, 3, 4, 32, 8>}, {pipeline_mode = #tpu.pipeline_mode<synchronous>, transform_indices = @transform_7, window_bounds = array<i64: 2, 3, 4, 1, 8>}, {pipeline_mode = #tpu.pipeline_mode<synchronous>, transform_indices = @transform_8, window_bounds = array<i64: 2, 4, 8, 32>}, {pipeline_mode = #tpu.pipeline_mode<synchronous>, transform_indices = @transform_9, window_bounds = array<i64: 2, 8, 32>}, {pipeline_mode = #tpu.pipeline_mode<synchronous>, transform_indices = @transform_10, window_bounds = array<i64: 2, 32, 128>}, {pipeline_mode = #tpu.pipeline_mode<synchronous>, transform_indices = @transform_11, window_bounds = array<i64: 2, 1, 128>}, {pipeline_mode = #tpu.pipeline_mode<synchronous>, transform_indices = @transform_12, window_bounds = array<i64: 2, 128, 32>}, {pipeline_mode = #tpu.pipeline_mode<synchronous>, transform_indices = @transform_13, window_bounds = array<i64: 32, 128>}, {pipeline_mode = #tpu.pipeline_mode<synchronous>, transform_indices = @transform_14, window_bounds = array<i64: 2, 128>}]} {
    %c0 = arith.constant 0 : index
    %c0_0 = arith.constant 0 : index
    %0 = vector.load %arg4[%c0, %c0_0] : memref<8x128xf32, #tpu.memory_space<vmem>>, vector<8x128xf32>
    %1 = vector.extract_strided_slice %0 {offsets = [0, 0], sizes = [1, 128], strides = [1, 1]} : vector<8x128xf32> to vector<1x128xf32>
    %2 = vector.extract_strided_slice %0 {offsets = [1, 0], sizes = [1, 128], strides = [1, 1]} : vector<8x128xf32> to vector<1x128xf32>
    %3 = vector.extract_strided_slice %0 {offsets = [2, 0], sizes = [1, 128], strides = [1, 1]} : vector<8x128xf32> to vector<1x128xf32>
    %c0_1 = arith.constant 0 : index
    %c0_2 = arith.constant 0 : index
    %4 = vector.load %arg5[%c0_1, %c0_2] : memref<8x32xf32, #tpu.memory_space<vmem>>, vector<8x32xf32>
    %5 = vector.extract_strided_slice %4 {offsets = [0, 0], sizes = [1, 32], strides = [1, 1]} : vector<8x32xf32> to vector<1x32xf32>
    %6 = vector.extract_strided_slice %4 {offsets = [1, 0], sizes = [1, 32], strides = [1, 1]} : vector<8x32xf32> to vector<1x32xf32>
    %7 = vector.extract_strided_slice %4 {offsets = [2, 0], sizes = [1, 32], strides = [1, 1]} : vector<8x32xf32> to vector<1x32xf32>
    %8 = vector.extract_strided_slice %4 {offsets = [3, 0], sizes = [1, 32], strides = [1, 1]} : vector<8x32xf32> to vector<1x32xf32>
    %c0_3 = arith.constant 0 : index
    %c0_4 = arith.constant 0 : index
    %9 = vector.load %arg1[%c0_3, %c0_4] : memref<32x128xf32, #tpu.memory_space<vmem>>, vector<32x128xf32>
    %10 = vector.broadcast %1 : vector<1x128xf32> to vector<32x128xf32>
    %11 = arith.subf %9, %10 : vector<32x128xf32>
    %12 = vector.broadcast %2 : vector<1x128xf32> to vector<32x128xf32>
    %13 = arith.divf %11, %12 : vector<32x128xf32>
    %c0_5 = arith.constant 0 : index
    %c0_6 = arith.constant 0 : index
    %14 = vector.load %arg3[%c0_5, %c0_6] : memref<128x32xf32, #tpu.memory_space<vmem>>, vector<128x32xf32>
    %cst = arith.constant dense<0.000000e+00> : vector<32x32xf32>
    %15 = tpu.matmul %13, %14, %cst {dimension_numbers = #tpu.dot_dimension_numbers<[1], [0], [0], [1], [0, 0, 1, 1], [], []>} : vector<32x128xf32>, vector<128x32xf32>, vector<32x32xf32> -> vector<32x32xf32>
    %16 = vector.broadcast %5 : vector<1x32xf32> to vector<32x32xf32>
    %17 = arith.addf %15, %16 : vector<32x32xf32>
    %c0_7 = arith.constant 0 : index
    %c0_8 = arith.constant 0 : index
    %18 = vector.load %arg6[%c0_7, %c0_8] : memref<17x32xf32, #tpu.memory_space<vmem>>, vector<17x32xf32>
    %19 = vector.extract_strided_slice %18 {offsets = [0, 0], sizes = [1, 32], strides = [1, 1]} : vector<17x32xf32> to vector<1x32xf32>
    %20 = arith.addf %6, %19 : vector<1x32xf32>
    %21 = vector.extract_strided_slice %17 {offsets = [0, 0], sizes = [16, 32], strides = [1, 1]} : vector<32x32xf32> to vector<16x32xf32>
    %22 = vector.extract_strided_slice %18 {offsets = [1, 0], sizes = [16, 32], strides = [1, 1]} : vector<17x32xf32> to vector<16x32xf32>
    %23 = arith.addf %21, %22 : vector<16x32xf32>
    %24 = vector.extract_strided_slice %17 {offsets = [16, 0], sizes = [16, 32], strides = [1, 1]} : vector<32x32xf32> to vector<16x32xf32>
    %25 = vector.extract_strided_slice %18 {offsets = [1, 0], sizes = [16, 32], strides = [1, 1]} : vector<17x32xf32> to vector<16x32xf32>
    %26 = arith.addf %24, %25 : vector<16x32xf32>
    %27 = tpu.concatenate %20, %23, %20, %26 in 0 : vector<1x32xf32>, vector<16x32xf32>, vector<1x32xf32>, vector<16x32xf32> -> vector<34x32xf32>
    %c0_9 = arith.constant 0 : index
    %c0_10 = arith.constant 0 : index
    %28 = vector.load %arg2[%c0_9, %c0_10] : memref<34x34xf32, #tpu.memory_space<vmem>>, vector<34x34xf32>
    %c0_11 = arith.constant 0 : index
    %c0_12 = arith.constant 0 : index
    %c0_13 = arith.constant 0 : index
    %29 = vector.load %arg10[%c0_11, %c0_12, %c0_13] : memref<2x8x32xf32, #tpu.memory_space<vmem>>, vector<1x8x32xf32>
    %30 = vector.shape_cast %29 : vector<1x8x32xf32> to vector<8x32xf32>
    %31 = vector.extract_strided_slice %30 {offsets = [0, 0], sizes = [1, 32], strides = [1, 1]} : vector<8x32xf32> to vector<1x32xf32>
    %32 = vector.extract_strided_slice %30 {offsets = [1, 0], sizes = [1, 32], strides = [1, 1]} : vector<8x32xf32> to vector<1x32xf32>
    %33 = vector.extract_strided_slice %30 {offsets = [2, 0], sizes = [1, 32], strides = [1, 1]} : vector<8x32xf32> to vector<1x32xf32>
    %34 = vector.extract_strided_slice %30 {offsets = [3, 0], sizes = [1, 32], strides = [1, 1]} : vector<8x32xf32> to vector<1x32xf32>
    %35 = vector.extract_strided_slice %30 {offsets = [4, 0], sizes = [1, 32], strides = [1, 1]} : vector<8x32xf32> to vector<1x32xf32>
    %36 = vector.extract_strided_slice %30 {offsets = [5, 0], sizes = [1, 32], strides = [1, 1]} : vector<8x32xf32> to vector<1x32xf32>
    %cst_14 = arith.constant dense<0.000000e+00> : vector<34xf32>
    %37 = vector.multi_reduction <add>, %27, %cst_14 [1] : vector<34x32xf32> to vector<34xf32>
    %38 = vector.shape_cast %37 : vector<34xf32> to vector<34x1xf32>
    %cst_15 = arith.constant 3.200000e+01 : f32
    %39 = vector.broadcast %cst_15 : f32 to vector<34x1xf32>
    %40 = arith.divf %38, %39 : vector<34x1xf32>
    %41 = vector.broadcast %40 : vector<34x1xf32> to vector<34x32xf32>
    %42 = arith.subf %27, %41 : vector<34x32xf32>
    %43 = arith.mulf %42, %42 : vector<34x32xf32>
    %cst_16 = arith.constant dense<0.000000e+00> : vector<34xf32>
    %44 = vector.multi_reduction <add>, %43, %cst_16 [1] : vector<34x32xf32> to vector<34xf32>
    %45 = vector.shape_cast %44 : vector<34xf32> to vector<34x1xf32>
    %cst_17 = arith.constant 3.200000e+01 : f32
    %46 = vector.broadcast %cst_17 : f32 to vector<34x1xf32>
    %47 = arith.divf %45, %46 : vector<34x1xf32>
    %48 = vector.broadcast %40 : vector<34x1xf32> to vector<34x32xf32>
    %49 = arith.subf %27, %48 : vector<34x32xf32>
    %cst_18 = arith.constant 9.99999997E-7 : f32
    %50 = vector.broadcast %cst_18 : f32 to vector<34x1xf32>
    %51 = arith.addf %47, %50 : vector<34x1xf32>
    %52 = math.rsqrt %51 : vector<34x1xf32>
    %53 = vector.broadcast %52 : vector<34x1xf32> to vector<34x32xf32>
    %54 = arith.mulf %49, %53 : vector<34x32xf32>
    %55 = vector.broadcast %31 : vector<1x32xf32> to vector<34x32xf32>
    %56 = arith.mulf %54, %55 : vector<34x32xf32>
    %57 = vector.broadcast %32 : vector<1x32xf32> to vector<34x32xf32>
    %58 = arith.addf %56, %57 : vector<34x32xf32>
    %cst_19 = arith.constant 0.000000e+00 : f32
    %59 = vector.broadcast %cst_19 : f32 to vector<34x32xf32>
    %c0_20 = arith.constant 0 : index
    %c0_21 = arith.constant 0 : index
    %c0_22 = arith.constant 0 : index
    %c0_23 = arith.constant 0 : index
    %c0_24 = arith.constant 0 : index
    %60 = vector.load %arg7[%c0_20, %c0_21, %c0_22, %c0_23, %c0_24] : memref<2x3x4x32x8xf32, #tpu.memory_space<vmem>>, vector<1x1x1x32x8xf32>
    %61 = vector.shape_cast %60 : vector<1x1x1x32x8xf32> to vector<32x8xf32>
    %cst_25 = arith.constant dense<0.000000e+00> : vector<34x8xf32>
    %62 = tpu.matmul %58, %61, %cst_25 {dimension_numbers = #tpu.dot_dimension_numbers<[1], [0], [0], [1], [0, 0, 1, 1], [], []>} : vector<34x32xf32>, vector<32x8xf32>, vector<34x8xf32> -> vector<34x8xf32>
    %c0_26 = arith.constant 0 : index
    %c0_27 = arith.constant 0 : index
    %c0_28 = arith.constant 0 : index
    %c0_29 = arith.constant 0 : index
    %c0_30 = arith.constant 0 : index
    %63 = vector.load %arg8[%c0_26, %c0_27, %c0_28, %c0_29, %c0_30] : memref<2x3x4x1x8xf32, #tpu.memory_space<vmem>>, vector<1x1x1x1x8xf32>
    %64 = vector.shape_cast %63 : vector<1x1x1x1x8xf32> to vector<1x8xf32>
    %65 = vector.broadcast %64 : vector<1x8xf32> to vector<34x8xf32>
    %66 = arith.addf %62, %65 : vector<34x8xf32>
    %c0_31 = arith.constant 0 : index
    %c1 = arith.constant 1 : index
    %c0_32 = arith.constant 0 : index
    %c0_33 = arith.constant 0 : index
    %c0_34 = arith.constant 0 : index
    %67 = vector.load %arg7[%c0_31, %c1, %c0_32, %c0_33, %c0_34] : memref<2x3x4x32x8xf32, #tpu.memory_space<vmem>>, vector<1x1x1x32x8xf32>
    %68 = vector.shape_cast %67 : vector<1x1x1x32x8xf32> to vector<32x8xf32>
    %cst_35 = arith.constant dense<0.000000e+00> : vector<34x8xf32>
    %69 = tpu.matmul %58, %68, %cst_35 {dimension_numbers = #tpu.dot_dimension_numbers<[1], [0], [0], [1], [0, 0, 1, 1], [], []>} : vector<34x32xf32>, vector<32x8xf32>, vector<34x8xf32> -> vector<34x8xf32>
    %c0_36 = arith.constant 0 : index
    %c1_37 = arith.constant 1 : index
    %c0_38 = arith.constant 0 : index
    %c0_39 = arith.constant 0 : index
    %c0_40 = arith.constant 0 : index
    %70 = vector.load %arg8[%c0_36, %c1_37, %c0_38, %c0_39, %c0_40] : memref<2x3x4x1x8xf32, #tpu.memory_space<vmem>>, vector<1x1x1x1x8xf32>
    %71 = vector.shape_cast %70 : vector<1x1x1x1x8xf32> to vector<1x8xf32>
    %72 = vector.broadcast %71 : vector<1x8xf32> to vector<34x8xf32>
    %73 = arith.addf %69, %72 : vector<34x8xf32>
    %c0_41 = arith.constant 0 : index
    %c2 = arith.constant 2 : index
    %c0_42 = arith.constant 0 : index
    %c0_43 = arith.constant 0 : index
    %c0_44 = arith.constant 0 : index
    %74 = vector.load %arg7[%c0_41, %c2, %c0_42, %c0_43, %c0_44] : memref<2x3x4x32x8xf32, #tpu.memory_space<vmem>>, vector<1x1x1x32x8xf32>
    %75 = vector.shape_cast %74 : vector<1x1x1x32x8xf32> to vector<32x8xf32>
    %cst_45 = arith.constant dense<0.000000e+00> : vector<34x8xf32>
    %76 = tpu.matmul %58, %75, %cst_45 {dimension_numbers = #tpu.dot_dimension_numbers<[1], [0], [0], [1], [0, 0, 1, 1], [], []>} : vector<34x32xf32>, vector<32x8xf32>, vector<34x8xf32> -> vector<34x8xf32>
    %c0_46 = arith.constant 0 : index
    %c2_47 = arith.constant 2 : index
    %c0_48 = arith.constant 0 : index
    %c0_49 = arith.constant 0 : index
    %c0_50 = arith.constant 0 : index
    %77 = vector.load %arg8[%c0_46, %c2_47, %c0_48, %c0_49, %c0_50] : memref<2x3x4x1x8xf32, #tpu.memory_space<vmem>>, vector<1x1x1x1x8xf32>
    %78 = vector.shape_cast %77 : vector<1x1x1x1x8xf32> to vector<1x8xf32>
    %79 = vector.broadcast %78 : vector<1x8xf32> to vector<34x8xf32>
    %80 = arith.addf %76, %79 : vector<34x8xf32>
    %81 = tpu.transpose %73, [1, 0] : vector<34x8xf32> -> vector<8x34xf32>
    %cst_51 = arith.constant dense<0.000000e+00> : vector<34x34xf32>
    %82 = tpu.matmul %66, %81, %cst_51 {dimension_numbers = #tpu.dot_dimension_numbers<[1], [0], [0], [1], [0, 0, 1, 1], [], []>} : vector<34x8xf32>, vector<8x34xf32>, vector<34x34xf32> -> vector<34x34xf32>
    %cst_52 = arith.constant 0.353553385 : f32
    %83 = vector.broadcast %cst_52 : f32 to vector<34x34xf32>
    %84 = arith.mulf %82, %83 : vector<34x34xf32>
    %85 = arith.addf %84, %28 : vector<34x34xf32>
    %cst_53 = arith.constant dense<0xFF800000> : vector<34xf32>
    %86 = vector.multi_reduction <maximumf>, %85, %cst_53 [1] : vector<34x34xf32> to vector<34xf32>
    %87 = vector.shape_cast %86 : vector<34xf32> to vector<34x1xf32>
    %88 = vector.broadcast %87 : vector<34x1xf32> to vector<34x34xf32>
    %89 = arith.subf %85, %88 : vector<34x34xf32>
    %90 = math.exp %89 : vector<34x34xf32>
    %cst_54 = arith.constant dense<0.000000e+00> : vector<34xf32>
    %91 = vector.multi_reduction <add>, %90, %cst_54 [1] : vector<34x34xf32> to vector<34xf32>
    %92 = vector.shape_cast %91 : vector<34xf32> to vector<34x1xf32>
    %93 = tpu.reciprocal %92 {approx = true} : vector<34x1xf32> -> vector<34x1xf32>
    %94 = vector.broadcast %93 : vector<34x1xf32> to vector<34x34xf32>
    %95 = arith.mulf %90, %94 : vector<34x34xf32>
    %cst_55 = arith.constant dense<0.000000e+00> : vector<34x8xf32>
    %96 = tpu.matmul %95, %80, %cst_55 {dimension_numbers = #tpu.dot_dimension_numbers<[1], [0], [0], [1], [0, 0, 1, 1], [], []>} : vector<34x34xf32>, vector<34x8xf32>, vector<34x8xf32> -> vector<34x8xf32>
    %c0_56 = arith.constant 0 : index
    %c0_57 = arith.constant 0 : index
    %c0_58 = arith.constant 0 : index
    %c0_59 = arith.constant 0 : index
    %97 = vector.load %arg9[%c0_56, %c0_57, %c0_58, %c0_59] : memref<2x4x8x32xf32, #tpu.memory_space<vmem>>, vector<1x1x8x32xf32>
    %98 = vector.shape_cast %97 : vector<1x1x8x32xf32> to vector<8x32xf32>
    %cst_60 = arith.constant dense<0.000000e+00> : vector<34x32xf32>
    %99 = tpu.matmul %96, %98, %cst_60 {dimension_numbers = #tpu.dot_dimension_numbers<[1], [0], [0], [1], [0, 0, 1, 1], [], []>} : vector<34x8xf32>, vector<8x32xf32>, vector<34x32xf32> -> vector<34x32xf32>
    %100 = arith.addf %59, %99 : vector<34x32xf32>
    %c0_61 = arith.constant 0 : index
    %c0_62 = arith.constant 0 : index
    %c1_63 = arith.constant 1 : index
    %c0_64 = arith.constant 0 : index
    %c0_65 = arith.constant 0 : index
    %101 = vector.load %arg7[%c0_61, %c0_62, %c1_63, %c0_64, %c0_65] : memref<2x3x4x32x8xf32, #tpu.memory_space<vmem>>, vector<1x1x1x32x8xf32>
    %102 = vector.shape_cast %101 : vector<1x1x1x32x8xf32> to vector<32x8xf32>
    %cst_66 = arith.constant dense<0.000000e+00> : vector<34x8xf32>
    %103 = tpu.matmul %58, %102, %cst_66 {dimension_numbers = #tpu.dot_dimension_numbers<[1], [0], [0], [1], [0, 0, 1, 1], [], []>} : vector<34x32xf32>, vector<32x8xf32>, vector<34x8xf32> -> vector<34x8xf32>
    %c0_67 = arith.constant 0 : index
    %c0_68 = arith.constant 0 : index
    %c1_69 = arith.constant 1 : index
    %c0_70 = arith.constant 0 : index
    %c0_71 = arith.constant 0 : index
    %104 = vector.load %arg8[%c0_67, %c0_68, %c1_69, %c0_70, %c0_71] : memref<2x3x4x1x8xf32, #tpu.memory_space<vmem>>, vector<1x1x1x1x8xf32>
    %105 = vector.shape_cast %104 : vector<1x1x1x1x8xf32> to vector<1x8xf32>
    %106 = vector.broadcast %105 : vector<1x8xf32> to vector<34x8xf32>
    %107 = arith.addf %103, %106 : vector<34x8xf32>
    %c0_72 = arith.constant 0 : index
    %c1_73 = arith.constant 1 : index
    %c1_74 = arith.constant 1 : index
    %c0_75 = arith.constant 0 : index
    %c0_76 = arith.constant 0 : index
    %108 = vector.load %arg7[%c0_72, %c1_73, %c1_74, %c0_75, %c0_76] : memref<2x3x4x32x8xf32, #tpu.memory_space<vmem>>, vector<1x1x1x32x8xf32>
    %109 = vector.shape_cast %108 : vector<1x1x1x32x8xf32> to vector<32x8xf32>
    %cst_77 = arith.constant dense<0.000000e+00> : vector<34x8xf32>
    %110 = tpu.matmul %58, %109, %cst_77 {dimension_numbers = #tpu.dot_dimension_numbers<[1], [0], [0], [1], [0, 0, 1, 1], [], []>} : vector<34x32xf32>, vector<32x8xf32>, vector<34x8xf32> -> vector<34x8xf32>
    %c0_78 = arith.constant 0 : index
    %c1_79 = arith.constant 1 : index
    %c1_80 = arith.constant 1 : index
    %c0_81 = arith.constant 0 : index
    %c0_82 = arith.constant 0 : index
    %111 = vector.load %arg8[%c0_78, %c1_79, %c1_80, %c0_81, %c0_82] : memref<2x3x4x1x8xf32, #tpu.memory_space<vmem>>, vector<1x1x1x1x8xf32>
    %112 = vector.shape_cast %111 : vector<1x1x1x1x8xf32> to vector<1x8xf32>
    %113 = vector.broadcast %112 : vector<1x8xf32> to vector<34x8xf32>
    %114 = arith.addf %110, %113 : vector<34x8xf32>
    %c0_83 = arith.constant 0 : index
    %c2_84 = arith.constant 2 : index
    %c1_85 = arith.constant 1 : index
    %c0_86 = arith.constant 0 : index
    %c0_87 = arith.constant 0 : index
    %115 = vector.load %arg7[%c0_83, %c2_84, %c1_85, %c0_86, %c0_87] : memref<2x3x4x32x8xf32, #tpu.memory_space<vmem>>, vector<1x1x1x32x8xf32>
    %116 = vector.shape_cast %115 : vector<1x1x1x32x8xf32> to vector<32x8xf32>
    %cst_88 = arith.constant dense<0.000000e+00> : vector<34x8xf32>
    %117 = tpu.matmul %58, %116, %cst_88 {dimension_numbers = #tpu.dot_dimension_numbers<[1], [0], [0], [1], [0, 0, 1, 1], [], []>} : vector<34x32xf32>, vector<32x8xf32>, vector<34x8xf32> -> vector<34x8xf32>
    %c0_89 = arith.constant 0 : index
    %c2_90 = arith.constant 2 : index
    %c1_91 = arith.constant 1 : index
    %c0_92 = arith.constant 0 : index
    %c0_93 = arith.constant 0 : index
    %118 = vector.load %arg8[%c0_89, %c2_90, %c1_91, %c0_92, %c0_93] : memref<2x3x4x1x8xf32, #tpu.memory_space<vmem>>, vector<1x1x1x1x8xf32>
    %119 = vector.shape_cast %118 : vector<1x1x1x1x8xf32> to vector<1x8xf32>
    %120 = vector.broadcast %119 : vector<1x8xf32> to vector<34x8xf32>
    %121 = arith.addf %117, %120 : vector<34x8xf32>
    %122 = tpu.transpose %114, [1, 0] : vector<34x8xf32> -> vector<8x34xf32>
    %cst_94 = arith.constant dense<0.000000e+00> : vector<34x34xf32>
    %123 = tpu.matmul %107, %122, %cst_94 {dimension_numbers = #tpu.dot_dimension_numbers<[1], [0], [0], [1], [0, 0, 1, 1], [], []>} : vector<34x8xf32>, vector<8x34xf32>, vector<34x34xf32> -> vector<34x34xf32>
    %cst_95 = arith.constant 0.353553385 : f32
    %124 = vector.broadcast %cst_95 : f32 to vector<34x34xf32>
    %125 = arith.mulf %123, %124 : vector<34x34xf32>
    %126 = arith.addf %125, %28 : vector<34x34xf32>
    %cst_96 = arith.constant dense<0xFF800000> : vector<34xf32>
    %127 = vector.multi_reduction <maximumf>, %126, %cst_96 [1] : vector<34x34xf32> to vector<34xf32>
    %128 = vector.shape_cast %127 : vector<34xf32> to vector<34x1xf32>
    %129 = vector.broadcast %128 : vector<34x1xf32> to vector<34x34xf32>
    %130 = arith.subf %126, %129 : vector<34x34xf32>
    %131 = math.exp %130 : vector<34x34xf32>
    %cst_97 = arith.constant dense<0.000000e+00> : vector<34xf32>
    %132 = vector.multi_reduction <add>, %131, %cst_97 [1] : vector<34x34xf32> to vector<34xf32>
    %133 = vector.shape_cast %132 : vector<34xf32> to vector<34x1xf32>
    %134 = tpu.reciprocal %133 {approx = true} : vector<34x1xf32> -> vector<34x1xf32>
    %135 = vector.broadcast %134 : vector<34x1xf32> to vector<34x34xf32>
    %136 = arith.mulf %131, %135 : vector<34x34xf32>
    %cst_98 = arith.constant dense<0.000000e+00> : vector<34x8xf32>
    %137 = tpu.matmul %136, %121, %cst_98 {dimension_numbers = #tpu.dot_dimension_numbers<[1], [0], [0], [1], [0, 0, 1, 1], [], []>} : vector<34x34xf32>, vector<34x8xf32>, vector<34x8xf32> -> vector<34x8xf32>
    %c0_99 = arith.constant 0 : index
    %c1_100 = arith.constant 1 : index
    %c0_101 = arith.constant 0 : index
    %c0_102 = arith.constant 0 : index
    %138 = vector.load %arg9[%c0_99, %c1_100, %c0_101, %c0_102] : memref<2x4x8x32xf32, #tpu.memory_space<vmem>>, vector<1x1x8x32xf32>
    %139 = vector.shape_cast %138 : vector<1x1x8x32xf32> to vector<8x32xf32>
    %cst_103 = arith.constant dense<0.000000e+00> : vector<34x32xf32>
    %140 = tpu.matmul %137, %139, %cst_103 {dimension_numbers = #tpu.dot_dimension_numbers<[1], [0], [0], [1], [0, 0, 1, 1], [], []>} : vector<34x8xf32>, vector<8x32xf32>, vector<34x32xf32> -> vector<34x32xf32>
    %141 = arith.addf %100, %140 : vector<34x32xf32>
    %c0_104 = arith.constant 0 : index
    %c0_105 = arith.constant 0 : index
    %c2_106 = arith.constant 2 : index
    %c0_107 = arith.constant 0 : index
    %c0_108 = arith.constant 0 : index
    %142 = vector.load %arg7[%c0_104, %c0_105, %c2_106, %c0_107, %c0_108] : memref<2x3x4x32x8xf32, #tpu.memory_space<vmem>>, vector<1x1x1x32x8xf32>
    %143 = vector.shape_cast %142 : vector<1x1x1x32x8xf32> to vector<32x8xf32>
    %cst_109 = arith.constant dense<0.000000e+00> : vector<34x8xf32>
    %144 = tpu.matmul %58, %143, %cst_109 {dimension_numbers = #tpu.dot_dimension_numbers<[1], [0], [0], [1], [0, 0, 1, 1], [], []>} : vector<34x32xf32>, vector<32x8xf32>, vector<34x8xf32> -> vector<34x8xf32>
    %c0_110 = arith.constant 0 : index
    %c0_111 = arith.constant 0 : index
    %c2_112 = arith.constant 2 : index
    %c0_113 = arith.constant 0 : index
    %c0_114 = arith.constant 0 : index
    %145 = vector.load %arg8[%c0_110, %c0_111, %c2_112, %c0_113, %c0_114] : memref<2x3x4x1x8xf32, #tpu.memory_space<vmem>>, vector<1x1x1x1x8xf32>
    %146 = vector.shape_cast %145 : vector<1x1x1x1x8xf32> to vector<1x8xf32>
    %147 = vector.broadcast %146 : vector<1x8xf32> to vector<34x8xf32>
    %148 = arith.addf %144, %147 : vector<34x8xf32>
    %c0_115 = arith.constant 0 : index
    %c1_116 = arith.constant 1 : index
    %c2_117 = arith.constant 2 : index
    %c0_118 = arith.constant 0 : index
    %c0_119 = arith.constant 0 : index
    %149 = vector.load %arg7[%c0_115, %c1_116, %c2_117, %c0_118, %c0_119] : memref<2x3x4x32x8xf32, #tpu.memory_space<vmem>>, vector<1x1x1x32x8xf32>
    %150 = vector.shape_cast %149 : vector<1x1x1x32x8xf32> to vector<32x8xf32>
    %cst_120 = arith.constant dense<0.000000e+00> : vector<34x8xf32>
    %151 = tpu.matmul %58, %150, %cst_120 {dimension_numbers = #tpu.dot_dimension_numbers<[1], [0], [0], [1], [0, 0, 1, 1], [], []>} : vector<34x32xf32>, vector<32x8xf32>, vector<34x8xf32> -> vector<34x8xf32>
    %c0_121 = arith.constant 0 : index
    %c1_122 = arith.constant 1 : index
    %c2_123 = arith.constant 2 : index
    %c0_124 = arith.constant 0 : index
    %c0_125 = arith.constant 0 : index
    %152 = vector.load %arg8[%c0_121, %c1_122, %c2_123, %c0_124, %c0_125] : memref<2x3x4x1x8xf32, #tpu.memory_space<vmem>>, vector<1x1x1x1x8xf32>
    %153 = vector.shape_cast %152 : vector<1x1x1x1x8xf32> to vector<1x8xf32>
    %154 = vector.broadcast %153 : vector<1x8xf32> to vector<34x8xf32>
    %155 = arith.addf %151, %154 : vector<34x8xf32>
    %c0_126 = arith.constant 0 : index
    %c2_127 = arith.constant 2 : index
    %c2_128 = arith.constant 2 : index
    %c0_129 = arith.constant 0 : index
    %c0_130 = arith.constant 0 : index
    %156 = vector.load %arg7[%c0_126, %c2_127, %c2_128, %c0_129, %c0_130] : memref<2x3x4x32x8xf32, #tpu.memory_space<vmem>>, vector<1x1x1x32x8xf32>
    %157 = vector.shape_cast %156 : vector<1x1x1x32x8xf32> to vector<32x8xf32>
    %cst_131 = arith.constant dense<0.000000e+00> : vector<34x8xf32>
    %158 = tpu.matmul %58, %157, %cst_131 {dimension_numbers = #tpu.dot_dimension_numbers<[1], [0], [0], [1], [0, 0, 1, 1], [], []>} : vector<34x32xf32>, vector<32x8xf32>, vector<34x8xf32> -> vector<34x8xf32>
    %c0_132 = arith.constant 0 : index
    %c2_133 = arith.constant 2 : index
    %c2_134 = arith.constant 2 : index
    %c0_135 = arith.constant 0 : index
    %c0_136 = arith.constant 0 : index
    %159 = vector.load %arg8[%c0_132, %c2_133, %c2_134, %c0_135, %c0_136] : memref<2x3x4x1x8xf32, #tpu.memory_space<vmem>>, vector<1x1x1x1x8xf32>
    %160 = vector.shape_cast %159 : vector<1x1x1x1x8xf32> to vector<1x8xf32>
    %161 = vector.broadcast %160 : vector<1x8xf32> to vector<34x8xf32>
    %162 = arith.addf %158, %161 : vector<34x8xf32>
    %163 = tpu.transpose %155, [1, 0] : vector<34x8xf32> -> vector<8x34xf32>
    %cst_137 = arith.constant dense<0.000000e+00> : vector<34x34xf32>
    %164 = tpu.matmul %148, %163, %cst_137 {dimension_numbers = #tpu.dot_dimension_numbers<[1], [0], [0], [1], [0, 0, 1, 1], [], []>} : vector<34x8xf32>, vector<8x34xf32>, vector<34x34xf32> -> vector<34x34xf32>
    %cst_138 = arith.constant 0.353553385 : f32
    %165 = vector.broadcast %cst_138 : f32 to vector<34x34xf32>
    %166 = arith.mulf %164, %165 : vector<34x34xf32>
    %167 = arith.addf %166, %28 : vector<34x34xf32>
    %cst_139 = arith.constant dense<0xFF800000> : vector<34xf32>
    %168 = vector.multi_reduction <maximumf>, %167, %cst_139 [1] : vector<34x34xf32> to vector<34xf32>
    %169 = vector.shape_cast %168 : vector<34xf32> to vector<34x1xf32>
    %170 = vector.broadcast %169 : vector<34x1xf32> to vector<34x34xf32>
    %171 = arith.subf %167, %170 : vector<34x34xf32>
    %172 = math.exp %171 : vector<34x34xf32>
    %cst_140 = arith.constant dense<0.000000e+00> : vector<34xf32>
    %173 = vector.multi_reduction <add>, %172, %cst_140 [1] : vector<34x34xf32> to vector<34xf32>
    %174 = vector.shape_cast %173 : vector<34xf32> to vector<34x1xf32>
    %175 = tpu.reciprocal %174 {approx = true} : vector<34x1xf32> -> vector<34x1xf32>
    %176 = vector.broadcast %175 : vector<34x1xf32> to vector<34x34xf32>
    %177 = arith.mulf %172, %176 : vector<34x34xf32>
    %cst_141 = arith.constant dense<0.000000e+00> : vector<34x8xf32>
    %178 = tpu.matmul %177, %162, %cst_141 {dimension_numbers = #tpu.dot_dimension_numbers<[1], [0], [0], [1], [0, 0, 1, 1], [], []>} : vector<34x34xf32>, vector<34x8xf32>, vector<34x8xf32> -> vector<34x8xf32>
    %c0_142 = arith.constant 0 : index
    %c2_143 = arith.constant 2 : index
    %c0_144 = arith.constant 0 : index
    %c0_145 = arith.constant 0 : index
    %179 = vector.load %arg9[%c0_142, %c2_143, %c0_144, %c0_145] : memref<2x4x8x32xf32, #tpu.memory_space<vmem>>, vector<1x1x8x32xf32>
    %180 = vector.shape_cast %179 : vector<1x1x8x32xf32> to vector<8x32xf32>
    %cst_146 = arith.constant dense<0.000000e+00> : vector<34x32xf32>
    %181 = tpu.matmul %178, %180, %cst_146 {dimension_numbers = #tpu.dot_dimension_numbers<[1], [0], [0], [1], [0, 0, 1, 1], [], []>} : vector<34x8xf32>, vector<8x32xf32>, vector<34x32xf32> -> vector<34x32xf32>
    %182 = arith.addf %141, %181 : vector<34x32xf32>
    %c0_147 = arith.constant 0 : index
    %c0_148 = arith.constant 0 : index
    %c3 = arith.constant 3 : index
    %c0_149 = arith.constant 0 : index
    %c0_150 = arith.constant 0 : index
    %183 = vector.load %arg7[%c0_147, %c0_148, %c3, %c0_149, %c0_150] : memref<2x3x4x32x8xf32, #tpu.memory_space<vmem>>, vector<1x1x1x32x8xf32>
    %184 = vector.shape_cast %183 : vector<1x1x1x32x8xf32> to vector<32x8xf32>
    %cst_151 = arith.constant dense<0.000000e+00> : vector<34x8xf32>
    %185 = tpu.matmul %58, %184, %cst_151 {dimension_numbers = #tpu.dot_dimension_numbers<[1], [0], [0], [1], [0, 0, 1, 1], [], []>} : vector<34x32xf32>, vector<32x8xf32>, vector<34x8xf32> -> vector<34x8xf32>
    %c0_152 = arith.constant 0 : index
    %c0_153 = arith.constant 0 : index
    %c3_154 = arith.constant 3 : index
    %c0_155 = arith.constant 0 : index
    %c0_156 = arith.constant 0 : index
    %186 = vector.load %arg8[%c0_152, %c0_153, %c3_154, %c0_155, %c0_156] : memref<2x3x4x1x8xf32, #tpu.memory_space<vmem>>, vector<1x1x1x1x8xf32>
    %187 = vector.shape_cast %186 : vector<1x1x1x1x8xf32> to vector<1x8xf32>
    %188 = vector.broadcast %187 : vector<1x8xf32> to vector<34x8xf32>
    %189 = arith.addf %185, %188 : vector<34x8xf32>
    %c0_157 = arith.constant 0 : index
    %c1_158 = arith.constant 1 : index
    %c3_159 = arith.constant 3 : index
    %c0_160 = arith.constant 0 : index
    %c0_161 = arith.constant 0 : index
    %190 = vector.load %arg7[%c0_157, %c1_158, %c3_159, %c0_160, %c0_161] : memref<2x3x4x32x8xf32, #tpu.memory_space<vmem>>, vector<1x1x1x32x8xf32>
    %191 = vector.shape_cast %190 : vector<1x1x1x32x8xf32> to vector<32x8xf32>
    %cst_162 = arith.constant dense<0.000000e+00> : vector<34x8xf32>
    %192 = tpu.matmul %58, %191, %cst_162 {dimension_numbers = #tpu.dot_dimension_numbers<[1], [0], [0], [1], [0, 0, 1, 1], [], []>} : vector<34x32xf32>, vector<32x8xf32>, vector<34x8xf32> -> vector<34x8xf32>
    %c0_163 = arith.constant 0 : index
    %c1_164 = arith.constant 1 : index
    %c3_165 = arith.constant 3 : index
    %c0_166 = arith.constant 0 : index
    %c0_167 = arith.constant 0 : index
    %193 = vector.load %arg8[%c0_163, %c1_164, %c3_165, %c0_166, %c0_167] : memref<2x3x4x1x8xf32, #tpu.memory_space<vmem>>, vector<1x1x1x1x8xf32>
    %194 = vector.shape_cast %193 : vector<1x1x1x1x8xf32> to vector<1x8xf32>
    %195 = vector.broadcast %194 : vector<1x8xf32> to vector<34x8xf32>
    %196 = arith.addf %192, %195 : vector<34x8xf32>
    %c0_168 = arith.constant 0 : index
    %c2_169 = arith.constant 2 : index
    %c3_170 = arith.constant 3 : index
    %c0_171 = arith.constant 0 : index
    %c0_172 = arith.constant 0 : index
    %197 = vector.load %arg7[%c0_168, %c2_169, %c3_170, %c0_171, %c0_172] : memref<2x3x4x32x8xf32, #tpu.memory_space<vmem>>, vector<1x1x1x32x8xf32>
    %198 = vector.shape_cast %197 : vector<1x1x1x32x8xf32> to vector<32x8xf32>
    %cst_173 = arith.constant dense<0.000000e+00> : vector<34x8xf32>
    %199 = tpu.matmul %58, %198, %cst_173 {dimension_numbers = #tpu.dot_dimension_numbers<[1], [0], [0], [1], [0, 0, 1, 1], [], []>} : vector<34x32xf32>, vector<32x8xf32>, vector<34x8xf32> -> vector<34x8xf32>
    %c0_174 = arith.constant 0 : index
    %c2_175 = arith.constant 2 : index
    %c3_176 = arith.constant 3 : index
    %c0_177 = arith.constant 0 : index
    %c0_178 = arith.constant 0 : index
    %200 = vector.load %arg8[%c0_174, %c2_175, %c3_176, %c0_177, %c0_178] : memref<2x3x4x1x8xf32, #tpu.memory_space<vmem>>, vector<1x1x1x1x8xf32>
    %201 = vector.shape_cast %200 : vector<1x1x1x1x8xf32> to vector<1x8xf32>
    %202 = vector.broadcast %201 : vector<1x8xf32> to vector<34x8xf32>
    %203 = arith.addf %199, %202 : vector<34x8xf32>
    %204 = tpu.transpose %196, [1, 0] : vector<34x8xf32> -> vector<8x34xf32>
    %cst_179 = arith.constant dense<0.000000e+00> : vector<34x34xf32>
    %205 = tpu.matmul %189, %204, %cst_179 {dimension_numbers = #tpu.dot_dimension_numbers<[1], [0], [0], [1], [0, 0, 1, 1], [], []>} : vector<34x8xf32>, vector<8x34xf32>, vector<34x34xf32> -> vector<34x34xf32>
    %cst_180 = arith.constant 0.353553385 : f32
    %206 = vector.broadcast %cst_180 : f32 to vector<34x34xf32>
    %207 = arith.mulf %205, %206 : vector<34x34xf32>
    %208 = arith.addf %207, %28 : vector<34x34xf32>
    %cst_181 = arith.constant dense<0xFF800000> : vector<34xf32>
    %209 = vector.multi_reduction <maximumf>, %208, %cst_181 [1] : vector<34x34xf32> to vector<34xf32>
    %210 = vector.shape_cast %209 : vector<34xf32> to vector<34x1xf32>
    %211 = vector.broadcast %210 : vector<34x1xf32> to vector<34x34xf32>
    %212 = arith.subf %208, %211 : vector<34x34xf32>
    %213 = math.exp %212 : vector<34x34xf32>
    %cst_182 = arith.constant dense<0.000000e+00> : vector<34xf32>
    %214 = vector.multi_reduction <add>, %213, %cst_182 [1] : vector<34x34xf32> to vector<34xf32>
    %215 = vector.shape_cast %214 : vector<34xf32> to vector<34x1xf32>
    %216 = tpu.reciprocal %215 {approx = true} : vector<34x1xf32> -> vector<34x1xf32>
    %217 = vector.broadcast %216 : vector<34x1xf32> to vector<34x34xf32>
    %218 = arith.mulf %213, %217 : vector<34x34xf32>
    %cst_183 = arith.constant dense<0.000000e+00> : vector<34x8xf32>
    %219 = tpu.matmul %218, %203, %cst_183 {dimension_numbers = #tpu.dot_dimension_numbers<[1], [0], [0], [1], [0, 0, 1, 1], [], []>} : vector<34x34xf32>, vector<34x8xf32>, vector<34x8xf32> -> vector<34x8xf32>
    %c0_184 = arith.constant 0 : index
    %c3_185 = arith.constant 3 : index
    %c0_186 = arith.constant 0 : index
    %c0_187 = arith.constant 0 : index
    %220 = vector.load %arg9[%c0_184, %c3_185, %c0_186, %c0_187] : memref<2x4x8x32xf32, #tpu.memory_space<vmem>>, vector<1x1x8x32xf32>
    %221 = vector.shape_cast %220 : vector<1x1x8x32xf32> to vector<8x32xf32>
    %cst_188 = arith.constant dense<0.000000e+00> : vector<34x32xf32>
    %222 = tpu.matmul %219, %221, %cst_188 {dimension_numbers = #tpu.dot_dimension_numbers<[1], [0], [0], [1], [0, 0, 1, 1], [], []>} : vector<34x8xf32>, vector<8x32xf32>, vector<34x32xf32> -> vector<34x32xf32>
    %223 = arith.addf %182, %222 : vector<34x32xf32>
    %224 = arith.addf %27, %223 : vector<34x32xf32>
    %225 = vector.broadcast %35 : vector<1x32xf32> to vector<34x32xf32>
    %226 = arith.addf %224, %225 : vector<34x32xf32>
    %cst_189 = arith.constant dense<0.000000e+00> : vector<34xf32>
    %227 = vector.multi_reduction <add>, %226, %cst_189 [1] : vector<34x32xf32> to vector<34xf32>
    %228 = vector.shape_cast %227 : vector<34xf32> to vector<34x1xf32>
    %cst_190 = arith.constant 3.200000e+01 : f32
    %229 = vector.broadcast %cst_190 : f32 to vector<34x1xf32>
    %230 = arith.divf %228, %229 : vector<34x1xf32>
    %231 = vector.broadcast %230 : vector<34x1xf32> to vector<34x32xf32>
    %232 = arith.subf %226, %231 : vector<34x32xf32>
    %233 = arith.mulf %232, %232 : vector<34x32xf32>
    %cst_191 = arith.constant dense<0.000000e+00> : vector<34xf32>
    %234 = vector.multi_reduction <add>, %233, %cst_191 [1] : vector<34x32xf32> to vector<34xf32>
    %235 = vector.shape_cast %234 : vector<34xf32> to vector<34x1xf32>
    %cst_192 = arith.constant 3.200000e+01 : f32
    %236 = vector.broadcast %cst_192 : f32 to vector<34x1xf32>
    %237 = arith.divf %235, %236 : vector<34x1xf32>
    %238 = vector.broadcast %230 : vector<34x1xf32> to vector<34x32xf32>
    %239 = arith.subf %226, %238 : vector<34x32xf32>
    %cst_193 = arith.constant 9.99999997E-7 : f32
    %240 = vector.broadcast %cst_193 : f32 to vector<34x1xf32>
    %241 = arith.addf %237, %240 : vector<34x1xf32>
    %242 = math.rsqrt %241 : vector<34x1xf32>
    %243 = vector.broadcast %242 : vector<34x1xf32> to vector<34x32xf32>
    %244 = arith.mulf %239, %243 : vector<34x32xf32>
    %245 = vector.broadcast %33 : vector<1x32xf32> to vector<34x32xf32>
    %246 = arith.mulf %244, %245 : vector<34x32xf32>
    %247 = vector.broadcast %34 : vector<1x32xf32> to vector<34x32xf32>
    %248 = arith.addf %246, %247 : vector<34x32xf32>
    %c0_194 = arith.constant 0 : index
    %c0_195 = arith.constant 0 : index
    %c0_196 = arith.constant 0 : index
    %249 = vector.load %arg11[%c0_194, %c0_195, %c0_196] : memref<2x32x128xf32, #tpu.memory_space<vmem>>, vector<1x32x128xf32>
    %250 = vector.shape_cast %249 : vector<1x32x128xf32> to vector<32x128xf32>
    %cst_197 = arith.constant dense<0.000000e+00> : vector<34x128xf32>
    %251 = tpu.matmul %248, %250, %cst_197 {dimension_numbers = #tpu.dot_dimension_numbers<[1], [0], [0], [1], [0, 0, 1, 1], [], []>} : vector<34x32xf32>, vector<32x128xf32>, vector<34x128xf32> -> vector<34x128xf32>
    %c0_198 = arith.constant 0 : index
    %c0_199 = arith.constant 0 : index
    %c0_200 = arith.constant 0 : index
    %252 = vector.load %arg12[%c0_198, %c0_199, %c0_200] : memref<2x1x128xf32, #tpu.memory_space<vmem>>, vector<1x1x128xf32>
    %253 = vector.shape_cast %252 : vector<1x1x128xf32> to vector<1x128xf32>
    %254 = vector.broadcast %253 : vector<1x128xf32> to vector<34x128xf32>
    %255 = arith.addf %251, %254 : vector<34x128xf32>
    %cst_201 = arith.constant 5.000000e-01 : f32
    %256 = vector.broadcast %cst_201 : f32 to vector<34x128xf32>
    %257 = arith.mulf %256, %255 : vector<34x128xf32>
    %cst_202 = arith.constant 0.707106769 : f32
    %258 = vector.broadcast %cst_202 : f32 to vector<34x128xf32>
    %259 = arith.mulf %255, %258 : vector<34x128xf32>
    %260 = math.erf %259 : vector<34x128xf32>
    %cst_203 = arith.constant 1.000000e+00 : f32
    %261 = vector.broadcast %cst_203 : f32 to vector<34x128xf32>
    %262 = arith.addf %261, %260 : vector<34x128xf32>
    %263 = arith.mulf %257, %262 : vector<34x128xf32>
    %c0_204 = arith.constant 0 : index
    %c0_205 = arith.constant 0 : index
    %c0_206 = arith.constant 0 : index
    %264 = vector.load %arg13[%c0_204, %c0_205, %c0_206] : memref<2x128x32xf32, #tpu.memory_space<vmem>>, vector<1x128x32xf32>
    %265 = vector.shape_cast %264 : vector<1x128x32xf32> to vector<128x32xf32>
    %cst_207 = arith.constant dense<0.000000e+00> : vector<34x32xf32>
    %266 = tpu.matmul %263, %265, %cst_207 {dimension_numbers = #tpu.dot_dimension_numbers<[1], [0], [0], [1], [0, 0, 1, 1], [], []>} : vector<34x128xf32>, vector<128x32xf32>, vector<34x32xf32> -> vector<34x32xf32>
    %267 = arith.addf %226, %266 : vector<34x32xf32>
    %268 = vector.broadcast %36 : vector<1x32xf32> to vector<34x32xf32>
    %269 = arith.addf %267, %268 : vector<34x32xf32>
    %c1_208 = arith.constant 1 : index
    %c0_209 = arith.constant 0 : index
    %c0_210 = arith.constant 0 : index
    %270 = vector.load %arg10[%c1_208, %c0_209, %c0_210] : memref<2x8x32xf32, #tpu.memory_space<vmem>>, vector<1x8x32xf32>
    %271 = vector.shape_cast %270 : vector<1x8x32xf32> to vector<8x32xf32>
    %272 = vector.extract_strided_slice %271 {offsets = [0, 0], sizes = [1, 32], strides = [1, 1]} : vector<8x32xf32> to vector<1x32xf32>
    %273 = vector.extract_strided_slice %271 {offsets = [1, 0], sizes = [1, 32], strides = [1, 1]} : vector<8x32xf32> to vector<1x32xf32>
    %274 = vector.extract_strided_slice %271 {offsets = [2, 0], sizes = [1, 32], strides = [1, 1]} : vector<8x32xf32> to vector<1x32xf32>
    %275 = vector.extract_strided_slice %271 {offsets = [3, 0], sizes = [1, 32], strides = [1, 1]} : vector<8x32xf32> to vector<1x32xf32>
    %276 = vector.extract_strided_slice %271 {offsets = [4, 0], sizes = [1, 32], strides = [1, 1]} : vector<8x32xf32> to vector<1x32xf32>
    %277 = vector.extract_strided_slice %271 {offsets = [5, 0], sizes = [1, 32], strides = [1, 1]} : vector<8x32xf32> to vector<1x32xf32>
    %cst_211 = arith.constant dense<0.000000e+00> : vector<34xf32>
    %278 = vector.multi_reduction <add>, %269, %cst_211 [1] : vector<34x32xf32> to vector<34xf32>
    %279 = vector.shape_cast %278 : vector<34xf32> to vector<34x1xf32>
    %cst_212 = arith.constant 3.200000e+01 : f32
    %280 = vector.broadcast %cst_212 : f32 to vector<34x1xf32>
    %281 = arith.divf %279, %280 : vector<34x1xf32>
    %282 = vector.broadcast %281 : vector<34x1xf32> to vector<34x32xf32>
    %283 = arith.subf %269, %282 : vector<34x32xf32>
    %284 = arith.mulf %283, %283 : vector<34x32xf32>
    %cst_213 = arith.constant dense<0.000000e+00> : vector<34xf32>
    %285 = vector.multi_reduction <add>, %284, %cst_213 [1] : vector<34x32xf32> to vector<34xf32>
    %286 = vector.shape_cast %285 : vector<34xf32> to vector<34x1xf32>
    %cst_214 = arith.constant 3.200000e+01 : f32
    %287 = vector.broadcast %cst_214 : f32 to vector<34x1xf32>
    %288 = arith.divf %286, %287 : vector<34x1xf32>
    %289 = vector.broadcast %281 : vector<34x1xf32> to vector<34x32xf32>
    %290 = arith.subf %269, %289 : vector<34x32xf32>
    %cst_215 = arith.constant 9.99999997E-7 : f32
    %291 = vector.broadcast %cst_215 : f32 to vector<34x1xf32>
    %292 = arith.addf %288, %291 : vector<34x1xf32>
    %293 = math.rsqrt %292 : vector<34x1xf32>
    %294 = vector.broadcast %293 : vector<34x1xf32> to vector<34x32xf32>
    %295 = arith.mulf %290, %294 : vector<34x32xf32>
    %296 = vector.broadcast %272 : vector<1x32xf32> to vector<34x32xf32>
    %297 = arith.mulf %295, %296 : vector<34x32xf32>
    %298 = vector.broadcast %273 : vector<1x32xf32> to vector<34x32xf32>
    %299 = arith.addf %297, %298 : vector<34x32xf32>
    %cst_216 = arith.constant 0.000000e+00 : f32
    %300 = vector.broadcast %cst_216 : f32 to vector<34x32xf32>
    %c1_217 = arith.constant 1 : index
    %c0_218 = arith.constant 0 : index
    %c0_219 = arith.constant 0 : index
    %c0_220 = arith.constant 0 : index
    %c0_221 = arith.constant 0 : index
    %301 = vector.load %arg7[%c1_217, %c0_218, %c0_219, %c0_220, %c0_221] : memref<2x3x4x32x8xf32, #tpu.memory_space<vmem>>, vector<1x1x1x32x8xf32>
    %302 = vector.shape_cast %301 : vector<1x1x1x32x8xf32> to vector<32x8xf32>
    %cst_222 = arith.constant dense<0.000000e+00> : vector<34x8xf32>
    %303 = tpu.matmul %299, %302, %cst_222 {dimension_numbers = #tpu.dot_dimension_numbers<[1], [0], [0], [1], [0, 0, 1, 1], [], []>} : vector<34x32xf32>, vector<32x8xf32>, vector<34x8xf32> -> vector<34x8xf32>
    %c1_223 = arith.constant 1 : index
    %c0_224 = arith.constant 0 : index
    %c0_225 = arith.constant 0 : index
    %c0_226 = arith.constant 0 : index
    %c0_227 = arith.constant 0 : index
    %304 = vector.load %arg8[%c1_223, %c0_224, %c0_225, %c0_226, %c0_227] : memref<2x3x4x1x8xf32, #tpu.memory_space<vmem>>, vector<1x1x1x1x8xf32>
    %305 = vector.shape_cast %304 : vector<1x1x1x1x8xf32> to vector<1x8xf32>
    %306 = vector.broadcast %305 : vector<1x8xf32> to vector<34x8xf32>
    %307 = arith.addf %303, %306 : vector<34x8xf32>
    %c1_228 = arith.constant 1 : index
    %c1_229 = arith.constant 1 : index
    %c0_230 = arith.constant 0 : index
    %c0_231 = arith.constant 0 : index
    %c0_232 = arith.constant 0 : index
    %308 = vector.load %arg7[%c1_228, %c1_229, %c0_230, %c0_231, %c0_232] : memref<2x3x4x32x8xf32, #tpu.memory_space<vmem>>, vector<1x1x1x32x8xf32>
    %309 = vector.shape_cast %308 : vector<1x1x1x32x8xf32> to vector<32x8xf32>
    %cst_233 = arith.constant dense<0.000000e+00> : vector<34x8xf32>
    %310 = tpu.matmul %299, %309, %cst_233 {dimension_numbers = #tpu.dot_dimension_numbers<[1], [0], [0], [1], [0, 0, 1, 1], [], []>} : vector<34x32xf32>, vector<32x8xf32>, vector<34x8xf32> -> vector<34x8xf32>
    %c1_234 = arith.constant 1 : index
    %c1_235 = arith.constant 1 : index
    %c0_236 = arith.constant 0 : index
    %c0_237 = arith.constant 0 : index
    %c0_238 = arith.constant 0 : index
    %311 = vector.load %arg8[%c1_234, %c1_235, %c0_236, %c0_237, %c0_238] : memref<2x3x4x1x8xf32, #tpu.memory_space<vmem>>, vector<1x1x1x1x8xf32>
    %312 = vector.shape_cast %311 : vector<1x1x1x1x8xf32> to vector<1x8xf32>
    %313 = vector.broadcast %312 : vector<1x8xf32> to vector<34x8xf32>
    %314 = arith.addf %310, %313 : vector<34x8xf32>
    %c1_239 = arith.constant 1 : index
    %c2_240 = arith.constant 2 : index
    %c0_241 = arith.constant 0 : index
    %c0_242 = arith.constant 0 : index
    %c0_243 = arith.constant 0 : index
    %315 = vector.load %arg7[%c1_239, %c2_240, %c0_241, %c0_242, %c0_243] : memref<2x3x4x32x8xf32, #tpu.memory_space<vmem>>, vector<1x1x1x32x8xf32>
    %316 = vector.shape_cast %315 : vector<1x1x1x32x8xf32> to vector<32x8xf32>
    %cst_244 = arith.constant dense<0.000000e+00> : vector<34x8xf32>
    %317 = tpu.matmul %299, %316, %cst_244 {dimension_numbers = #tpu.dot_dimension_numbers<[1], [0], [0], [1], [0, 0, 1, 1], [], []>} : vector<34x32xf32>, vector<32x8xf32>, vector<34x8xf32> -> vector<34x8xf32>
    %c1_245 = arith.constant 1 : index
    %c2_246 = arith.constant 2 : index
    %c0_247 = arith.constant 0 : index
    %c0_248 = arith.constant 0 : index
    %c0_249 = arith.constant 0 : index
    %318 = vector.load %arg8[%c1_245, %c2_246, %c0_247, %c0_248, %c0_249] : memref<2x3x4x1x8xf32, #tpu.memory_space<vmem>>, vector<1x1x1x1x8xf32>
    %319 = vector.shape_cast %318 : vector<1x1x1x1x8xf32> to vector<1x8xf32>
    %320 = vector.broadcast %319 : vector<1x8xf32> to vector<34x8xf32>
    %321 = arith.addf %317, %320 : vector<34x8xf32>
    %322 = tpu.transpose %314, [1, 0] : vector<34x8xf32> -> vector<8x34xf32>
    %cst_250 = arith.constant dense<0.000000e+00> : vector<34x34xf32>
    %323 = tpu.matmul %307, %322, %cst_250 {dimension_numbers = #tpu.dot_dimension_numbers<[1], [0], [0], [1], [0, 0, 1, 1], [], []>} : vector<34x8xf32>, vector<8x34xf32>, vector<34x34xf32> -> vector<34x34xf32>
    %cst_251 = arith.constant 0.353553385 : f32
    %324 = vector.broadcast %cst_251 : f32 to vector<34x34xf32>
    %325 = arith.mulf %323, %324 : vector<34x34xf32>
    %326 = arith.addf %325, %28 : vector<34x34xf32>
    %cst_252 = arith.constant dense<0xFF800000> : vector<34xf32>
    %327 = vector.multi_reduction <maximumf>, %326, %cst_252 [1] : vector<34x34xf32> to vector<34xf32>
    %328 = vector.shape_cast %327 : vector<34xf32> to vector<34x1xf32>
    %329 = vector.broadcast %328 : vector<34x1xf32> to vector<34x34xf32>
    %330 = arith.subf %326, %329 : vector<34x34xf32>
    %331 = math.exp %330 : vector<34x34xf32>
    %cst_253 = arith.constant dense<0.000000e+00> : vector<34xf32>
    %332 = vector.multi_reduction <add>, %331, %cst_253 [1] : vector<34x34xf32> to vector<34xf32>
    %333 = vector.shape_cast %332 : vector<34xf32> to vector<34x1xf32>
    %334 = tpu.reciprocal %333 {approx = true} : vector<34x1xf32> -> vector<34x1xf32>
    %335 = vector.broadcast %334 : vector<34x1xf32> to vector<34x34xf32>
    %336 = arith.mulf %331, %335 : vector<34x34xf32>
    %cst_254 = arith.constant dense<0.000000e+00> : vector<34x8xf32>
    %337 = tpu.matmul %336, %321, %cst_254 {dimension_numbers = #tpu.dot_dimension_numbers<[1], [0], [0], [1], [0, 0, 1, 1], [], []>} : vector<34x34xf32>, vector<34x8xf32>, vector<34x8xf32> -> vector<34x8xf32>
    %c1_255 = arith.constant 1 : index
    %c0_256 = arith.constant 0 : index
    %c0_257 = arith.constant 0 : index
    %c0_258 = arith.constant 0 : index
    %338 = vector.load %arg9[%c1_255, %c0_256, %c0_257, %c0_258] : memref<2x4x8x32xf32, #tpu.memory_space<vmem>>, vector<1x1x8x32xf32>
    %339 = vector.shape_cast %338 : vector<1x1x8x32xf32> to vector<8x32xf32>
    %cst_259 = arith.constant dense<0.000000e+00> : vector<34x32xf32>
    %340 = tpu.matmul %337, %339, %cst_259 {dimension_numbers = #tpu.dot_dimension_numbers<[1], [0], [0], [1], [0, 0, 1, 1], [], []>} : vector<34x8xf32>, vector<8x32xf32>, vector<34x32xf32> -> vector<34x32xf32>
    %341 = arith.addf %300, %340 : vector<34x32xf32>
    %c1_260 = arith.constant 1 : index
    %c0_261 = arith.constant 0 : index
    %c1_262 = arith.constant 1 : index
    %c0_263 = arith.constant 0 : index
    %c0_264 = arith.constant 0 : index
    %342 = vector.load %arg7[%c1_260, %c0_261, %c1_262, %c0_263, %c0_264] : memref<2x3x4x32x8xf32, #tpu.memory_space<vmem>>, vector<1x1x1x32x8xf32>
    %343 = vector.shape_cast %342 : vector<1x1x1x32x8xf32> to vector<32x8xf32>
    %cst_265 = arith.constant dense<0.000000e+00> : vector<34x8xf32>
    %344 = tpu.matmul %299, %343, %cst_265 {dimension_numbers = #tpu.dot_dimension_numbers<[1], [0], [0], [1], [0, 0, 1, 1], [], []>} : vector<34x32xf32>, vector<32x8xf32>, vector<34x8xf32> -> vector<34x8xf32>
    %c1_266 = arith.constant 1 : index
    %c0_267 = arith.constant 0 : index
    %c1_268 = arith.constant 1 : index
    %c0_269 = arith.constant 0 : index
    %c0_270 = arith.constant 0 : index
    %345 = vector.load %arg8[%c1_266, %c0_267, %c1_268, %c0_269, %c0_270] : memref<2x3x4x1x8xf32, #tpu.memory_space<vmem>>, vector<1x1x1x1x8xf32>
    %346 = vector.shape_cast %345 : vector<1x1x1x1x8xf32> to vector<1x8xf32>
    %347 = vector.broadcast %346 : vector<1x8xf32> to vector<34x8xf32>
    %348 = arith.addf %344, %347 : vector<34x8xf32>
    %c1_271 = arith.constant 1 : index
    %c1_272 = arith.constant 1 : index
    %c1_273 = arith.constant 1 : index
    %c0_274 = arith.constant 0 : index
    %c0_275 = arith.constant 0 : index
    %349 = vector.load %arg7[%c1_271, %c1_272, %c1_273, %c0_274, %c0_275] : memref<2x3x4x32x8xf32, #tpu.memory_space<vmem>>, vector<1x1x1x32x8xf32>
    %350 = vector.shape_cast %349 : vector<1x1x1x32x8xf32> to vector<32x8xf32>
    %cst_276 = arith.constant dense<0.000000e+00> : vector<34x8xf32>
    %351 = tpu.matmul %299, %350, %cst_276 {dimension_numbers = #tpu.dot_dimension_numbers<[1], [0], [0], [1], [0, 0, 1, 1], [], []>} : vector<34x32xf32>, vector<32x8xf32>, vector<34x8xf32> -> vector<34x8xf32>
    %c1_277 = arith.constant 1 : index
    %c1_278 = arith.constant 1 : index
    %c1_279 = arith.constant 1 : index
    %c0_280 = arith.constant 0 : index
    %c0_281 = arith.constant 0 : index
    %352 = vector.load %arg8[%c1_277, %c1_278, %c1_279, %c0_280, %c0_281] : memref<2x3x4x1x8xf32, #tpu.memory_space<vmem>>, vector<1x1x1x1x8xf32>
    %353 = vector.shape_cast %352 : vector<1x1x1x1x8xf32> to vector<1x8xf32>
    %354 = vector.broadcast %353 : vector<1x8xf32> to vector<34x8xf32>
    %355 = arith.addf %351, %354 : vector<34x8xf32>
    %c1_282 = arith.constant 1 : index
    %c2_283 = arith.constant 2 : index
    %c1_284 = arith.constant 1 : index
    %c0_285 = arith.constant 0 : index
    %c0_286 = arith.constant 0 : index
    %356 = vector.load %arg7[%c1_282, %c2_283, %c1_284, %c0_285, %c0_286] : memref<2x3x4x32x8xf32, #tpu.memory_space<vmem>>, vector<1x1x1x32x8xf32>
    %357 = vector.shape_cast %356 : vector<1x1x1x32x8xf32> to vector<32x8xf32>
    %cst_287 = arith.constant dense<0.000000e+00> : vector<34x8xf32>
    %358 = tpu.matmul %299, %357, %cst_287 {dimension_numbers = #tpu.dot_dimension_numbers<[1], [0], [0], [1], [0, 0, 1, 1], [], []>} : vector<34x32xf32>, vector<32x8xf32>, vector<34x8xf32> -> vector<34x8xf32>
    %c1_288 = arith.constant 1 : index
    %c2_289 = arith.constant 2 : index
    %c1_290 = arith.constant 1 : index
    %c0_291 = arith.constant 0 : index
    %c0_292 = arith.constant 0 : index
    %359 = vector.load %arg8[%c1_288, %c2_289, %c1_290, %c0_291, %c0_292] : memref<2x3x4x1x8xf32, #tpu.memory_space<vmem>>, vector<1x1x1x1x8xf32>
    %360 = vector.shape_cast %359 : vector<1x1x1x1x8xf32> to vector<1x8xf32>
    %361 = vector.broadcast %360 : vector<1x8xf32> to vector<34x8xf32>
    %362 = arith.addf %358, %361 : vector<34x8xf32>
    %363 = tpu.transpose %355, [1, 0] : vector<34x8xf32> -> vector<8x34xf32>
    %cst_293 = arith.constant dense<0.000000e+00> : vector<34x34xf32>
    %364 = tpu.matmul %348, %363, %cst_293 {dimension_numbers = #tpu.dot_dimension_numbers<[1], [0], [0], [1], [0, 0, 1, 1], [], []>} : vector<34x8xf32>, vector<8x34xf32>, vector<34x34xf32> -> vector<34x34xf32>
    %cst_294 = arith.constant 0.353553385 : f32
    %365 = vector.broadcast %cst_294 : f32 to vector<34x34xf32>
    %366 = arith.mulf %364, %365 : vector<34x34xf32>
    %367 = arith.addf %366, %28 : vector<34x34xf32>
    %cst_295 = arith.constant dense<0xFF800000> : vector<34xf32>
    %368 = vector.multi_reduction <maximumf>, %367, %cst_295 [1] : vector<34x34xf32> to vector<34xf32>
    %369 = vector.shape_cast %368 : vector<34xf32> to vector<34x1xf32>
    %370 = vector.broadcast %369 : vector<34x1xf32> to vector<34x34xf32>
    %371 = arith.subf %367, %370 : vector<34x34xf32>
    %372 = math.exp %371 : vector<34x34xf32>
    %cst_296 = arith.constant dense<0.000000e+00> : vector<34xf32>
    %373 = vector.multi_reduction <add>, %372, %cst_296 [1] : vector<34x34xf32> to vector<34xf32>
    %374 = vector.shape_cast %373 : vector<34xf32> to vector<34x1xf32>
    %375 = tpu.reciprocal %374 {approx = true} : vector<34x1xf32> -> vector<34x1xf32>
    %376 = vector.broadcast %375 : vector<34x1xf32> to vector<34x34xf32>
    %377 = arith.mulf %372, %376 : vector<34x34xf32>
    %cst_297 = arith.constant dense<0.000000e+00> : vector<34x8xf32>
    %378 = tpu.matmul %377, %362, %cst_297 {dimension_numbers = #tpu.dot_dimension_numbers<[1], [0], [0], [1], [0, 0, 1, 1], [], []>} : vector<34x34xf32>, vector<34x8xf32>, vector<34x8xf32> -> vector<34x8xf32>
    %c1_298 = arith.constant 1 : index
    %c1_299 = arith.constant 1 : index
    %c0_300 = arith.constant 0 : index
    %c0_301 = arith.constant 0 : index
    %379 = vector.load %arg9[%c1_298, %c1_299, %c0_300, %c0_301] : memref<2x4x8x32xf32, #tpu.memory_space<vmem>>, vector<1x1x8x32xf32>
    %380 = vector.shape_cast %379 : vector<1x1x8x32xf32> to vector<8x32xf32>
    %cst_302 = arith.constant dense<0.000000e+00> : vector<34x32xf32>
    %381 = tpu.matmul %378, %380, %cst_302 {dimension_numbers = #tpu.dot_dimension_numbers<[1], [0], [0], [1], [0, 0, 1, 1], [], []>} : vector<34x8xf32>, vector<8x32xf32>, vector<34x32xf32> -> vector<34x32xf32>
    %382 = arith.addf %341, %381 : vector<34x32xf32>
    %c1_303 = arith.constant 1 : index
    %c0_304 = arith.constant 0 : index
    %c2_305 = arith.constant 2 : index
    %c0_306 = arith.constant 0 : index
    %c0_307 = arith.constant 0 : index
    %383 = vector.load %arg7[%c1_303, %c0_304, %c2_305, %c0_306, %c0_307] : memref<2x3x4x32x8xf32, #tpu.memory_space<vmem>>, vector<1x1x1x32x8xf32>
    %384 = vector.shape_cast %383 : vector<1x1x1x32x8xf32> to vector<32x8xf32>
    %cst_308 = arith.constant dense<0.000000e+00> : vector<34x8xf32>
    %385 = tpu.matmul %299, %384, %cst_308 {dimension_numbers = #tpu.dot_dimension_numbers<[1], [0], [0], [1], [0, 0, 1, 1], [], []>} : vector<34x32xf32>, vector<32x8xf32>, vector<34x8xf32> -> vector<34x8xf32>
    %c1_309 = arith.constant 1 : index
    %c0_310 = arith.constant 0 : index
    %c2_311 = arith.constant 2 : index
    %c0_312 = arith.constant 0 : index
    %c0_313 = arith.constant 0 : index
    %386 = vector.load %arg8[%c1_309, %c0_310, %c2_311, %c0_312, %c0_313] : memref<2x3x4x1x8xf32, #tpu.memory_space<vmem>>, vector<1x1x1x1x8xf32>
    %387 = vector.shape_cast %386 : vector<1x1x1x1x8xf32> to vector<1x8xf32>
    %388 = vector.broadcast %387 : vector<1x8xf32> to vector<34x8xf32>
    %389 = arith.addf %385, %388 : vector<34x8xf32>
    %c1_314 = arith.constant 1 : index
    %c1_315 = arith.constant 1 : index
    %c2_316 = arith.constant 2 : index
    %c0_317 = arith.constant 0 : index
    %c0_318 = arith.constant 0 : index
    %390 = vector.load %arg7[%c1_314, %c1_315, %c2_316, %c0_317, %c0_318] : memref<2x3x4x32x8xf32, #tpu.memory_space<vmem>>, vector<1x1x1x32x8xf32>
    %391 = vector.shape_cast %390 : vector<1x1x1x32x8xf32> to vector<32x8xf32>
    %cst_319 = arith.constant dense<0.000000e+00> : vector<34x8xf32>
    %392 = tpu.matmul %299, %391, %cst_319 {dimension_numbers = #tpu.dot_dimension_numbers<[1], [0], [0], [1], [0, 0, 1, 1], [], []>} : vector<34x32xf32>, vector<32x8xf32>, vector<34x8xf32> -> vector<34x8xf32>
    %c1_320 = arith.constant 1 : index
    %c1_321 = arith.constant 1 : index
    %c2_322 = arith.constant 2 : index
    %c0_323 = arith.constant 0 : index
    %c0_324 = arith.constant 0 : index
    %393 = vector.load %arg8[%c1_320, %c1_321, %c2_322, %c0_323, %c0_324] : memref<2x3x4x1x8xf32, #tpu.memory_space<vmem>>, vector<1x1x1x1x8xf32>
    %394 = vector.shape_cast %393 : vector<1x1x1x1x8xf32> to vector<1x8xf32>
    %395 = vector.broadcast %394 : vector<1x8xf32> to vector<34x8xf32>
    %396 = arith.addf %392, %395 : vector<34x8xf32>
    %c1_325 = arith.constant 1 : index
    %c2_326 = arith.constant 2 : index
    %c2_327 = arith.constant 2 : index
    %c0_328 = arith.constant 0 : index
    %c0_329 = arith.constant 0 : index
    %397 = vector.load %arg7[%c1_325, %c2_326, %c2_327, %c0_328, %c0_329] : memref<2x3x4x32x8xf32, #tpu.memory_space<vmem>>, vector<1x1x1x32x8xf32>
    %398 = vector.shape_cast %397 : vector<1x1x1x32x8xf32> to vector<32x8xf32>
    %cst_330 = arith.constant dense<0.000000e+00> : vector<34x8xf32>
    %399 = tpu.matmul %299, %398, %cst_330 {dimension_numbers = #tpu.dot_dimension_numbers<[1], [0], [0], [1], [0, 0, 1, 1], [], []>} : vector<34x32xf32>, vector<32x8xf32>, vector<34x8xf32> -> vector<34x8xf32>
    %c1_331 = arith.constant 1 : index
    %c2_332 = arith.constant 2 : index
    %c2_333 = arith.constant 2 : index
    %c0_334 = arith.constant 0 : index
    %c0_335 = arith.constant 0 : index
    %400 = vector.load %arg8[%c1_331, %c2_332, %c2_333, %c0_334, %c0_335] : memref<2x3x4x1x8xf32, #tpu.memory_space<vmem>>, vector<1x1x1x1x8xf32>
    %401 = vector.shape_cast %400 : vector<1x1x1x1x8xf32> to vector<1x8xf32>
    %402 = vector.broadcast %401 : vector<1x8xf32> to vector<34x8xf32>
    %403 = arith.addf %399, %402 : vector<34x8xf32>
    %404 = tpu.transpose %396, [1, 0] : vector<34x8xf32> -> vector<8x34xf32>
    %cst_336 = arith.constant dense<0.000000e+00> : vector<34x34xf32>
    %405 = tpu.matmul %389, %404, %cst_336 {dimension_numbers = #tpu.dot_dimension_numbers<[1], [0], [0], [1], [0, 0, 1, 1], [], []>} : vector<34x8xf32>, vector<8x34xf32>, vector<34x34xf32> -> vector<34x34xf32>
    %cst_337 = arith.constant 0.353553385 : f32
    %406 = vector.broadcast %cst_337 : f32 to vector<34x34xf32>
    %407 = arith.mulf %405, %406 : vector<34x34xf32>
    %408 = arith.addf %407, %28 : vector<34x34xf32>
    %cst_338 = arith.constant dense<0xFF800000> : vector<34xf32>
    %409 = vector.multi_reduction <maximumf>, %408, %cst_338 [1] : vector<34x34xf32> to vector<34xf32>
    %410 = vector.shape_cast %409 : vector<34xf32> to vector<34x1xf32>
    %411 = vector.broadcast %410 : vector<34x1xf32> to vector<34x34xf32>
    %412 = arith.subf %408, %411 : vector<34x34xf32>
    %413 = math.exp %412 : vector<34x34xf32>
    %cst_339 = arith.constant dense<0.000000e+00> : vector<34xf32>
    %414 = vector.multi_reduction <add>, %413, %cst_339 [1] : vector<34x34xf32> to vector<34xf32>
    %415 = vector.shape_cast %414 : vector<34xf32> to vector<34x1xf32>
    %416 = tpu.reciprocal %415 {approx = true} : vector<34x1xf32> -> vector<34x1xf32>
    %417 = vector.broadcast %416 : vector<34x1xf32> to vector<34x34xf32>
    %418 = arith.mulf %413, %417 : vector<34x34xf32>
    %cst_340 = arith.constant dense<0.000000e+00> : vector<34x8xf32>
    %419 = tpu.matmul %418, %403, %cst_340 {dimension_numbers = #tpu.dot_dimension_numbers<[1], [0], [0], [1], [0, 0, 1, 1], [], []>} : vector<34x34xf32>, vector<34x8xf32>, vector<34x8xf32> -> vector<34x8xf32>
    %c1_341 = arith.constant 1 : index
    %c2_342 = arith.constant 2 : index
    %c0_343 = arith.constant 0 : index
    %c0_344 = arith.constant 0 : index
    %420 = vector.load %arg9[%c1_341, %c2_342, %c0_343, %c0_344] : memref<2x4x8x32xf32, #tpu.memory_space<vmem>>, vector<1x1x8x32xf32>
    %421 = vector.shape_cast %420 : vector<1x1x8x32xf32> to vector<8x32xf32>
    %cst_345 = arith.constant dense<0.000000e+00> : vector<34x32xf32>
    %422 = tpu.matmul %419, %421, %cst_345 {dimension_numbers = #tpu.dot_dimension_numbers<[1], [0], [0], [1], [0, 0, 1, 1], [], []>} : vector<34x8xf32>, vector<8x32xf32>, vector<34x32xf32> -> vector<34x32xf32>
    %423 = arith.addf %382, %422 : vector<34x32xf32>
    %c1_346 = arith.constant 1 : index
    %c0_347 = arith.constant 0 : index
    %c3_348 = arith.constant 3 : index
    %c0_349 = arith.constant 0 : index
    %c0_350 = arith.constant 0 : index
    %424 = vector.load %arg7[%c1_346, %c0_347, %c3_348, %c0_349, %c0_350] : memref<2x3x4x32x8xf32, #tpu.memory_space<vmem>>, vector<1x1x1x32x8xf32>
    %425 = vector.shape_cast %424 : vector<1x1x1x32x8xf32> to vector<32x8xf32>
    %cst_351 = arith.constant dense<0.000000e+00> : vector<34x8xf32>
    %426 = tpu.matmul %299, %425, %cst_351 {dimension_numbers = #tpu.dot_dimension_numbers<[1], [0], [0], [1], [0, 0, 1, 1], [], []>} : vector<34x32xf32>, vector<32x8xf32>, vector<34x8xf32> -> vector<34x8xf32>
    %c1_352 = arith.constant 1 : index
    %c0_353 = arith.constant 0 : index
    %c3_354 = arith.constant 3 : index
    %c0_355 = arith.constant 0 : index
    %c0_356 = arith.constant 0 : index
    %427 = vector.load %arg8[%c1_352, %c0_353, %c3_354, %c0_355, %c0_356] : memref<2x3x4x1x8xf32, #tpu.memory_space<vmem>>, vector<1x1x1x1x8xf32>
    %428 = vector.shape_cast %427 : vector<1x1x1x1x8xf32> to vector<1x8xf32>
    %429 = vector.broadcast %428 : vector<1x8xf32> to vector<34x8xf32>
    %430 = arith.addf %426, %429 : vector<34x8xf32>
    %c1_357 = arith.constant 1 : index
    %c1_358 = arith.constant 1 : index
    %c3_359 = arith.constant 3 : index
    %c0_360 = arith.constant 0 : index
    %c0_361 = arith.constant 0 : index
    %431 = vector.load %arg7[%c1_357, %c1_358, %c3_359, %c0_360, %c0_361] : memref<2x3x4x32x8xf32, #tpu.memory_space<vmem>>, vector<1x1x1x32x8xf32>
    %432 = vector.shape_cast %431 : vector<1x1x1x32x8xf32> to vector<32x8xf32>
    %cst_362 = arith.constant dense<0.000000e+00> : vector<34x8xf32>
    %433 = tpu.matmul %299, %432, %cst_362 {dimension_numbers = #tpu.dot_dimension_numbers<[1], [0], [0], [1], [0, 0, 1, 1], [], []>} : vector<34x32xf32>, vector<32x8xf32>, vector<34x8xf32> -> vector<34x8xf32>
    %c1_363 = arith.constant 1 : index
    %c1_364 = arith.constant 1 : index
    %c3_365 = arith.constant 3 : index
    %c0_366 = arith.constant 0 : index
    %c0_367 = arith.constant 0 : index
    %434 = vector.load %arg8[%c1_363, %c1_364, %c3_365, %c0_366, %c0_367] : memref<2x3x4x1x8xf32, #tpu.memory_space<vmem>>, vector<1x1x1x1x8xf32>
    %435 = vector.shape_cast %434 : vector<1x1x1x1x8xf32> to vector<1x8xf32>
    %436 = vector.broadcast %435 : vector<1x8xf32> to vector<34x8xf32>
    %437 = arith.addf %433, %436 : vector<34x8xf32>
    %c1_368 = arith.constant 1 : index
    %c2_369 = arith.constant 2 : index
    %c3_370 = arith.constant 3 : index
    %c0_371 = arith.constant 0 : index
    %c0_372 = arith.constant 0 : index
    %438 = vector.load %arg7[%c1_368, %c2_369, %c3_370, %c0_371, %c0_372] : memref<2x3x4x32x8xf32, #tpu.memory_space<vmem>>, vector<1x1x1x32x8xf32>
    %439 = vector.shape_cast %438 : vector<1x1x1x32x8xf32> to vector<32x8xf32>
    %cst_373 = arith.constant dense<0.000000e+00> : vector<34x8xf32>
    %440 = tpu.matmul %299, %439, %cst_373 {dimension_numbers = #tpu.dot_dimension_numbers<[1], [0], [0], [1], [0, 0, 1, 1], [], []>} : vector<34x32xf32>, vector<32x8xf32>, vector<34x8xf32> -> vector<34x8xf32>
    %c1_374 = arith.constant 1 : index
    %c2_375 = arith.constant 2 : index
    %c3_376 = arith.constant 3 : index
    %c0_377 = arith.constant 0 : index
    %c0_378 = arith.constant 0 : index
    %441 = vector.load %arg8[%c1_374, %c2_375, %c3_376, %c0_377, %c0_378] : memref<2x3x4x1x8xf32, #tpu.memory_space<vmem>>, vector<1x1x1x1x8xf32>
    %442 = vector.shape_cast %441 : vector<1x1x1x1x8xf32> to vector<1x8xf32>
    %443 = vector.broadcast %442 : vector<1x8xf32> to vector<34x8xf32>
    %444 = arith.addf %440, %443 : vector<34x8xf32>
    %445 = tpu.transpose %437, [1, 0] : vector<34x8xf32> -> vector<8x34xf32>
    %cst_379 = arith.constant dense<0.000000e+00> : vector<34x34xf32>
    %446 = tpu.matmul %430, %445, %cst_379 {dimension_numbers = #tpu.dot_dimension_numbers<[1], [0], [0], [1], [0, 0, 1, 1], [], []>} : vector<34x8xf32>, vector<8x34xf32>, vector<34x34xf32> -> vector<34x34xf32>
    %cst_380 = arith.constant 0.353553385 : f32
    %447 = vector.broadcast %cst_380 : f32 to vector<34x34xf32>
    %448 = arith.mulf %446, %447 : vector<34x34xf32>
    %449 = arith.addf %448, %28 : vector<34x34xf32>
    %cst_381 = arith.constant dense<0xFF800000> : vector<34xf32>
    %450 = vector.multi_reduction <maximumf>, %449, %cst_381 [1] : vector<34x34xf32> to vector<34xf32>
    %451 = vector.shape_cast %450 : vector<34xf32> to vector<34x1xf32>
    %452 = vector.broadcast %451 : vector<34x1xf32> to vector<34x34xf32>
    %453 = arith.subf %449, %452 : vector<34x34xf32>
    %454 = math.exp %453 : vector<34x34xf32>
    %cst_382 = arith.constant dense<0.000000e+00> : vector<34xf32>
    %455 = vector.multi_reduction <add>, %454, %cst_382 [1] : vector<34x34xf32> to vector<34xf32>
    %456 = vector.shape_cast %455 : vector<34xf32> to vector<34x1xf32>
    %457 = tpu.reciprocal %456 {approx = true} : vector<34x1xf32> -> vector<34x1xf32>
    %458 = vector.broadcast %457 : vector<34x1xf32> to vector<34x34xf32>
    %459 = arith.mulf %454, %458 : vector<34x34xf32>
    %cst_383 = arith.constant dense<0.000000e+00> : vector<34x8xf32>
    %460 = tpu.matmul %459, %444, %cst_383 {dimension_numbers = #tpu.dot_dimension_numbers<[1], [0], [0], [1], [0, 0, 1, 1], [], []>} : vector<34x34xf32>, vector<34x8xf32>, vector<34x8xf32> -> vector<34x8xf32>
    %c1_384 = arith.constant 1 : index
    %c3_385 = arith.constant 3 : index
    %c0_386 = arith.constant 0 : index
    %c0_387 = arith.constant 0 : index
    %461 = vector.load %arg9[%c1_384, %c3_385, %c0_386, %c0_387] : memref<2x4x8x32xf32, #tpu.memory_space<vmem>>, vector<1x1x8x32xf32>
    %462 = vector.shape_cast %461 : vector<1x1x8x32xf32> to vector<8x32xf32>
    %cst_388 = arith.constant dense<0.000000e+00> : vector<34x32xf32>
    %463 = tpu.matmul %460, %462, %cst_388 {dimension_numbers = #tpu.dot_dimension_numbers<[1], [0], [0], [1], [0, 0, 1, 1], [], []>} : vector<34x8xf32>, vector<8x32xf32>, vector<34x32xf32> -> vector<34x32xf32>
    %464 = arith.addf %423, %463 : vector<34x32xf32>
    %465 = arith.addf %269, %464 : vector<34x32xf32>
    %466 = vector.broadcast %276 : vector<1x32xf32> to vector<34x32xf32>
    %467 = arith.addf %465, %466 : vector<34x32xf32>
    %cst_389 = arith.constant dense<0.000000e+00> : vector<34xf32>
    %468 = vector.multi_reduction <add>, %467, %cst_389 [1] : vector<34x32xf32> to vector<34xf32>
    %469 = vector.shape_cast %468 : vector<34xf32> to vector<34x1xf32>
    %cst_390 = arith.constant 3.200000e+01 : f32
    %470 = vector.broadcast %cst_390 : f32 to vector<34x1xf32>
    %471 = arith.divf %469, %470 : vector<34x1xf32>
    %472 = vector.broadcast %471 : vector<34x1xf32> to vector<34x32xf32>
    %473 = arith.subf %467, %472 : vector<34x32xf32>
    %474 = arith.mulf %473, %473 : vector<34x32xf32>
    %cst_391 = arith.constant dense<0.000000e+00> : vector<34xf32>
    %475 = vector.multi_reduction <add>, %474, %cst_391 [1] : vector<34x32xf32> to vector<34xf32>
    %476 = vector.shape_cast %475 : vector<34xf32> to vector<34x1xf32>
    %cst_392 = arith.constant 3.200000e+01 : f32
    %477 = vector.broadcast %cst_392 : f32 to vector<34x1xf32>
    %478 = arith.divf %476, %477 : vector<34x1xf32>
    %479 = vector.broadcast %471 : vector<34x1xf32> to vector<34x32xf32>
    %480 = arith.subf %467, %479 : vector<34x32xf32>
    %cst_393 = arith.constant 9.99999997E-7 : f32
    %481 = vector.broadcast %cst_393 : f32 to vector<34x1xf32>
    %482 = arith.addf %478, %481 : vector<34x1xf32>
    %483 = math.rsqrt %482 : vector<34x1xf32>
    %484 = vector.broadcast %483 : vector<34x1xf32> to vector<34x32xf32>
    %485 = arith.mulf %480, %484 : vector<34x32xf32>
    %486 = vector.broadcast %274 : vector<1x32xf32> to vector<34x32xf32>
    %487 = arith.mulf %485, %486 : vector<34x32xf32>
    %488 = vector.broadcast %275 : vector<1x32xf32> to vector<34x32xf32>
    %489 = arith.addf %487, %488 : vector<34x32xf32>
    %c1_394 = arith.constant 1 : index
    %c0_395 = arith.constant 0 : index
    %c0_396 = arith.constant 0 : index
    %490 = vector.load %arg11[%c1_394, %c0_395, %c0_396] : memref<2x32x128xf32, #tpu.memory_space<vmem>>, vector<1x32x128xf32>
    %491 = vector.shape_cast %490 : vector<1x32x128xf32> to vector<32x128xf32>
    %cst_397 = arith.constant dense<0.000000e+00> : vector<34x128xf32>
    %492 = tpu.matmul %489, %491, %cst_397 {dimension_numbers = #tpu.dot_dimension_numbers<[1], [0], [0], [1], [0, 0, 1, 1], [], []>} : vector<34x32xf32>, vector<32x128xf32>, vector<34x128xf32> -> vector<34x128xf32>
    %c1_398 = arith.constant 1 : index
    %c0_399 = arith.constant 0 : index
    %c0_400 = arith.constant 0 : index
    %493 = vector.load %arg12[%c1_398, %c0_399, %c0_400] : memref<2x1x128xf32, #tpu.memory_space<vmem>>, vector<1x1x128xf32>
    %494 = vector.shape_cast %493 : vector<1x1x128xf32> to vector<1x128xf32>
    %495 = vector.broadcast %494 : vector<1x128xf32> to vector<34x128xf32>
    %496 = arith.addf %492, %495 : vector<34x128xf32>
    %cst_401 = arith.constant 5.000000e-01 : f32
    %497 = vector.broadcast %cst_401 : f32 to vector<34x128xf32>
    %498 = arith.mulf %497, %496 : vector<34x128xf32>
    %cst_402 = arith.constant 0.707106769 : f32
    %499 = vector.broadcast %cst_402 : f32 to vector<34x128xf32>
    %500 = arith.mulf %496, %499 : vector<34x128xf32>
    %501 = math.erf %500 : vector<34x128xf32>
    %cst_403 = arith.constant 1.000000e+00 : f32
    %502 = vector.broadcast %cst_403 : f32 to vector<34x128xf32>
    %503 = arith.addf %502, %501 : vector<34x128xf32>
    %504 = arith.mulf %498, %503 : vector<34x128xf32>
    %c1_404 = arith.constant 1 : index
    %c0_405 = arith.constant 0 : index
    %c0_406 = arith.constant 0 : index
    %505 = vector.load %arg13[%c1_404, %c0_405, %c0_406] : memref<2x128x32xf32, #tpu.memory_space<vmem>>, vector<1x128x32xf32>
    %506 = vector.shape_cast %505 : vector<1x128x32xf32> to vector<128x32xf32>
    %cst_407 = arith.constant dense<0.000000e+00> : vector<34x32xf32>
    %507 = tpu.matmul %504, %506, %cst_407 {dimension_numbers = #tpu.dot_dimension_numbers<[1], [0], [0], [1], [0, 0, 1, 1], [], []>} : vector<34x128xf32>, vector<128x32xf32>, vector<34x32xf32> -> vector<34x32xf32>
    %508 = arith.addf %467, %507 : vector<34x32xf32>
    %509 = vector.broadcast %277 : vector<1x32xf32> to vector<34x32xf32>
    %510 = arith.addf %508, %509 : vector<34x32xf32>
    %511 = vector.extract_strided_slice %510 {offsets = [0, 0], sizes = [1, 32], strides = [1, 1]} : vector<34x32xf32> to vector<1x32xf32>
    %512 = vector.extract_strided_slice %510 {offsets = [17, 0], sizes = [1, 32], strides = [1, 1]} : vector<34x32xf32> to vector<1x32xf32>
    %513 = tpu.concatenate %511, %512 in 0 : vector<1x32xf32>, vector<1x32xf32> -> vector<2x32xf32>
    %cst_408 = arith.constant dense<0.000000e+00> : vector<2xf32>
    %514 = vector.multi_reduction <add>, %513, %cst_408 [1] : vector<2x32xf32> to vector<2xf32>
    %515 = vector.shape_cast %514 : vector<2xf32> to vector<2x1xf32>
    %cst_409 = arith.constant 3.200000e+01 : f32
    %516 = vector.broadcast %cst_409 : f32 to vector<2x1xf32>
    %517 = arith.divf %515, %516 : vector<2x1xf32>
    %518 = vector.broadcast %517 : vector<2x1xf32> to vector<2x32xf32>
    %519 = arith.subf %513, %518 : vector<2x32xf32>
    %520 = arith.mulf %519, %519 : vector<2x32xf32>
    %cst_410 = arith.constant dense<0.000000e+00> : vector<2xf32>
    %521 = vector.multi_reduction <add>, %520, %cst_410 [1] : vector<2x32xf32> to vector<2xf32>
    %522 = vector.shape_cast %521 : vector<2xf32> to vector<2x1xf32>
    %cst_411 = arith.constant 3.200000e+01 : f32
    %523 = vector.broadcast %cst_411 : f32 to vector<2x1xf32>
    %524 = arith.divf %522, %523 : vector<2x1xf32>
    %525 = vector.broadcast %517 : vector<2x1xf32> to vector<2x32xf32>
    %526 = arith.subf %513, %525 : vector<2x32xf32>
    %cst_412 = arith.constant 9.99999997E-7 : f32
    %527 = vector.broadcast %cst_412 : f32 to vector<2x1xf32>
    %528 = arith.addf %524, %527 : vector<2x1xf32>
    %529 = math.rsqrt %528 : vector<2x1xf32>
    %530 = vector.broadcast %529 : vector<2x1xf32> to vector<2x32xf32>
    %531 = arith.mulf %526, %530 : vector<2x32xf32>
    %532 = vector.broadcast %7 : vector<1x32xf32> to vector<2x32xf32>
    %533 = arith.mulf %531, %532 : vector<2x32xf32>
    %534 = vector.broadcast %8 : vector<1x32xf32> to vector<2x32xf32>
    %535 = arith.addf %533, %534 : vector<2x32xf32>
    %c0_413 = arith.constant 0 : index
    %c0_414 = arith.constant 0 : index
    %536 = vector.load %arg14[%c0_413, %c0_414] : memref<32x128xf32, #tpu.memory_space<vmem>>, vector<32x128xf32>
    %cst_415 = arith.constant dense<0.000000e+00> : vector<2x128xf32>
    %537 = tpu.matmul %535, %536, %cst_415 {dimension_numbers = #tpu.dot_dimension_numbers<[1], [0], [0], [1], [0, 0, 1, 1], [], []>} : vector<2x32xf32>, vector<32x128xf32>, vector<2x128xf32> -> vector<2x128xf32>
    %538 = vector.broadcast %3 : vector<1x128xf32> to vector<2x128xf32>
    %539 = arith.addf %537, %538 : vector<2x128xf32>
    %c0_416 = arith.constant 0 : index
    %c0_417 = arith.constant 0 : index
    %540 = vector.load %arg15[%c0_416, %c0_417] : memref<2x128xf32, #tpu.memory_space<vmem>>, vector<2x128xf32>
    tpu.vector_store %arg15[%c0_416, %c0_417], %539 {strides = array<i32>} : memref<2x128xf32, #tpu.memory_space<vmem>>, vector<2x128xf32>,
    return
  }
  func.func @transform_0(%arg0: i32) -> (i32, i32) {
    %c0_i32 = arith.constant 0 : i32
    %c0_i32_0 = arith.constant 0 : i32
    %c0_i32_1 = arith.constant 0 : i32
    return %c0_i32, %c0_i32_0 : i32, i32
  }
  func.func @transform_1(%arg0: i32) -> (i32, i32) {
    %c0_i32 = arith.constant 0 : i32
    %c0_i32_0 = arith.constant 0 : i32
    %c0_i32_1 = arith.constant 0 : i32
    return %c0_i32, %c0_i32_0 : i32, i32
  }
  func.func @transform_2(%arg0: i32) -> (i32, i32) {
    %c0_i32 = arith.constant 0 : i32
    %c0_i32_0 = arith.constant 0 : i32
    %c0_i32_1 = arith.constant 0 : i32
    return %c0_i32, %c0_i32_0 : i32, i32
  }
  func.func @transform_3(%arg0: i32) -> (i32, i32) {
    %c0_i32 = arith.constant 0 : i32
    %c0_i32_0 = arith.constant 0 : i32
    %c0_i32_1 = arith.constant 0 : i32
    return %c0_i32, %c0_i32_0 : i32, i32
  }
  func.func @transform_4(%arg0: i32) -> (i32, i32) {
    %c0_i32 = arith.constant 0 : i32
    %c0_i32_0 = arith.constant 0 : i32
    %c0_i32_1 = arith.constant 0 : i32
    return %c0_i32, %c0_i32_0 : i32, i32
  }
  func.func @transform_5(%arg0: i32) -> (i32, i32) {
    %c0_i32 = arith.constant 0 : i32
    %c0_i32_0 = arith.constant 0 : i32
    %c0_i32_1 = arith.constant 0 : i32
    return %c0_i32, %c0_i32_0 : i32, i32
  }
  func.func @transform_6(%arg0: i32) -> (i32, i32, i32, i32, i32) {
    %c0_i32 = arith.constant 0 : i32
    %c0_i32_0 = arith.constant 0 : i32
    %c0_i32_1 = arith.constant 0 : i32
    %c0_i32_2 = arith.constant 0 : i32
    %c0_i32_3 = arith.constant 0 : i32
    %c0_i32_4 = arith.constant 0 : i32
    return %c0_i32, %c0_i32_0, %c0_i32_1, %c0_i32_2, %c0_i32_3 : i32, i32, i32, i32, i32
  }
  func.func @transform_7(%arg0: i32) -> (i32, i32, i32, i32, i32) {
    %c0_i32 = arith.constant 0 : i32
    %c0_i32_0 = arith.constant 0 : i32
    %c0_i32_1 = arith.constant 0 : i32
    %c0_i32_2 = arith.constant 0 : i32
    %c0_i32_3 = arith.constant 0 : i32
    %c0_i32_4 = arith.constant 0 : i32
    return %c0_i32, %c0_i32_0, %c0_i32_1, %c0_i32_2, %c0_i32_3 : i32, i32, i32, i32, i32
  }
  func.func @transform_8(%arg0: i32) -> (i32, i32, i32, i32) {
    %c0_i32 = arith.constant 0 : i32
    %c0_i32_0 = arith.constant 0 : i32
    %c0_i32_1 = arith.constant 0 : i32
    %c0_i32_2 = arith.constant 0 : i32
    %c0_i32_3 = arith.constant 0 : i32
    return %c0_i32, %c0_i32_0, %c0_i32_1, %c0_i32_2 : i32, i32, i32, i32
  }
  func.func @transform_9(%arg0: i32) -> (i32, i32, i32) {
    %c0_i32 = arith.constant 0 : i32
    %c0_i32_0 = arith.constant 0 : i32
    %c0_i32_1 = arith.constant 0 : i32
    %c0_i32_2 = arith.constant 0 : i32
    return %c0_i32, %c0_i32_0, %c0_i32_1 : i32, i32, i32
  }
  func.func @transform_10(%arg0: i32) -> (i32, i32, i32) {
    %c0_i32 = arith.constant 0 : i32
    %c0_i32_0 = arith.constant 0 : i32
    %c0_i32_1 = arith.constant 0 : i32
    %c0_i32_2 = arith.constant 0 : i32
    return %c0_i32, %c0_i32_0, %c0_i32_1 : i32, i32, i32
  }
  func.func @transform_11(%arg0: i32) -> (i32, i32, i32) {
    %c0_i32 = arith.constant 0 : i32
    %c0_i32_0 = arith.constant 0 : i32
    %c0_i32_1 = arith.constant 0 : i32
    %c0_i32_2 = arith.constant 0 : i32
    return %c0_i32, %c0_i32_0, %c0_i32_1 : i32, i32, i32
  }
  func.func @transform_12(%arg0: i32) -> (i32, i32, i32) {
    %c0_i32 = arith.constant 0 : i32
    %c0_i32_0 = arith.constant 0 : i32
    %c0_i32_1 = arith.constant 0 : i32
    %c0_i32_2 = arith.constant 0 : i32
    return %c0_i32, %c0_i32_0, %c0_i32_1 : i32, i32, i32
  }
  func.func @transform_13(%arg0: i32) -> (i32, i32) {
    %c0_i32 = arith.constant 0 : i32
    %c0_i32_0 = arith.constant 0 : i32
    %c0_i32_1 = arith.constant 0 : i32
    return %c0_i32, %c0_i32_0 : i32, i32
  }
  func.func @transform_14(%arg0: i32) -> (i32, i32) {
    %c0_i32 = arith.constant 0 : i32
    %c0_i32_0 = arith.constant 0 : i32
    %c0_i32_1 = arith.constant 0 : i32
    return %c0_i32, %c0_i32_0 : i32, i32
  }
}

</mosaic_0001>

<bundles_post_ra>
// kernel: vit_forward.1
= control target key start
LH: loop header
LB: loop body
LE: loop exit
PB: predicated region body
PF: predicated region fallthrough
CT: control target
= control target key end

     0   :  { %v54_v2 = vlaneseq  ;;  %s12066_s0 = inlined_call_operand.vmem [shape: f32[32,128], index: 0, kind: input, shape index: {}]   ;;  %s12067_s1 = inlined_call_operand.vmem [shape: f32[34,34], index: 1, kind: input, shape index: {}]   ;;  %s12068_s2 = inlined_call_operand.vmem [shape: f32[128,32], index: 2, kind: input, shape index: {}]   ;;  %s12069_s3 = inlined_call_operand.vmem [shape: f32[8,128], index: 3, kind: input, shape index: {}]   ;;  %s12070_s4 = inlined_call_operand.vmem [shape: f32[8,32], index: 4, kind: input, shape index: {}]   ;;  %s12071_s5 = inlined_call_operand.vmem [shape: f32[17,32], index: 5, kind: input, shape index: {}]   ;;  %s12072_s6 = inlined_call_operand.vmem [shape: f32[2,3,4,32,8], index: 6, kind: input, shape index: {}]   ;;  %s12073_s7 = inlined_call_operand.vmem [shape: f32[2,3,4,1,8], index: 7, kind: input, shape index: {}]   ;;  %s12074_s8 = inlined_call_operand.vmem [shape: f32[2,4,8,32], index: 8, kind: input, shape index: {}]   ;;  %s12075_s9 = inlined_call_operand.vmem [shape: f32[2,8,32], index: 9, kind: input, shape index: {}]   ;;  %s12076_s10 = inlined_call_operand.vmem [shape: f32[2,32,128], index: 10, kind: input, shape index: {}]   ;;  %s12077_s11 = inlined_call_operand.vmem [shape: f32[2,1,128], index: 11, kind: input, shape index: {}]   ;;  %s12078_s12 = inlined_call_operand.vmem [shape: f32[2,128,32], index: 12, kind: input, shape index: {}]   ;;  %s12079_s13 = inlined_call_operand.vmem [shape: f32[32,128], index: 13, kind: input, shape index: {}]   ;;  %s12080_s14 = inlined_call_operand.hbm [shape: f32[2,128], index: 14, kind: output, shape index: {}]  }
   0x1   :  { %v86_v0 = vld [vmem:[%s12068_s2 + $0x78] sm:$0xff]  ;;  %v85_v1 = vld [vmem:[%s12068_s2 + $0x70] sm:$0xff]  ;;  %v84_v3 = vld [vmem:[%s12068_s2 + $0x68] sm:$0xff] }
   0x2   :  { %7928 = vmatprep.subr.mxu0 %v86_v0  ;;  %v9570_v4 = vshrl.u32 %v54_v2, 7  ;;  %v83_v5 = vld [vmem:[%s12068_s2 + $0x60] sm:$0xff]  ;;  %v82_v8 = vld [vmem:[%s12068_s2 + $0x58] sm:$0xff]  ;;  %v81_v10 = vld [vmem:[%s12068_s2 + $0x50] sm:$0xff] }
   0x3   :  { %7929 = vmatpush3.msra.mxu0 %v86_v0  ;;  %v48_v7 = vld [vmem:[%s12069_s3] sm:$0xff] }
   0x4   :  { %7930 = vmatprep.subr.mxu0 %v85_v1  ;;  %v9576_v6 = vsub.s32 1, %v9570_v4 }
   0x5   :  { %7931 = vmatpush3.msra.mxu0 %v85_v1 }
   0x6   :  { %7932 = vmatprep.subr.mxu0 %v84_v3  ;;  %v65_v9 = vrot.slane %v48_v7, %v9576_v6 }
   0x7   :  { %7933 = vmatpush3.msra.mxu0 %v84_v3 }
   0x8   :  { %7934 = vmatprep.subr.mxu0 %v83_v5  ;;  %9218 = vrcp.f32 %v65_v9 }
   0x9   :  { %7935 = vmatpush3.msra.mxu0 %v83_v5 }
   0xa   :  { %19 = vsyncpa [#allocation3], 0  ;;  %7936 = vmatprep.subr.mxu0 %v82_v8  ;;  %v80_v11 = vld [vmem:[%s12068_s2 + $0x48] sm:$0xff]  ;;  %v9592_v12 = vsub.s32 0, %v9570_v4  ;;  %v79_v13 = vld [vmem:[%s12068_s2 + $0x40] sm:$0xff]  ;;  %vm185_vm0 = vcmask 1046528  }
   0xb   :  { %7937 = vmatpush3.msra.mxu0 %v82_v8  ;;  %v78_v14 = vld [vmem:[%s12068_s2 + $0x38] sm:$0xff]  ;;  %v50_v16 = vld [vmem:[%s12066_s0] sm:$0xff]  ;;  %v77_v17 = vld [vmem:[%s12068_s2 + $0x30] sm:$0xff]  ;;  %vm227_vm1 = vcmask 261120   ;;  %vm202_vm2 = vcmask 1040384   ;;  %vm211_vm3 = vcmask 1041408  }
   0xc   :  { %7938 = vmatprep.subr.mxu0 %v81_v10  ;;  %v57_v15 = vrot.slane %v48_v7, %v9592_v12  ;;  %v76_v18 = vld [vmem:[%s12068_s2 + $0x28] sm:$0xff]  ;;  %v75_v20 = vld [vmem:[%s12068_s2 + $0x20] sm:$0xff]  ;;  %v74_v22 = vld [vmem:[%s12068_s2 + $0x18] sm:$0xff]  ;;  %vm240_vm4 = vcmask 254976   ;;  %vm9484_vm5 = vmmov 0   ;;  %vm635_vm6 = vcmask 64512  }
   0xd   :  { %7939 = vmatpush3.msra.mxu0 %v81_v10  ;;  %v51_v24 = vld [vmem:[%s12066_s0 + $0x8] sm:$0xff]  ;;  %v52_v25 = vld [vmem:[%s12066_s0 + $0x10] sm:$0xff]  ;;  %v53_v30 = vld [vmem:[%s12066_s0 + $0x18] sm:$0xff]  ;;  %vm766_vm7 = vcmask 277504   ;;  %vm779_vm8 = vcmask 271360  }
   0xe   :  { %7940 = vmatprep.subr.mxu0 %v80_v11  ;;  %v58_v19 = vsub.f32 %v50_v16, %v57_v15  ;;  %v73_v26 = vld [vmem:[%s12068_s2 + $0x10] sm:$0xff]  ;;  %v59_v27 = vsub.f32 %v51_v24, %v57_v15  ;;  %v72_v28 = vld [vmem:[%s12068_s2 + $0x8] sm:$0xff]  ;;  %v60_v29 = vsub.f32 %v52_v25, %v57_v15  ;;  %v71_v31 = vld [vmem:[%s12068_s2] sm:$0xff]  ;;  %v61_v33 = vsub.f32 %v53_v30, %v57_v15 }
   0xf   :  { %7941 = vmatpush3.msra.mxu0 %v80_v11  ;;  %v49_v36 = vld [vmem:[%s12070_s4] sm:$0xff]  ;;  %v177_v37 = vld [vmem:[%s12071_s5 + $0x8] sm:$0xff]  ;;  %v178_v38 = vld [vmem:[%s12071_s5 + $0x10] sm:$0x1] }
  0x10   :  { %7942 = vmatprep.subr.mxu0 %v79_v13  ;;  %v176_v39 = vld [vmem:[%s12071_s5] sm:$0xff]  ;;  %v90_v40 = vrot.slane %v49_v36, %v9592_v12  ;;  %v187_v41 = vrot.slane %v177_v37, 1  ;;  %v189_v42 = vrot.slane %v178_v38, 1  ;;  %s9485_s5 = smov [#allocation2]  }
  0x11   :  { %7943 = vmatpush3.msra.mxu0 %v79_v13  ;;  %v180_v43 = vrot.slane %v176_v39, 7  ;;  %v186_v44 = vrot.slane %v176_v39, 1  ;;  %v9483_v39 = vmov 0.0   ;;  %s6942_s29 = sshll.u32 %s9485_s5, 4  ;;  %s6943_s29 = int_to_ptr.vmem [resolvable:$true] %s6942_s29 }
  0x12   :  { %7944 = vmatprep.subr.mxu0 %v78_v14  ;;  %v190_v47 = vsel %vm185_vm0, %v187_v41, %v189_v42  ;;  %7966 = vmatprep.subr.mxu1 %v9483_v39  ;;  %v315_v42 = vld [vmem:[%s12072_s6 + $0x10] sm:$0xff]  ;;  %p9466_p1 = scmp.lt.s32.totalorder %s6943_s29, %s6943_s29 }
  0x13   :  { %7945 = vmatpush3.msra.mxu0 %v78_v14  ;;  %v182_v48 = vadd.f32 %v180_v43, %v49_v36  ;;  %v188_v50 = vsel %vm185_vm0, %v186_v44, %v187_v41  ;;  %v6970_v41 = vld [vmem:[%s12072_s6 + $0x118] sm:$0xff]  ;;  %v6969_v43 = vld [vmem:[%s12072_s6 + $0x110] sm:$0xff]  ;;  %v314_v44 = vld [vmem:[%s12072_s6 + $0x8] sm:$0xff]  ;;  %7974 = vmatprep.mubr.msk.f32.mxu1 %vm9484_vm5, %v9483_v39 }
  0x14   :  { %7946 = vmatprep.subr.mxu0 %v77_v17 }
  0x15   :  { %7947 = vmatpush3.msra.mxu0 %v77_v17  ;;  %v9219_v21 = vpop.eup %9218  ;;  %v198_v56 = vrot.slane %v182_v48, 1 }
  0x16   :  { %7948 = vmatprep.subr.mxu0 %v76_v18  ;;  %v67_v23 = vmul.f32 %v9219_v21, %v58_v19  ;;  %v68_v32 = vmul.f32 %v9219_v21, %v59_v27  ;;  %v69_v34 = vmul.f32 %v9219_v21, %v60_v29  ;;  %v70_v35 = vmul.f32 %v9219_v21, %v61_v33 }
  0x17   :  { %7949 = vmatpush3.msra.mxu0 %v76_v18 }
  0x18   :  { %7950 = vmatprep.subr.mxu0 %v75_v20  ;;  %7960 = vmatprep.mubr.f32.mxu0 %v67_v23 }
  0x19   :  { %7951 = vmatpush3.msra.mxu0 %v75_v20 }
  0x1a   :  { %7952 = vmatprep.subr.mxu0 %v74_v22 }
  0x1b   :  { %7953 = vmatpush3.msra.mxu0 %v74_v22 }
  0x1c   :  { %7954 = vmatprep.subr.mxu0 %v73_v26 }
  0x1d   :  { %7955 = vmatpush3.msra.mxu0 %v73_v26 }
  0x1e   :  { %7956 = vmatprep.subr.mxu0 %v72_v28 }
  0x1f   :  { %7957 = vmatpush3.msra.mxu0 %v72_v28 }
  0x20   :  { %7958 = vmatprep.subr.mxu0 %v71_v31 }
  0x21   :  { %7959 = vmatpush3.msra.mxu0 %v71_v31 }
  0x22   :  { %7961 = vmatmul.mubr.f32.vlgmr.msra.gmra.mxu0 %v68_v32  ;;  %8012 = vmatprep.subr.mxu0 %v9483_v39 }
  0x23   :  { %7963 = vmatprep.mubr.f32.mxu0 %v69_v34  ;;  %8013 = vmatpush3.msra.mxu0 %v6970_v41 }
  0x24   :  { %8014 = vmatprep.subr.mxu0 %v9483_v39 }
  0x25   :  { %8015 = vmatpush3.msra.mxu0 %v6969_v43 }
  0x26   :  { %7964 = vmatmul.mubr.f32.gmra.mxu0 %v70_v35  ;;  %8016 = vmatprep.subr.mxu0 %v9483_v39 }
  0x27   :  { %8020 = vmatprep.mubr.msk.f32.mxu0 %vm9484_vm5, %v9483_v39 }
  0xe2   :  { %v7962_v45 = vpop.f32.mrf.mxu0 }
  0xe3   :  { %v163_v46 = vadd.f32 %v7962_v45, %v90_v40  ;;  %v6968_v45 = vld [vmem:[%s12072_s6 + $0x108] sm:$0xff] }
  0xe4   :  { %v157_v49 = vpop.f32.mrf.mxu0  ;;  %8017 = vmatpush3.msra.mxu0 %v6968_v45 }
  0xe5   :  { %v158_v51 = vadd.f32 %v157_v49, %v90_v40  ;;  %v194_v52 = vadd.f32 %v190_v47, %v163_v46  ;;  %8018 = vmatprep.subr.mxu0 %v9483_v39  ;;  %v313_v46 = vld [vmem:[%s12072_s6] sm:$0xff] }
  0xe6   :  { %v7965_v53 = vpop.f32.mrf.mxu0 }
  0xe7   :  { %v193_v54 = vadd.f32 %v188_v50, %v158_v51  ;;  %v173_v55 = vadd.f32 %v7965_v53, %v90_v40  ;;  %v204_v61 = vrot.slane %v194_v52, 7 }
  0xe8   :  { %v167_v57 = vpop.f32.mrf.mxu0 }
  0xe9   :  { %v203_v58 = vrot.slane %v193_v54, 7  ;;  %v196_v59 = vadd.f32 %v190_v47, %v173_v55  ;;  %v168_v60 = vadd.f32 %v167_v57, %v90_v40  ;;  %v219_v5 = vsel %vm202_vm2, %v204_v61, %v182_v48  ;;  %v316_v40 = vld [vmem:[%s12072_s6 + $0x18] sm:$0xff]  ;;  %v6967_v47 = vld [vmem:[%s12072_s6 + $0x100] sm:$0xff] }
  0xea   :  { %7967 = vmatpush3.msra.mxu1 %v316_v40  ;;  %8019 = vmatpush3.msra.mxu0 %v6967_v47 }
  0xeb   :  { %v195_v62 = vadd.f32 %v188_v50, %v168_v60  ;;  %v9648_v63 = vsel %vm202_vm2, %v198_v56, %v203_v58  ;;  %v9652_v1 = vrot.slane %v196_v59, 6  ;;  %v9655_v3 = vsel %vm202_vm2, %v203_v58, %v204_v61  ;;  %7968 = vmatprep.subr.mxu1 %v9483_v39  ;;  %8060 = vmatprep.subr.mxu0 %v9483_v39 }
  0xec   :  { %v228_v0 = vsel %vm227_vm1, %v9648_v63, 0.0  ;;  %v231_v9 = vsel %vm227_vm1, %v9655_v3, 0.0  ;;  %7969 = vmatpush3.msra.mxu1 %v315_v42 }
  0xed   :  { %v212_v2 = vrot.slane %v195_v62, 6  ;;  %229 = vadd.xlane.f32.xlu0 %v228_v0  ;;  %v241_v13 = vsel %vm240_vm4, %v9652_v1, 0.0  ;;  %7970 = vmatprep.subr.mxu1 %v9483_v39  ;;  %v226_v0 = vld [vmem:[%s12075_s9] sm:$0xff] }
  0xee   :  { %7971 = vmatpush3.msra.mxu1 %v314_v44 }
  0xef   :  { %v9659_v7 = vsel %vm211_vm3, %v219_v5, %v212_v2  ;;  %v9667_v10 = vsel %vm211_vm3, %v212_v2, %v9652_v1  ;;  %7972 = vmatprep.subr.mxu1 %v9483_v39  ;;  %v298_v2 = vrot.slane %v226_v0, %v9592_v12 }
  0xf0   :  { %v234_v8 = vsel %vm227_vm1, %v9659_v7, 0.0  ;;  %v237_v11 = vsel %vm227_vm1, %v9667_v10, 0.0  ;;  %7973 = vmatpush3.msra.mxu1 %v313_v46 }
  0xf1   :  { %235 = vadd.xlane.f32.xlu1 %v234_v8  ;;  %232 = vadd.xlane.f32.xlu0 %v231_v9  ;;  %v307_v8 = vrot.slane %v226_v0, %v9576_v6 }
  0xf2   :  { %7989 = vmatprep.subr.mxu1 %v9483_v39 }
  0xf5   :  { %238 = vadd.xlane.f32.xlu1 %v237_v11  ;;  %242 = vadd.xlane.f32.xlu0 %v241_v13 }
 0x176   :  { %v230_v14 = vpop.xlane.xlu0 %229 }
 0x177   :  { %v245_v15 = vmul.f32 0.03125, %v230_v14 }
 0x179   :  { %v9674_v16 = vsub.f32 %v9648_v63, %v245_v15 }
 0x17a   :  { %v236_v17 = vpop.xlane.xlu1 %235  ;;  %v233_v18 = vpop.xlane.xlu0 %232 }
 0x17b   :  { %v247_v19 = vmul.f32 0.03125, %v236_v17  ;;  %v246_v20 = vmul.f32 0.03125, %v233_v18  ;;  %v255_v21 = vmul.f32 %v9674_v16, %v9674_v16  ;;  %v6959_v18 = vld [vmem:[%s12072_s6 + $0x98] sm:$0xff] }
 0x17d   :  { %v9679_v22 = vsub.f32 %v9659_v7, %v247_v19  ;;  %v9682_v23 = vsub.f32 %v9655_v3, %v246_v20  ;;  %v260_v24 = vsel %vm227_vm1, %v255_v21, 0.0 }
 0x17e   :  { %v239_v25 = vpop.xlane.xlu1 %238  ;;  %261 = vadd.xlane.f32.xlu1 %v260_v24  ;;  %v243_v26 = vpop.xlane.xlu0 %242 }
 0x17f   :  { %v248_v27 = vmul.f32 0.03125, %v239_v25  ;;  %v249_v28 = vmul.f32 0.03125, %v243_v26  ;;  %v257_v29 = vmul.f32 %v9679_v22, %v9679_v22  ;;  %v256_v30 = vmul.f32 %v9682_v23, %v9682_v23 }
 0x181   :  { %v9690_v31 = vsub.f32 %v9667_v10, %v248_v27  ;;  %v9693_v32 = vsub.f32 %v9652_v1, %v249_v28  ;;  %v266_v33 = vsel %vm227_vm1, %v257_v29, 0.0  ;;  %v263_v34 = vsel %vm227_vm1, %v256_v30, 0.0  ;;  %v6957_v29 = vld [vmem:[%s12072_s6 + $0x88] sm:$0xff] }
 0x182   :  { %267 = vadd.xlane.f32.xlu1 %v266_v33  ;;  %264 = vadd.xlane.f32.xlu0 %v263_v34  ;;  %v6956_v33 = vld [vmem:[%s12072_s6 + $0x80] sm:$0xff] }
 0x183   :  { %v258_v35 = vmul.f32 %v9690_v31, %v9690_v31  ;;  %v259_v36 = vmul.f32 %v9693_v32, %v9693_v32 }
 0x185   :  { %v269_v37 = vsel %vm227_vm1, %v258_v35, 0.0  ;;  %v272_v38 = vsel %vm240_vm4, %v259_v36, 0.0 }
 0x186   :  { %270 = vadd.xlane.f32.xlu0 %v269_v37  ;;  %273 = vadd.xlane.f32.xlu1 %v272_v38 }
 0x207   :  { %v262_v48 = vpop.xlane.xlu1 %261 }
 0x208   :  { %v275_v49 = vmul.f32 0.03125, %v262_v48 }
 0x20a   :  { %v280_v50 = vadd.f32 1e-06, %v275_v49 }
 0x20b   :  { %v268_v51 = vpop.xlane.xlu1 %267  ;;  %v265_v52 = vpop.xlane.xlu0 %264 }
 0x20c   :  { %9220 = vrsqrt.f32 %v280_v50  ;;  %v277_v53 = vmul.f32 0.03125, %v268_v51  ;;  %v276_v54 = vmul.f32 0.03125, %v265_v52  ;;  %v6972_v51 = vld [vmem:[%s12073_s7 + $0x8] ss:$0 sm:$0xff] }
 0x20e   :  { %v282_v55 = vadd.f32 1e-06, %v277_v53  ;;  %v281_v56 = vadd.f32 1e-06, %v276_v54 }
 0x20f   :  { %v274_v57 = vpop.xlane.xlu1 %273  ;;  %v271_v58 = vpop.xlane.xlu0 %270 }
 0x210   :  { %9222 = vrsqrt.f32 %v282_v55  ;;  %v279_v59 = vmul.f32 0.03125, %v274_v57  ;;  %v278_v60 = vmul.f32 0.03125, %v271_v58 }
 0x211   :  { %9224 = vrsqrt.f32 %v281_v56 }
 0x212   :  { %v284_v61 = vadd.f32 1e-06, %v279_v59  ;;  %v283_v62 = vadd.f32 1e-06, %v278_v60 }
 0x214   :  { %9226 = vrsqrt.f32 %v284_v61 }
 0x215   :  { %9228 = vrsqrt.f32 %v283_v62 }
 0x219   :  { %v9221_v5 = vpop.eup %9220 }
 0x21a   :  { %v290_v9 = vmul.f32 %v9221_v5, %v9674_v16  ;;  %v6958_v16 = vld [vmem:[%s12072_s6 + $0x90] sm:$0xff] }
 0x21c   :  { %v299_v11 = vmul.f32 %v298_v2, %v290_v9 }
 0x21d   :  { %v9223_v13 = vpop.eup %9222 }
 0x21e   :  { %v9225_v14 = vpop.eup %9224  ;;  %v9747_v15 = vadd.f32 %v307_v8, %v299_v11  ;;  %v292_v17 = vmul.f32 %v9223_v13, %v9679_v22  ;;  %v6961_v13 = vld [vmem:[%s12073_s7 + $0x4] ss:$0 sm:$0xff] }
 0x21f   :  { %v291_v19 = vmul.f32 %v9225_v14, %v9682_v23 }
 0x220   :  { %v301_v20 = vmul.f32 %v298_v2, %v292_v17  ;;  %7975 = vmatmul.mubr.msk.f32.vlgmr.msra.gmra.mxu1 %vm227_vm1, %v9747_v15  ;;  %8021 = vmatmul.mubr.msk.f32.vlgmr.msra.gmra.mxu0 %vm227_vm1, %v9747_v15 }
 0x221   :  { %v9227_v21 = vpop.eup %9226  ;;  %v300_v24 = vmul.f32 %v298_v2, %v291_v19  ;;  %7990 = vmatpush3.msra.mxu1 %v6959_v18  ;;  %7977 = vmatprep.mubr.msk.f32.mxu1 %vm9484_vm5, %v9483_v39 }
 0x222   :  { %v9229_v22 = vpop.eup %9228  ;;  %v9763_v25 = vadd.f32 %v307_v8, %v301_v20  ;;  %v294_v23 = vmul.f32 %v9227_v21, %v9693_v32  ;;  %8023 = vmatprep.mubr.msk.f32.mxu0 %vm9484_vm5, %v9483_v39  ;;  %7991 = vmatprep.subr.mxu1 %v9483_v39  ;;  %v6950_v21 = vld [vmem:[%s12073_s7] ss:$0 sm:$0xff] }
 0x223   :  { %v9769_v26 = vadd.f32 %v307_v8, %v300_v24  ;;  %v293_v27 = vmul.f32 %v9229_v22, %v9690_v31  ;;  %7992 = vmatpush3.msra.mxu1 %v6958_v16 }
 0x224   :  { %v303_v28 = vmul.f32 %v298_v2, %v294_v23  ;;  %7993 = vmatprep.subr.mxu1 %v9483_v39 }
 0x225   :  { %v302_v30 = vmul.f32 %v298_v2, %v293_v27  ;;  %7978 = vmatmul.mubr.msk.f32.gmra.mxu1 %vm227_vm1, %v9769_v26  ;;  %8024 = vmatmul.mubr.msk.f32.gmra.mxu0 %vm227_vm1, %v9769_v26 }
 0x226   :  { %v9780_v32 = vadd.f32 %v307_v8, %v303_v28  ;;  %7980 = vmatprep.mubr.msk.f32.mxu1 %vm9484_vm5, %v9483_v39  ;;  %8026 = vmatprep.mubr.msk.f32.mxu0 %vm9484_vm5, %v9483_v39 }
 0x227   :  { %v9786_v31 = vadd.f32 %v307_v8, %v302_v30  ;;  %7994 = vmatpush3.msra.mxu1 %v6957_v29 }
 0x228   :  { %7995 = vmatprep.subr.mxu1 %v9483_v39 }
 0x229   :  { %7981 = vmatmul.mubr.msk.f32.gmra.mxu1 %vm227_vm1, %v9763_v25  ;;  %8027 = vmatmul.mubr.msk.f32.gmra.mxu0 %vm227_vm1, %v9763_v25 }
 0x22a   :  { %7983 = vmatprep.mubr.msk.f32.mxu1 %vm9484_vm5, %v9483_v39  ;;  %8029 = vmatprep.mubr.msk.f32.mxu0 %vm9484_vm5, %v9483_v39 }
 0x22b   :  { %7996 = vmatpush3.msra.mxu1 %v6956_v33  ;;  %v9901_v33 = vld [vmem:[%s12067_s1] sm:$0xff] }
 0x22c   :  { %8035 = vmatprep.subr.mxu1 %v9483_v39 }
 0x22d   :  { %7984 = vmatmul.mubr.msk.f32.gmra.mxu1 %vm227_vm1, %v9786_v31  ;;  %8030 = vmatmul.mubr.msk.f32.gmra.mxu0 %vm227_vm1, %v9786_v31 }
 0x22e   :  { %7986 = vmatprep.mubr.msk.f32.mxu1 %vm9484_vm5, %v9483_v39  ;;  %8032 = vmatprep.mubr.msk.f32.mxu0 %vm9484_vm5, %v9483_v39 }
 0x231   :  { %7987 = vmatmul.mubr.msk.f32.gmra.mxu1 %vm227_vm1, %v9780_v32  ;;  %8033 = vmatmul.mubr.msk.f32.gmra.mxu0 %vm227_vm1, %v9780_v32 }
 0x232   :  { %7997 = vmatprep.mubr.msk.f32.mxu1 %vm9484_vm5, %v9483_v39  ;;  %8070 = vmatprep.mubr.msk.f32.mxu0 %vm9484_vm5, %v9483_v39 }
 0x235   :  { %7998 = vmatmul.mubr.msk.f32.vlgmr.msra.gmra.mxu1 %vm227_vm1, %v9747_v15 }
 0x236   :  { %8000 = vmatprep.mubr.msk.f32.mxu1 %vm9484_vm5, %v9483_v39 }
 0x239   :  { %8001 = vmatmul.mubr.msk.f32.gmra.mxu1 %vm227_vm1, %v9769_v26 }
 0x23a   :  { %8003 = vmatprep.mubr.msk.f32.mxu1 %vm9484_vm5, %v9483_v39 }
 0x23d   :  { %8004 = vmatmul.mubr.msk.f32.gmra.mxu1 %vm227_vm1, %v9763_v25 }
 0x23e   :  { %8006 = vmatprep.mubr.msk.f32.mxu1 %vm9484_vm5, %v9483_v39 }
 0x241   :  { %8007 = vmatmul.mubr.msk.f32.gmra.mxu1 %vm227_vm1, %v9786_v31 }
 0x242   :  { %8009 = vmatprep.mubr.msk.f32.mxu1 %vm9484_vm5, %v9483_v39 }
 0x245   :  { %8010 = vmatmul.mubr.msk.f32.gmra.mxu1 %vm227_vm1, %v9780_v32 }
 0x246   :  { %8045 = vmatprep.mubr.msk.f32.mxu1 %vm9484_vm5, %v9483_v39 }
 0x2e0   :  { %v9837_v34 = vpop.f32.mrf.mxu1  ;;  %v611_v35 = vpop.f32.mrf.mxu0 }
 0x2e1   :  { %v612_v0 = vadd.f32 %v6972_v51, %v611_v35  ;;  %v406_v22 = vadd.f32 %v6950_v21, %v9837_v34 }
 0x2e2   :  { %v7976_v36 = vpop.f32.mrf.mxu1  ;;  %v8022_v37 = vpop.f32.mrf.mxu0 }
 0x2e5   :  { %v9839_v38 = vpop.f32.mrf.mxu1  ;;  %v616_v40 = vpop.f32.mrf.mxu0 }
 0x2e6   :  { %v617_v61 = vadd.f32 %v6972_v51, %v616_v40  ;;  %v411_v23 = vadd.f32 %v6950_v21, %v9839_v38  ;;  %v9907_v38 = vld [vmem:[%s12067_s1 + $0x8] sm:$0xff] }
 0x2e7   :  { %v7979_v41 = vpop.f32.mrf.mxu1  ;;  %v8025_v42 = vpop.f32.mrf.mxu0 }
 0x2e9   :  { %v9841_v43 = vpop.f32.mrf.mxu1  ;;  %v621_v44 = vpop.f32.mrf.mxu0 }
 0x2ea   :  { %v622_v59 = vadd.f32 %v6972_v51, %v621_v44  ;;  %v416_v27 = vadd.f32 %v6950_v21, %v9841_v43 }
 0x2eb   :  { %v7982_v45 = vpop.f32.mrf.mxu1  ;;  %v8028_v46 = vpop.f32.mrf.mxu0 }
 0x2ec   :  { %v9914_v45 = vld [vmem:[%s12067_s1 + $0x10] sm:$0xff] }
 0x2ed   :  { %v9843_v47 = vpop.f32.mrf.mxu1  ;;  %v626_v48 = vpop.f32.mrf.mxu0 }
 0x2ee   :  { %v627_v57 = vadd.f32 %v6972_v51, %v626_v48  ;;  %v421_v28 = vadd.f32 %v6950_v21, %v9843_v47 }
 0x2ef   :  { %v7985_v49 = vpop.f32.mrf.mxu1  ;;  %v8031_v50 = vpop.f32.mrf.mxu0 }
 0x2f1   :  { %v9848_v52 = vpop.f32.mrf.mxu1  ;;  %v631_v53 = vpop.f32.mrf.mxu0 }
 0x2f2   :  { %v632_v54 = vadd.f32 %v6972_v51, %v631_v53  ;;  %v426_v29 = vadd.f32 %v6950_v21, %v9848_v52  ;;  %v9921_v51 = vld [vmem:[%s12067_s1 + $0x18] sm:$0xff] }
 0x2f3   :  { %v7988_v55 = vpop.f32.mrf.mxu1  ;;  %v8034_v56 = vpop.f32.mrf.mxu0 }
 0x2f4   :  { %8061 = vmatpush3.msk.msra.mxu0 %vm211_vm3, %v632_v54 }
 0x2f5   :  { %v508_v58 = vpop.f32.mrf.mxu1  ;;  %8062 = vmatprep.subr.mxu0 %v9483_v39 }
 0x2f6   :  { %8063 = vmatpush3.msra.mxu0 %v627_v57  ;;  %v509_v24 = vadd.f32 %v6961_v13, %v508_v58 }
 0x2f7   :  { %v7999_v60 = vpop.f32.mrf.mxu1  ;;  %8064 = vmatprep.subr.mxu0 %v9483_v39 }
 0x2f8   :  { %8065 = vmatpush3.msra.mxu0 %v622_v59 }
 0x2f9   :  { %v513_v62 = vpop.f32.mrf.mxu1  ;;  %8066 = vmatprep.subr.mxu0 %v9483_v39 }
 0x2fa   :  { %8067 = vmatpush3.msra.mxu0 %v617_v61  ;;  %v514_v16 = vadd.f32 %v6961_v13, %v513_v62 }
 0x2fb   :  { %v8002_v2 = vpop.f32.mrf.mxu1  ;;  %8068 = vmatprep.subr.mxu0 %v9483_v39 }
 0x2fc   :  { %8069 = vmatpush3.msra.mxu0 %v612_v0 }
 0x2fd   :  { %v518_v5 = vpop.f32.mrf.mxu1  ;;  %8108 = vmatprep.subr.mxu0 %v9483_v39 }
 0x2fe   :  { %v519_v20 = vadd.f32 %v6961_v13, %v518_v5 }
 0x2ff   :  { %v8005_v8 = vpop.f32.mrf.mxu1 }
 0x301   :  { %v523_v9 = vpop.f32.mrf.mxu1 }
 0x302   :  { %v524_v19 = vadd.f32 %v6961_v13, %v523_v9 }
 0x303   :  { %v8008_v11 = vpop.f32.mrf.mxu1 }
 0x305   :  { %v528_v14 = vpop.f32.mrf.mxu1 }
 0x306   :  { %v529_v17 = vadd.f32 %v6961_v13, %v528_v14 }
 0x307   :  { %v8011_v18 = vpop.f32.mrf.mxu1 }
 0x308   :  { %8036 = vmatpush3.xpose.msk.msra.mxu1 %vm635_vm6, %v529_v17 }
 0x309   :  { %8037 = vmatprep.subr.mxu1 %v9483_v39 }
 0x30c   :  { %8038 = vmatpush3.xpose.msk.msra.mxu1 %vm635_vm6, %v524_v19 }
 0x30d   :  { %8039 = vmatprep.subr.mxu1 %v9483_v39 }
 0x310   :  { %8040 = vmatpush3.xpose.msk.msra.mxu1 %vm635_vm6, %v519_v20 }
 0x311   :  { %8041 = vmatprep.subr.mxu1 %v9483_v39 }
 0x314   :  { %8042 = vmatpush3.xpose.msk.msra.mxu1 %vm635_vm6, %v514_v16 }
 0x315   :  { %8043 = vmatprep.subr.mxu1 %v9483_v39 }
 0x318   :  { %8044 = vmatpush3.xpose.msk.msra.mxu1 %vm635_vm6, %v509_v24 }
 0x319   :  { %9205 = vmatprep.subr.mxu1 %v9483_v39 }
 0x31b   :  { %8046 = vmatmul.mubr.msk.f32.vlgmr.msra.gmra.mxu1 %vm635_vm6, %v406_v22 }
 0x31c   :  { %9210 = vmatpush3.msk.msra.mxu1 %vm211_vm3, %v632_v54  ;;  %8048 = vmatprep.mubr.msk.f32.mxu1 %vm9484_vm5, %v9483_v39 }
 0x31d   :  { %9206 = vmatprep.subr.mxu1 %v9483_v39 }
 0x31e   :  { %9211 = vmatpush3.msra.mxu1 %v627_v57  ;;  %v9928_v57 = vld [vmem:[%s12067_s1 + $0x20] sm:$0x3] }
 0x31f   :  { %8049 = vmatmul.mubr.msk.f32.gmra.mxu1 %vm635_vm6, %v411_v23  ;;  %9207 = vmatprep.subr.mxu1 %v9483_v39 }
 0x320   :  { %9212 = vmatpush3.msra.mxu1 %v622_v59  ;;  %8051 = vmatprep.mubr.msk.f32.mxu1 %vm9484_vm5, %v9483_v39 }
 0x321   :  { %9208 = vmatprep.subr.mxu1 %v9483_v39 }
 0x322   :  { %9213 = vmatpush3.msra.mxu1 %v617_v61 }
 0x323   :  { %8052 = vmatmul.mubr.msk.f32.gmra.mxu1 %vm635_vm6, %v416_v27  ;;  %9209 = vmatprep.subr.mxu1 %v9483_v39 }
 0x324   :  { %9214 = vmatpush3.msra.mxu1 %v612_v0  ;;  %8054 = vmatprep.mubr.msk.f32.mxu1 %vm9484_vm5, %v9483_v39 }
 0x325   :  { %8085 = vmatprep.subr.mxu1 %v9483_v39 }
 0x327   :  { %8055 = vmatmul.mubr.msk.f32.gmra.mxu1 %vm635_vm6, %v421_v28 }
 0x328   :  { %8057 = vmatprep.mubr.msk.f32.mxu1 %vm9484_vm5, %v9483_v39 }
 0x32b   :  { %8058 = vmatmul.mubr.msk.f32.gmra.mxu1 %vm635_vm6, %v426_v29 }
 0x32c   :  { %8076 = vmatprep.mubr.msk.f32.mxu1 %vm9484_vm5, %v9483_v39 }
 0x3db   :  { %v732_v30 = vpop.f32.mrf.mxu1 }
 0x3dc   :  { %v756_v34 = vmul.f32 0.35355338, %v732_v30 }
 0x3dd   :  { %v8047_v35 = vpop.f32.mrf.mxu1 }
 0x3de   :  { %v761_v36 = vadd.f32 %v756_v34, %v9901_v33 }
 0x3df   :  { %v737_v37 = vpop.f32.mrf.mxu1 }
 0x3e0   :  { %v757_v40 = vmul.f32 0.35355338, %v737_v37  ;;  %v767_v41 = vsel %vm766_vm7, %v761_v36, -inf }
 0x3e1   :  { %768 = vmax.xlane.f32.xlu0 %v767_v41  ;;  %v8050_v42 = vpop.f32.mrf.mxu1 }
 0x3e2   :  { %v762_v43 = vadd.f32 %v757_v40, %v9907_v38 }
 0x3e3   :  { %v742_v44 = vpop.f32.mrf.mxu1 }
 0x3e4   :  { %v758_v46 = vmul.f32 0.35355338, %v742_v44  ;;  %v770_v47 = vsel %vm766_vm7, %v762_v43, -inf }
 0x3e5   :  { %771 = vmax.xlane.f32.xlu1 %v770_v47  ;;  %v8053_v48 = vpop.f32.mrf.mxu1  ;;  %v7008_v47 = vld [vmem:[%s12072_s6 + $0xb8] sm:$0xff] }
 0x3e6   :  { %v763_v49 = vadd.f32 %v758_v46, %v9914_v45 }
 0x3e7   :  { %v747_v50 = vpop.f32.mrf.mxu1 }
 0x3e8   :  { %v759_v52 = vmul.f32 0.35355338, %v747_v50  ;;  %v773_v53 = vsel %vm766_vm7, %v763_v49, -inf }
 0x3e9   :  { %774 = vmax.xlane.f32.xlu0 %v773_v53  ;;  %v8056_v54 = vpop.f32.mrf.mxu1  ;;  %v7006_v53 = vld [vmem:[%s12072_s6 + $0xa8] sm:$0xff] }
 0x3ea   :  { %v764_v55 = vadd.f32 %v759_v52, %v9921_v51  ;;  %v7005_v54 = vld [vmem:[%s12072_s6 + $0xa0] sm:$0xff] }
 0x3eb   :  { %v752_v56 = vpop.f32.mrf.mxu1 }
 0x3ec   :  { %v760_v58 = vmul.f32 0.35355338, %v752_v56  ;;  %v776_v59 = vsel %vm766_vm7, %v764_v55, -inf }
 0x3ed   :  { %777 = vmax.xlane.f32.xlu1 %v776_v59  ;;  %v8059_v60 = vpop.f32.mrf.mxu1 }
 0x3ee   :  { %v765_v61 = vadd.f32 %v760_v58, %v9928_v57  ;;  %v6997_v58 = vld [vmem:[%s12072_s6 + $0x38] sm:$0xff] }
 0x3f0   :  { %v780_v62 = vsel %vm779_vm8, %v765_v61, -inf }
 0x3f1   :  { %781 = vmax.xlane.f32.xlu0 %v780_v62  ;;  %v6995_v62 = vld [vmem:[%s12072_s6 + $0x28] sm:$0xff] }
 0x46a   :  { %v769_v0 = vpop.xlane.xlu0 %768 }
 0x46b   :  { %v783_v2 = vsub.f32 %v761_v36, %v769_v0 }
 0x46d   :  { %v788_v5 = vmul.f32 1.442695, %v783_v2 }
 0x46e   :  { %v772_v8 = vpop.xlane.xlu1 %771 }
 0x46f   :  { %9230 = vpow2.f32 %v788_v5  ;;  %v784_v9 = vsub.f32 %v762_v43, %v772_v8  ;;  %v6994_v5 = vld [vmem:[%s12072_s6 + $0x20] sm:$0xff]  ;;  %v7019_v8 = vld [vmem:[%s12072_s6 + $0x138] sm:$0xff] }
 0x471   :  { %v790_v11 = vmul.f32 1.442695, %v784_v9  ;;  %v7018_v9 = vld [vmem:[%s12072_s6 + $0x130] sm:$0xff] }
 0x472   :  { %v775_v13 = vpop.xlane.xlu0 %774 }
 0x473   :  { %9232 = vpow2.f32 %v790_v11  ;;  %v785_v14 = vsub.f32 %v763_v49, %v775_v13  ;;  %v7007_v49 = vld [vmem:[%s12072_s6 + $0xb0] sm:$0xff]  ;;  %v7017_v11 = vld [vmem:[%s12072_s6 + $0x128] sm:$0xff]  ;;  %v7016_v13 = vld [vmem:[%s12072_s6 + $0x120] sm:$0xff] }
 0x475   :  { %v792_v17 = vmul.f32 1.442695, %v785_v14 }
 0x476   :  { %v778_v18 = vpop.xlane.xlu1 %777 }
 0x477   :  { %9234 = vpow2.f32 %v792_v17  ;;  %v786_v19 = vsub.f32 %v764_v55, %v778_v18 }
 0x479   :  { %v794_v20 = vmul.f32 1.442695, %v786_v19 }
 0x47a   :  { %v782_v16 = vpop.xlane.xlu0 %781 }
 0x47b   :  { %9236 = vpow2.f32 %v794_v20  ;;  %v787_v21 = vsub.f32 %v765_v61, %v782_v16  ;;  %v6996_v61 = vld [vmem:[%s12072_s6 + $0x30] sm:$0xff] }
 0x47c   :  { %v9231_v24 = vpop.eup %9230 }
 0x47d   :  { %v796_v22 = vmul.f32 1.442695, %v787_v21  ;;  %v798_v23 = vsel %vm766_vm7, %v9231_v24, 0.0 }
 0x47e   :  { %799 = vadd.xlane.f32.xlu1 %v798_v23 }
 0x47f   :  { %9238 = vpow2.f32 %v796_v22 }
 0x480   :  { %v9233_v27 = vpop.eup %9232 }
 0x481   :  { %v801_v28 = vsel %vm766_vm7, %v9233_v27, 0.0 }
 0x482   :  { %802 = vadd.xlane.f32.xlu0 %v801_v28 }
 0x484   :  { %v9235_v29 = vpop.eup %9234 }
 0x485   :  { %v804_v30 = vsel %vm766_vm7, %v9235_v29, 0.0 }
 0x486   :  { %805 = vadd.xlane.f32.xlu1 %v804_v30 }
 0x488   :  { %v9237_v34 = vpop.eup %9236 }
 0x489   :  { %v807_v35 = vsel %vm766_vm7, %v9237_v34, 0.0 }
 0x48a   :  { %808 = vadd.xlane.f32.xlu0 %v807_v35 }
 0x48c   :  { %v9239_v36 = vpop.eup %9238 }
 0x48d   :  { %v810_v37 = vsel %vm779_vm8, %v9239_v36, 0.0 }
 0x48e   :  { %811 = vadd.xlane.f32.xlu1 %v810_v37 }
 0x507   :  { %v800_v40 = vpop.xlane.xlu1 %799 }
 0x508   :  { %9240 = vrcp.f32 %v800_v40 }
 0x50b   :  { %v803_v41 = vpop.xlane.xlu0 %802 }
 0x50c   :  { %9242 = vrcp.f32 %v803_v41 }
 0x50f   :  { %v806_v42 = vpop.xlane.xlu1 %805 }
 0x510   :  { %9244 = vrcp.f32 %v806_v42  ;;  %v7010_v42 = vld [vmem:[%s12073_s7 + $0x5] ss:$0 sm:$0xff] }
 0x513   :  { %v809_v43 = vpop.xlane.xlu0 %808 }
 0x514   :  { %9246 = vrcp.f32 %v809_v43 }
 0x515   :  { %v9241_v44 = vpop.eup %9240 }
 0x516   :  { %v818_v46 = vmul.f32 %v9241_v44, %v9231_v24 }
 0x517   :  { %v812_v48 = vpop.xlane.xlu1 %811 }
 0x518   :  { %9248 = vrcp.f32 %v812_v48  ;;  %8071 = vmatmul.mubr.msk.f32.vlgmr.msra.gmra.mxu0 %vm766_vm7, %v818_v46 }
 0x519   :  { %v9243_v50 = vpop.eup %9242  ;;  %8109 = vmatpush3.msra.mxu0 %v7008_v47  ;;  %8073 = vmatprep.mubr.msk.f32.mxu0 %vm9484_vm5, %v9483_v39 }
 0x51a   :  { %8110 = vmatprep.subr.mxu0 %v9483_v39  ;;  %v819_v52 = vmul.f32 %v9243_v50, %v9233_v27 }
 0x51b   :  { %8111 = vmatpush3.msra.mxu0 %v7007_v49 }
 0x51c   :  { %8074 = vmatmul.mubr.msk.f32.gmra.mxu0 %vm766_vm7, %v819_v52  ;;  %8112 = vmatprep.subr.mxu0 %v9483_v39 }
 0x51d   :  { %v9245_v55 = vpop.eup %9244  ;;  %8113 = vmatpush3.msra.mxu0 %v7006_v53  ;;  %8116 = vmatprep.mubr.msk.f32.mxu0 %vm9484_vm5, %v9483_v39 }
 0x51e   :  { %v820_v56 = vmul.f32 %v9245_v55, %v9235_v29  ;;  %8114 = vmatprep.subr.mxu0 %v9483_v39 }
 0x51f   :  { %8115 = vmatpush3.msra.mxu0 %v7005_v54 }
 0x520   :  { %8077 = vmatmul.mubr.msk.f32.vlgmr.msra.gmra.mxu1 %vm766_vm7, %v820_v56  ;;  %8117 = vmatmul.mubr.msk.f32.vlgmr.msra.gmra.mxu0 %vm227_vm1, %v9747_v15 }
 0x521   :  { %v9247_v59 = vpop.eup %9246  ;;  %8079 = vmatprep.mubr.msk.f32.mxu1 %vm9484_vm5, %v9483_v39  ;;  %8119 = vmatprep.mubr.msk.f32.mxu0 %vm9484_vm5, %v9483_v39 }
 0x522   :  { %v821_v60 = vmul.f32 %v9247_v59, %v9237_v34  ;;  %8086 = vmatpush3.msra.mxu1 %v6997_v58  ;;  %8154 = vmatprep.subr.mxu0 %v9483_v39 }
 0x523   :  { %8087 = vmatprep.subr.mxu1 %v9483_v39 }
 0x524   :  { %8080 = vmatmul.mubr.msk.f32.gmra.mxu1 %vm766_vm7, %v821_v60  ;;  %8120 = vmatmul.mubr.msk.f32.gmra.mxu0 %vm227_vm1, %v9769_v26 }
 0x525   :  { %v9249_v0 = vpop.eup %9248  ;;  %8082 = vmatprep.mubr.msk.f32.mxu1 %vm9484_vm5, %v9483_v39  ;;  %8088 = vmatpush3.msra.mxu1 %v6996_v61 }
 0x526   :  { %8122 = vmatprep.mubr.msk.f32.mxu0 %vm9484_vm5, %v9483_v39  ;;  %v822_v2 = vmul.f32 %v9249_v0, %v9239_v36  ;;  %8089 = vmatprep.subr.mxu1 %v9483_v39 }
 0x527   :  { %8090 = vmatpush3.msra.mxu1 %v6995_v62  ;;  %v6999_v62 = vld [vmem:[%s12073_s7 + $0x1] ss:$0 sm:$0xff] }
 0x528   :  { %8083 = vmatmul.mubr.msk.f32.gmra.mxu1 %vm766_vm7, %v822_v2  ;;  %8123 = vmatmul.mubr.msk.f32.gmra.mxu0 %vm227_vm1, %v9763_v25 }
 0x529   :  { %8091 = vmatprep.subr.mxu1 %v9483_v39  ;;  %8093 = vmatprep.mubr.msk.f32.mxu1 %vm9484_vm5, %v9483_v39 }
 0x52a   :  { %8092 = vmatpush3.msra.mxu1 %v6994_v5  ;;  %8125 = vmatprep.mubr.msk.f32.mxu0 %vm9484_vm5, %v9483_v39 }
 0x52b   :  { %8131 = vmatprep.subr.mxu1 %v9483_v39 }
 0x52c   :  { %8094 = vmatmul.mubr.msk.f32.vlgmr.msra.gmra.mxu1 %vm227_vm1, %v9747_v15  ;;  %8126 = vmatmul.mubr.msk.f32.gmra.mxu0 %vm227_vm1, %v9786_v31 }
 0x52d   :  { %8096 = vmatprep.mubr.msk.f32.mxu1 %vm9484_vm5, %v9483_v39  ;;  %8128 = vmatprep.mubr.msk.f32.mxu0 %vm9484_vm5, %v9483_v39 }
 0x52e   :  { %8132 = vmatpush3.msra.mxu1 %v7019_v8 }
 0x52f   :  { %8133 = vmatprep.subr.mxu1 %v9483_v39 }
 0x530   :  { %8097 = vmatmul.mubr.msk.f32.gmra.mxu1 %vm227_vm1, %v9769_v26  ;;  %8129 = vmatmul.mubr.msk.f32.gmra.mxu0 %vm227_vm1, %v9780_v32 }
 0x531   :  { %8099 = vmatprep.mubr.msk.f32.mxu1 %vm9484_vm5, %v9483_v39  ;;  %8134 = vmatpush3.msra.mxu1 %v7018_v9 }
 0x532   :  { %8135 = vmatprep.subr.mxu1 %v9483_v39  ;;  %8164 = vmatprep.mubr.msk.f32.mxu0 %vm9484_vm5, %v9483_v39 }
 0x533   :  { %8136 = vmatpush3.msra.mxu1 %v7017_v11 }
 0x534   :  { %8100 = vmatmul.mubr.msk.f32.gmra.mxu1 %vm227_vm1, %v9763_v25  ;;  %8137 = vmatprep.subr.mxu1 %v9483_v39 }
 0x535   :  { %8102 = vmatprep.mubr.msk.f32.mxu1 %vm9484_vm5, %v9483_v39  ;;  %8138 = vmatpush3.msra.mxu1 %v7016_v13 }
 0x536   :  { %8179 = vmatprep.subr.mxu1 %v9483_v39 }
 0x538   :  { %8103 = vmatmul.mubr.msk.f32.gmra.mxu1 %vm227_vm1, %v9786_v31 }
 0x539   :  { %8105 = vmatprep.mubr.msk.f32.mxu1 %vm9484_vm5, %v9483_v39 }
 0x53c   :  { %8106 = vmatmul.mubr.msk.f32.gmra.mxu1 %vm227_vm1, %v9780_v32 }
 0x53d   :  { %8139 = vmatprep.mubr.msk.f32.mxu1 %vm9484_vm5, %v9483_v39 }
 0x540   :  { %8140 = vmatmul.mubr.msk.f32.vlgmr.msra.gmra.mxu1 %vm227_vm1, %v9747_v15 }
 0x541   :  { %8142 = vmatprep.mubr.msk.f32.mxu1 %vm9484_vm5, %v9483_v39 }
 0x544   :  { %8143 = vmatmul.mubr.msk.f32.gmra.mxu1 %vm227_vm1, %v9769_v26 }
 0x545   :  { %8145 = vmatprep.mubr.msk.f32.mxu1 %vm9484_vm5, %v9483_v39 }
 0x548   :  { %8146 = vmatmul.mubr.msk.f32.gmra.mxu1 %vm227_vm1, %v9763_v25 }
 0x549   :  { %8148 = vmatprep.mubr.msk.f32.mxu1 %vm9484_vm5, %v9483_v39 }
 0x54c   :  { %8149 = vmatmul.mubr.msk.f32.gmra.mxu1 %vm227_vm1, %v9786_v31 }
 0x54d   :  { %8151 = vmatprep.mubr.msk.f32.mxu1 %vm9484_vm5, %v9483_v39 }
 0x550   :  { %8152 = vmatmul.mubr.msk.f32.gmra.mxu1 %vm227_vm1, %v9780_v32 }
 0x551   :  { %8189 = vmatprep.mubr.msk.f32.mxu1 %vm9484_vm5, %v9483_v39 }
 0x5d8   :  { %v10061_v14 = vpop.f32.mrf.mxu0 }
 0x5da   :  { %v8072_v17 = vpop.f32.mrf.mxu0 }
 0x5dc   :  { %v10063_v18 = vpop.f32.mrf.mxu0 }
 0x5de   :  { %v8075_v19 = vpop.f32.mrf.mxu0 }
 0x5e0   :  { %v10065_v20 = vpop.f32.mrf.mxu1  ;;  %v1114_v16 = vpop.f32.mrf.mxu0 }
 0x5e1   :  { %v1115_v61 = vadd.f32 %v7010_v42, %v1114_v16 }
 0x5e2   :  { %v8078_v21 = vpop.f32.mrf.mxu1  ;;  %v8118_v24 = vpop.f32.mrf.mxu0 }
 0x5e3   :  { %v7021_v24 = vld [vmem:[%s12073_s7 + $0x9] ss:$0 sm:$0xff] }
 0x5e4   :  { %v10067_v22 = vpop.f32.mrf.mxu1  ;;  %v1119_v23 = vpop.f32.mrf.mxu0 }
 0x5e5   :  { %v1120_v58 = vadd.f32 %v7010_v42, %v1119_v23 }
 0x5e6   :  { %v8081_v27 = vpop.f32.mrf.mxu1  ;;  %v8121_v28 = vpop.f32.mrf.mxu0 }
 0x5e8   :  { %v10069_v29 = vpop.f32.mrf.mxu1  ;;  %v1124_v30 = vpop.f32.mrf.mxu0 }
 0x5e9   :  { %v1125_v54 = vadd.f32 %v7010_v42, %v1124_v30 }
 0x5ea   :  { %v8084_v34 = vpop.f32.mrf.mxu1  ;;  %v8124_v35 = vpop.f32.mrf.mxu0 }
 0x5ec   :  { %v1011_v36 = vpop.f32.mrf.mxu1  ;;  %v1129_v37 = vpop.f32.mrf.mxu0 }
 0x5ed   :  { %v1130_v50 = vadd.f32 %v7010_v42, %v1129_v37  ;;  %v1012_v2 = vadd.f32 %v6999_v62, %v1011_v36 }
 0x5ee   :  { %v8095_v40 = vpop.f32.mrf.mxu1  ;;  %v8127_v41 = vpop.f32.mrf.mxu0 }
 0x5f0   :  { %v1016_v43 = vpop.f32.mrf.mxu1  ;;  %v1134_v44 = vpop.f32.mrf.mxu0 }
 0x5f1   :  { %v1135_v46 = vadd.f32 %v7010_v42, %v1134_v44  ;;  %v1017_v9 = vadd.f32 %v6999_v62, %v1016_v43 }
 0x5f2   :  { %v8098_v47 = vpop.f32.mrf.mxu1  ;;  %v8130_v48 = vpop.f32.mrf.mxu0 }
 0x5f3   :  { %8155 = vmatpush3.xpose.msk.msra.mxu0 %vm635_vm6, %v1135_v46 }
 0x5f4   :  { %v1021_v49 = vpop.f32.mrf.mxu1  ;;  %8156 = vmatprep.subr.mxu0 %v9483_v39 }
 0x5f5   :  { %v1022_v17 = vadd.f32 %v6999_v62, %v1021_v49 }
 0x5f6   :  { %v8101_v52 = vpop.f32.mrf.mxu1 }
 0x5f7   :  { %8157 = vmatpush3.xpose.msk.msra.mxu0 %vm635_vm6, %v1130_v50 }
 0x5f8   :  { %v1026_v53 = vpop.f32.mrf.mxu1  ;;  %8158 = vmatprep.subr.mxu0 %v9483_v39 }
 0x5f9   :  { %v1027_v21 = vadd.f32 %v6999_v62, %v1026_v53 }
 0x5fa   :  { %v8104_v55 = vpop.f32.mrf.mxu1 }
 0x5fb   :  { %8159 = vmatpush3.xpose.msk.msra.mxu0 %vm635_vm6, %v1125_v54 }
 0x5fc   :  { %v1031_v56 = vpop.f32.mrf.mxu1  ;;  %8160 = vmatprep.subr.mxu0 %v9483_v39 }
 0x5fd   :  { %v1032_v34 = vadd.f32 %v6999_v62, %v1031_v56 }
 0x5fe   :  { %v8107_v59 = vpop.f32.mrf.mxu1 }
 0x5ff   :  { %8161 = vmatpush3.xpose.msk.msra.mxu0 %vm635_vm6, %v1120_v58 }
 0x600   :  { %v1217_v60 = vpop.f32.mrf.mxu1  ;;  %8162 = vmatprep.subr.mxu0 %v9483_v39 }
 0x601   :  { %v1218_v37 = vadd.f32 %v7021_v24, %v1217_v60 }
 0x602   :  { %v8141_v0 = vpop.f32.mrf.mxu1 }
 0x603   :  { %8163 = vmatpush3.xpose.msk.msra.mxu0 %vm635_vm6, %v1115_v61 }
 0x604   :  { %v1222_v5 = vpop.f32.mrf.mxu1  ;;  %8204 = vmatprep.subr.mxu0 %v9483_v39 }
 0x605   :  { %v1223_v36 = vadd.f32 %v7021_v24, %v1222_v5 }
 0x606   :  { %v8144_v8 = vpop.f32.mrf.mxu1  ;;  %8165 = vmatmul.mubr.msk.f32.vlgmr.msra.gmra.mxu0 %vm635_vm6, %v1012_v2 }
 0x607   :  { %8167 = vmatprep.mubr.msk.f32.mxu0 %vm9484_vm5, %v9483_v39 }
 0x608   :  { %v1227_v11 = vpop.f32.mrf.mxu1 }
 0x609   :  { %v1228_v35 = vadd.f32 %v7021_v24, %v1227_v11 }
 0x60a   :  { %v8147_v13 = vpop.f32.mrf.mxu1  ;;  %8168 = vmatmul.mubr.msk.f32.gmra.mxu0 %vm635_vm6, %v1017_v9 }
 0x60b   :  { %8170 = vmatprep.mubr.msk.f32.mxu0 %vm9484_vm5, %v9483_v39 }
 0x60c   :  { %v1232_v19 = vpop.f32.mrf.mxu1 }
 0x60d   :  { %v1233_v30 = vadd.f32 %v7021_v24, %v1232_v19 }
 0x60e   :  { %v8150_v16 = vpop.f32.mrf.mxu1  ;;  %8171 = vmatmul.mubr.msk.f32.gmra.mxu0 %vm635_vm6, %v1022_v17 }
 0x60f   :  { %8173 = vmatprep.mubr.msk.f32.mxu0 %vm9484_vm5, %v9483_v39 }
 0x610   :  { %v1237_v23 = vpop.f32.mrf.mxu1 }
 0x611   :  { %v1238_v27 = vadd.f32 %v7021_v24, %v1237_v23 }
 0x612   :  { %v8153_v28 = vpop.f32.mrf.mxu1  ;;  %8174 = vmatmul.mubr.msk.f32.gmra.mxu0 %vm635_vm6, %v1027_v21 }
 0x613   :  { %8180 = vmatpush3.msk.msra.mxu1 %vm211_vm3, %v1238_v27  ;;  %8176 = vmatprep.mubr.msk.f32.mxu0 %vm9484_vm5, %v9483_v39 }
 0x614   :  { %8181 = vmatprep.subr.mxu1 %v9483_v39 }
 0x615   :  { %8182 = vmatpush3.msra.mxu1 %v1233_v30 }
 0x616   :  { %8177 = vmatmul.mubr.msk.f32.gmra.mxu0 %vm635_vm6, %v1032_v34  ;;  %8183 = vmatprep.subr.mxu1 %v9483_v39 }
 0x617   :  { %8184 = vmatpush3.msra.mxu1 %v1228_v35  ;;  %8206 = vmatprep.mubr.msk.f32.mxu0 %vm9484_vm5, %v9483_v39 }
 0x618   :  { %8185 = vmatprep.subr.mxu1 %v9483_v39 }
 0x619   :  { %8186 = vmatpush3.msra.mxu1 %v1223_v36 }
 0x61a   :  { %8187 = vmatprep.subr.mxu1 %v9483_v39 }
 0x61b   :  { %8188 = vmatpush3.msra.mxu1 %v1218_v37 }
 0x61c   :  { %8221 = vmatprep.subr.mxu1 %v9483_v39 }
 0x6c6   :  { %v1337_v40 = vpop.f32.mrf.mxu0 }
 0x6c7   :  { %v1361_v41 = vmul.f32 0.35355338, %v1337_v40 }
 0x6c8   :  { %v8166_v42 = vpop.f32.mrf.mxu0 }
 0x6c9   :  { %v1366_v43 = vadd.f32 %v1361_v41, %v9901_v33 }
 0x6ca   :  { %v1342_v44 = vpop.f32.mrf.mxu0 }
 0x6cb   :  { %v1362_v46 = vmul.f32 0.35355338, %v1342_v44  ;;  %v1371_v47 = vsel %vm766_vm7, %v1366_v43, -inf }
 0x6cc   :  { %1372 = vmax.xlane.f32.xlu0 %v1371_v47  ;;  %v8169_v48 = vpop.f32.mrf.mxu0 }
 0x6cd   :  { %v1367_v49 = vadd.f32 %v1362_v46, %v9907_v38  ;;  %v7043_v46 = vld [vmem:[%s12074_s8 + $0x8] sm:$0xff] }
 0x6ce   :  { %v1347_v50 = vpop.f32.mrf.mxu0  ;;  %8205 = vmatpush3.msra.mxu0 %v7043_v46 }
 0x6cf   :  { %v1363_v52 = vmul.f32 0.35355338, %v1347_v50  ;;  %v1374_v53 = vsel %vm766_vm7, %v1367_v49, -inf  ;;  %8238 = vmatprep.subr.mxu0 %v9483_v39 }
 0x6d0   :  { %1375 = vmax.xlane.f32.xlu1 %v1374_v53  ;;  %v8172_v54 = vpop.f32.mrf.mxu0 }
 0x6d1   :  { %v1368_v55 = vadd.f32 %v1363_v52, %v9914_v45  ;;  %v931_v54 = vld [vmem:[%s12074_s8] sm:$0xff] }
 0x6d2   :  { %v1352_v56 = vpop.f32.mrf.mxu0 }
 0x6d3   :  { %v1364_v58 = vmul.f32 0.35355338, %v1352_v56  ;;  %v1377_v33 = vsel %vm766_vm7, %v1368_v55, -inf }
 0x6d4   :  { %1378 = vmax.xlane.f32.xlu0 %v1377_v33  ;;  %v8175_v59 = vpop.f32.mrf.mxu0 }
 0x6d5   :  { %v1369_v60 = vadd.f32 %v1364_v58, %v9921_v51 }
 0x6d6   :  { %v1357_v61 = vpop.f32.mrf.mxu0 }
 0x6d7   :  { %v1365_v62 = vmul.f32 0.35355338, %v1357_v61  ;;  %v1380_v38 = vsel %vm766_vm7, %v1369_v60, -inf }
 0x6d8   :  { %1381 = vmax.xlane.f32.xlu1 %v1380_v38  ;;  %v8178_v0 = vpop.f32.mrf.mxu0 }
 0x6d9   :  { %v1370_v2 = vadd.f32 %v1365_v62, %v9928_v57  ;;  %v7068_v0 = vld [vmem:[%s12072_s6 + $0xd8] sm:$0xff] }
 0x6db   :  { %v1383_v5 = vsel %vm779_vm8, %v1370_v2, -inf }
 0x6dc   :  { %1384 = vmax.xlane.f32.xlu0 %v1383_v5  ;;  %v7066_v5 = vld [vmem:[%s12072_s6 + $0xc8] sm:$0xff] }
 0x755   :  { %v1373_v45 = vpop.xlane.xlu0 %1372 }
 0x756   :  { %v1386_v8 = vsub.f32 %v1366_v43, %v1373_v45  ;;  %v7055_v45 = vld [vmem:[%s12072_s6 + $0x48] sm:$0xff] }
 0x758   :  { %v1391_v9 = vmul.f32 1.442695, %v1386_v8 }
 0x759   :  { %v1376_v11 = vpop.xlane.xlu1 %1375 }
 0x75a   :  { %9250 = vpow2.f32 %v1391_v9  ;;  %v1387_v13 = vsub.f32 %v1367_v49, %v1376_v11  ;;  %v7054_v9 = vld [vmem:[%s12072_s6 + $0x40] sm:$0xff] }
 0x75c   :  { %v1393_v17 = vmul.f32 1.442695, %v1387_v13 }
 0x75d   :  { %v1379_v19 = vpop.xlane.xlu0 %1378 }
 0x75e   :  { %9252 = vpow2.f32 %v1393_v17  ;;  %v1388_v51 = vsub.f32 %v1368_v55, %v1379_v19 }
 0x760   :  { %v1395_v16 = vmul.f32 1.442695, %v1388_v51 }
 0x761   :  { %v1382_v21 = vpop.xlane.xlu1 %1381 }
 0x762   :  { %9254 = vpow2.f32 %v1395_v16  ;;  %v1389_v24 = vsub.f32 %v1369_v60, %v1382_v21 }
 0x764   :  { %v1397_v23 = vmul.f32 1.442695, %v1389_v24  ;;  %v7079_v24 = vld [vmem:[%s12072_s6 + $0x158] sm:$0xff] }
 0x765   :  { %v1385_v27 = vpop.xlane.xlu0 %1384 }
 0x766   :  { %9256 = vpow2.f32 %v1397_v23  ;;  %v1390_v57 = vsub.f32 %v1370_v2, %v1385_v27  ;;  %v7067_v2 = vld [vmem:[%s12072_s6 + $0xd0] sm:$0xff] }
 0x767   :  { %v9251_v28 = vpop.eup %9250  ;;  %v7078_v27 = vld [vmem:[%s12072_s6 + $0x150] sm:$0xff] }
 0x768   :  { %v1399_v30 = vmul.f32 1.442695, %v1390_v57  ;;  %v1401_v34 = vsel %vm766_vm7, %v9251_v28, 0.0 }
 0x769   :  { %1402 = vadd.xlane.f32.xlu1 %v1401_v34  ;;  %v7076_v34 = vld [vmem:[%s12072_s6 + $0x140] sm:$0xff] }
 0x76a   :  { %9258 = vpow2.f32 %v1399_v30 }
 0x76b   :  { %v9253_v35 = vpop.eup %9252 }
 0x76c   :  { %v1404_v36 = vsel %vm766_vm7, %v9253_v35, 0.0 }
 0x76d   :  { %1405 = vadd.xlane.f32.xlu0 %v1404_v36 }
 0x76f   :  { %v9255_v37 = vpop.eup %9254 }
 0x770   :  { %v1407_v40 = vsel %vm766_vm7, %v9255_v37, 0.0 }
 0x771   :  { %1408 = vadd.xlane.f32.xlu1 %v1407_v40 }
 0x773   :  { %v9257_v41 = vpop.eup %9256 }
 0x774   :  { %v1410_v42 = vsel %vm766_vm7, %v9257_v41, 0.0 }
 0x775   :  { %1411 = vadd.xlane.f32.xlu0 %v1410_v42 }
 0x777   :  { %v9259_v43 = vpop.eup %9258 }
 0x778   :  { %v1413_v44 = vsel %vm779_vm8, %v9259_v43, 0.0 }
 0x779   :  { %1414 = vadd.xlane.f32.xlu1 %v1413_v44 }
 0x7f2   :  { %v1403_v47 = vpop.xlane.xlu1 %1402 }
 0x7f3   :  { %9260 = vrcp.f32 %v1403_v47 }
 0x7f6   :  { %v1406_v48 = vpop.xlane.xlu0 %1405 }
 0x7f7   :  { %9262 = vrcp.f32 %v1406_v48 }
 0x7fa   :  { %v1409_v49 = vpop.xlane.xlu1 %1408 }
 0x7fb   :  { %9264 = vrcp.f32 %v1409_v49 }
 0x7fe   :  { %v1412_v50 = vpop.xlane.xlu0 %1411 }
 0x7ff   :  { %9266 = vrcp.f32 %v1412_v50 }
 0x800   :  { %v9261_v52 = vpop.eup %9260 }
 0x801   :  { %v1421_v53 = vmul.f32 %v9261_v52, %v9251_v28  ;;  %v7077_v28 = vld [vmem:[%s12072_s6 + $0x148] sm:$0xff] }
 0x802   :  { %v1415_v55 = vpop.xlane.xlu1 %1414 }
 0x803   :  { %9268 = vrcp.f32 %v1415_v55  ;;  %8190 = vmatmul.mubr.msk.f32.vlgmr.msra.gmra.mxu1 %vm766_vm7, %v1421_v53 }
 0x804   :  { %v9263_v56 = vpop.eup %9262  ;;  %8192 = vmatprep.mubr.msk.f32.mxu1 %vm9484_vm5, %v9483_v39  ;;  %8222 = vmatpush3.msra.mxu1 %v931_v54  ;;  %v7070_v54 = vld [vmem:[%s12073_s7 + $0x6] ss:$0 sm:$0xff] }
 0x805   :  { %v1422_v58 = vmul.f32 %v9263_v56, %v9253_v35  ;;  %8261 = vmatprep.subr.mxu1 %v9483_v39 }
 0x807   :  { %8193 = vmatmul.mubr.msk.f32.gmra.mxu1 %vm766_vm7, %v1422_v58 }
 0x808   :  { %v9265_v33 = vpop.eup %9264  ;;  %8195 = vmatprep.mubr.msk.f32.mxu1 %vm9484_vm5, %v9483_v39 }
 0x809   :  { %v1423_v59 = vmul.f32 %v9265_v33, %v9255_v37 }
 0x80b   :  { %8196 = vmatmul.mubr.msk.f32.gmra.mxu1 %vm766_vm7, %v1423_v59 }
 0x80c   :  { %v9267_v60 = vpop.eup %9266  ;;  %8198 = vmatprep.mubr.msk.f32.mxu1 %vm9484_vm5, %v9483_v39 }
 0x80d   :  { %v1424_v61 = vmul.f32 %v9267_v60, %v9257_v41 }
 0x80f   :  { %8199 = vmatmul.mubr.msk.f32.gmra.mxu1 %vm766_vm7, %v1424_v61 }
 0x810   :  { %v9269_v62 = vpop.eup %9268  ;;  %8201 = vmatprep.mubr.msk.f32.mxu1 %vm9484_vm5, %v9483_v39 }
 0x811   :  { %v1425_v38 = vmul.f32 %v9269_v62, %v9259_v43 }
 0x813   :  { %8202 = vmatmul.mubr.msk.f32.gmra.mxu1 %vm766_vm7, %v1425_v38 }
 0x814   :  { %8223 = vmatprep.mubr.msk.f32.mxu1 %vm9484_vm5, %v9483_v39 }
 0x817   :  { %8224 = vmatmul.mubr.msk.f32.vlgmr.msra.gmra.mxu1 %vm635_vm6, %v10061_v14  ;;  %v7065_v14 = vld [vmem:[%s12072_s6 + $0xc0] sm:$0xff] }
 0x818   :  { %8226 = vmatprep.mubr.msk.f32.mxu1 %vm9484_vm5, %v9483_v39  ;;  %8262 = vmatpush3.msra.mxu1 %v7068_v0 }
 0x819   :  { %8263 = vmatprep.subr.mxu1 %v9483_v39 }
 0x81a   :  { %8264 = vmatpush3.msra.mxu1 %v7067_v2 }
 0x81b   :  { %8227 = vmatmul.mubr.msk.f32.gmra.mxu1 %vm635_vm6, %v10063_v18  ;;  %8265 = vmatprep.subr.mxu1 %v9483_v39  ;;  %v7057_v18 = vld [vmem:[%s12072_s6 + $0x58] sm:$0xff] }
 0x81c   :  { %8229 = vmatprep.mubr.msk.f32.mxu1 %vm9484_vm5, %v9483_v39  ;;  %8266 = vmatpush3.msra.mxu1 %v7066_v5 }
 0x81d   :  { %8267 = vmatprep.subr.mxu1 %v9483_v39 }
 0x81e   :  { %8268 = vmatpush3.msra.mxu1 %v7065_v14 }
 0x81f   :  { %8230 = vmatmul.mubr.msk.f32.gmra.mxu1 %vm635_vm6, %v10065_v20  ;;  %8307 = vmatprep.subr.mxu1 %v9483_v39 }
 0x820   :  { %8232 = vmatprep.mubr.msk.f32.mxu1 %vm9484_vm5, %v9483_v39 }
 0x823   :  { %8233 = vmatmul.mubr.msk.f32.gmra.mxu1 %vm635_vm6, %v10067_v22  ;;  %v7056_v22 = vld [vmem:[%s12072_s6 + $0x50] sm:$0xff] }
 0x824   :  { %8235 = vmatprep.mubr.msk.f32.mxu1 %vm9484_vm5, %v9483_v39 }
 0x827   :  { %8236 = vmatmul.mubr.msk.f32.gmra.mxu1 %vm635_vm6, %v10069_v29 }
 0x828   :  { %8269 = vmatprep.mubr.msk.f32.mxu1 %vm9484_vm5, %v9483_v39 }
 0x82b   :  { %8270 = vmatmul.mubr.msk.f32.vlgmr.msra.gmra.mxu1 %vm227_vm1, %v9747_v15 }
 0x82c   :  { %8272 = vmatprep.mubr.msk.f32.mxu1 %vm9484_vm5, %v9483_v39 }
 0x82f   :  { %8273 = vmatmul.mubr.msk.f32.gmra.mxu1 %vm227_vm1, %v9769_v26 }
 0x830   :  { %8275 = vmatprep.mubr.msk.f32.mxu1 %vm9484_vm5, %v9483_v39 }
 0x833   :  { %8276 = vmatmul.mubr.msk.f32.gmra.mxu1 %vm227_vm1, %v9763_v25 }
 0x834   :  { %8278 = vmatprep.mubr.msk.f32.mxu1 %vm9484_vm5, %v9483_v39 }
 0x837   :  { %8279 = vmatmul.mubr.msk.f32.gmra.mxu1 %vm227_vm1, %v9786_v31 }
 0x838   :  { %8281 = vmatprep.mubr.msk.f32.mxu1 %vm9484_vm5, %v9483_v39 }
 0x83b   :  { %8282 = vmatmul.mubr.msk.f32.gmra.mxu1 %vm227_vm1, %v9780_v32 }
 0x83c   :  { %8317 = vmatprep.mubr.msk.f32.mxu1 %vm9484_vm5, %v9483_v39 }
 0x8c3   :  { %v1510_v20 = vpop.f32.mrf.mxu1 }
 0x8c4   :  { %8207 = vmatmul.mubr.msk.f32.vlgmr.msra.gmra.mxu0 %vm635_vm6, %v1510_v20 }
 0x8c5   :  { %v8191_v29 = vpop.f32.mrf.mxu1  ;;  %8239 = vmatpush3.msra.mxu0 %v7057_v18  ;;  %8209 = vmatprep.mubr.msk.f32.mxu0 %vm9484_vm5, %v9483_v39 }
 0x8c6   :  { %8240 = vmatprep.subr.mxu0 %v9483_v39 }
 0x8c7   :  { %v1515_v8 = vpop.f32.mrf.mxu1  ;;  %8241 = vmatpush3.msra.mxu0 %v7056_v22 }
 0x8c8   :  { %8210 = vmatmul.mubr.msk.f32.gmra.mxu0 %vm635_vm6, %v1515_v8  ;;  %8242 = vmatprep.subr.mxu0 %v9483_v39 }
 0x8c9   :  { %v8194_v11 = vpop.f32.mrf.mxu1  ;;  %8212 = vmatprep.mubr.msk.f32.mxu0 %vm9484_vm5, %v9483_v39  ;;  %8243 = vmatpush3.msra.mxu0 %v7055_v45  ;;  %v7059_v45 = vld [vmem:[%s12073_s7 + $0x2] ss:$0 sm:$0xff] }
 0x8ca   :  { %8244 = vmatprep.subr.mxu0 %v9483_v39 }
 0x8cb   :  { %v1520_v13 = vpop.f32.mrf.mxu1  ;;  %8245 = vmatpush3.msra.mxu0 %v7054_v9 }
 0x8cc   :  { %8213 = vmatmul.mubr.msk.f32.gmra.mxu0 %vm635_vm6, %v1520_v13  ;;  %8284 = vmatprep.subr.mxu0 %v9483_v39 }
 0x8cd   :  { %v8197_v17 = vpop.f32.mrf.mxu1  ;;  %8215 = vmatprep.mubr.msk.f32.mxu0 %vm9484_vm5, %v9483_v39 }
 0x8cf   :  { %v1525_v19 = vpop.f32.mrf.mxu1 }
 0x8d0   :  { %8216 = vmatmul.mubr.msk.f32.gmra.mxu0 %vm635_vm6, %v1525_v19 }
 0x8d1   :  { %v8200_v51 = vpop.f32.mrf.mxu1  ;;  %8218 = vmatprep.mubr.msk.f32.mxu0 %vm9484_vm5, %v9483_v39 }
 0x8d3   :  { %v1530_v16 = vpop.f32.mrf.mxu1 }
 0x8d4   :  { %8219 = vmatmul.mubr.msk.f32.gmra.mxu0 %vm635_vm6, %v1530_v16 }
 0x8d5   :  { %v8203_v21 = vpop.f32.mrf.mxu1  ;;  %8246 = vmatprep.mubr.msk.f32.mxu0 %vm9484_vm5, %v9483_v39 }
 0x8d7   :  { %v10239_v23 = vpop.f32.mrf.mxu1 }
 0x8d8   :  { %8247 = vmatmul.mubr.msk.f32.vlgmr.msra.gmra.mxu0 %vm227_vm1, %v9747_v15 }
 0x8d9   :  { %v8225_v57 = vpop.f32.mrf.mxu1  ;;  %8249 = vmatprep.mubr.msk.f32.mxu0 %vm9484_vm5, %v9483_v39  ;;  %8285 = vmatpush3.msra.mxu0 %v7079_v24 }
 0x8da   :  { %8286 = vmatprep.subr.mxu0 %v9483_v39 }
 0x8db   :  { %v10252_v30 = vpop.f32.mrf.mxu1  ;;  %8287 = vmatpush3.msra.mxu0 %v7078_v27 }
 0x8dc   :  { %8250 = vmatmul.mubr.msk.f32.gmra.mxu0 %vm227_vm1, %v9769_v26  ;;  %8288 = vmatprep.subr.mxu0 %v9483_v39 }
 0x8dd   :  { %v8228_v35 = vpop.f32.mrf.mxu1  ;;  %8252 = vmatprep.mubr.msk.f32.mxu0 %vm9484_vm5, %v9483_v39  ;;  %8289 = vmatpush3.msra.mxu0 %v7077_v28 }
 0x8de   :  { %8290 = vmatprep.subr.mxu0 %v9483_v39 }
 0x8df   :  { %v10263_v36 = vpop.f32.mrf.mxu1  ;;  %8291 = vmatpush3.msra.mxu0 %v7076_v34 }
 0x8e0   :  { %8253 = vmatmul.mubr.msk.f32.gmra.mxu0 %vm227_vm1, %v9763_v25  ;;  %8332 = vmatprep.subr.mxu0 %v9483_v39 }
 0x8e1   :  { %v8231_v37 = vpop.f32.mrf.mxu1  ;;  %8255 = vmatprep.mubr.msk.f32.mxu0 %vm9484_vm5, %v9483_v39 }
 0x8e3   :  { %v10270_v40 = vpop.f32.mrf.mxu1 }
 0x8e4   :  { %8256 = vmatmul.mubr.msk.f32.gmra.mxu0 %vm227_vm1, %v9786_v31 }
 0x8e5   :  { %v8234_v41 = vpop.f32.mrf.mxu1  ;;  %8258 = vmatprep.mubr.msk.f32.mxu0 %vm9484_vm5, %v9483_v39 }
 0x8e7   :  { %v10276_v42 = vpop.f32.mrf.mxu1 }
 0x8e8   :  { %8259 = vmatmul.mubr.msk.f32.gmra.mxu0 %vm227_vm1, %v9780_v32 }
 0x8e9   :  { %v8237_v43 = vpop.f32.mrf.mxu1  ;;  %8292 = vmatprep.mubr.msk.f32.mxu0 %vm9484_vm5, %v9483_v39 }
 0x8eb   :  { %v1928_v44 = vpop.f32.mrf.mxu1 }
 0x8ec   :  { %8293 = vmatmul.mubr.msk.f32.vlgmr.msra.gmra.mxu0 %vm227_vm1, %v9747_v15  ;;  %v1929_v61 = vadd.f32 %v7070_v54, %v1928_v44 }
 0x8ed   :  { %v8271_v46 = vpop.f32.mrf.mxu1  ;;  %8295 = vmatprep.mubr.msk.f32.mxu0 %vm9484_vm5, %v9483_v39 }
 0x8ef   :  { %v1933_v47 = vpop.f32.mrf.mxu1 }
 0x8f0   :  { %8296 = vmatmul.mubr.msk.f32.gmra.mxu0 %vm227_vm1, %v9769_v26  ;;  %v1934_v60 = vadd.f32 %v7070_v54, %v1933_v47 }
 0x8f1   :  { %v8274_v48 = vpop.f32.mrf.mxu1  ;;  %8298 = vmatprep.mubr.msk.f32.mxu0 %vm9484_vm5, %v9483_v39 }
 0x8f3   :  { %v1938_v49 = vpop.f32.mrf.mxu1 }
 0x8f4   :  { %8299 = vmatmul.mubr.msk.f32.gmra.mxu0 %vm227_vm1, %v9763_v25  ;;  %v1939_v59 = vadd.f32 %v7070_v54, %v1938_v49 }
 0x8f5   :  { %v8277_v50 = vpop.f32.mrf.mxu1  ;;  %8301 = vmatprep.mubr.msk.f32.mxu0 %vm9484_vm5, %v9483_v39 }
 0x8f6   :  { %v7081_v50 = vld [vmem:[%s12073_s7 + $0xa] ss:$0 sm:$0xff] }
 0x8f7   :  { %v1943_v52 = vpop.f32.mrf.mxu1 }
 0x8f8   :  { %8302 = vmatmul.mubr.msk.f32.gmra.mxu0 %vm227_vm1, %v9786_v31  ;;  %v1944_v33 = vadd.f32 %v7070_v54, %v1943_v52 }
 0x8f9   :  { %v8280_v53 = vpop.f32.mrf.mxu1  ;;  %8304 = vmatprep.mubr.msk.f32.mxu0 %vm9484_vm5, %v9483_v39 }
 0x8fb   :  { %v1948_v55 = vpop.f32.mrf.mxu1 }
 0x8fc   :  { %v1949_v56 = vadd.f32 %v7070_v54, %v1948_v55  ;;  %8305 = vmatmul.mubr.msk.f32.gmra.mxu0 %vm227_vm1, %v9780_v32 }
 0x8fd   :  { %v8283_v58 = vpop.f32.mrf.mxu1  ;;  %8342 = vmatprep.mubr.msk.f32.mxu0 %vm9484_vm5, %v9483_v39 }
 0x8fe   :  { %8308 = vmatpush3.xpose.msk.msra.mxu1 %vm635_vm6, %v1949_v56 }
 0x8ff   :  { %8309 = vmatprep.subr.mxu1 %v9483_v39 }
 0x902   :  { %8310 = vmatpush3.xpose.msk.msra.mxu1 %vm635_vm6, %v1944_v33 }
 0x903   :  { %8311 = vmatprep.subr.mxu1 %v9483_v39 }
 0x906   :  { %8312 = vmatpush3.xpose.msk.msra.mxu1 %vm635_vm6, %v1939_v59 }
 0x907   :  { %8313 = vmatprep.subr.mxu1 %v9483_v39 }
 0x90a   :  { %8314 = vmatpush3.xpose.msk.msra.mxu1 %vm635_vm6, %v1934_v60 }
 0x90b   :  { %8315 = vmatprep.subr.mxu1 %v9483_v39 }
 0x90e   :  { %8316 = vmatpush3.xpose.msk.msra.mxu1 %vm635_vm6, %v1929_v61 }
 0x90f   :  { %8357 = vmatprep.subr.mxu1 %v9483_v39 }
 0x984   :  { %v10315_v62 = vpop.f32.mrf.mxu0 }
 0x986   :  { %v8208_v38 = vpop.f32.mrf.mxu0 }
 0x987   :  { %v10355_v38 = vld [vmem:[%s12067_s1] sm:$0xff] }
 0x988   :  { %v10317_v0 = vpop.f32.mrf.mxu0 }
 0x98a   :  { %v8211_v2 = vpop.f32.mrf.mxu0 }
 0x98c   :  { %v10319_v5 = vpop.f32.mrf.mxu0 }
 0x98e   :  { %v8214_v14 = vpop.f32.mrf.mxu0 }
 0x990   :  { %v10321_v18 = vpop.f32.mrf.mxu0 }
 0x992   :  { %v8217_v20 = vpop.f32.mrf.mxu0 }
 0x994   :  { %v10323_v22 = vpop.f32.mrf.mxu0 }
 0x996   :  { %v8220_v29 = vpop.f32.mrf.mxu0 }
 0x998   :  { %v1825_v8 = vpop.f32.mrf.mxu0 }
 0x999   :  { %v1826_v9 = vadd.f32 %v7059_v45, %v1825_v8  ;;  %v10362_v8 = vld [vmem:[%s12067_s1 + $0x8] sm:$0xff] }
 0x99a   :  { %v8248_v11 = vpop.f32.mrf.mxu0 }
 0x99b   :  { %8318 = vmatmul.mubr.msk.f32.vlgmr.msra.gmra.mxu1 %vm635_vm6, %v1826_v9 }
 0x99c   :  { %v1830_v13 = vpop.f32.mrf.mxu0  ;;  %8320 = vmatprep.mubr.msk.f32.mxu1 %vm9484_vm5, %v9483_v39 }
 0x99d   :  { %v1831_v17 = vadd.f32 %v7059_v45, %v1830_v13 }
 0x99e   :  { %v8251_v19 = vpop.f32.mrf.mxu0 }
 0x99f   :  { %8321 = vmatmul.mubr.msk.f32.gmra.mxu1 %vm635_vm6, %v1831_v17 }
 0x9a0   :  { %v1835_v51 = vpop.f32.mrf.mxu0  ;;  %8323 = vmatprep.mubr.msk.f32.mxu1 %vm9484_vm5, %v9483_v39 }
 0x9a1   :  { %v1836_v16 = vadd.f32 %v7059_v45, %v1835_v51  ;;  %v10369_v51 = vld [vmem:[%s12067_s1 + $0x10] sm:$0xff] }
 0x9a2   :  { %v8254_v21 = vpop.f32.mrf.mxu0 }
 0x9a3   :  { %8324 = vmatmul.mubr.msk.f32.gmra.mxu1 %vm635_vm6, %v1836_v16 }
 0x9a4   :  { %v1840_v24 = vpop.f32.mrf.mxu0  ;;  %8326 = vmatprep.mubr.msk.f32.mxu1 %vm9484_vm5, %v9483_v39 }
 0x9a5   :  { %v1841_v27 = vadd.f32 %v7059_v45, %v1840_v24 }
 0x9a6   :  { %v8257_v57 = vpop.f32.mrf.mxu0 }
 0x9a7   :  { %8327 = vmatmul.mubr.msk.f32.gmra.mxu1 %vm635_vm6, %v1841_v27 }
 0x9a8   :  { %v1845_v28 = vpop.f32.mrf.mxu0  ;;  %8329 = vmatprep.mubr.msk.f32.mxu1 %vm9484_vm5, %v9483_v39 }
 0x9a9   :  { %v1846_v34 = vadd.f32 %v7059_v45, %v1845_v28  ;;  %v10376_v28 = vld [vmem:[%s12067_s1 + $0x18] sm:$0xff] }
 0x9aa   :  { %v8260_v35 = vpop.f32.mrf.mxu0 }
 0x9ab   :  { %8330 = vmatmul.mubr.msk.f32.gmra.mxu1 %vm635_vm6, %v1846_v34 }
 0x9ac   :  { %v2031_v37 = vpop.f32.mrf.mxu0  ;;  %8359 = vmatprep.mubr.msk.f32.mxu1 %vm9484_vm5, %v9483_v39 }
 0x9ad   :  { %v2032_v33 = vadd.f32 %v7081_v50, %v2031_v37 }
 0x9ae   :  { %v8294_v41 = vpop.f32.mrf.mxu0 }
 0x9b0   :  { %v2036_v43 = vpop.f32.mrf.mxu0 }
 0x9b1   :  { %v2037_v58 = vadd.f32 %v7081_v50, %v2036_v43 }
 0x9b2   :  { %v8297_v44 = vpop.f32.mrf.mxu0 }
 0x9b3   :  { %v10383_v44 = vld [vmem:[%s12067_s1 + $0x20] sm:$0x3] }
 0x9b4   :  { %v2041_v46 = vpop.f32.mrf.mxu0 }
 0x9b5   :  { %v2042_v56 = vadd.f32 %v7081_v50, %v2041_v46 }
 0x9b6   :  { %v8300_v47 = vpop.f32.mrf.mxu0 }
 0x9b8   :  { %v2046_v48 = vpop.f32.mrf.mxu0 }
 0x9b9   :  { %v2047_v55 = vadd.f32 %v7081_v50, %v2046_v48 }
 0x9ba   :  { %v8303_v49 = vpop.f32.mrf.mxu0 }
 0x9bc   :  { %v2051_v52 = vpop.f32.mrf.mxu0 }
 0x9bd   :  { %v2052_v53 = vadd.f32 %v7081_v50, %v2051_v52 }
 0x9be   :  { %v8306_v54 = vpop.f32.mrf.mxu0 }
 0x9bf   :  { %8333 = vmatpush3.msk.msra.mxu0 %vm211_vm3, %v2052_v53 }
 0x9c0   :  { %8334 = vmatprep.subr.mxu0 %v9483_v39 }
 0x9c1   :  { %8335 = vmatpush3.msra.mxu0 %v2047_v55 }
 0x9c2   :  { %8336 = vmatprep.subr.mxu0 %v9483_v39 }
 0x9c3   :  { %8337 = vmatpush3.msra.mxu0 %v2042_v56 }
 0x9c4   :  { %8338 = vmatprep.subr.mxu0 %v9483_v39 }
 0x9c5   :  { %8339 = vmatpush3.msra.mxu0 %v2037_v58 }
 0x9c6   :  { %8340 = vmatprep.subr.mxu0 %v9483_v39 }
 0x9c7   :  { %8341 = vmatpush3.msra.mxu0 %v2032_v33 }
 0x9c8   :  { %8374 = vmatprep.subr.mxu0 %v9483_v39 }
 0xa5b   :  { %v2151_v59 = vpop.f32.mrf.mxu1 }
 0xa5c   :  { %v2175_v60 = vmul.f32 0.35355338, %v2151_v59 }
 0xa5d   :  { %v8319_v61 = vpop.f32.mrf.mxu1 }
 0xa5e   :  { %v2180_v2 = vadd.f32 %v10355_v38, %v2175_v60 }
 0xa5f   :  { %v2156_v14 = vpop.f32.mrf.mxu1 }
 0xa60   :  { %v2176_v20 = vmul.f32 0.35355338, %v2156_v14  ;;  %v2185_v29 = vsel %vm766_vm7, %v2180_v2, -inf }
 0xa61   :  { %2186 = vmax.xlane.f32.xlu0 %v2185_v29  ;;  %v8322_v45 = vpop.f32.mrf.mxu1 }
 0xa62   :  { %v2181_v9 = vadd.f32 %v10362_v8, %v2176_v20 }
 0xa63   :  { %v2161_v11 = vpop.f32.mrf.mxu1 }
 0xa64   :  { %v2177_v13 = vmul.f32 0.35355338, %v2161_v11  ;;  %v2188_v17 = vsel %vm766_vm7, %v2181_v9, -inf }
 0xa65   :  { %2189 = vmax.xlane.f32.xlu1 %v2188_v17  ;;  %v8325_v19 = vpop.f32.mrf.mxu1 }
 0xa66   :  { %v2182_v16 = vadd.f32 %v10369_v51, %v2177_v13 }
 0xa67   :  { %v2166_v21 = vpop.f32.mrf.mxu1 }
 0xa68   :  { %v2178_v24 = vmul.f32 0.35355338, %v2166_v21  ;;  %v2191_v27 = vsel %vm766_vm7, %v2182_v16, -inf }
 0xa69   :  { %2192 = vmax.xlane.f32.xlu0 %v2191_v27  ;;  %v8328_v57 = vpop.f32.mrf.mxu1 }
 0xa6a   :  { %v2183_v34 = vadd.f32 %v10376_v28, %v2178_v24  ;;  %v7103_v24 = vld [vmem:[%s12074_s8 + $0x10] sm:$0xff] }
 0xa6b   :  { %v2171_v35 = vpop.f32.mrf.mxu1  ;;  %8358 = vmatpush3.msra.mxu1 %v7103_v24 }
 0xa6c   :  { %v2179_v37 = vmul.f32 0.35355338, %v2171_v35  ;;  %v2194_v41 = vsel %vm766_vm7, %v2183_v34, -inf  ;;  %8397 = vmatprep.subr.mxu1 %v9483_v39 }
 0xa6d   :  { %2195 = vmax.xlane.f32.xlu1 %v2194_v41  ;;  %v8331_v43 = vpop.f32.mrf.mxu1 }
 0xa6e   :  { %v2184_v46 = vadd.f32 %v10383_v44, %v2179_v37  ;;  %v7112_v43 = vld [vmem:[%s12072_s6 + $0x78] sm:$0xff] }
 0xa70   :  { %v2197_v47 = vsel %vm779_vm8, %v2184_v46, -inf }
 0xa71   :  { %2198 = vmax.xlane.f32.xlu0 %v2197_v47  ;;  %v7111_v47 = vld [vmem:[%s12072_s6 + $0x70] sm:$0xff] }
 0xaea   :  { %v2187_v48 = vpop.xlane.xlu0 %2186 }
 0xaeb   :  { %v2200_v49 = vsub.f32 %v2180_v2, %v2187_v48 }
 0xaed   :  { %v2205_v50 = vmul.f32 1.442695, %v2200_v49 }
 0xaee   :  { %v2190_v52 = vpop.xlane.xlu1 %2189 }
 0xaef   :  { %9270 = vpow2.f32 %v2205_v50  ;;  %v2201_v53 = vsub.f32 %v2181_v9, %v2190_v52  ;;  %v7110_v50 = vld [vmem:[%s12072_s6 + $0x68] sm:$0xff]  ;;  %v7109_v52 = vld [vmem:[%s12072_s6 + $0x60] sm:$0xff] }
 0xaf1   :  { %v2207_v54 = vmul.f32 1.442695, %v2201_v53 }
 0xaf2   :  { %v2193_v55 = vpop.xlane.xlu0 %2192 }
 0xaf3   :  { %9272 = vpow2.f32 %v2207_v54  ;;  %v2202_v56 = vsub.f32 %v2182_v16, %v2193_v55 }
 0xaf5   :  { %v2209_v58 = vmul.f32 1.442695, %v2202_v56 }
 0xaf6   :  { %v2196_v33 = vpop.xlane.xlu1 %2195 }
 0xaf7   :  { %9274 = vpow2.f32 %v2209_v58  ;;  %v2203_v59 = vsub.f32 %v2183_v34, %v2196_v33 }
 0xaf9   :  { %v2211_v60 = vmul.f32 1.442695, %v2203_v59  ;;  %v7134_v59 = vld [vmem:[%s12072_s6 + $0x178] sm:$0xff] }
 0xafa   :  { %v2199_v61 = vpop.xlane.xlu0 %2198 }
 0xafb   :  { %9276 = vpow2.f32 %v2211_v60  ;;  %v2204_v14 = vsub.f32 %v2184_v46, %v2199_v61  ;;  %v7133_v60 = vld [vmem:[%s12072_s6 + $0x170] sm:$0xff]  ;;  %v7132_v61 = vld [vmem:[%s12072_s6 + $0x168] sm:$0xff] }
 0xafc   :  { %v9271_v20 = vpop.eup %9270 }
 0xafd   :  { %v2213_v29 = vmul.f32 1.442695, %v2204_v14  ;;  %v2215_v2 = vsel %vm766_vm7, %v9271_v20, 0.0  ;;  %v7131_v14 = vld [vmem:[%s12072_s6 + $0x160] sm:$0xff] }
 0xafe   :  { %2216 = vadd.xlane.f32.xlu1 %v2215_v2  ;;  %v7122_v2 = vld [vmem:[%s12072_s6 + $0xf0] sm:$0xff] }
 0xaff   :  { %9278 = vpow2.f32 %v2213_v29 }
 0xb00   :  { %v9273_v45 = vpop.eup %9272 }
 0xb01   :  { %v2218_v9 = vsel %vm766_vm7, %v9273_v45, 0.0 }
 0xb02   :  { %2219 = vadd.xlane.f32.xlu0 %v2218_v9  ;;  %v7121_v9 = vld [vmem:[%s12072_s6 + $0xe8] sm:$0xff] }
 0xb04   :  { %v9275_v11 = vpop.eup %9274 }
 0xb05   :  { %v2221_v13 = vsel %vm766_vm7, %v9275_v11, 0.0 }
 0xb06   :  { %2222 = vadd.xlane.f32.xlu1 %v2221_v13  ;;  %v7120_v13 = vld [vmem:[%s12072_s6 + $0xe0] sm:$0xff] }
 0xb08   :  { %v9277_v17 = vpop.eup %9276 }
 0xb09   :  { %v2224_v19 = vsel %vm766_vm7, %v9277_v17, 0.0 }
 0xb0a   :  { %2225 = vadd.xlane.f32.xlu0 %v2224_v19 }
 0xb0c   :  { %v9279_v16 = vpop.eup %9278 }
 0xb0d   :  { %v2227_v21 = vsel %vm779_vm8, %v9279_v16, 0.0 }
 0xb0e   :  { %2228 = vadd.xlane.f32.xlu1 %v2227_v21 }
 0xb87   :  { %v2217_v27 = vpop.xlane.xlu1 %2216 }
 0xb88   :  { %9280 = vrcp.f32 %v2217_v27 }
 0xb8b   :  { %v2220_v57 = vpop.xlane.xlu0 %2219 }
 0xb8c   :  { %9282 = vrcp.f32 %v2220_v57 }
 0xb8f   :  { %v2223_v34 = vpop.xlane.xlu1 %2222 }
 0xb90   :  { %9284 = vrcp.f32 %v2223_v34 }
 0xb93   :  { %v2226_v35 = vpop.xlane.xlu0 %2225 }
 0xb94   :  { %9286 = vrcp.f32 %v2226_v35 }
 0xb95   :  { %v9281_v37 = vpop.eup %9280 }
 0xb96   :  { %v2235_v41 = vmul.f32 %v9281_v37, %v9271_v20  ;;  %v7123_v20 = vld [vmem:[%s12072_s6 + $0xf8] sm:$0xff] }
 0xb97   :  { %v2229_v46 = vpop.xlane.xlu1 %2228 }
 0xb98   :  { %9288 = vrcp.f32 %v2229_v46  ;;  %8343 = vmatmul.mubr.msk.f32.vlgmr.msra.gmra.mxu0 %vm766_vm7, %v2235_v41 }
 0xb99   :  { %v9283_v48 = vpop.eup %9282  ;;  %8345 = vmatprep.mubr.msk.f32.mxu0 %vm9484_vm5, %v9483_v39  ;;  %8375 = vmatpush3.msra.mxu0 %v7112_v43 }
 0xb9a   :  { %v2236_v49 = vmul.f32 %v9283_v48, %v9273_v45  ;;  %8376 = vmatprep.subr.mxu0 %v9483_v39 }
 0xb9b   :  { %8377 = vmatpush3.msra.mxu0 %v7111_v47 }
 0xb9c   :  { %8346 = vmatmul.mubr.msk.f32.gmra.mxu0 %vm766_vm7, %v2236_v49  ;;  %8378 = vmatprep.subr.mxu0 %v9483_v39 }
 0xb9d   :  { %v9285_v53 = vpop.eup %9284  ;;  %8348 = vmatprep.mubr.msk.f32.mxu0 %vm9484_vm5, %v9483_v39  ;;  %8379 = vmatpush3.msra.mxu0 %v7110_v50 }
 0xb9e   :  { %v2237_v54 = vmul.f32 %v9285_v53, %v9275_v11  ;;  %8380 = vmatprep.subr.mxu0 %v9483_v39 }
 0xb9f   :  { %8381 = vmatpush3.msra.mxu0 %v7109_v52 }
 0xba0   :  { %8349 = vmatmul.mubr.msk.f32.gmra.mxu0 %vm766_vm7, %v2237_v54  ;;  %8420 = vmatprep.subr.mxu0 %v9483_v39 }
 0xba1   :  { %v9287_v55 = vpop.eup %9286  ;;  %8351 = vmatprep.mubr.msk.f32.mxu0 %vm9484_vm5, %v9483_v39 }
 0xba2   :  { %v2238_v56 = vmul.f32 %v9287_v55, %v9277_v17 }
 0xba4   :  { %8352 = vmatmul.mubr.msk.f32.gmra.mxu0 %vm766_vm7, %v2238_v56  ;;  %v7136_v56 = vld [vmem:[%s12073_s7 + $0xb] ss:$0 sm:$0xff] }
 0xba5   :  { %v9289_v58 = vpop.eup %9288  ;;  %8354 = vmatprep.mubr.msk.f32.mxu0 %vm9484_vm5, %v9483_v39 }
 0xba6   :  { %v2239_v33 = vmul.f32 %v9289_v58, %v9279_v16 }
 0xba8   :  { %8355 = vmatmul.mubr.msk.f32.gmra.mxu0 %vm766_vm7, %v2239_v33 }
 0xba9   :  { %8382 = vmatprep.mubr.msk.f32.mxu0 %vm9484_vm5, %v9483_v39 }
 0xbac   :  { %8383 = vmatmul.mubr.msk.f32.vlgmr.msra.gmra.mxu0 %vm227_vm1, %v9747_v15 }
 0xbad   :  { %8385 = vmatprep.mubr.msk.f32.mxu0 %vm9484_vm5, %v9483_v39  ;;  %8421 = vmatpush3.msra.mxu0 %v7134_v59 }
 0xbae   :  { %8422 = vmatprep.subr.mxu0 %v9483_v39 }
 0xbaf   :  { %8423 = vmatpush3.msra.mxu0 %v7133_v60 }
 0xbb0   :  { %8386 = vmatmul.mubr.msk.f32.gmra.mxu0 %vm227_vm1, %v9769_v26  ;;  %8424 = vmatprep.subr.mxu0 %v9483_v39 }
 0xbb1   :  { %8388 = vmatprep.mubr.msk.f32.mxu0 %vm9484_vm5, %v9483_v39  ;;  %8425 = vmatpush3.msra.mxu0 %v7132_v61 }
 0xbb2   :  { %8426 = vmatprep.subr.mxu0 %v9483_v39 }
 0xbb3   :  { %8427 = vmatpush3.msra.mxu0 %v7131_v14 }
 0xbb4   :  { %8389 = vmatmul.mubr.msk.f32.gmra.mxu0 %vm227_vm1, %v9763_v25  ;;  %8468 = vmatprep.subr.mxu0 %v9483_v39 }
 0xbb5   :  { %8391 = vmatprep.mubr.msk.f32.mxu0 %vm9484_vm5, %v9483_v39 }
 0xbb8   :  { %8392 = vmatmul.mubr.msk.f32.gmra.mxu0 %vm227_vm1, %v9786_v31 }
 0xbb9   :  { %8394 = vmatprep.mubr.msk.f32.mxu0 %vm9484_vm5, %v9483_v39 }
 0xbbc   :  { %8395 = vmatmul.mubr.msk.f32.gmra.mxu0 %vm227_vm1, %v9780_v32 }
 0xbbd   :  { %8428 = vmatprep.mubr.msk.f32.mxu0 %vm9484_vm5, %v9483_v39 }
 0xbc0   :  { %8429 = vmatmul.mubr.msk.f32.vlgmr.msra.gmra.mxu0 %vm227_vm1, %v9747_v15 }
 0xbc1   :  { %8431 = vmatprep.mubr.msk.f32.mxu0 %vm9484_vm5, %v9483_v39 }
 0xbc4   :  { %8432 = vmatmul.mubr.msk.f32.gmra.mxu0 %vm227_vm1, %v9769_v26 }
 0xbc5   :  { %8434 = vmatprep.mubr.msk.f32.mxu0 %vm9484_vm5, %v9483_v39 }
 0xbc8   :  { %8435 = vmatmul.mubr.msk.f32.gmra.mxu0 %vm227_vm1, %v9763_v25 }
 0xbc9   :  { %8437 = vmatprep.mubr.msk.f32.mxu0 %vm9484_vm5, %v9483_v39 }
 0xbcc   :  { %8438 = vmatmul.mubr.msk.f32.gmra.mxu0 %vm227_vm1, %v9786_v31 }
 0xbcd   :  { %8440 = vmatprep.mubr.msk.f32.mxu0 %vm9484_vm5, %v9483_v39 }
 0xbd0   :  { %8441 = vmatmul.mubr.msk.f32.gmra.mxu0 %vm227_vm1, %v9780_v32 }
 0xbd1   :  { %8478 = vmatprep.mubr.msk.f32.mxu0 %vm9484_vm5, %v9483_v39 }
 0xc58   :  { %v2324_v29 = vpop.f32.mrf.mxu0 }
 0xc59   :  { %8360 = vmatmul.mubr.msk.f32.vlgmr.msra.gmra.mxu1 %vm635_vm6, %v2324_v29 }
 0xc5a   :  { %v8344_v45 = vpop.f32.mrf.mxu0  ;;  %8398 = vmatpush3.msra.mxu1 %v7123_v20  ;;  %8362 = vmatprep.mubr.msk.f32.mxu1 %vm9484_vm5, %v9483_v39  ;;  %v1723_v20 = vadd.f32 %v10239_v23, %v10315_v62  ;;  %v1738_v23 = vadd.f32 %v10270_v40, %v10321_v18  ;;  %v7125_v40 = vld [vmem:[%s12073_s7 + $0x7] ss:$0 sm:$0xff] }
 0xc5b   :  { %8399 = vmatprep.subr.mxu1 %v9483_v39 }
 0xc5c   :  { %v2329_v11 = vpop.f32.mrf.mxu0  ;;  %8400 = vmatpush3.msra.mxu1 %v7122_v2 }
 0xc5d   :  { %8363 = vmatmul.mubr.msk.f32.gmra.mxu1 %vm635_vm6, %v2329_v11  ;;  %8401 = vmatprep.subr.mxu1 %v9483_v39 }
 0xc5e   :  { %v8347_v17 = vpop.f32.mrf.mxu0  ;;  %8365 = vmatprep.mubr.msk.f32.mxu1 %vm9484_vm5, %v9483_v39  ;;  %8402 = vmatpush3.msra.mxu1 %v7121_v9  ;;  %v1728_v9 = vadd.f32 %v10252_v30, %v10317_v0  ;;  %v1743_v30 = vadd.f32 %v10276_v42, %v10323_v22 }
 0xc5f   :  { %8403 = vmatprep.subr.mxu1 %v9483_v39 }
 0xc60   :  { %v2334_v19 = vpop.f32.mrf.mxu0  ;;  %8404 = vmatpush3.msra.mxu1 %v7120_v13 }
 0xc61   :  { %8366 = vmatmul.mubr.msk.f32.gmra.mxu1 %vm635_vm6, %v2334_v19  ;;  %8443 = vmatprep.subr.mxu1 %v9483_v39  ;;  %v1733_v19 = vadd.f32 %v10263_v36, %v10319_v5 }
 0xc62   :  { %v8350_v16 = vpop.f32.mrf.mxu0  ;;  %8368 = vmatprep.mubr.msk.f32.mxu1 %vm9484_vm5, %v9483_v39 }
 0xc64   :  { %v2339_v21 = vpop.f32.mrf.mxu0 }
 0xc65   :  { %8369 = vmatmul.mubr.msk.f32.gmra.mxu1 %vm635_vm6, %v2339_v21 }
 0xc66   :  { %v8353_v24 = vpop.f32.mrf.mxu0  ;;  %8371 = vmatprep.mubr.msk.f32.mxu1 %vm9484_vm5, %v9483_v39 }
 0xc68   :  { %v2344_v27 = vpop.f32.mrf.mxu0 }
 0xc69   :  { %8372 = vmatmul.mubr.msk.f32.gmra.mxu1 %vm635_vm6, %v2344_v27 }
 0xc6a   :  { %v8356_v57 = vpop.f32.mrf.mxu0  ;;  %8405 = vmatprep.mubr.msk.f32.mxu1 %vm9484_vm5, %v9483_v39 }
 0xc6c   :  { %v10514_v34 = vpop.f32.mrf.mxu0 }
 0xc6d   :  { %8406 = vmatmul.mubr.msk.f32.vlgmr.msra.gmra.mxu1 %vm227_vm1, %v9747_v15 }
 0xc6e   :  { %v8384_v35 = vpop.f32.mrf.mxu0  ;;  %8408 = vmatprep.mubr.msk.f32.mxu1 %vm9484_vm5, %v9483_v39 }
 0xc70   :  { %v10520_v37 = vpop.f32.mrf.mxu0 }
 0xc71   :  { %8409 = vmatmul.mubr.msk.f32.gmra.mxu1 %vm227_vm1, %v9769_v26 }
 0xc72   :  { %v8387_v41 = vpop.f32.mrf.mxu0  ;;  %8411 = vmatprep.mubr.msk.f32.mxu1 %vm9484_vm5, %v9483_v39 }
 0xc74   :  { %v10526_v43 = vpop.f32.mrf.mxu0 }
 0xc75   :  { %8412 = vmatmul.mubr.msk.f32.gmra.mxu1 %vm227_vm1, %v9763_v25 }
 0xc76   :  { %v8390_v46 = vpop.f32.mrf.mxu0  ;;  %8414 = vmatprep.mubr.msk.f32.mxu1 %vm9484_vm5, %v9483_v39 }
 0xc78   :  { %v10532_v15 = vpop.f32.mrf.mxu0 }
 0xc79   :  { %8415 = vmatmul.mubr.msk.f32.gmra.mxu1 %vm227_vm1, %v9786_v31 }
 0xc7a   :  { %v8393_v47 = vpop.f32.mrf.mxu0  ;;  %8417 = vmatprep.mubr.msk.f32.mxu1 %vm9484_vm5, %v9483_v39 }
 0xc7c   :  { %v10538_v26 = vpop.f32.mrf.mxu0 }
 0xc7d   :  { %8418 = vmatmul.mubr.msk.f32.gmra.mxu1 %vm227_vm1, %v9780_v32 }
 0xc7e   :  { %v8396_v48 = vpop.f32.mrf.mxu0  ;;  %8453 = vmatprep.mubr.msk.f32.mxu1 %vm9484_vm5, %v9483_v39 }
 0xc80   :  { %v2745_v25 = vpop.f32.mrf.mxu0 }
 0xc81   :  { %v2746_v14 = vadd.f32 %v7136_v56, %v2745_v25 }
 0xc82   :  { %v8430_v49 = vpop.f32.mrf.mxu0 }
 0xc84   :  { %v2750_v50 = vpop.f32.mrf.mxu0 }
 0xc85   :  { %v2751_v61 = vadd.f32 %v7136_v56, %v2750_v50 }
 0xc86   :  { %v8433_v52 = vpop.f32.mrf.mxu0 }
 0xc88   :  { %v2755_v53 = vpop.f32.mrf.mxu0 }
 0xc89   :  { %v2756_v60 = vadd.f32 %v7136_v56, %v2755_v53 }
 0xc8a   :  { %v8436_v54 = vpop.f32.mrf.mxu0 }
 0xc8c   :  { %v2760_v31 = vpop.f32.mrf.mxu0 }
 0xc8d   :  { %v2761_v32 = vadd.f32 %v7136_v56, %v2760_v31  ;;  %v7114_v31 = vld [vmem:[%s12073_s7 + $0x3] ss:$0 sm:$0xff] }
 0xc8e   :  { %v8439_v55 = vpop.f32.mrf.mxu0 }
 0xc90   :  { %v2765_v58 = vpop.f32.mrf.mxu0 }
 0xc91   :  { %v2766_v33 = vadd.f32 %v7136_v56, %v2765_v58  ;;  %v2540_v56 = vadd.f32 %v7114_v31, %v10514_v34  ;;  %v2545_v58 = vadd.f32 %v7114_v31, %v10520_v37  ;;  %v2555_v34 = vadd.f32 %v7114_v31, %v10532_v15 }
 0xc92   :  { %v8442_v59 = vpop.f32.mrf.mxu0  ;;  %v2560_v37 = vadd.f32 %v7114_v31, %v10538_v26 }
 0xc93   :  { %8469 = vmatpush3.msk.msra.mxu0 %vm211_vm3, %v2766_v33  ;;  %v2550_v33 = vadd.f32 %v7114_v31, %v10526_v43 }
 0xc94   :  { %8470 = vmatprep.subr.mxu0 %v9483_v39 }
 0xc95   :  { %8471 = vmatpush3.msra.mxu0 %v2761_v32 }
 0xc96   :  { %8472 = vmatprep.subr.mxu0 %v9483_v39 }
 0xc97   :  { %8473 = vmatpush3.msra.mxu0 %v2756_v60 }
 0xc98   :  { %8474 = vmatprep.subr.mxu0 %v9483_v39 }
 0xc99   :  { %8475 = vmatpush3.msra.mxu0 %v2751_v61 }
 0xc9a   :  { %8476 = vmatprep.subr.mxu0 %v9483_v39 }
 0xc9b   :  { %8477 = vmatpush3.msra.mxu0 %v2746_v14 }
 0xc9c   :  { %8510 = vmatprep.subr.mxu0 %v9483_v39 }
 0xd19   :  { %v2431_v29 = vpop.f32.mrf.mxu1 }
 0xd1a   :  { %v10555_v2 = vadd.f32 %v2431_v29, %v1723_v20 }
 0xd1b   :  { %v8361_v45 = vpop.f32.mrf.mxu1 }
 0xd1d   :  { %v2436_v11 = vpop.f32.mrf.mxu1 }
 0xd1e   :  { %v10559_v13 = vadd.f32 %v2436_v11, %v1728_v9 }
 0xd1f   :  { %v8364_v17 = vpop.f32.mrf.mxu1 }
 0xd21   :  { %v2441_v16 = vpop.f32.mrf.mxu1 }
 0xd22   :  { %v10563_v21 = vadd.f32 %v2441_v16, %v1733_v19 }
 0xd23   :  { %v8367_v24 = vpop.f32.mrf.mxu1 }
 0xd25   :  { %v2446_v62 = vpop.f32.mrf.mxu1 }
 0xd26   :  { %v10567_v27 = vadd.f32 %v2446_v62, %v1738_v23 }
 0xd27   :  { %v8370_v57 = vpop.f32.mrf.mxu1 }
 0xd29   :  { %v2451_v0 = vpop.f32.mrf.mxu1 }
 0xd2a   :  { %v10571_v35 = vadd.f32 %v2451_v0, %v1743_v30 }
 0xd2b   :  { %v8373_v41 = vpop.f32.mrf.mxu1 }
 0xd2d   :  { %v2642_v46 = vpop.f32.mrf.mxu1 }
 0xd2e   :  { %v2643_v55 = vadd.f32 %v7125_v40, %v2642_v46 }
 0xd2f   :  { %v8407_v36 = vpop.f32.mrf.mxu1 }
 0xd31   :  { %v2647_v5 = vpop.f32.mrf.mxu1 }
 0xd32   :  { %v2648_v54 = vadd.f32 %v7125_v40, %v2647_v5 }
 0xd33   :  { %v8410_v47 = vpop.f32.mrf.mxu1 }
 0xd35   :  { %v2652_v48 = vpop.f32.mrf.mxu1 }
 0xd36   :  { %v2653_v22 = vadd.f32 %v7125_v40, %v2652_v48 }
 0xd37   :  { %v8413_v25 = vpop.f32.mrf.mxu1 }
 0xd39   :  { %v2657_v49 = vpop.f32.mrf.mxu1 }
 0xd3a   :  { %v2658_v42 = vadd.f32 %v7125_v40, %v2657_v49 }
 0xd3b   :  { %v8416_v50 = vpop.f32.mrf.mxu1 }
 0xd3d   :  { %v2662_v18 = vpop.f32.mrf.mxu1 }
 0xd3e   :  { %v2663_v52 = vadd.f32 %v7125_v40, %v2662_v18 }
 0xd3f   :  { %v8419_v53 = vpop.f32.mrf.mxu1 }
 0xd40   :  { %8444 = vmatpush3.xpose.msk.msra.mxu1 %vm635_vm6, %v2663_v52 }
 0xd41   :  { %8445 = vmatprep.subr.mxu1 %v9483_v39 }
 0xd44   :  { %8446 = vmatpush3.xpose.msk.msra.mxu1 %vm635_vm6, %v2658_v42 }
 0xd45   :  { %8447 = vmatprep.subr.mxu1 %v9483_v39 }
 0xd48   :  { %8448 = vmatpush3.xpose.msk.msra.mxu1 %vm635_vm6, %v2653_v22 }
 0xd49   :  { %8449 = vmatprep.subr.mxu1 %v9483_v39 }
 0xd4c   :  { %8450 = vmatpush3.xpose.msk.msra.mxu1 %vm635_vm6, %v2648_v54 }
 0xd4d   :  { %8451 = vmatprep.subr.mxu1 %v9483_v39 }
 0xd50   :  { %8452 = vmatpush3.xpose.msk.msra.mxu1 %vm635_vm6, %v2643_v55 }
 0xd51   :  { %8493 = vmatprep.subr.mxu1 %v9483_v39 }
 0xd53   :  { %8454 = vmatmul.mubr.msk.f32.vlgmr.msra.gmra.mxu1 %vm635_vm6, %v2540_v56 }
 0xd54   :  { %8456 = vmatprep.mubr.msk.f32.mxu1 %vm9484_vm5, %v9483_v39 }
 0xd57   :  { %8457 = vmatmul.mubr.msk.f32.gmra.mxu1 %vm635_vm6, %v2545_v58 }
 0xd58   :  { %8459 = vmatprep.mubr.msk.f32.mxu1 %vm9484_vm5, %v9483_v39 }
 0xd5b   :  { %8460 = vmatmul.mubr.msk.f32.gmra.mxu1 %vm635_vm6, %v2550_v33 }
 0xd5c   :  { %8462 = vmatprep.mubr.msk.f32.mxu1 %vm9484_vm5, %v9483_v39 }
 0xd5f   :  { %8463 = vmatmul.mubr.msk.f32.gmra.mxu1 %vm635_vm6, %v2555_v34 }
 0xd60   :  { %8465 = vmatprep.mubr.msk.f32.mxu1 %vm9484_vm5, %v9483_v39 }
 0xd63   :  { %8466 = vmatmul.mubr.msk.f32.gmra.mxu1 %vm635_vm6, %v2560_v37 }
 0xd64   :  { %8495 = vmatprep.mubr.msk.f32.mxu1 %vm9484_vm5, %v9483_v39 }
 0xe13   :  { %v2865_v43 = vpop.f32.mrf.mxu1 }
 0xe14   :  { %v2889_v59 = vmul.f32 0.35355338, %v2865_v43  ;;  %v7158_v43 = vld [vmem:[%s12074_s8 + $0x18] sm:$0xff] }
 0xe15   :  { %v8455_v32 = vpop.f32.mrf.mxu1  ;;  %8494 = vmatpush3.msra.mxu1 %v7158_v43 }
 0xe16   :  { %v2894_v60 = vadd.f32 %v10355_v38, %v2889_v59  ;;  %8533 = vmatprep.subr.mxu1 %v9483_v39 }
 0xe17   :  { %v2870_v61 = vpop.f32.mrf.mxu1 }
 0xe18   :  { %v2890_v14 = vmul.f32 0.35355338, %v2870_v61  ;;  %v2899_v15 = vsel %vm766_vm7, %v2894_v60, -inf }
 0xe19   :  { %2900 = vmax.xlane.f32.xlu0 %v2899_v15  ;;  %v8458_v20 = vpop.f32.mrf.mxu1 }
 0xe1a   :  { %v2895_v29 = vadd.f32 %v10362_v8, %v2890_v14 }
 0xe1b   :  { %v2875_v45 = vpop.f32.mrf.mxu1 }
 0xe1c   :  { %v2891_v26 = vmul.f32 0.35355338, %v2875_v45  ;;  %v2902_v9 = vsel %vm766_vm7, %v2895_v29, -inf }
 0xe1d   :  { %2903 = vmax.xlane.f32.xlu1 %v2902_v9  ;;  %v8461_v11 = vpop.f32.mrf.mxu1 }
 0xe1e   :  { %v2896_v17 = vadd.f32 %v10369_v51, %v2891_v26 }
 0xe1f   :  { %v2880_v19 = vpop.f32.mrf.mxu1 }
 0xe20   :  { %v2892_v16 = vmul.f32 0.35355338, %v2880_v19  ;;  %v2905_v38 = vsel %vm766_vm7, %v2896_v17, -inf }
 0xe21   :  { %2906 = vmax.xlane.f32.xlu0 %v2905_v38  ;;  %v8464_v24 = vpop.f32.mrf.mxu1 }
 0xe22   :  { %v2897_v23 = vadd.f32 %v10376_v28, %v2892_v16 }
 0xe23   :  { %v2885_v62 = vpop.f32.mrf.mxu1 }
 0xe24   :  { %v2893_v57 = vmul.f32 0.35355338, %v2885_v62  ;;  %v2908_v8 = vsel %vm766_vm7, %v2897_v23, -inf }
 0xe25   :  { %2909 = vmax.xlane.f32.xlu1 %v2908_v8  ;;  %v8467_v30 = vpop.f32.mrf.mxu1 }
 0xe26   :  { %v2898_v0 = vadd.f32 %v10383_v44, %v2893_v57 }
 0xe28   :  { %v2911_v41 = vsel %vm779_vm8, %v2898_v0, -inf }
 0xe29   :  { %2912 = vmax.xlane.f32.xlu0 %v2911_v41 }
 0xea2   :  { %v2901_v51 = vpop.xlane.xlu0 %2900 }
 0xea3   :  { %v2914_v46 = vsub.f32 %v2894_v60, %v2901_v51 }
 0xea5   :  { %v2919_v36 = vmul.f32 1.442695, %v2914_v46  ;;  %v3181_v46 = vsub.s32 4, %v9570_v4 }
 0xea6   :  { %v2904_v5 = vpop.xlane.xlu1 %2903 }
 0xea7   :  { %9290 = vpow2.f32 %v2919_v36  ;;  %v2915_v47 = vsub.f32 %v2895_v29, %v2904_v5 }
 0xea9   :  { %v2921_v48 = vmul.f32 1.442695, %v2915_v47  ;;  %v10663_v47 = vld [vmem:[%s12075_s9] sm:$0xff] }
 0xeaa   :  { %v2907_v25 = vpop.xlane.xlu0 %2906 }
 0xeab   :  { %9292 = vpow2.f32 %v2921_v48  ;;  %v2916_v28 = vsub.f32 %v2896_v17, %v2907_v25  ;;  %v3182_v48 = vrot.slane %v10663_v47, %v3181_v46 }
 0xead   :  { %v2923_v49 = vmul.f32 1.442695, %v2916_v28 }
 0xeae   :  { %v2910_v50 = vpop.xlane.xlu1 %2909 }
 0xeaf   :  { %9294 = vpow2.f32 %v2923_v49  ;;  %v2917_v40 = vsub.f32 %v2897_v23, %v2910_v50 }
 0xeb1   :  { %v2925_v18 = vmul.f32 1.442695, %v2917_v40 }
 0xeb2   :  { %v2913_v52 = vpop.xlane.xlu0 %2912 }
 0xeb3   :  { %9296 = vpow2.f32 %v2925_v18  ;;  %v2918_v44 = vsub.f32 %v2898_v0, %v2913_v52 }
 0xeb4   :  { %v9291_v53 = vpop.eup %9290 }
 0xeb5   :  { %v2927_v42 = vmul.f32 1.442695, %v2918_v44  ;;  %v2929_v22 = vsel %vm766_vm7, %v9291_v53, 0.0 }
 0xeb6   :  { %2930 = vadd.xlane.f32.xlu1 %v2929_v22 }
 0xeb7   :  { %9298 = vpow2.f32 %v2927_v42 }
 0xeb8   :  { %v9293_v54 = vpop.eup %9292 }
 0xeb9   :  { %v2932_v31 = vsel %vm766_vm7, %v9293_v54, 0.0 }
 0xeba   :  { %2933 = vadd.xlane.f32.xlu0 %v2932_v31 }
 0xebc   :  { %v9295_v55 = vpop.eup %9294 }
 0xebd   :  { %v2935_v56 = vsel %vm766_vm7, %v9295_v55, 0.0 }
 0xebe   :  { %2936 = vadd.xlane.f32.xlu1 %v2935_v56 }
 0xec0   :  { %v9297_v58 = vpop.eup %9296 }
 0xec1   :  { %v2938_v33 = vsel %vm766_vm7, %v9297_v58, 0.0 }
 0xec2   :  { %2939 = vadd.xlane.f32.xlu0 %v2938_v33 }
 0xec4   :  { %v9299_v34 = vpop.eup %9298 }
 0xec5   :  { %v2941_v37 = vsel %vm779_vm8, %v9299_v34, 0.0 }
 0xec6   :  { %2942 = vadd.xlane.f32.xlu1 %v2941_v37 }
 0xf3f   :  { %v2931_v59 = vpop.xlane.xlu1 %2930 }
 0xf40   :  { %9300 = vrcp.f32 %v2931_v59 }
 0xf43   :  { %v2934_v32 = vpop.xlane.xlu0 %2933 }
 0xf44   :  { %9302 = vrcp.f32 %v2934_v32 }
 0xf47   :  { %v2937_v60 = vpop.xlane.xlu1 %2936 }
 0xf48   :  { %9304 = vrcp.f32 %v2937_v60 }
 0xf4b   :  { %v2940_v61 = vpop.xlane.xlu0 %2939 }
 0xf4c   :  { %9306 = vrcp.f32 %v2940_v61 }
 0xf4d   :  { %v9301_v14 = vpop.eup %9300 }
 0xf4e   :  { %v2949_v15 = vmul.f32 %v9301_v14, %v9291_v53 }
 0xf4f   :  { %v2943_v20 = vpop.xlane.xlu1 %2942 }
 0xf50   :  { %9308 = vrcp.f32 %v2943_v20  ;;  %8479 = vmatmul.mubr.msk.f32.vlgmr.msra.gmra.mxu0 %vm766_vm7, %v2949_v15 }
 0xf51   :  { %v9303_v29 = vpop.eup %9302  ;;  %8481 = vmatprep.mubr.msk.f32.mxu0 %vm9484_vm5, %v9483_v39 }
 0xf52   :  { %v2950_v45 = vmul.f32 %v9303_v29, %v9293_v54 }
 0xf54   :  { %8482 = vmatmul.mubr.msk.f32.gmra.mxu0 %vm766_vm7, %v2950_v45 }
 0xf55   :  { %v9305_v26 = vpop.eup %9304  ;;  %8484 = vmatprep.mubr.msk.f32.mxu0 %vm9484_vm5, %v9483_v39 }
 0xf56   :  { %v2951_v9 = vmul.f32 %v9305_v26, %v9295_v55 }
 0xf58   :  { %8485 = vmatmul.mubr.msk.f32.gmra.mxu0 %vm766_vm7, %v2951_v9 }
 0xf59   :  { %v9307_v11 = vpop.eup %9306  ;;  %8487 = vmatprep.mubr.msk.f32.mxu0 %vm9484_vm5, %v9483_v39 }
 0xf5a   :  { %v2952_v17 = vmul.f32 %v9307_v11, %v9297_v58 }
 0xf5c   :  { %8488 = vmatmul.mubr.msk.f32.gmra.mxu0 %vm766_vm7, %v2952_v17 }
 0xf5d   :  { %v9309_v19 = vpop.eup %9308  ;;  %8490 = vmatprep.mubr.msk.f32.mxu0 %vm9484_vm5, %v9483_v39 }
 0xf5e   :  { %v2953_v16 = vmul.f32 %v9309_v19, %v9299_v34 }
 0xf60   :  { %8491 = vmatmul.mubr.msk.f32.gmra.mxu0 %vm766_vm7, %v2953_v16 }
 0xf61   :  { %8518 = vmatprep.mubr.msk.f32.mxu0 %vm9484_vm5, %v9483_v39 }
0x1010   :  { %v3038_v38 = vpop.f32.mrf.mxu0 }
0x1011   :  { %8496 = vmatmul.mubr.msk.f32.vlgmr.msra.gmra.mxu1 %vm635_vm6, %v3038_v38 }
0x1012   :  { %v8480_v24 = vpop.f32.mrf.mxu0  ;;  %8498 = vmatprep.mubr.msk.f32.mxu1 %vm9484_vm5, %v9483_v39 }
0x1014   :  { %v3043_v23 = vpop.f32.mrf.mxu0 }
0x1015   :  { %8499 = vmatmul.mubr.msk.f32.gmra.mxu1 %vm635_vm6, %v3043_v23 }
0x1016   :  { %v8483_v62 = vpop.f32.mrf.mxu0  ;;  %8501 = vmatprep.mubr.msk.f32.mxu1 %vm9484_vm5, %v9483_v39 }
0x1018   :  { %v3048_v57 = vpop.f32.mrf.mxu0 }
0x1019   :  { %8502 = vmatmul.mubr.msk.f32.gmra.mxu1 %vm635_vm6, %v3048_v57 }
0x101a   :  { %v8486_v8 = vpop.f32.mrf.mxu0  ;;  %8504 = vmatprep.mubr.msk.f32.mxu1 %vm9484_vm5, %v9483_v39 }
0x101c   :  { %v3053_v30 = vpop.f32.mrf.mxu0 }
0x101d   :  { %8505 = vmatmul.mubr.msk.f32.gmra.mxu1 %vm635_vm6, %v3053_v30 }
0x101e   :  { %v8489_v0 = vpop.f32.mrf.mxu0  ;;  %8507 = vmatprep.mubr.msk.f32.mxu1 %vm9484_vm5, %v9483_v39 }
0x1020   :  { %v3058_v41 = vpop.f32.mrf.mxu0 }
0x1021   :  { %8508 = vmatmul.mubr.msk.f32.gmra.mxu1 %vm635_vm6, %v3058_v41  ;;  %v3274_v41 = vld [vmem:[%s12076_s10 + $0x18] sm:$0xff] }
0x1022   :  { %v8492_v51 = vpop.f32.mrf.mxu0  ;;  %8565 = vmatprep.mubr.msk.f32.mxu1 %vm9484_vm5, %v9483_v39  ;;  %8511 = vmatpush3.msra.mxu0 %v3274_v41  ;;  %v3417_v41 = vld [vmem:[%s12078_s12 + $0x28] sm:$0xff] }
0x1023   :  { %8512 = vmatprep.subr.mxu0 %v9483_v39  ;;  %v3273_v51 = vld [vmem:[%s12076_s10 + $0x10] sm:$0xff] }
0x1024   :  { %8513 = vmatpush3.msra.mxu0 %v3273_v51  ;;  %v3416_v51 = vld [vmem:[%s12078_s12 + $0x20] sm:$0xff] }
0x1025   :  { %8514 = vmatprep.subr.mxu0 %v9483_v39 }
0x10d1   :  { %v3145_v36 = vpop.f32.mrf.mxu1 }
0x10d2   :  { %v3169_v5 = vadd.f32 %v3145_v36, %v10555_v2  ;;  %v3272_v36 = vld [vmem:[%s12076_s10 + $0x8] sm:$0xff] }
0x10d3   :  { %v8497_v25 = vpop.f32.mrf.mxu1  ;;  %8515 = vmatpush3.msra.mxu0 %v3272_v36  ;;  %v3415_v36 = vld [vmem:[%s12078_s12 + $0x18] sm:$0xff] }
0x10d4   :  { %v3174_v28 = vadd.f32 %v3169_v5, %v9648_v63  ;;  %8516 = vmatprep.subr.mxu0 %v9483_v39  ;;  %v3271_v5 = vld [vmem:[%s12076_s10] sm:$0xff]  ;;  %v3426_v25 = vld [vmem:[%s12078_s12 + $0x70] sm:$0xff] }
0x10d5   :  { %v3150_v49 = vpop.f32.mrf.mxu1  ;;  %8517 = vmatpush3.msra.mxu0 %v3271_v5  ;;  %v3414_v5 = vld [vmem:[%s12078_s12 + $0x10] sm:$0xff] }
0x10d6   :  { %v10669_v50 = vadd.f32 %v3182_v48, %v3174_v28  ;;  %v3170_v40 = vadd.f32 %v3150_v49, %v10559_v13  ;;  %8580 = vmatprep.subr.mxu0 %v9483_v39  ;;  %v3425_v28 = vld [vmem:[%s12078_s12 + $0x68] sm:$0xff]  ;;  %v3424_v49 = vld [vmem:[%s12078_s12 + $0x60] sm:$0xff] }
0x10d7   :  { %v8500_v18 = vpop.f32.mrf.mxu1 }
0x10d8   :  { %v3175_v2 = vadd.f32 %v3170_v40, %v9655_v3  ;;  %v3188_v52 = vsel %vm227_vm1, %v10669_v50, 0.0 }
0x10d9   :  { %3189 = vadd.xlane.f32.xlu0 %v3188_v52  ;;  %v3155_v44 = vpop.f32.mrf.mxu1 }
0x10da   :  { %v10675_v53 = vadd.f32 %v3182_v48, %v3175_v2  ;;  %v3171_v42 = vadd.f32 %v3155_v44, %v10563_v21 }
0x10db   :  { %v8503_v22 = vpop.f32.mrf.mxu1 }
0x10dc   :  { %v3176_v63 = vadd.f32 %v3171_v42, %v9659_v7  ;;  %v3191_v54 = vsel %vm227_vm1, %v10675_v53, 0.0 }
0x10dd   :  { %3192 = vadd.xlane.f32.xlu1 %v3191_v54  ;;  %v3160_v13 = vpop.f32.mrf.mxu1 }
0x10de   :  { %v10681_v31 = vadd.f32 %v3182_v48, %v3176_v63  ;;  %v3172_v3 = vadd.f32 %v3160_v13, %v10567_v27 }
0x10df   :  { %v8506_v55 = vpop.f32.mrf.mxu1 }
0x10e0   :  { %v3177_v56 = vadd.f32 %v3172_v3, %v9667_v10  ;;  %v3194_v58 = vsel %vm227_vm1, %v10681_v31, 0.0  ;;  %v10760_v3 = vsub.s32 2, %v9570_v4 }
0x10e1   :  { %3195 = vadd.xlane.f32.xlu0 %v3194_v58  ;;  %v3165_v21 = vpop.f32.mrf.mxu1 }
0x10e2   :  { %v10687_v33 = vadd.f32 %v3182_v48, %v3177_v56  ;;  %v3173_v7 = vadd.f32 %v3165_v21, %v10571_v35  ;;  %v10763_v56 = vsub.s32 3, %v9570_v4 }
0x10e3   :  { %v8509_v34 = vpop.f32.mrf.mxu1 }
0x10e4   :  { %v3178_v37 = vadd.f32 %v3173_v7, %v9652_v1  ;;  %v3197_v43 = vsel %vm227_vm1, %v10687_v33, 0.0  ;;  %v3256_v7 = vrot.slane %v10663_v47, %v10760_v3 }
0x10e5   :  { %3198 = vadd.xlane.f32.xlu1 %v3197_v43  ;;  %v3265_v43 = vrot.slane %v10663_v47, %v10763_v56 }
0x10e6   :  { %v10693_v27 = vadd.f32 %v3182_v48, %v3178_v37  ;;  %v3427_v48 = vld [vmem:[%s12078_s12 + $0x78] sm:$0xff] }
0x10e7   :  { %8534 = vmatpush3.msra.mxu1 %v3427_v48  ;;  %v3413_v48 = vld [vmem:[%s12078_s12 + $0x8] sm:$0xff] }
0x10e8   :  { %v3200_v10 = vsel %vm240_vm4, %v10693_v27, 0.0  ;;  %8535 = vmatprep.subr.mxu1 %v9483_v39 }
0x10e9   :  { %3201 = vadd.xlane.f32.xlu0 %v3200_v10  ;;  %8536 = vmatpush3.msra.mxu1 %v3426_v25  ;;  %v3412_v25 = vld [vmem:[%s12078_s12] sm:$0xff] }
0x10ea   :  { %8537 = vmatprep.subr.mxu1 %v9483_v39 }
0x10eb   :  { %8538 = vmatpush3.msra.mxu1 %v3425_v28  ;;  %v7164_v28 = vld [vmem:[%s12077_s11] ss:$0 sm:$0xff] }
0x10ec   :  { %8539 = vmatprep.subr.mxu1 %v9483_v39 }
0x10ed   :  { %8540 = vmatpush3.msra.mxu1 %v3424_v49 }
0x10ee   :  { %8541 = vmatprep.subr.mxu1 %v9483_v39 }
0x1162   :  { %v3190_v59 = vpop.xlane.xlu0 %3189 }
0x1163   :  { %v3203_v32 = vmul.f32 0.03125, %v3190_v59 }
0x1165   :  { %v10698_v60 = vsub.f32 %v10669_v50, %v3203_v32 }
0x1166   :  { %v3193_v61 = vpop.xlane.xlu1 %3192 }
0x1167   :  { %v3204_v35 = vmul.f32 0.03125, %v3193_v61  ;;  %v3213_v1 = vmul.f32 %v10698_v60, %v10698_v60 }
0x1169   :  { %v10703_v14 = vsub.f32 %v10675_v53, %v3204_v35  ;;  %v3218_v15 = vsel %vm227_vm1, %v3213_v1, 0.0 }
0x116a   :  { %v3196_v20 = vpop.xlane.xlu0 %3195  ;;  %3219 = vadd.xlane.f32.xlu1 %v3218_v15 }
0x116b   :  { %v3205_v29 = vmul.f32 0.03125, %v3196_v20  ;;  %v3214_v45 = vmul.f32 %v10703_v14, %v10703_v14 }
0x116d   :  { %v10709_v26 = vsub.f32 %v10681_v31, %v3205_v29  ;;  %v3221_v9 = vsel %vm227_vm1, %v3214_v45, 0.0 }
0x116e   :  { %v3199_v11 = vpop.xlane.xlu1 %3198  ;;  %3222 = vadd.xlane.f32.xlu0 %v3221_v9 }
0x116f   :  { %v3206_v17 = vmul.f32 0.03125, %v3199_v11  ;;  %v3215_v19 = vmul.f32 %v10709_v26, %v10709_v26 }
0x1171   :  { %v10715_v16 = vsub.f32 %v10687_v33, %v3206_v17  ;;  %v3224_v38 = vsel %vm227_vm1, %v3215_v19, 0.0 }
0x1172   :  { %3225 = vadd.xlane.f32.xlu1 %v3224_v38  ;;  %v3202_v24 = vpop.xlane.xlu0 %3201 }
0x1173   :  { %v3207_v23 = vmul.f32 0.03125, %v3202_v24  ;;  %v3216_v62 = vmul.f32 %v10715_v16, %v10715_v16 }
0x1175   :  { %v10721_v57 = vsub.f32 %v10693_v27, %v3207_v23  ;;  %v3227_v8 = vsel %vm227_vm1, %v3216_v62, 0.0  ;;  %v3422_v62 = vld [vmem:[%s12078_s12 + $0x50] sm:$0xff] }
0x1176   :  { %3228 = vadd.xlane.f32.xlu0 %v3227_v8  ;;  %v3420_v8 = vld [vmem:[%s12078_s12 + $0x40] sm:$0xff] }
0x1177   :  { %v3217_v30 = vmul.f32 %v10721_v57, %v10721_v57 }
0x1179   :  { %v3230_v0 = vsel %vm240_vm4, %v3217_v30, 0.0  ;;  %v3419_v30 = vld [vmem:[%s12078_s12 + $0x38] sm:$0xff] }
0x117a   :  { %3231 = vadd.xlane.f32.xlu1 %v3230_v0  ;;  %v3418_v0 = vld [vmem:[%s12078_s12 + $0x30] sm:$0xff] }
0x11f3   :  { %v3220_v40 = vpop.xlane.xlu1 %3219 }
0x11f4   :  { %v3233_v18 = vmul.f32 0.03125, %v3220_v40 }
0x11f6   :  { %v3238_v2 = vadd.f32 1e-06, %v3233_v18 }
0x11f7   :  { %v3223_v52 = vpop.xlane.xlu0 %3222 }
0x11f8   :  { %9310 = vrsqrt.f32 %v3238_v2  ;;  %v3234_v44 = vmul.f32 0.03125, %v3223_v52 }
0x11fa   :  { %v3239_v42 = vadd.f32 1e-06, %v3234_v44 }
0x11fb   :  { %v3226_v22 = vpop.xlane.xlu1 %3225 }
0x11fc   :  { %9312 = vrsqrt.f32 %v3239_v42  ;;  %v3235_v63 = vmul.f32 0.03125, %v3226_v22 }
0x11fe   :  { %v3240_v54 = vadd.f32 1e-06, %v3235_v63 }
0x11ff   :  { %v3229_v13 = vpop.xlane.xlu0 %3228 }
0x1200   :  { %9314 = vrsqrt.f32 %v3240_v54  ;;  %v3236_v55 = vmul.f32 0.03125, %v3229_v13 }
0x1202   :  { %v3241_v58 = vadd.f32 1e-06, %v3236_v55 }
0x1203   :  { %v3232_v21 = vpop.xlane.xlu1 %3231 }
0x1204   :  { %9316 = vrsqrt.f32 %v3241_v58  ;;  %v3237_v34 = vmul.f32 0.03125, %v3232_v21 }
0x1205   :  { %v9311_v37 = vpop.eup %9310 }
0x1206   :  { %v3248_v10 = vmul.f32 %v9311_v37, %v10698_v60  ;;  %v3242_v59 = vadd.f32 1e-06, %v3237_v34 }
0x1208   :  { %v3257_v32 = vmul.f32 %v3256_v7, %v3248_v10  ;;  %9318 = vrsqrt.f32 %v3242_v59 }
0x1209   :  { %v9313_v61 = vpop.eup %9312 }
0x120a   :  { %v3266_v35 = vadd.f32 %v3265_v43, %v3257_v32  ;;  %v3249_v1 = vmul.f32 %v9313_v61, %v10703_v14 }
0x120c   :  { %8519 = vmatmul.mubr.msk.f32.vlgmr.msra.gmra.mxu0 %vm227_vm1, %v3266_v35  ;;  %v3258_v15 = vmul.f32 %v3256_v7, %v3249_v1 }
0x120d   :  { %v9315_v20 = vpop.eup %9314  ;;  %8521 = vmatprep.mubr.msk.f32.mxu0 %vm9484_vm5, %v9483_v39 }
0x120e   :  { %v3250_v29 = vmul.f32 %v9315_v20, %v10709_v26  ;;  %v3267_v45 = vadd.f32 %v3265_v43, %v3258_v15 }
0x1210   :  { %8522 = vmatmul.mubr.msk.f32.gmra.mxu0 %vm227_vm1, %v3267_v45  ;;  %v3259_v60 = vmul.f32 %v3256_v7, %v3250_v29 }
0x1211   :  { %v9317_v9 = vpop.eup %9316  ;;  %8524 = vmatprep.mubr.msk.f32.mxu0 %vm9484_vm5, %v9483_v39 }
0x1212   :  { %v3251_v11 = vmul.f32 %v9317_v9, %v10715_v16  ;;  %v3268_v14 = vadd.f32 %v3265_v43, %v3259_v60  ;;  %v3423_v16 = vld [vmem:[%s12078_s12 + $0x58] sm:$0xff] }
0x1213   :  { %8542 = vmatpush3.msra.mxu1 %v3423_v16 }
0x1214   :  { %8525 = vmatmul.mubr.msk.f32.gmra.mxu0 %vm227_vm1, %v3268_v14  ;;  %v3260_v17 = vmul.f32 %v3256_v7, %v3251_v11  ;;  %8543 = vmatprep.subr.mxu1 %v9483_v39 }
0x1215   :  { %v9319_v19 = vpop.eup %9318  ;;  %8527 = vmatprep.mubr.msk.f32.mxu0 %vm9484_vm5, %v9483_v39  ;;  %8544 = vmatpush3.msra.mxu1 %v3422_v62 }
0x1216   :  { %v3252_v26 = vmul.f32 %v9319_v19, %v10721_v57  ;;  %v3269_v38 = vadd.f32 %v3265_v43, %v3260_v17  ;;  %8545 = vmatprep.subr.mxu1 %v9483_v39  ;;  %v3421_v57 = vld [vmem:[%s12078_s12 + $0x48] sm:$0xff] }
0x1217   :  { %8546 = vmatpush3.msra.mxu1 %v3421_v57  ;;  %v3525_v57 = vsub.s32 5, %v9570_v4 }
0x1218   :  { %8528 = vmatmul.mubr.msk.f32.gmra.mxu0 %vm227_vm1, %v3269_v38  ;;  %v3261_v24 = vmul.f32 %v3256_v7, %v3252_v26  ;;  %8547 = vmatprep.subr.mxu1 %v9483_v39 }
0x1219   :  { %8530 = vmatprep.mubr.msk.f32.mxu0 %vm9484_vm5, %v9483_v39  ;;  %8548 = vmatpush3.msra.mxu1 %v3420_v8  ;;  %v3526_v8 = vrot.slane %v10663_v47, %v3525_v57 }
0x121a   :  { %v3270_v23 = vadd.f32 %v3265_v43, %v3261_v24  ;;  %8549 = vmatprep.subr.mxu1 %v9483_v39 }
0x121b   :  { %8550 = vmatpush3.msra.mxu1 %v3419_v30 }
0x121c   :  { %8531 = vmatmul.mubr.msk.f32.gmra.mxu0 %vm227_vm1, %v3270_v23  ;;  %8551 = vmatprep.subr.mxu1 %v9483_v39 }
0x121d   :  { %8588 = vmatprep.mubr.msk.f32.mxu0 %vm9484_vm5, %v9483_v39  ;;  %8552 = vmatpush3.msra.mxu1 %v3418_v0 }
0x121e   :  { %8553 = vmatprep.subr.mxu1 %v9483_v39 }
0x121f   :  { %8554 = vmatpush3.msra.mxu1 %v3417_v41 }
0x1220   :  { %8555 = vmatprep.subr.mxu1 %v9483_v39 }
0x1221   :  { %8556 = vmatpush3.msra.mxu1 %v3416_v51 }
0x1222   :  { %8557 = vmatprep.subr.mxu1 %v9483_v39 }
0x1223   :  { %8558 = vmatpush3.msra.mxu1 %v3415_v36 }
0x1224   :  { %8559 = vmatprep.subr.mxu1 %v9483_v39 }
0x1225   :  { %8560 = vmatpush3.msra.mxu1 %v3414_v5 }
0x1226   :  { %8561 = vmatprep.subr.mxu1 %v9483_v39 }
0x1227   :  { %8562 = vmatpush3.msra.mxu1 %v3413_v48 }
0x1228   :  { %8563 = vmatprep.subr.mxu1 %v9483_v39 }
0x1229   :  { %8564 = vmatpush3.msra.mxu1 %v3412_v25 }
0x122a   :  { %8626 = vmatprep.subr.mxu1 %v9483_v39 }
0x12cc   :  { %v3363_v49 = vpop.f32.mrf.mxu0 }
0x12cd   :  { %v3364_v40 = vadd.f32 %v7164_v28, %v3363_v49 }
0x12ce   :  { %v8520_v18 = vpop.f32.mrf.mxu0 }
0x12cf   :  { %v3392_v2 = vmul.f32 0.70710677, %v3364_v40  ;;  %v3387_v32 = vmul.f32 0.5, %v3364_v40 }
0x12d0   :  { %v3368_v52 = vpop.f32.mrf.mxu0 }
0x12d1   :  { %9320 = verf.f32 %v3392_v2  ;;  %v3369_v44 = vadd.f32 %v7164_v28, %v3368_v52 }
0x12d2   :  { %v8523_v42 = vpop.f32.mrf.mxu0 }
0x12d3   :  { %v3393_v22 = vmul.f32 0.70710677, %v3369_v44  ;;  %v3388_v20 = vmul.f32 0.5, %v3369_v44 }
0x12d4   :  { %v3373_v63 = vpop.f32.mrf.mxu0 }
0x12d5   :  { %9322 = verf.f32 %v3393_v22  ;;  %v3374_v54 = vadd.f32 %v7164_v28, %v3373_v63 }
0x12d6   :  { %v8526_v13 = vpop.f32.mrf.mxu0 }
0x12d7   :  { %v3394_v55 = vmul.f32 0.70710677, %v3374_v54  ;;  %v3389_v9 = vmul.f32 0.5, %v3374_v54 }
0x12d8   :  { %v3378_v58 = vpop.f32.mrf.mxu0 }
0x12d9   :  { %9324 = verf.f32 %v3394_v55  ;;  %v3379_v21 = vadd.f32 %v7164_v28, %v3378_v58 }
0x12da   :  { %v8529_v7 = vpop.f32.mrf.mxu0 }
0x12db   :  { %v3395_v34 = vmul.f32 0.70710677, %v3379_v21  ;;  %v3390_v19 = vmul.f32 0.5, %v3379_v21 }
0x12dc   :  { %v3383_v37 = vpop.f32.mrf.mxu0 }
0x12dd   :  { %9326 = verf.f32 %v3395_v34  ;;  %v3384_v43 = vadd.f32 %v7164_v28, %v3383_v37 }
0x12de   :  { %v9321_v10 = vpop.eup %9320  ;;  %v8532_v59 = vpop.f32.mrf.mxu0 }
0x12df   :  { %v3402_v61 = vadd.f32 1.0, %v9321_v10  ;;  %v3396_v35 = vmul.f32 0.70710677, %v3384_v43  ;;  %v3391_v23 = vmul.f32 0.5, %v3384_v43 }
0x12e1   :  { %v3407_v1 = vmul.f32 %v3402_v61, %v3387_v32  ;;  %9328 = verf.f32 %v3396_v35 }
0x12e2   :  { %v9323_v15 = vpop.eup %9322 }
0x12e3   :  { %v3403_v29 = vadd.f32 1.0, %v9323_v15  ;;  %8566 = vmatmul.mubr.f32.vlgmr.msra.gmra.mxu1 %v3407_v1 }
0x12e4   :  { %8568 = vmatprep.mubr.msk.f32.mxu1 %vm9484_vm5, %v9483_v39 }
0x12e5   :  { %v3408_v45 = vmul.f32 %v3403_v29, %v3388_v20 }
0x12e6   :  { %v9325_v60 = vpop.eup %9324 }
0x12e7   :  { %v3404_v11 = vadd.f32 1.0, %v9325_v60  ;;  %8569 = vmatmul.mubr.f32.gmra.mxu1 %v3408_v45 }
0x12e8   :  { %8571 = vmatprep.mubr.msk.f32.mxu1 %vm9484_vm5, %v9483_v39 }
0x12e9   :  { %v3409_v14 = vmul.f32 %v3404_v11, %v3389_v9 }
0x12ea   :  { %v9327_v17 = vpop.eup %9326 }
0x12eb   :  { %v3405_v26 = vadd.f32 1.0, %v9327_v17  ;;  %8572 = vmatmul.mubr.f32.gmra.mxu1 %v3409_v14 }
0x12ec   :  { %8574 = vmatprep.mubr.msk.f32.mxu1 %vm9484_vm5, %v9483_v39 }
0x12ed   :  { %v3410_v38 = vmul.f32 %v3405_v26, %v3390_v19 }
0x12ee   :  { %v9329_v24 = vpop.eup %9328 }
0x12ef   :  { %v3406_v16 = vadd.f32 1.0, %v9329_v24  ;;  %8575 = vmatmul.mubr.f32.gmra.mxu1 %v3410_v38  ;;  %v7174_v38 = vld [vmem:[%s12072_s6 + $0x198] sm:$0xff] }
0x12f0   :  { %8577 = vmatprep.mubr.msk.f32.mxu1 %vm9484_vm5, %v9483_v39  ;;  %v7196_v24 = vld [vmem:[%s12072_s6 + $0x298] sm:$0xff]  ;;  %8581 = vmatpush3.msra.mxu0 %v7174_v38 }
0x12f1   :  { %v3411_v62 = vmul.f32 %v3406_v16, %v3391_v23  ;;  %8627 = vmatpush3.msra.mxu1 %v7196_v24  ;;  %8582 = vmatprep.subr.mxu0 %v9483_v39  ;;  %v7173_v23 = vld [vmem:[%s12072_s6 + $0x190] sm:$0xff] }
0x12f2   :  { %8628 = vmatprep.subr.mxu1 %v9483_v39  ;;  %v7195_v16 = vld [vmem:[%s12072_s6 + $0x290] sm:$0xff]  ;;  %8583 = vmatpush3.msra.mxu0 %v7173_v23 }
0x12f3   :  { %8578 = vmatmul.mubr.f32.gmra.mxu1 %v3411_v62  ;;  %8584 = vmatprep.subr.mxu0 %v9483_v39  ;;  %v7172_v62 = vld [vmem:[%s12072_s6 + $0x188] sm:$0xff] }
0x12f4   :  { %8634 = vmatprep.mubr.msk.f32.mxu1 %vm9484_vm5, %v9483_v39  ;;  %8629 = vmatpush3.msra.mxu1 %v7195_v16 }
0x12f5   :  { %8630 = vmatprep.subr.mxu1 %v9483_v39  ;;  %8585 = vmatpush3.msra.mxu0 %v7172_v62 }
0x12f6   :  { %8586 = vmatprep.subr.mxu0 %v9483_v39 }
0x13a3   :  { %v3494_v30 = vpop.f32.mrf.mxu1 }
0x13a4   :  { %v3518_v0 = vadd.f32 %v3494_v30, %v10669_v50  ;;  %v7171_v30 = vld [vmem:[%s12072_s6 + $0x180] sm:$0xff] }
0x13a5   :  { %v8567_v41 = vpop.f32.mrf.mxu1  ;;  %8587 = vmatpush3.msra.mxu0 %v7171_v30 }
0x13a6   :  { %v10855_v51 = vadd.f32 %v3526_v8, %v3518_v0  ;;  %v7193_v0 = vld [vmem:[%s12072_s6 + $0x280] sm:$0xff]  ;;  %8603 = vmatprep.subr.mxu0 %v9483_v39 }
0x13a7   :  { %v3499_v36 = vpop.f32.mrf.mxu1 }
0x13a8   :  { %v3519_v5 = vadd.f32 %v3499_v36, %v10675_v53  ;;  %v3534_v48 = vsel %vm227_vm1, %v10855_v51, 0.0 }
0x13a9   :  { %3535 = vadd.xlane.f32.xlu0 %v3534_v48  ;;  %v8570_v25 = vpop.f32.mrf.mxu1 }
0x13aa   :  { %v10860_v28 = vadd.f32 %v3526_v8, %v3519_v5 }
0x13ab   :  { %v3504_v49 = vpop.f32.mrf.mxu1 }
0x13ac   :  { %v3520_v40 = vadd.f32 %v3504_v49, %v10681_v31  ;;  %v3537_v47 = vsel %vm227_vm1, %v10860_v28, 0.0 }
0x13ad   :  { %3538 = vadd.xlane.f32.xlu1 %v3537_v47  ;;  %v8573_v50 = vpop.f32.mrf.mxu1 }
0x13ae   :  { %v10865_v18 = vadd.f32 %v3526_v8, %v3520_v40 }
0x13af   :  { %v3509_v2 = vpop.f32.mrf.mxu1 }
0x13b0   :  { %v3521_v53 = vadd.f32 %v3509_v2, %v10687_v33  ;;  %v3540_v52 = vsel %vm227_vm1, %v10865_v18, 0.0 }
0x13b1   :  { %3541 = vadd.xlane.f32.xlu0 %v3540_v52  ;;  %v8576_v44 = vpop.f32.mrf.mxu1  ;;  %v7170_v52 = vld [vmem:[%s12075_s9 + $0x8] sm:$0xff] }
0x13b2   :  { %v10870_v42 = vadd.f32 %v3526_v8, %v3521_v53 }
0x13b3   :  { %v3514_v22 = vpop.f32.mrf.mxu1 }
0x13b4   :  { %v3522_v31 = vadd.f32 %v3514_v22, %v10693_v27  ;;  %v3543_v63 = vsel %vm227_vm1, %v10870_v42, 0.0 }
0x13b5   :  { %3544 = vadd.xlane.f32.xlu1 %v3543_v63  ;;  %v8579_v54 = vpop.f32.mrf.mxu1 }
0x13b6   :  { %v10875_v13 = vadd.f32 %v3526_v8, %v3522_v31  ;;  %v7194_v8 = vld [vmem:[%s12072_s6 + $0x288] sm:$0xff]  ;;  %v3602_v31 = vrot.slane %v7170_v52, %v9592_v12 }
0x13b7   :  { %8631 = vmatpush3.msra.mxu1 %v7194_v8 }
0x13b8   :  { %v3546_v33 = vsel %vm240_vm4, %v10875_v13, 0.0  ;;  %8632 = vmatprep.subr.mxu1 %v9483_v39 }
0x13b9   :  { %3547 = vadd.xlane.f32.xlu0 %v3546_v33  ;;  %8633 = vmatpush3.msra.mxu1 %v7193_v0  ;;  %v3611_v33 = vrot.slane %v7170_v52, %v9576_v6  ;;  %v7184_v6 = vld [vmem:[%s12072_s6 + $0x210] sm:$0xff] }
0x13ba   :  { %8674 = vmatprep.subr.mxu1 %v9483_v39 }
0x1432   :  { %v3536_v55 = vpop.xlane.xlu0 %3535 }
0x1433   :  { %v3549_v58 = vmul.f32 0.03125, %v3536_v55 }
0x1435   :  { %v10880_v21 = vsub.f32 %v10855_v51, %v3549_v58 }
0x1436   :  { %v3539_v7 = vpop.xlane.xlu1 %3538 }
0x1437   :  { %v3550_v34 = vmul.f32 0.03125, %v3539_v7  ;;  %v3559_v27 = vmul.f32 %v10880_v21, %v10880_v21 }
0x1439   :  { %v10885_v37 = vsub.f32 %v10860_v28, %v3550_v34  ;;  %v3564_v43 = vsel %vm227_vm1, %v3559_v27, 0.0 }
0x143a   :  { %v3542_v10 = vpop.xlane.xlu0 %3541  ;;  %3565 = vadd.xlane.f32.xlu1 %v3564_v43 }
0x143b   :  { %v3551_v59 = vmul.f32 0.03125, %v3542_v10  ;;  %v3560_v32 = vmul.f32 %v10885_v37, %v10885_v37  ;;  %v7185_v10 = vld [vmem:[%s12072_s6 + $0x218] sm:$0xff] }
0x143d   :  { %v10891_v61 = vsub.f32 %v10865_v18, %v3551_v59  ;;  %v3567_v35 = vsel %vm227_vm1, %v3560_v32, 0.0 }
0x143e   :  { %v3545_v1 = vpop.xlane.xlu1 %3544  ;;  %3568 = vadd.xlane.f32.xlu0 %v3567_v35  ;;  %v7183_v35 = vld [vmem:[%s12072_s6 + $0x208] sm:$0xff] }
0x143f   :  { %v3552_v15 = vmul.f32 0.03125, %v3545_v1  ;;  %v3561_v20 = vmul.f32 %v10891_v61, %v10891_v61 }
0x1441   :  { %v10897_v29 = vsub.f32 %v10870_v42, %v3552_v15  ;;  %v3570_v45 = vsel %vm227_vm1, %v3561_v20, 0.0 }
0x1442   :  { %3571 = vadd.xlane.f32.xlu1 %v3570_v45  ;;  %v3548_v60 = vpop.xlane.xlu0 %3547  ;;  %v7182_v45 = vld [vmem:[%s12072_s6 + $0x200] sm:$0xff] }
0x1443   :  { %v3553_v9 = vmul.f32 0.03125, %v3548_v60  ;;  %v3562_v11 = vmul.f32 %v10897_v29, %v10897_v29 }
0x1445   :  { %v10903_v14 = vsub.f32 %v10875_v13, %v3553_v9  ;;  %v3573_v17 = vsel %vm227_vm1, %v3562_v11, 0.0 }
0x1446   :  { %3574 = vadd.xlane.f32.xlu0 %v3573_v17 }
0x1447   :  { %v3563_v19 = vmul.f32 %v10903_v14, %v10903_v14 }
0x1449   :  { %v3576_v26 = vsel %vm240_vm4, %v3563_v19, 0.0 }
0x144a   :  { %3577 = vadd.xlane.f32.xlu1 %v3576_v26 }
0x14c3   :  { %v3566_v41 = vpop.xlane.xlu1 %3565 }
0x14c4   :  { %v3579_v36 = vmul.f32 0.03125, %v3566_v41 }
0x14c6   :  { %v3584_v5 = vadd.f32 1e-06, %v3579_v36 }
0x14c7   :  { %v3569_v48 = vpop.xlane.xlu0 %3568 }
0x14c8   :  { %9330 = vrsqrt.f32 %v3584_v5  ;;  %v3580_v25 = vmul.f32 0.03125, %v3569_v48 }
0x14ca   :  { %v3585_v49 = vadd.f32 1e-06, %v3580_v25 }
0x14cb   :  { %v3572_v40 = vpop.xlane.xlu1 %3571 }
0x14cc   :  { %9332 = vrsqrt.f32 %v3585_v49  ;;  %v3581_v47 = vmul.f32 0.03125, %v3572_v40  ;;  %v7198_v49 = vld [vmem:[%s12073_s7 + $0x14] ss:$0 sm:$0xff] }
0x14ce   :  { %v3586_v50 = vadd.f32 1e-06, %v3581_v47 }
0x14cf   :  { %v3575_v2 = vpop.xlane.xlu0 %3574 }
0x14d0   :  { %9334 = vrsqrt.f32 %v3586_v50  ;;  %v3582_v53 = vmul.f32 0.03125, %v3575_v2 }
0x14d2   :  { %v3587_v44 = vadd.f32 1e-06, %v3582_v53 }
0x14d3   :  { %v3578_v22 = vpop.xlane.xlu1 %3577 }
0x14d4   :  { %9336 = vrsqrt.f32 %v3587_v44  ;;  %v3583_v63 = vmul.f32 0.03125, %v3578_v22 }
0x14d5   :  { %v9331_v54 = vpop.eup %9330 }
0x14d6   :  { %v3594_v55 = vmul.f32 %v9331_v54, %v10880_v21  ;;  %v3588_v58 = vadd.f32 1e-06, %v3583_v63 }
0x14d8   :  { %v3603_v7 = vmul.f32 %v3602_v31, %v3594_v55  ;;  %9338 = vrsqrt.f32 %v3588_v58 }
0x14d9   :  { %v9333_v34 = vpop.eup %9332 }
0x14da   :  { %v10947_v27 = vadd.f32 %v3611_v33, %v3603_v7  ;;  %v3595_v43 = vmul.f32 %v9333_v34, %v10885_v37 }
0x14dc   :  { %v3604_v12 = vmul.f32 %v3602_v31, %v3595_v43  ;;  %8589 = vmatmul.mubr.msk.f32.vlgmr.msra.gmra.mxu0 %vm227_vm1, %v10947_v27  ;;  %8635 = vmatmul.mubr.msk.f32.vlgmr.msra.gmra.mxu1 %vm227_vm1, %v10947_v27 }
0x14dd   :  { %v9335_v21 = vpop.eup %9334  ;;  %8604 = vmatpush3.msra.mxu0 %v7185_v10  ;;  %8591 = vmatprep.mubr.msk.f32.mxu0 %vm9484_vm5, %v9483_v39  ;;  %v7187_v10 = vld [vmem:[%s12073_s7 + $0x10] ss:$0 sm:$0xff] }
0x14de   :  { %v10962_v37 = vadd.f32 %v3611_v33, %v3604_v12  ;;  %v3596_v59 = vmul.f32 %v9335_v21, %v10891_v61  ;;  %8637 = vmatprep.mubr.msk.f32.mxu1 %vm9484_vm5, %v9483_v39  ;;  %8605 = vmatprep.subr.mxu0 %v9483_v39 }
0x14df   :  { %8606 = vmatpush3.msra.mxu0 %v7184_v6 }
0x14e0   :  { %v3605_v32 = vmul.f32 %v3602_v31, %v3596_v59  ;;  %8592 = vmatmul.mubr.msk.f32.gmra.mxu0 %vm227_vm1, %v10962_v37  ;;  %8638 = vmatmul.mubr.msk.f32.gmra.mxu1 %vm227_vm1, %v10962_v37 }
0x14e1   :  { %v9337_v1 = vpop.eup %9336  ;;  %8594 = vmatprep.mubr.msk.f32.mxu0 %vm9484_vm5, %v9483_v39  ;;  %8640 = vmatprep.mubr.msk.f32.mxu1 %vm9484_vm5, %v9483_v39 }
0x14e2   :  { %v10979_v61 = vadd.f32 %v3611_v33, %v3605_v32  ;;  %v3597_v15 = vmul.f32 %v9337_v1, %v10897_v29  ;;  %8607 = vmatprep.subr.mxu0 %v9483_v39  ;;  %v7176_v1 = vld [vmem:[%s12073_s7 + $0xc] ss:$0 sm:$0xff] }
0x14e3   :  { %8608 = vmatpush3.msra.mxu0 %v7183_v35 }
0x14e4   :  { %v3606_v20 = vmul.f32 %v3602_v31, %v3597_v15  ;;  %8595 = vmatmul.mubr.msk.f32.gmra.mxu0 %vm227_vm1, %v10979_v61  ;;  %8641 = vmatmul.mubr.msk.f32.gmra.mxu1 %vm227_vm1, %v10979_v61 }
0x14e5   :  { %v9339_v60 = vpop.eup %9338  ;;  %8597 = vmatprep.mubr.msk.f32.mxu0 %vm9484_vm5, %v9483_v39  ;;  %8643 = vmatprep.mubr.msk.f32.mxu1 %vm9484_vm5, %v9483_v39 }
0x14e6   :  { %v10994_v29 = vadd.f32 %v3611_v33, %v3606_v20  ;;  %v3598_v9 = vmul.f32 %v9339_v60, %v10903_v14  ;;  %8609 = vmatprep.subr.mxu0 %v9483_v39  ;;  %v7223_v60 = vld [vmem:[%s12072_s6 + $0x1b0] sm:$0xff] }
0x14e7   :  { %8610 = vmatpush3.msra.mxu0 %v7182_v45  ;;  %v7224_v45 = vld [vmem:[%s12072_s6 + $0x1b8] sm:$0xff] }
0x14e8   :  { %v3607_v11 = vmul.f32 %v3602_v31, %v3598_v9  ;;  %8598 = vmatmul.mubr.msk.f32.gmra.mxu0 %vm227_vm1, %v10994_v29  ;;  %8644 = vmatmul.mubr.msk.f32.gmra.mxu1 %vm227_vm1, %v10994_v29 }
0x14e9   :  { %8600 = vmatprep.mubr.msk.f32.mxu0 %vm9484_vm5, %v9483_v39  ;;  %8646 = vmatprep.mubr.msk.f32.mxu1 %vm9484_vm5, %v9483_v39 }
0x14ea   :  { %v11006_v17 = vadd.f32 %v3611_v33, %v3607_v11  ;;  %8649 = vmatprep.subr.mxu0 %v9483_v39  ;;  %v7222_v11 = vld [vmem:[%s12072_s6 + $0x1a8] sm:$0xff] }
0x14ec   :  { %8601 = vmatmul.mubr.msk.f32.gmra.mxu0 %vm227_vm1, %v11006_v17  ;;  %8647 = vmatmul.mubr.msk.f32.gmra.mxu1 %vm227_vm1, %v11006_v17 }
0x14ed   :  { %8611 = vmatprep.mubr.msk.f32.mxu0 %vm9484_vm5, %v9483_v39  ;;  %8684 = vmatprep.mubr.msk.f32.mxu1 %vm9484_vm5, %v9483_v39 }
0x14f0   :  { %8612 = vmatmul.mubr.msk.f32.vlgmr.msra.gmra.mxu0 %vm227_vm1, %v10947_v27 }
0x14f1   :  { %8614 = vmatprep.mubr.msk.f32.mxu0 %vm9484_vm5, %v9483_v39 }
0x14f4   :  { %8615 = vmatmul.mubr.msk.f32.gmra.mxu0 %vm227_vm1, %v10962_v37 }
0x14f5   :  { %8617 = vmatprep.mubr.msk.f32.mxu0 %vm9484_vm5, %v9483_v39 }
0x14f8   :  { %8618 = vmatmul.mubr.msk.f32.gmra.mxu0 %vm227_vm1, %v10979_v61 }
0x14f9   :  { %8620 = vmatprep.mubr.msk.f32.mxu0 %vm9484_vm5, %v9483_v39 }
0x14fc   :  { %8621 = vmatmul.mubr.msk.f32.gmra.mxu0 %vm227_vm1, %v10994_v29 }
0x14fd   :  { %8623 = vmatprep.mubr.msk.f32.mxu0 %vm9484_vm5, %v9483_v39 }
0x1500   :  { %8624 = vmatmul.mubr.msk.f32.gmra.mxu0 %vm227_vm1, %v11006_v17 }
0x1501   :  { %8659 = vmatprep.mubr.msk.f32.mxu0 %vm9484_vm5, %v9483_v39 }
0x159c   :  { %v3711_v14 = vpop.f32.mrf.mxu0  ;;  %v3917_v19 = vpop.f32.mrf.mxu1 }
0x159d   :  { %v3918_v33 = vadd.f32 %v7198_v49, %v3917_v19  ;;  %v3712_v20 = vadd.f32 %v7176_v1, %v3711_v14  ;;  %v7221_v14 = vld [vmem:[%s12072_s6 + $0x1a0] sm:$0xff] }
0x159e   :  { %v8590_v26 = vpop.f32.mrf.mxu0  ;;  %v8636_v38 = vpop.f32.mrf.mxu1 }
0x15a0   :  { %v11037_v24 = vpop.f32.mrf.mxu0  ;;  %v3922_v23 = vpop.f32.mrf.mxu1 }
0x15a1   :  { %v3923_v63 = vadd.f32 %v7198_v49, %v3922_v23  ;;  %v3717_v9 = vadd.f32 %v7176_v1, %v11037_v24  ;;  %v7246_v24 = vld [vmem:[%s12072_s6 + $0x2b8] sm:$0xff]  ;;  %v7245_v23 = vld [vmem:[%s12072_s6 + $0x2b0] sm:$0xff] }
0x15a2   :  { %v8593_v16 = vpop.f32.mrf.mxu0  ;;  %v8639_v62 = vpop.f32.mrf.mxu1 }
0x15a3   :  { %v7244_v16 = vld [vmem:[%s12072_s6 + $0x2a8] sm:$0xff]  ;;  %v7243_v62 = vld [vmem:[%s12072_s6 + $0x2a0] sm:$0xff] }
0x15a4   :  { %v11039_v8 = vpop.f32.mrf.mxu0  ;;  %v3927_v30 = vpop.f32.mrf.mxu1 }
0x15a5   :  { %v3928_v22 = vadd.f32 %v7198_v49, %v3927_v30  ;;  %v3722_v19 = vadd.f32 %v7176_v1, %v11039_v8 }
0x15a6   :  { %v8596_v0 = vpop.f32.mrf.mxu0  ;;  %v8642_v41 = vpop.f32.mrf.mxu1 }
0x15a7   :  { %v11164_v41 = vld [vmem:[%s12067_s1] sm:$0xff] }
0x15a8   :  { %v11041_v36 = vpop.f32.mrf.mxu0  ;;  %v3932_v5 = vpop.f32.mrf.mxu1 }
0x15a9   :  { %v3933_v52 = vadd.f32 %v7198_v49, %v3932_v5  ;;  %v3727_v26 = vadd.f32 %v7176_v1, %v11041_v36 }
0x15aa   :  { %v8599_v48 = vpop.f32.mrf.mxu0  ;;  %v8645_v25 = vpop.f32.mrf.mxu1 }
0x15ac   :  { %v11046_v40 = vpop.f32.mrf.mxu0  ;;  %v3937_v47 = vpop.f32.mrf.mxu1 }
0x15ad   :  { %v3938_v50 = vadd.f32 %v7198_v49, %v3937_v47  ;;  %v3732_v38 = vadd.f32 %v7176_v1, %v11046_v40  ;;  %v11174_v40 = vld [vmem:[%s12067_s1 + $0x8] sm:$0xff] }
0x15ae   :  { %v8602_v2 = vpop.f32.mrf.mxu0  ;;  %v8648_v53 = vpop.f32.mrf.mxu1 }
0x15af   :  { %8675 = vmatpush3.msk.msra.mxu1 %vm211_vm3, %v3938_v50 }
0x15b0   :  { %v3814_v44 = vpop.f32.mrf.mxu0  ;;  %8676 = vmatprep.subr.mxu1 %v9483_v39 }
0x15b1   :  { %8677 = vmatpush3.msra.mxu1 %v3933_v52  ;;  %v3815_v15 = vadd.f32 %v7187_v10, %v3814_v44  ;;  %v11184_v44 = vld [vmem:[%s12067_s1 + $0x10] sm:$0xff] }
0x15b2   :  { %v8613_v31 = vpop.f32.mrf.mxu0  ;;  %8678 = vmatprep.subr.mxu1 %v9483_v39 }
0x15b3   :  { %8679 = vmatpush3.msra.mxu1 %v3928_v22 }
0x15b4   :  { %v3819_v54 = vpop.f32.mrf.mxu0  ;;  %8680 = vmatprep.subr.mxu1 %v9483_v39 }
0x15b5   :  { %8681 = vmatpush3.msra.mxu1 %v3923_v63  ;;  %v3820_v35 = vadd.f32 %v7187_v10, %v3819_v54 }
0x15b6   :  { %v8616_v55 = vpop.f32.mrf.mxu0  ;;  %8682 = vmatprep.subr.mxu1 %v9483_v39 }
0x15b7   :  { %8683 = vmatpush3.msra.mxu1 %v3918_v33  ;;  %v11194_v55 = vld [vmem:[%s12067_s1 + $0x18] sm:$0xff] }
0x15b8   :  { %v3824_v58 = vpop.f32.mrf.mxu0  ;;  %8722 = vmatprep.subr.mxu1 %v9483_v39 }
0x15b9   :  { %v3825_v32 = vadd.f32 %v7187_v10, %v3824_v58 }
0x15ba   :  { %v8619_v7 = vpop.f32.mrf.mxu0 }
0x15bc   :  { %v3829_v34 = vpop.f32.mrf.mxu0 }
0x15bd   :  { %v3830_v59 = vadd.f32 %v7187_v10, %v3829_v34 }
0x15be   :  { %v8622_v43 = vpop.f32.mrf.mxu0 }
0x15c0   :  { %v3834_v12 = vpop.f32.mrf.mxu0 }
0x15c1   :  { %v3835_v6 = vadd.f32 %v7187_v10, %v3834_v12  ;;  %v11201_v12 = vld [vmem:[%s12067_s1 + $0x20] sm:$0x3] }
0x15c2   :  { %v8625_v21 = vpop.f32.mrf.mxu0 }
0x15c3   :  { %8650 = vmatpush3.xpose.msk.msra.mxu0 %vm635_vm6, %v3835_v6 }
0x15c4   :  { %8651 = vmatprep.subr.mxu0 %v9483_v39 }
0x15c7   :  { %8652 = vmatpush3.xpose.msk.msra.mxu0 %vm635_vm6, %v3830_v59 }
0x15c8   :  { %8653 = vmatprep.subr.mxu0 %v9483_v39 }
0x15cb   :  { %8654 = vmatpush3.xpose.msk.msra.mxu0 %vm635_vm6, %v3825_v32 }
0x15cc   :  { %8655 = vmatprep.subr.mxu0 %v9483_v39 }
0x15cf   :  { %8656 = vmatpush3.xpose.msk.msra.mxu0 %vm635_vm6, %v3820_v35 }
0x15d0   :  { %8657 = vmatprep.subr.mxu0 %v9483_v39 }
0x15d3   :  { %8658 = vmatpush3.xpose.msk.msra.mxu0 %vm635_vm6, %v3815_v15 }
0x15d4   :  { %8699 = vmatprep.subr.mxu0 %v9483_v39 }
0x15d6   :  { %8660 = vmatmul.mubr.msk.f32.vlgmr.msra.gmra.mxu0 %vm635_vm6, %v3712_v20 }
0x15d7   :  { %8662 = vmatprep.mubr.msk.f32.mxu0 %vm9484_vm5, %v9483_v39  ;;  %8700 = vmatpush3.msra.mxu0 %v7224_v45 }
0x15d8   :  { %8701 = vmatprep.subr.mxu0 %v9483_v39 }
0x15d9   :  { %8702 = vmatpush3.msra.mxu0 %v7223_v60 }
0x15da   :  { %8663 = vmatmul.mubr.msk.f32.gmra.mxu0 %vm635_vm6, %v3717_v9  ;;  %8703 = vmatprep.subr.mxu0 %v9483_v39 }
0x15db   :  { %8665 = vmatprep.mubr.msk.f32.mxu0 %vm9484_vm5, %v9483_v39  ;;  %8704 = vmatpush3.msra.mxu0 %v7222_v11 }
0x15dc   :  { %8705 = vmatprep.subr.mxu0 %v9483_v39 }
0x15dd   :  { %8706 = vmatpush3.msra.mxu0 %v7221_v14 }
0x15de   :  { %8666 = vmatmul.mubr.msk.f32.gmra.mxu0 %vm635_vm6, %v3722_v19  ;;  %8745 = vmatprep.subr.mxu0 %v9483_v39 }
0x15df   :  { %8668 = vmatprep.mubr.msk.f32.mxu0 %vm9484_vm5, %v9483_v39 }
0x15e2   :  { %8669 = vmatmul.mubr.msk.f32.gmra.mxu0 %vm635_vm6, %v3727_v26 }
0x15e3   :  { %8671 = vmatprep.mubr.msk.f32.mxu0 %vm9484_vm5, %v9483_v39 }
0x15e6   :  { %8672 = vmatmul.mubr.msk.f32.gmra.mxu0 %vm635_vm6, %v3732_v38 }
0x15e7   :  { %8707 = vmatprep.mubr.msk.f32.mxu0 %vm9484_vm5, %v9483_v39 }
0x15ea   :  { %8708 = vmatmul.mubr.msk.f32.vlgmr.msra.gmra.mxu0 %vm227_vm1, %v10947_v27 }
0x15eb   :  { %8710 = vmatprep.mubr.msk.f32.mxu0 %vm9484_vm5, %v9483_v39  ;;  %8746 = vmatpush3.msra.mxu0 %v7246_v24 }
0x15ec   :  { %8747 = vmatprep.subr.mxu0 %v9483_v39 }
0x15ed   :  { %8748 = vmatpush3.msra.mxu0 %v7245_v23 }
0x15ee   :  { %8711 = vmatmul.mubr.msk.f32.gmra.mxu0 %vm227_vm1, %v10962_v37  ;;  %8749 = vmatprep.subr.mxu0 %v9483_v39 }
0x15ef   :  { %8713 = vmatprep.mubr.msk.f32.mxu0 %vm9484_vm5, %v9483_v39  ;;  %8750 = vmatpush3.msra.mxu0 %v7244_v16 }
0x15f0   :  { %8751 = vmatprep.subr.mxu0 %v9483_v39 }
0x15f1   :  { %8752 = vmatpush3.msra.mxu0 %v7243_v62 }
0x15f2   :  { %8714 = vmatmul.mubr.msk.f32.gmra.mxu0 %vm227_vm1, %v10979_v61  ;;  %8793 = vmatprep.subr.mxu0 %v9483_v39 }
0x15f3   :  { %8716 = vmatprep.mubr.msk.f32.mxu0 %vm9484_vm5, %v9483_v39 }
0x15f6   :  { %8717 = vmatmul.mubr.msk.f32.gmra.mxu0 %vm227_vm1, %v10994_v29 }
0x15f7   :  { %8719 = vmatprep.mubr.msk.f32.mxu0 %vm9484_vm5, %v9483_v39 }
0x15fa   :  { %8720 = vmatmul.mubr.msk.f32.gmra.mxu0 %vm227_vm1, %v11006_v17 }
0x15fb   :  { %8753 = vmatprep.mubr.msk.f32.mxu0 %vm9484_vm5, %v9483_v39 }
0x15fe   :  { %8754 = vmatmul.mubr.msk.f32.vlgmr.msra.gmra.mxu0 %vm227_vm1, %v10947_v27 }
0x15ff   :  { %8756 = vmatprep.mubr.msk.f32.mxu0 %vm9484_vm5, %v9483_v39 }
0x1602   :  { %8757 = vmatmul.mubr.msk.f32.gmra.mxu0 %vm227_vm1, %v10962_v37 }
0x1603   :  { %8759 = vmatprep.mubr.msk.f32.mxu0 %vm9484_vm5, %v9483_v39 }
0x1606   :  { %8760 = vmatmul.mubr.msk.f32.gmra.mxu0 %vm227_vm1, %v10979_v61 }
0x1607   :  { %8762 = vmatprep.mubr.msk.f32.mxu0 %vm9484_vm5, %v9483_v39 }
0x160a   :  { %8763 = vmatmul.mubr.msk.f32.gmra.mxu0 %vm227_vm1, %v10994_v29 }
0x160b   :  { %8765 = vmatprep.mubr.msk.f32.mxu0 %vm9484_vm5, %v9483_v39 }
0x160e   :  { %8766 = vmatmul.mubr.msk.f32.gmra.mxu0 %vm227_vm1, %v11006_v17 }
0x160f   :  { %8803 = vmatprep.mubr.msk.f32.mxu0 %vm9484_vm5, %v9483_v39 }
0x1696   :  { %v4037_v8 = vpop.f32.mrf.mxu0 }
0x1697   :  { %v4061_v30 = vmul.f32 0.35355338, %v4037_v8  ;;  %v7248_v8 = vld [vmem:[%s12073_s7 + $0x15] ss:$0 sm:$0xff] }
0x1698   :  { %v8661_v0 = vpop.f32.mrf.mxu0 }
0x1699   :  { %v11167_v36 = vadd.f32 %v11164_v41, %v4061_v30 }
0x169a   :  { %v4042_v5 = vpop.f32.mrf.mxu0 }
0x169b   :  { %v4062_v48 = vmul.f32 0.35355338, %v4042_v5  ;;  %v4071_v25 = vsel %vm766_vm7, %v11167_v36, -inf }
0x169c   :  { %4072 = vmax.xlane.f32.xlu0 %v4071_v25  ;;  %v8664_v49 = vpop.f32.mrf.mxu0 }
0x169d   :  { %v11177_v47 = vadd.f32 %v11174_v40, %v4062_v48 }
0x169e   :  { %v4047_v50 = vpop.f32.mrf.mxu0 }
0x169f   :  { %v4063_v2 = vmul.f32 0.35355338, %v4047_v50  ;;  %v4074_v53 = vsel %vm766_vm7, %v11177_v47, -inf }
0x16a0   :  { %4075 = vmax.xlane.f32.xlu1 %v4074_v53  ;;  %v8667_v52 = vpop.f32.mrf.mxu0 }
0x16a1   :  { %v11187_v22 = vadd.f32 %v11184_v44, %v4063_v2 }
0x16a2   :  { %v4052_v31 = vpop.f32.mrf.mxu0 }
0x16a3   :  { %v4064_v63 = vmul.f32 0.35355338, %v4052_v31  ;;  %v4077_v54 = vsel %vm766_vm7, %v11187_v22, -inf }
0x16a4   :  { %4078 = vmax.xlane.f32.xlu0 %v4077_v54  ;;  %v8670_v33 = vpop.f32.mrf.mxu0 }
0x16a5   :  { %v4069_v58 = vadd.f32 %v11194_v55, %v4064_v63 }
0x16a6   :  { %v4057_v7 = vpop.f32.mrf.mxu0 }
0x16a7   :  { %v4065_v34 = vmul.f32 0.35355338, %v4057_v7  ;;  %v4080_v43 = vsel %vm766_vm7, %v4069_v58, -inf }
0x16a8   :  { %4081 = vmax.xlane.f32.xlu1 %v4080_v43  ;;  %v8673_v10 = vpop.f32.mrf.mxu0 }
0x16a9   :  { %v4070_v6 = vadd.f32 %v11201_v12, %v4065_v34 }
0x16aa   :  { %v11204_v21 = vpop.f32.mrf.mxu0 }
0x16ab   :  { %v4083_v59 = vsel %vm779_vm8, %v4070_v6, -inf }
0x16ac   :  { %4084 = vmax.xlane.f32.xlu0 %v4083_v59  ;;  %v8709_v32 = vpop.f32.mrf.mxu0 }
0x16ae   :  { %v11207_v35 = vpop.f32.mrf.mxu0 }
0x16b0   :  { %v8712_v1 = vpop.f32.mrf.mxu0 }
0x16b2   :  { %v11209_v15 = vpop.f32.mrf.mxu0 }
0x16b4   :  { %v8715_v20 = vpop.f32.mrf.mxu0 }
0x16b6   :  { %v11211_v45 = vpop.f32.mrf.mxu0 }
0x16b8   :  { %v8718_v60 = vpop.f32.mrf.mxu0 }
0x16ba   :  { %v11213_v9 = vpop.f32.mrf.mxu0 }
0x16bc   :  { %v8721_v11 = vpop.f32.mrf.mxu0 }
0x16be   :  { %v4521_v14 = vpop.f32.mrf.mxu0 }
0x16bf   :  { %v4522_v50 = vadd.f32 %v7248_v8, %v4521_v14 }
0x16c0   :  { %v8755_v19 = vpop.f32.mrf.mxu0 }
0x16c2   :  { %v4526_v26 = vpop.f32.mrf.mxu0 }
0x16c3   :  { %v4527_v49 = vadd.f32 %v7248_v8, %v4526_v26 }
0x16c4   :  { %v8758_v38 = vpop.f32.mrf.mxu0 }
0x16c6   :  { %v4531_v24 = vpop.f32.mrf.mxu0 }
0x16c7   :  { %v4532_v25 = vadd.f32 %v7248_v8, %v4531_v24 }
0x16c8   :  { %v8761_v23 = vpop.f32.mrf.mxu0 }
0x16ca   :  { %v4536_v16 = vpop.f32.mrf.mxu0 }
0x16cb   :  { %v4537_v48 = vadd.f32 %v7248_v8, %v4536_v16 }
0x16cc   :  { %v8764_v62 = vpop.f32.mrf.mxu0 }
0x16ce   :  { %v4541_v30 = vpop.f32.mrf.mxu0 }
0x16cf   :  { %v4542_v0 = vadd.f32 %v7248_v8, %v4541_v30  ;;  %v7235_v30 = vld [vmem:[%s12072_s6 + $0x238] sm:$0xff] }
0x16d0   :  { %v8767_v5 = vpop.f32.mrf.mxu0 }
0x16d1   :  { %8794 = vmatpush3.msk.msra.mxu0 %vm211_vm3, %v4542_v0  ;;  %v7234_v5 = vld [vmem:[%s12072_s6 + $0x230] sm:$0xff] }
0x16d2   :  { %8795 = vmatprep.subr.mxu0 %v9483_v39 }
0x16d3   :  { %8796 = vmatpush3.msra.mxu0 %v4537_v48 }
0x16d4   :  { %8797 = vmatprep.subr.mxu0 %v9483_v39 }
0x16d5   :  { %8798 = vmatpush3.msra.mxu0 %v4532_v25 }
0x16d6   :  { %8799 = vmatprep.subr.mxu0 %v9483_v39 }
0x16d7   :  { %8800 = vmatpush3.msra.mxu0 %v4527_v49  ;;  %v7233_v49 = vld [vmem:[%s12072_s6 + $0x228] sm:$0xff] }
0x16d8   :  { %8801 = vmatprep.subr.mxu0 %v9483_v39 }
0x16d9   :  { %8802 = vmatpush3.msra.mxu0 %v4522_v50  ;;  %v7232_v50 = vld [vmem:[%s12072_s6 + $0x220] sm:$0xff] }
0x16da   :  { %8835 = vmatprep.subr.mxu0 %v9483_v39 }
0x1725   :  { %v4073_v2 = vpop.xlane.xlu0 %4072 }
0x1726   :  { %v4086_v53 = vsub.f32 %v11167_v36, %v4073_v2 }
0x1728   :  { %v4091_v52 = vmul.f32 1.442695, %v4086_v53 }
0x1729   :  { %v4076_v31 = vpop.xlane.xlu1 %4075 }
0x172a   :  { %9340 = vpow2.f32 %v4091_v52  ;;  %v4087_v63 = vsub.f32 %v11177_v47, %v4076_v31 }
0x172c   :  { %v4093_v54 = vmul.f32 1.442695, %v4087_v63 }
0x172d   :  { %v4079_v33 = vpop.xlane.xlu0 %4078 }
0x172e   :  { %9342 = vpow2.f32 %v4093_v54  ;;  %v4088_v7 = vsub.f32 %v11187_v22, %v4079_v33 }
0x1730   :  { %v4095_v34 = vmul.f32 1.442695, %v4088_v7 }
0x1731   :  { %v4082_v43 = vpop.xlane.xlu1 %4081 }
0x1732   :  { %9344 = vpow2.f32 %v4095_v34  ;;  %v4089_v10 = vsub.f32 %v4069_v58, %v4082_v43 }
0x1734   :  { %v4097_v59 = vmul.f32 1.442695, %v4089_v10 }
0x1735   :  { %v4085_v32 = vpop.xlane.xlu0 %4084 }
0x1736   :  { %9346 = vpow2.f32 %v4097_v59  ;;  %v4090_v1 = vsub.f32 %v4070_v6, %v4085_v32 }
0x1737   :  { %v9341_v20 = vpop.eup %9340 }
0x1738   :  { %v4099_v36 = vmul.f32 1.442695, %v4090_v1  ;;  %v4101_v60 = vsel %vm766_vm7, %v9341_v20, 0.0 }
0x1739   :  { %4102 = vadd.xlane.f32.xlu1 %v4101_v60 }
0x173a   :  { %9348 = vpow2.f32 %v4099_v36 }
0x173b   :  { %v9343_v47 = vpop.eup %9342 }
0x173c   :  { %v4104_v11 = vsel %vm766_vm7, %v9343_v47, 0.0 }
0x173d   :  { %4105 = vadd.xlane.f32.xlu0 %v4104_v11 }
0x173f   :  { %v9345_v14 = vpop.eup %9344 }
0x1740   :  { %v4107_v22 = vsel %vm766_vm7, %v9345_v14, 0.0 }
0x1741   :  { %4108 = vadd.xlane.f32.xlu1 %v4107_v22 }
0x1743   :  { %v9347_v19 = vpop.eup %9346 }
0x1744   :  { %v4110_v58 = vsel %vm766_vm7, %v9347_v19, 0.0 }
0x1745   :  { %4111 = vadd.xlane.f32.xlu0 %v4110_v58 }
0x1747   :  { %v9349_v26 = vpop.eup %9348 }
0x1748   :  { %v4113_v6 = vsel %vm779_vm8, %v9349_v26, 0.0 }
0x1749   :  { %4114 = vadd.xlane.f32.xlu1 %v4113_v6  ;;  %v7237_v6 = vld [vmem:[%s12073_s7 + $0x11] ss:$0 sm:$0xff] }
0x17c2   :  { %v4103_v38 = vpop.xlane.xlu1 %4102 }
0x17c3   :  { %9350 = vrcp.f32 %v4103_v38 }
0x17c6   :  { %v4106_v24 = vpop.xlane.xlu0 %4105 }
0x17c7   :  { %9352 = vrcp.f32 %v4106_v24 }
0x17ca   :  { %v4109_v23 = vpop.xlane.xlu1 %4108 }
0x17cb   :  { %9354 = vrcp.f32 %v4109_v23 }
0x17ce   :  { %v4112_v16 = vpop.xlane.xlu0 %4111 }
0x17cf   :  { %9356 = vrcp.f32 %v4112_v16 }
0x17d0   :  { %v9351_v62 = vpop.eup %9350 }
0x17d1   :  { %v4121_v8 = vmul.f32 %v9351_v62, %v9341_v20 }
0x17d2   :  { %v4115_v0 = vpop.xlane.xlu1 %4114 }
0x17d3   :  { %9358 = vrcp.f32 %v4115_v0  ;;  %8685 = vmatmul.mubr.msk.f32.vlgmr.msra.gmra.mxu1 %vm766_vm7, %v4121_v8 }
0x17d4   :  { %v9353_v48 = vpop.eup %9352  ;;  %8723 = vmatpush3.msra.mxu1 %v7235_v30  ;;  %8687 = vmatprep.mubr.msk.f32.mxu1 %vm9484_vm5, %v9483_v39  ;;  %v7226_v30 = vld [vmem:[%s12073_s7 + $0xd] ss:$0 sm:$0xff] }
0x17d5   :  { %v4122_v25 = vmul.f32 %v9353_v48, %v9343_v47  ;;  %8724 = vmatprep.subr.mxu1 %v9483_v39  ;;  %v4321_v48 = vadd.f32 %v7226_v30, %v11207_v35  ;;  %v4336_v35 = vadd.f32 %v7226_v30, %v11213_v9 }
0x17d6   :  { %8725 = vmatpush3.msra.mxu1 %v7234_v5  ;;  %v4316_v5 = vadd.f32 %v7226_v30, %v11204_v21  ;;  %v4331_v21 = vadd.f32 %v7226_v30, %v11211_v45 }
0x17d7   :  { %8688 = vmatmul.mubr.msk.f32.gmra.mxu1 %vm766_vm7, %v4122_v25  ;;  %8726 = vmatprep.subr.mxu1 %v9483_v39  ;;  %v4326_v25 = vadd.f32 %v7226_v30, %v11209_v15 }
0x17d8   :  { %v9355_v2 = vpop.eup %9354  ;;  %8690 = vmatprep.mubr.msk.f32.mxu1 %vm9484_vm5, %v9483_v39  ;;  %8727 = vmatpush3.msra.mxu1 %v7233_v49 }
0x17d9   :  { %v4123_v53 = vmul.f32 %v9355_v2, %v9345_v14  ;;  %8728 = vmatprep.subr.mxu1 %v9483_v39 }
0x17da   :  { %8729 = vmatpush3.msra.mxu1 %v7232_v50 }
0x17db   :  { %8691 = vmatmul.mubr.msk.f32.gmra.mxu1 %vm766_vm7, %v4123_v53  ;;  %8768 = vmatprep.subr.mxu1 %v9483_v39 }
0x17dc   :  { %v9357_v52 = vpop.eup %9356  ;;  %8693 = vmatprep.mubr.msk.f32.mxu1 %vm9484_vm5, %v9483_v39 }
0x17dd   :  { %v4124_v31 = vmul.f32 %v9357_v52, %v9347_v19 }
0x17df   :  { %8694 = vmatmul.mubr.msk.f32.gmra.mxu1 %vm766_vm7, %v4124_v31 }
0x17e0   :  { %v9359_v63 = vpop.eup %9358  ;;  %8696 = vmatprep.mubr.msk.f32.mxu1 %vm9484_vm5, %v9483_v39 }
0x17e1   :  { %v4125_v54 = vmul.f32 %v9359_v63, %v9349_v26 }
0x17e3   :  { %8697 = vmatmul.mubr.msk.f32.gmra.mxu1 %vm766_vm7, %v4125_v54 }
0x17e4   :  { %8730 = vmatprep.mubr.msk.f32.mxu1 %vm9484_vm5, %v9483_v39 }
0x17e7   :  { %8731 = vmatmul.mubr.msk.f32.vlgmr.msra.gmra.mxu1 %vm227_vm1, %v10947_v27 }
0x17e8   :  { %8733 = vmatprep.mubr.msk.f32.mxu1 %vm9484_vm5, %v9483_v39 }
0x17eb   :  { %8734 = vmatmul.mubr.msk.f32.gmra.mxu1 %vm227_vm1, %v10962_v37 }
0x17ec   :  { %8736 = vmatprep.mubr.msk.f32.mxu1 %vm9484_vm5, %v9483_v39 }
0x17ef   :  { %8737 = vmatmul.mubr.msk.f32.gmra.mxu1 %vm227_vm1, %v10979_v61 }
0x17f0   :  { %8739 = vmatprep.mubr.msk.f32.mxu1 %vm9484_vm5, %v9483_v39 }
0x17f3   :  { %8740 = vmatmul.mubr.msk.f32.gmra.mxu1 %vm227_vm1, %v10994_v29 }
0x17f4   :  { %8742 = vmatprep.mubr.msk.f32.mxu1 %vm9484_vm5, %v9483_v39 }
0x17f7   :  { %8743 = vmatmul.mubr.msk.f32.gmra.mxu1 %vm227_vm1, %v11006_v17 }
0x17f8   :  { %8778 = vmatprep.mubr.msk.f32.mxu1 %vm9484_vm5, %v9483_v39 }
0x1893   :  { %v11283_v33 = vpop.f32.mrf.mxu1 }
0x1895   :  { %v8686_v7 = vpop.f32.mrf.mxu1 }
0x1897   :  { %v11285_v34 = vpop.f32.mrf.mxu1 }
0x1899   :  { %v8689_v43 = vpop.f32.mrf.mxu1 }
0x189b   :  { %v11287_v10 = vpop.f32.mrf.mxu1 }
0x189d   :  { %v8692_v59 = vpop.f32.mrf.mxu1 }
0x189f   :  { %v11289_v32 = vpop.f32.mrf.mxu1 }
0x18a1   :  { %v8695_v1 = vpop.f32.mrf.mxu1 }
0x18a3   :  { %v11291_v20 = vpop.f32.mrf.mxu1 }
0x18a5   :  { %v8698_v36 = vpop.f32.mrf.mxu1 }
0x18a7   :  { %v4418_v60 = vpop.f32.mrf.mxu1 }
0x18a8   :  { %v4419_v0 = vadd.f32 %v7237_v6, %v4418_v60 }
0x18a9   :  { %v8732_v47 = vpop.f32.mrf.mxu1 }
0x18ab   :  { %v4423_v11 = vpop.f32.mrf.mxu1 }
0x18ac   :  { %v4424_v8 = vadd.f32 %v7237_v6, %v4423_v11 }
0x18ad   :  { %v8735_v14 = vpop.f32.mrf.mxu1 }
0x18af   :  { %v4428_v22 = vpop.f32.mrf.mxu1 }
0x18b0   :  { %v4429_v62 = vadd.f32 %v7237_v6, %v4428_v22 }
0x18b1   :  { %v8738_v19 = vpop.f32.mrf.mxu1 }
0x18b3   :  { %v4433_v58 = vpop.f32.mrf.mxu1 }
0x18b4   :  { %v4434_v16 = vadd.f32 %v7237_v6, %v4433_v58 }
0x18b5   :  { %v8741_v26 = vpop.f32.mrf.mxu1 }
0x18b7   :  { %v4438_v38 = vpop.f32.mrf.mxu1 }
0x18b8   :  { %v4439_v24 = vadd.f32 %v7237_v6, %v4438_v38 }
0x18b9   :  { %v8744_v23 = vpop.f32.mrf.mxu1 }
0x18ba   :  { %8769 = vmatpush3.xpose.msk.msra.mxu1 %vm635_vm6, %v4439_v24 }
0x18bb   :  { %8770 = vmatprep.subr.mxu1 %v9483_v39 }
0x18be   :  { %8771 = vmatpush3.xpose.msk.msra.mxu1 %vm635_vm6, %v4434_v16 }
0x18bf   :  { %8772 = vmatprep.subr.mxu1 %v9483_v39 }
0x18c2   :  { %8773 = vmatpush3.xpose.msk.msra.mxu1 %vm635_vm6, %v4429_v62 }
0x18c3   :  { %8774 = vmatprep.subr.mxu1 %v9483_v39 }
0x18c6   :  { %8775 = vmatpush3.xpose.msk.msra.mxu1 %vm635_vm6, %v4424_v8 }
0x18c7   :  { %8776 = vmatprep.subr.mxu1 %v9483_v39 }
0x18ca   :  { %8777 = vmatpush3.xpose.msk.msra.mxu1 %vm635_vm6, %v4419_v0 }
0x18cb   :  { %8818 = vmatprep.subr.mxu1 %v9483_v39 }
0x18cd   :  { %8779 = vmatmul.mubr.msk.f32.vlgmr.msra.gmra.mxu1 %vm635_vm6, %v4316_v5 }
0x18ce   :  { %8781 = vmatprep.mubr.msk.f32.mxu1 %vm9484_vm5, %v9483_v39 }
0x18d1   :  { %8782 = vmatmul.mubr.msk.f32.gmra.mxu1 %vm635_vm6, %v4321_v48 }
0x18d2   :  { %8784 = vmatprep.mubr.msk.f32.mxu1 %vm9484_vm5, %v9483_v39 }
0x18d5   :  { %8785 = vmatmul.mubr.msk.f32.gmra.mxu1 %vm635_vm6, %v4326_v25 }
0x18d6   :  { %8787 = vmatprep.mubr.msk.f32.mxu1 %vm9484_vm5, %v9483_v39 }
0x18d9   :  { %8788 = vmatmul.mubr.msk.f32.gmra.mxu1 %vm635_vm6, %v4331_v21 }
0x18da   :  { %8790 = vmatprep.mubr.msk.f32.mxu1 %vm9484_vm5, %v9483_v39 }
0x18dd   :  { %8791 = vmatmul.mubr.msk.f32.gmra.mxu1 %vm635_vm6, %v4336_v35 }
0x18de   :  { %8820 = vmatprep.mubr.msk.f32.mxu1 %vm9484_vm5, %v9483_v39 }
0x198d   :  { %v4641_v15 = vpop.f32.mrf.mxu1 }
0x198e   :  { %v4665_v49 = vmul.f32 0.35355338, %v4641_v15 }
0x198f   :  { %v8780_v50 = vpop.f32.mrf.mxu1 }
0x1990   :  { %v4670_v2 = vadd.f32 %v11164_v41, %v4665_v49 }
0x1991   :  { %v4646_v53 = vpop.f32.mrf.mxu1 }
0x1992   :  { %v4666_v52 = vmul.f32 0.35355338, %v4646_v53  ;;  %v4675_v45 = vsel %vm766_vm7, %v4670_v2, -inf }
0x1993   :  { %4676 = vmax.xlane.f32.xlu0 %v4675_v45  ;;  %v8783_v31 = vpop.f32.mrf.mxu1 }
0x1994   :  { %v4671_v63 = vadd.f32 %v11174_v40, %v4666_v52 }
0x1995   :  { %v4651_v54 = vpop.f32.mrf.mxu1 }
0x1996   :  { %v4667_v9 = vmul.f32 0.35355338, %v4651_v54  ;;  %v4678_v7 = vsel %vm766_vm7, %v4671_v63, -inf }
0x1997   :  { %4679 = vmax.xlane.f32.xlu1 %v4678_v7  ;;  %v8786_v43 = vpop.f32.mrf.mxu1 }
0x1998   :  { %v4672_v59 = vadd.f32 %v11184_v44, %v4667_v9  ;;  %v7270_v43 = vld [vmem:[%s12074_s8 + $0x28] sm:$0xff] }
0x1999   :  { %v4656_v1 = vpop.f32.mrf.mxu1  ;;  %8819 = vmatpush3.msra.mxu1 %v7270_v43 }
0x199a   :  { %v4668_v36 = vmul.f32 0.35355338, %v4656_v1  ;;  %v4681_v60 = vsel %vm766_vm7, %v4672_v59, -inf  ;;  %8852 = vmatprep.subr.mxu1 %v9483_v39 }
0x199b   :  { %4682 = vmax.xlane.f32.xlu0 %v4681_v60  ;;  %v8789_v47 = vpop.f32.mrf.mxu1 }
0x199c   :  { %v4673_v11 = vadd.f32 %v11194_v55, %v4668_v36 }
0x199d   :  { %v4661_v14 = vpop.f32.mrf.mxu1 }
0x199e   :  { %v4669_v22 = vmul.f32 0.35355338, %v4661_v14  ;;  %v4684_v19 = vsel %vm766_vm7, %v4673_v11, -inf  ;;  %v7220_v14 = vld [vmem:[%s12074_s8 + $0x20] sm:$0xff] }
0x199f   :  { %4685 = vmax.xlane.f32.xlu1 %v4684_v19  ;;  %v8792_v58 = vpop.f32.mrf.mxu1 }
0x19a0   :  { %v4674_v26 = vadd.f32 %v11201_v12, %v4669_v22 }
0x19a2   :  { %v4687_v6 = vsel %vm779_vm8, %v4674_v26, -inf }
0x19a3   :  { %4688 = vmax.xlane.f32.xlu0 %v4687_v6 }
0x1a1c   :  { %v4677_v38 = vpop.xlane.xlu0 %4676 }
0x1a1d   :  { %v4690_v24 = vsub.f32 %v4670_v2, %v4677_v38 }
0x1a1f   :  { %v4695_v23 = vmul.f32 1.442695, %v4690_v24 }
0x1a20   :  { %v4680_v16 = vpop.xlane.xlu1 %4679 }
0x1a21   :  { %9360 = vpow2.f32 %v4695_v23  ;;  %v4691_v62 = vsub.f32 %v4671_v63, %v4680_v16 }
0x1a23   :  { %v4697_v8 = vmul.f32 1.442695, %v4691_v62  ;;  %v7295_v62 = vld [vmem:[%s12072_s6 + $0x258] sm:$0xff] }
0x1a24   :  { %v4683_v30 = vpop.xlane.xlu0 %4682 }
0x1a25   :  { %9362 = vpow2.f32 %v4697_v8  ;;  %v4692_v0 = vsub.f32 %v4672_v59, %v4683_v30  ;;  %v7294_v8 = vld [vmem:[%s12072_s6 + $0x250] sm:$0xff]  ;;  %v7293_v30 = vld [vmem:[%s12072_s6 + $0x248] sm:$0xff] }
0x1a27   :  { %v4699_v5 = vmul.f32 1.442695, %v4692_v0  ;;  %v7282_v0 = vld [vmem:[%s12072_s6 + $0x1c8] sm:$0xff] }
0x1a28   :  { %v4686_v48 = vpop.xlane.xlu1 %4685 }
0x1a29   :  { %9364 = vpow2.f32 %v4699_v5  ;;  %v4693_v25 = vsub.f32 %v4673_v11, %v4686_v48  ;;  %v7281_v48 = vld [vmem:[%s12072_s6 + $0x1c0] sm:$0xff] }
0x1a2b   :  { %v4701_v21 = vmul.f32 1.442695, %v4693_v25 }
0x1a2c   :  { %v4689_v35 = vpop.xlane.xlu0 %4688 }
0x1a2d   :  { %9366 = vpow2.f32 %v4701_v21  ;;  %v4694_v15 = vsub.f32 %v4674_v26, %v4689_v35 }
0x1a2e   :  { %v9361_v49 = vpop.eup %9360 }
0x1a2f   :  { %v4703_v50 = vmul.f32 1.442695, %v4694_v15  ;;  %v4705_v2 = vsel %vm766_vm7, %v9361_v49, 0.0 }
0x1a30   :  { %4706 = vadd.xlane.f32.xlu1 %v4705_v2 }
0x1a31   :  { %9368 = vpow2.f32 %v4703_v50 }
0x1a32   :  { %v9363_v53 = vpop.eup %9362 }
0x1a33   :  { %v4708_v52 = vsel %vm766_vm7, %v9363_v53, 0.0 }
0x1a34   :  { %4709 = vadd.xlane.f32.xlu0 %v4708_v52 }
0x1a36   :  { %v9365_v45 = vpop.eup %9364 }
0x1a37   :  { %v4711_v31 = vsel %vm766_vm7, %v9365_v45, 0.0 }
0x1a38   :  { %4712 = vadd.xlane.f32.xlu1 %v4711_v31 }
0x1a3a   :  { %v9367_v63 = vpop.eup %9366 }
0x1a3b   :  { %v4714_v54 = vsel %vm766_vm7, %v9367_v63, 0.0 }
0x1a3c   :  { %4715 = vadd.xlane.f32.xlu0 %v4714_v54 }
0x1a3e   :  { %v9369_v9 = vpop.eup %9368 }
0x1a3f   :  { %v4717_v7 = vsel %vm779_vm8, %v9369_v9, 0.0 }
0x1a40   :  { %4718 = vadd.xlane.f32.xlu1 %v4717_v7 }
0x1ab9   :  { %v4707_v59 = vpop.xlane.xlu1 %4706 }
0x1aba   :  { %9370 = vrcp.f32 %v4707_v59 }
0x1abd   :  { %v4710_v1 = vpop.xlane.xlu0 %4709 }
0x1abe   :  { %9372 = vrcp.f32 %v4710_v1 }
0x1ac1   :  { %v4713_v36 = vpop.xlane.xlu1 %4712 }
0x1ac2   :  { %9374 = vrcp.f32 %v4713_v36 }
0x1ac5   :  { %v4716_v60 = vpop.xlane.xlu0 %4715 }
0x1ac6   :  { %9376 = vrcp.f32 %v4716_v60 }
0x1ac7   :  { %v9371_v47 = vpop.eup %9370 }
0x1ac8   :  { %v4725_v11 = vmul.f32 %v9371_v47, %v9361_v49 }
0x1ac9   :  { %v4719_v22 = vpop.xlane.xlu1 %4718 }
0x1aca   :  { %9378 = vrcp.f32 %v4719_v22  ;;  %8804 = vmatmul.mubr.msk.f32.vlgmr.msra.gmra.mxu0 %vm766_vm7, %v4725_v11 }
0x1acb   :  { %v9373_v19 = vpop.eup %9372  ;;  %8806 = vmatprep.mubr.msk.f32.mxu0 %vm9484_vm5, %v9483_v39  ;;  %8836 = vmatpush3.msra.mxu0 %v7220_v14 }
0x1acc   :  { %v4726_v58 = vmul.f32 %v9373_v19, %v9363_v53  ;;  %8875 = vmatprep.subr.mxu0 %v9483_v39  ;;  %v7306_v53 = vld [vmem:[%s12072_s6 + $0x2d8] sm:$0xff] }
0x1ace   :  { %8807 = vmatmul.mubr.msk.f32.gmra.mxu0 %vm766_vm7, %v4726_v58 }
0x1acf   :  { %v9375_v26 = vpop.eup %9374  ;;  %8809 = vmatprep.mubr.msk.f32.mxu0 %vm9484_vm5, %v9483_v39 }
0x1ad0   :  { %v4727_v6 = vmul.f32 %v9375_v26, %v9365_v45  ;;  %v7305_v45 = vld [vmem:[%s12072_s6 + $0x2d0] sm:$0xff] }
0x1ad2   :  { %8810 = vmatmul.mubr.msk.f32.gmra.mxu0 %vm766_vm7, %v4727_v6 }
0x1ad3   :  { %v9377_v38 = vpop.eup %9376  ;;  %8812 = vmatprep.mubr.msk.f32.mxu0 %vm9484_vm5, %v9483_v39 }
0x1ad4   :  { %v4728_v24 = vmul.f32 %v9377_v38, %v9367_v63  ;;  %v7304_v63 = vld [vmem:[%s12072_s6 + $0x2c8] sm:$0xff] }
0x1ad6   :  { %8813 = vmatmul.mubr.msk.f32.gmra.mxu0 %vm766_vm7, %v4728_v24  ;;  %v7297_v24 = vld [vmem:[%s12073_s7 + $0x12] ss:$0 sm:$0xff] }
0x1ad7   :  { %v9379_v23 = vpop.eup %9378  ;;  %8815 = vmatprep.mubr.msk.f32.mxu0 %vm9484_vm5, %v9483_v39 }
0x1ad8   :  { %v4729_v16 = vmul.f32 %v9379_v23, %v9369_v9  ;;  %v7303_v9 = vld [vmem:[%s12072_s6 + $0x2c0] sm:$0xff] }
0x1ada   :  { %8816 = vmatmul.mubr.msk.f32.gmra.mxu0 %vm766_vm7, %v4729_v16 }
0x1adb   :  { %8837 = vmatprep.mubr.msk.f32.mxu0 %vm9484_vm5, %v9483_v39 }
0x1ade   :  { %8838 = vmatmul.mubr.msk.f32.vlgmr.msra.gmra.mxu0 %vm635_vm6, %v11283_v33  ;;  %v7292_v33 = vld [vmem:[%s12072_s6 + $0x240] sm:$0xff] }
0x1adf   :  { %8840 = vmatprep.mubr.msk.f32.mxu0 %vm9484_vm5, %v9483_v39  ;;  %8876 = vmatpush3.msra.mxu0 %v7295_v62 }
0x1ae0   :  { %8877 = vmatprep.subr.mxu0 %v9483_v39 }
0x1ae1   :  { %8878 = vmatpush3.msra.mxu0 %v7294_v8 }
0x1ae2   :  { %8841 = vmatmul.mubr.msk.f32.gmra.mxu0 %vm635_vm6, %v11285_v34  ;;  %8879 = vmatprep.subr.mxu0 %v9483_v39  ;;  %v7284_v34 = vld [vmem:[%s12072_s6 + $0x1d8] sm:$0xff] }
0x1ae3   :  { %8843 = vmatprep.mubr.msk.f32.mxu0 %vm9484_vm5, %v9483_v39  ;;  %8880 = vmatpush3.msra.mxu0 %v7293_v30 }
0x1ae4   :  { %8881 = vmatprep.subr.mxu0 %v9483_v39 }
0x1ae5   :  { %8882 = vmatpush3.msra.mxu0 %v7292_v33 }
0x1ae6   :  { %8844 = vmatmul.mubr.msk.f32.gmra.mxu0 %vm635_vm6, %v11287_v10  ;;  %8921 = vmatprep.subr.mxu0 %v9483_v39 }
0x1ae7   :  { %8846 = vmatprep.mubr.msk.f32.mxu0 %vm9484_vm5, %v9483_v39 }
0x1aea   :  { %8847 = vmatmul.mubr.msk.f32.gmra.mxu0 %vm635_vm6, %v11289_v32  ;;  %v7283_v32 = vld [vmem:[%s12072_s6 + $0x1d0] sm:$0xff] }
0x1aeb   :  { %8849 = vmatprep.mubr.msk.f32.mxu0 %vm9484_vm5, %v9483_v39 }
0x1aee   :  { %8850 = vmatmul.mubr.msk.f32.gmra.mxu0 %vm635_vm6, %v11291_v20 }
0x1aef   :  { %8883 = vmatprep.mubr.msk.f32.mxu0 %vm9484_vm5, %v9483_v39 }
0x1af2   :  { %8884 = vmatmul.mubr.msk.f32.vlgmr.msra.gmra.mxu0 %vm227_vm1, %v10947_v27 }
0x1af3   :  { %8886 = vmatprep.mubr.msk.f32.mxu0 %vm9484_vm5, %v9483_v39 }
0x1af6   :  { %8887 = vmatmul.mubr.msk.f32.gmra.mxu0 %vm227_vm1, %v10962_v37 }
0x1af7   :  { %8889 = vmatprep.mubr.msk.f32.mxu0 %vm9484_vm5, %v9483_v39 }
0x1afa   :  { %8890 = vmatmul.mubr.msk.f32.gmra.mxu0 %vm227_vm1, %v10979_v61 }
0x1afb   :  { %8892 = vmatprep.mubr.msk.f32.mxu0 %vm9484_vm5, %v9483_v39 }
0x1afe   :  { %8893 = vmatmul.mubr.msk.f32.gmra.mxu0 %vm227_vm1, %v10994_v29 }
0x1aff   :  { %8895 = vmatprep.mubr.msk.f32.mxu0 %vm9484_vm5, %v9483_v39 }
0x1b02   :  { %8896 = vmatmul.mubr.msk.f32.gmra.mxu0 %vm227_vm1, %v11006_v17 }
0x1b03   :  { %8931 = vmatprep.mubr.msk.f32.mxu0 %vm9484_vm5, %v9483_v39 }
0x1b8a   :  { %v4814_v10 = vpop.f32.mrf.mxu0 }
0x1b8b   :  { %8821 = vmatmul.mubr.msk.f32.vlgmr.msra.gmra.mxu1 %vm635_vm6, %v4814_v10 }
0x1b8c   :  { %v8805_v20 = vpop.f32.mrf.mxu0  ;;  %8853 = vmatpush3.msra.mxu1 %v7284_v34  ;;  %8823 = vmatprep.mubr.msk.f32.mxu1 %vm9484_vm5, %v9483_v39 }
0x1b8d   :  { %8854 = vmatprep.subr.mxu1 %v9483_v39 }
0x1b8e   :  { %v4819_v5 = vpop.f32.mrf.mxu0  ;;  %8855 = vmatpush3.msra.mxu1 %v7283_v32 }
0x1b8f   :  { %8824 = vmatmul.mubr.msk.f32.gmra.mxu1 %vm635_vm6, %v4819_v5  ;;  %8856 = vmatprep.subr.mxu1 %v9483_v39 }
0x1b90   :  { %v8808_v25 = vpop.f32.mrf.mxu0  ;;  %8826 = vmatprep.mubr.msk.f32.mxu1 %vm9484_vm5, %v9483_v39  ;;  %8857 = vmatpush3.msra.mxu1 %v7282_v0 }
0x1b91   :  { %8858 = vmatprep.subr.mxu1 %v9483_v39 }
0x1b92   :  { %v4824_v21 = vpop.f32.mrf.mxu0  ;;  %8859 = vmatpush3.msra.mxu1 %v7281_v48 }
0x1b93   :  { %8827 = vmatmul.mubr.msk.f32.gmra.mxu1 %vm635_vm6, %v4824_v21  ;;  %8898 = vmatprep.subr.mxu1 %v9483_v39 }
0x1b94   :  { %v8811_v35 = vpop.f32.mrf.mxu0  ;;  %8829 = vmatprep.mubr.msk.f32.mxu1 %vm9484_vm5, %v9483_v39 }
0x1b96   :  { %v4829_v15 = vpop.f32.mrf.mxu0 }
0x1b97   :  { %8830 = vmatmul.mubr.msk.f32.gmra.mxu1 %vm635_vm6, %v4829_v15 }
0x1b98   :  { %v8814_v49 = vpop.f32.mrf.mxu0  ;;  %8832 = vmatprep.mubr.msk.f32.mxu1 %vm9484_vm5, %v9483_v39 }
0x1b99   :  { %v7286_v49 = vld [vmem:[%s12073_s7 + $0xe] ss:$0 sm:$0xff] }
0x1b9a   :  { %v4834_v50 = vpop.f32.mrf.mxu0 }
0x1b9b   :  { %8833 = vmatmul.mubr.msk.f32.gmra.mxu1 %vm635_vm6, %v4834_v50 }
0x1b9c   :  { %v8817_v2 = vpop.f32.mrf.mxu0  ;;  %8860 = vmatprep.mubr.msk.f32.mxu1 %vm9484_vm5, %v9483_v39 }
0x1b9e   :  { %v11457_v52 = vpop.f32.mrf.mxu0 }
0x1b9f   :  { %8861 = vmatmul.mubr.msk.f32.vlgmr.msra.gmra.mxu1 %vm227_vm1, %v10947_v27 }
0x1ba0   :  { %v8839_v31 = vpop.f32.mrf.mxu0  ;;  %8863 = vmatprep.mubr.msk.f32.mxu1 %vm9484_vm5, %v9483_v39  ;;  %8899 = vmatpush3.msra.mxu1 %v7306_v53 }
0x1ba1   :  { %8900 = vmatprep.subr.mxu1 %v9483_v39 }
0x1ba2   :  { %v11470_v54 = vpop.f32.mrf.mxu0  ;;  %8901 = vmatpush3.msra.mxu1 %v7305_v45 }
0x1ba3   :  { %8864 = vmatmul.mubr.msk.f32.gmra.mxu1 %vm227_vm1, %v10962_v37  ;;  %8902 = vmatprep.subr.mxu1 %v9483_v39 }
0x1ba4   :  { %v8842_v7 = vpop.f32.mrf.mxu0  ;;  %8866 = vmatprep.mubr.msk.f32.mxu1 %vm9484_vm5, %v9483_v39  ;;  %8903 = vmatpush3.msra.mxu1 %v7304_v63 }
0x1ba5   :  { %8904 = vmatprep.subr.mxu1 %v9483_v39 }
0x1ba6   :  { %v11481_v43 = vpop.f32.mrf.mxu0  ;;  %8905 = vmatpush3.msra.mxu1 %v7303_v9 }
0x1ba7   :  { %8867 = vmatmul.mubr.msk.f32.gmra.mxu1 %vm227_vm1, %v10979_v61  ;;  %8946 = vmatprep.subr.mxu1 %v9483_v39 }
0x1ba8   :  { %v8845_v59 = vpop.f32.mrf.mxu0  ;;  %8869 = vmatprep.mubr.msk.f32.mxu1 %vm9484_vm5, %v9483_v39 }
0x1baa   :  { %v11488_v1 = vpop.f32.mrf.mxu0 }
0x1bab   :  { %8870 = vmatmul.mubr.msk.f32.gmra.mxu1 %vm227_vm1, %v10994_v29 }
0x1bac   :  { %v8848_v36 = vpop.f32.mrf.mxu0  ;;  %8872 = vmatprep.mubr.msk.f32.mxu1 %vm9484_vm5, %v9483_v39 }
0x1bae   :  { %v11494_v60 = vpop.f32.mrf.mxu0 }
0x1baf   :  { %8873 = vmatmul.mubr.msk.f32.gmra.mxu1 %vm227_vm1, %v11006_v17 }
0x1bb0   :  { %v8851_v47 = vpop.f32.mrf.mxu0  ;;  %8906 = vmatprep.mubr.msk.f32.mxu1 %vm9484_vm5, %v9483_v39 }
0x1bb2   :  { %v5232_v11 = vpop.f32.mrf.mxu0 }
0x1bb3   :  { %8907 = vmatmul.mubr.msk.f32.vlgmr.msra.gmra.mxu1 %vm227_vm1, %v10947_v27  ;;  %v5233_v34 = vadd.f32 %v7297_v24, %v5232_v11 }
0x1bb4   :  { %v8885_v14 = vpop.f32.mrf.mxu0  ;;  %8909 = vmatprep.mubr.msk.f32.mxu1 %vm9484_vm5, %v9483_v39 }
0x1bb6   :  { %v5237_v22 = vpop.f32.mrf.mxu0 }
0x1bb7   :  { %8910 = vmatmul.mubr.msk.f32.gmra.mxu1 %vm227_vm1, %v10962_v37  ;;  %v5238_v33 = vadd.f32 %v7297_v24, %v5237_v22 }
0x1bb8   :  { %v8888_v19 = vpop.f32.mrf.mxu0  ;;  %8912 = vmatprep.mubr.msk.f32.mxu1 %vm9484_vm5, %v9483_v39 }
0x1bba   :  { %v5242_v58 = vpop.f32.mrf.mxu0 }
0x1bbb   :  { %8913 = vmatmul.mubr.msk.f32.gmra.mxu1 %vm227_vm1, %v10979_v61  ;;  %v5243_v30 = vadd.f32 %v7297_v24, %v5242_v58 }
0x1bbc   :  { %v8891_v26 = vpop.f32.mrf.mxu0  ;;  %8915 = vmatprep.mubr.msk.f32.mxu1 %vm9484_vm5, %v9483_v39 }
0x1bbe   :  { %v5247_v6 = vpop.f32.mrf.mxu0 }
0x1bbf   :  { %8916 = vmatmul.mubr.msk.f32.gmra.mxu1 %vm227_vm1, %v10994_v29  ;;  %v5248_v8 = vadd.f32 %v7297_v24, %v5247_v6 }
0x1bc0   :  { %v8894_v38 = vpop.f32.mrf.mxu0  ;;  %8918 = vmatprep.mubr.msk.f32.mxu1 %vm9484_vm5, %v9483_v39 }
0x1bc2   :  { %v5252_v23 = vpop.f32.mrf.mxu0 }
0x1bc3   :  { %v5253_v16 = vadd.f32 %v7297_v24, %v5252_v23  ;;  %8919 = vmatmul.mubr.msk.f32.gmra.mxu1 %vm227_vm1, %v11006_v17 }
0x1bc4   :  { %v8897_v62 = vpop.f32.mrf.mxu0  ;;  %8956 = vmatprep.mubr.msk.f32.mxu1 %vm9484_vm5, %v9483_v39 }
0x1bc5   :  { %8922 = vmatpush3.xpose.msk.msra.mxu0 %vm635_vm6, %v5253_v16 }
0x1bc6   :  { %8923 = vmatprep.subr.mxu0 %v9483_v39 }
0x1bc9   :  { %8924 = vmatpush3.xpose.msk.msra.mxu0 %vm635_vm6, %v5248_v8  ;;  %v7308_v8 = vld [vmem:[%s12073_s7 + $0x16] ss:$0 sm:$0xff] }
0x1bca   :  { %8925 = vmatprep.subr.mxu0 %v9483_v39 }
0x1bcd   :  { %8926 = vmatpush3.xpose.msk.msra.mxu0 %vm635_vm6, %v5243_v30 }
0x1bce   :  { %8927 = vmatprep.subr.mxu0 %v9483_v39 }
0x1bd1   :  { %8928 = vmatpush3.xpose.msk.msra.mxu0 %vm635_vm6, %v5238_v33 }
0x1bd2   :  { %8929 = vmatprep.subr.mxu0 %v9483_v39 }
0x1bd5   :  { %8930 = vmatpush3.xpose.msk.msra.mxu0 %vm635_vm6, %v5233_v34 }
0x1bd6   :  { %8971 = vmatprep.subr.mxu0 %v9483_v39 }
0x1c4b   :  { %v11533_v10 = vpop.f32.mrf.mxu1 }
0x1c4d   :  { %v8822_v32 = vpop.f32.mrf.mxu1 }
0x1c4f   :  { %v11535_v20 = vpop.f32.mrf.mxu1 }
0x1c51   :  { %v8825_v0 = vpop.f32.mrf.mxu1 }
0x1c53   :  { %v11537_v5 = vpop.f32.mrf.mxu1 }
0x1c55   :  { %v8828_v48 = vpop.f32.mrf.mxu1 }
0x1c57   :  { %v11539_v25 = vpop.f32.mrf.mxu1 }
0x1c59   :  { %v8831_v21 = vpop.f32.mrf.mxu1 }
0x1c5b   :  { %v11541_v35 = vpop.f32.mrf.mxu1 }
0x1c5d   :  { %v8834_v15 = vpop.f32.mrf.mxu1 }
0x1c5f   :  { %v5129_v50 = vpop.f32.mrf.mxu1 }
0x1c60   :  { %v5130_v2 = vadd.f32 %v7286_v49, %v5129_v50 }
0x1c61   :  { %v8862_v53 = vpop.f32.mrf.mxu1 }
0x1c62   :  { %8932 = vmatmul.mubr.msk.f32.vlgmr.msra.gmra.mxu0 %vm635_vm6, %v5130_v2 }
0x1c63   :  { %v5134_v45 = vpop.f32.mrf.mxu1  ;;  %8934 = vmatprep.mubr.msk.f32.mxu0 %vm9484_vm5, %v9483_v39 }
0x1c64   :  { %v5135_v31 = vadd.f32 %v7286_v49, %v5134_v45 }
0x1c65   :  { %v8865_v63 = vpop.f32.mrf.mxu1 }
0x1c66   :  { %8935 = vmatmul.mubr.msk.f32.gmra.mxu0 %vm635_vm6, %v5135_v31 }
0x1c67   :  { %v5139_v9 = vpop.f32.mrf.mxu1  ;;  %8937 = vmatprep.mubr.msk.f32.mxu0 %vm9484_vm5, %v9483_v39 }
0x1c68   :  { %v5140_v7 = vadd.f32 %v7286_v49, %v5139_v9 }
0x1c69   :  { %v8868_v59 = vpop.f32.mrf.mxu1 }
0x1c6a   :  { %8938 = vmatmul.mubr.msk.f32.gmra.mxu0 %vm635_vm6, %v5140_v7 }
0x1c6b   :  { %v5144_v36 = vpop.f32.mrf.mxu1  ;;  %8940 = vmatprep.mubr.msk.f32.mxu0 %vm9484_vm5, %v9483_v39 }
0x1c6c   :  { %v5145_v47 = vadd.f32 %v7286_v49, %v5144_v36 }
0x1c6d   :  { %v8871_v11 = vpop.f32.mrf.mxu1 }
0x1c6e   :  { %8941 = vmatmul.mubr.msk.f32.gmra.mxu0 %vm635_vm6, %v5145_v47 }
0x1c6f   :  { %v5149_v14 = vpop.f32.mrf.mxu1  ;;  %8943 = vmatprep.mubr.msk.f32.mxu0 %vm9484_vm5, %v9483_v39 }
0x1c70   :  { %v5150_v22 = vadd.f32 %v7286_v49, %v5149_v14 }
0x1c71   :  { %v8874_v19 = vpop.f32.mrf.mxu1 }
0x1c72   :  { %8944 = vmatmul.mubr.msk.f32.gmra.mxu0 %vm635_vm6, %v5150_v22 }
0x1c73   :  { %v5335_v58 = vpop.f32.mrf.mxu1  ;;  %8973 = vmatprep.mubr.msk.f32.mxu0 %vm9484_vm5, %v9483_v39 }
0x1c74   :  { %v5336_v21 = vadd.f32 %v7308_v8, %v5335_v58 }
0x1c75   :  { %v8908_v26 = vpop.f32.mrf.mxu1 }
0x1c77   :  { %v5340_v6 = vpop.f32.mrf.mxu1 }
0x1c78   :  { %v5341_v48 = vadd.f32 %v7308_v8, %v5340_v6 }
0x1c79   :  { %v8911_v38 = vpop.f32.mrf.mxu1 }
0x1c7b   :  { %v5345_v24 = vpop.f32.mrf.mxu1 }
0x1c7c   :  { %v5346_v0 = vadd.f32 %v7308_v8, %v5345_v24 }
0x1c7d   :  { %v8914_v23 = vpop.f32.mrf.mxu1 }
0x1c7f   :  { %v5350_v16 = vpop.f32.mrf.mxu1 }
0x1c80   :  { %v5351_v32 = vadd.f32 %v7308_v8, %v5350_v16 }
0x1c81   :  { %v8917_v62 = vpop.f32.mrf.mxu1 }
0x1c83   :  { %v5355_v30 = vpop.f32.mrf.mxu1 }
0x1c84   :  { %v5356_v33 = vadd.f32 %v7308_v8, %v5355_v30 }
0x1c85   :  { %v8920_v34 = vpop.f32.mrf.mxu1 }
0x1c86   :  { %8947 = vmatpush3.msk.msra.mxu1 %vm211_vm3, %v5356_v33 }
0x1c87   :  { %8948 = vmatprep.subr.mxu1 %v9483_v39 }
0x1c88   :  { %8949 = vmatpush3.msra.mxu1 %v5351_v32 }
0x1c89   :  { %8950 = vmatprep.subr.mxu1 %v9483_v39 }
0x1c8a   :  { %8951 = vmatpush3.msra.mxu1 %v5346_v0 }
0x1c8b   :  { %8952 = vmatprep.subr.mxu1 %v9483_v39 }
0x1c8c   :  { %8953 = vmatpush3.msra.mxu1 %v5341_v48 }
0x1c8d   :  { %8954 = vmatprep.subr.mxu1 %v9483_v39 }
0x1c8e   :  { %8955 = vmatpush3.msra.mxu1 %v5336_v21 }
0x1c8f   :  { %8988 = vmatprep.subr.mxu1 %v9483_v39 }
0x1d22   :  { %v5455_v15 = vpop.f32.mrf.mxu0 }
0x1d23   :  { %v5479_v49 = vmul.f32 0.35355338, %v5455_v15 }
0x1d24   :  { %v8933_v50 = vpop.f32.mrf.mxu0 }
0x1d25   :  { %v5484_v2 = vadd.f32 %v11164_v41, %v5479_v49 }
0x1d26   :  { %v5460_v53 = vpop.f32.mrf.mxu0 }
0x1d27   :  { %v5480_v45 = vmul.f32 0.35355338, %v5460_v53  ;;  %v5489_v31 = vsel %vm766_vm7, %v5484_v2, -inf }
0x1d28   :  { %5490 = vmax.xlane.f32.xlu0 %v5489_v31  ;;  %v8936_v63 = vpop.f32.mrf.mxu0 }
0x1d29   :  { %v5485_v9 = vadd.f32 %v11174_v40, %v5480_v45 }
0x1d2a   :  { %v5465_v7 = vpop.f32.mrf.mxu0 }
0x1d2b   :  { %v5481_v59 = vmul.f32 0.35355338, %v5465_v7  ;;  %v5492_v36 = vsel %vm766_vm7, %v5485_v9, -inf }
0x1d2c   :  { %5493 = vmax.xlane.f32.xlu1 %v5492_v36  ;;  %v8939_v47 = vpop.f32.mrf.mxu0 }
0x1d2d   :  { %v5486_v11 = vadd.f32 %v11184_v44, %v5481_v59  ;;  %v7330_v47 = vld [vmem:[%s12074_s8 + $0x30] sm:$0xff] }
0x1d2e   :  { %v5470_v14 = vpop.f32.mrf.mxu0  ;;  %8972 = vmatpush3.msra.mxu0 %v7330_v47 }
0x1d2f   :  { %v5482_v22 = vmul.f32 0.35355338, %v5470_v14  ;;  %v5495_v41 = vsel %vm766_vm7, %v5486_v11, -inf  ;;  %9011 = vmatprep.subr.mxu0 %v9483_v39 }
0x1d30   :  { %5496 = vmax.xlane.f32.xlu0 %v5495_v41  ;;  %v8942_v19 = vpop.f32.mrf.mxu0 }
0x1d31   :  { %v5487_v58 = vadd.f32 %v11194_v55, %v5482_v22 }
0x1d32   :  { %v5475_v26 = vpop.f32.mrf.mxu0 }
0x1d33   :  { %v5483_v6 = vmul.f32 0.35355338, %v5475_v26  ;;  %v5498_v40 = vsel %vm766_vm7, %v5487_v58, -inf  ;;  %v7339_v26 = vld [vmem:[%s12072_s6 + $0x1f8] sm:$0xff] }
0x1d34   :  { %5499 = vmax.xlane.f32.xlu1 %v5498_v40  ;;  %v8945_v38 = vpop.f32.mrf.mxu0  ;;  %v7338_v40 = vld [vmem:[%s12072_s6 + $0x1f0] sm:$0xff] }
0x1d35   :  { %v5488_v24 = vadd.f32 %v11201_v12, %v5483_v6 }
0x1d37   :  { %v5501_v23 = vsel %vm779_vm8, %v5488_v24, -inf }
0x1d38   :  { %5502 = vmax.xlane.f32.xlu0 %v5501_v23  ;;  %v7337_v23 = vld [vmem:[%s12072_s6 + $0x1e8] sm:$0xff] }
0x1db1   :  { %v5491_v44 = vpop.xlane.xlu0 %5490 }
0x1db2   :  { %v5504_v16 = vsub.f32 %v5484_v2, %v5491_v44  ;;  %v7336_v44 = vld [vmem:[%s12072_s6 + $0x1e0] sm:$0xff] }
0x1db4   :  { %v5509_v62 = vmul.f32 1.442695, %v5504_v16 }
0x1db5   :  { %v5494_v8 = vpop.xlane.xlu1 %5493 }
0x1db6   :  { %9380 = vpow2.f32 %v5509_v62  ;;  %v5505_v30 = vsub.f32 %v5485_v9, %v5494_v8 }
0x1db8   :  { %v5511_v33 = vmul.f32 1.442695, %v5505_v30 }
0x1db9   :  { %v5497_v34 = vpop.xlane.xlu0 %5496 }
0x1dba   :  { %9382 = vpow2.f32 %v5511_v33  ;;  %v5506_v55 = vsub.f32 %v5486_v11, %v5497_v34 }
0x1dbc   :  { %v5513_v32 = vmul.f32 1.442695, %v5506_v55  ;;  %v7361_v55 = vld [vmem:[%s12072_s6 + $0x2f8] sm:$0xff] }
0x1dbd   :  { %v5500_v0 = vpop.xlane.xlu1 %5499 }
0x1dbe   :  { %9384 = vpow2.f32 %v5513_v32  ;;  %v5507_v48 = vsub.f32 %v5487_v58, %v5500_v0  ;;  %v7360_v32 = vld [vmem:[%s12072_s6 + $0x2f0] sm:$0xff]  ;;  %v7359_v0 = vld [vmem:[%s12072_s6 + $0x2e8] sm:$0xff] }
0x1dc0   :  { %v5515_v21 = vmul.f32 1.442695, %v5507_v48  ;;  %v7358_v48 = vld [vmem:[%s12072_s6 + $0x2e0] sm:$0xff] }
0x1dc1   :  { %v5503_v15 = vpop.xlane.xlu0 %5502 }
0x1dc2   :  { %9386 = vpow2.f32 %v5515_v21  ;;  %v5508_v12 = vsub.f32 %v5488_v24, %v5503_v15  ;;  %v7350_v21 = vld [vmem:[%s12072_s6 + $0x278] sm:$0xff] }
0x1dc3   :  { %v9381_v49 = vpop.eup %9380 }
0x1dc4   :  { %v5517_v50 = vmul.f32 1.442695, %v5508_v12  ;;  %v5519_v2 = vsel %vm766_vm7, %v9381_v49, 0.0  ;;  %v7349_v12 = vld [vmem:[%s12072_s6 + $0x270] sm:$0xff] }
0x1dc5   :  { %5520 = vadd.xlane.f32.xlu1 %v5519_v2 }
0x1dc6   :  { %9388 = vpow2.f32 %v5517_v50  ;;  %v7348_v50 = vld [vmem:[%s12072_s6 + $0x268] sm:$0xff] }
0x1dc7   :  { %v9383_v53 = vpop.eup %9382 }
0x1dc8   :  { %v5522_v45 = vsel %vm766_vm7, %v9383_v53, 0.0 }
0x1dc9   :  { %5523 = vadd.xlane.f32.xlu0 %v5522_v45 }
0x1dcb   :  { %v9385_v31 = vpop.eup %9384 }
0x1dcc   :  { %v5525_v63 = vsel %vm766_vm7, %v9385_v31, 0.0 }
0x1dcd   :  { %5526 = vadd.xlane.f32.xlu1 %v5525_v63 }
0x1dcf   :  { %v9387_v9 = vpop.eup %9386 }
0x1dd0   :  { %v5528_v7 = vsel %vm766_vm7, %v9387_v9, 0.0 }
0x1dd1   :  { %5529 = vadd.xlane.f32.xlu0 %v5528_v7 }
0x1dd3   :  { %v9389_v59 = vpop.eup %9388 }
0x1dd4   :  { %v5531_v36 = vsel %vm779_vm8, %v9389_v59, 0.0 }
0x1dd5   :  { %5532 = vadd.xlane.f32.xlu1 %v5531_v36 }
0x1e4e   :  { %v5521_v11 = vpop.xlane.xlu1 %5520 }
0x1e4f   :  { %9390 = vrcp.f32 %v5521_v11 }
0x1e52   :  { %v5524_v14 = vpop.xlane.xlu0 %5523 }
0x1e53   :  { %9392 = vrcp.f32 %v5524_v14 }
0x1e56   :  { %v5527_v22 = vpop.xlane.xlu1 %5526 }
0x1e57   :  { %9394 = vrcp.f32 %v5527_v22 }
0x1e5a   :  { %v5530_v41 = vpop.xlane.xlu0 %5529 }
0x1e5b   :  { %9396 = vrcp.f32 %v5530_v41 }
0x1e5c   :  { %v9391_v19 = vpop.eup %9390 }
0x1e5d   :  { %v5539_v58 = vmul.f32 %v9391_v19, %v9381_v49 }
0x1e5e   :  { %v5533_v6 = vpop.xlane.xlu1 %5532 }
0x1e5f   :  { %9398 = vrcp.f32 %v5533_v6  ;;  %8957 = vmatmul.mubr.msk.f32.vlgmr.msra.gmra.mxu1 %vm766_vm7, %v5539_v58 }
0x1e60   :  { %v9393_v38 = vpop.eup %9392  ;;  %8959 = vmatprep.mubr.msk.f32.mxu1 %vm9484_vm5, %v9483_v39  ;;  %8989 = vmatpush3.msra.mxu1 %v7339_v26 }
0x1e61   :  { %v5540_v24 = vmul.f32 %v9393_v38, %v9383_v53  ;;  %8990 = vmatprep.subr.mxu1 %v9483_v39  ;;  %v7347_v53 = vld [vmem:[%s12072_s6 + $0x260] sm:$0xff] }
0x1e62   :  { %8991 = vmatpush3.msra.mxu1 %v7338_v40 }
0x1e63   :  { %8960 = vmatmul.mubr.msk.f32.gmra.mxu1 %vm766_vm7, %v5540_v24  ;;  %8992 = vmatprep.subr.mxu1 %v9483_v39 }
0x1e64   :  { %v9395_v16 = vpop.eup %9394  ;;  %8962 = vmatprep.mubr.msk.f32.mxu1 %vm9484_vm5, %v9483_v39  ;;  %8993 = vmatpush3.msra.mxu1 %v7337_v23 }
0x1e65   :  { %v5541_v62 = vmul.f32 %v9395_v16, %v9385_v31  ;;  %8994 = vmatprep.subr.mxu1 %v9483_v39  ;;  %v7363_v16 = vld [vmem:[%s12073_s7 + $0x17] ss:$0 sm:$0xff] }
0x1e66   :  { %8995 = vmatpush3.msra.mxu1 %v7336_v44 }
0x1e67   :  { %8963 = vmatmul.mubr.msk.f32.gmra.mxu1 %vm766_vm7, %v5541_v62  ;;  %9034 = vmatprep.subr.mxu1 %v9483_v39 }
0x1e68   :  { %v9397_v8 = vpop.eup %9396  ;;  %8965 = vmatprep.mubr.msk.f32.mxu1 %vm9484_vm5, %v9483_v39 }
0x1e69   :  { %v5542_v30 = vmul.f32 %v9397_v8, %v9387_v9 }
0x1e6b   :  { %8966 = vmatmul.mubr.msk.f32.gmra.mxu1 %vm766_vm7, %v5542_v30 }
0x1e6c   :  { %v9399_v33 = vpop.eup %9398  ;;  %8968 = vmatprep.mubr.msk.f32.mxu1 %vm9484_vm5, %v9483_v39 }
0x1e6d   :  { %v5543_v34 = vmul.f32 %v9399_v33, %v9389_v59 }
0x1e6f   :  { %8969 = vmatmul.mubr.msk.f32.gmra.mxu1 %vm766_vm7, %v5543_v34 }
0x1e70   :  { %8996 = vmatprep.mubr.msk.f32.mxu1 %vm9484_vm5, %v9483_v39 }
0x1e73   :  { %8997 = vmatmul.mubr.msk.f32.vlgmr.msra.gmra.mxu1 %vm227_vm1, %v10947_v27 }
0x1e74   :  { %8999 = vmatprep.mubr.msk.f32.mxu1 %vm9484_vm5, %v9483_v39  ;;  %9035 = vmatpush3.msra.mxu1 %v7361_v55 }
0x1e75   :  { %9036 = vmatprep.subr.mxu1 %v9483_v39 }
0x1e76   :  { %9037 = vmatpush3.msra.mxu1 %v7360_v32  ;;  %v5027_v32 = vadd.f32 %v11457_v52, %v11533_v10  ;;  %v5042_v52 = vadd.f32 %v11488_v1, %v11539_v25  ;;  %v7352_v1 = vld [vmem:[%s12073_s7 + $0x13] ss:$0 sm:$0xff] }
0x1e77   :  { %9000 = vmatmul.mubr.msk.f32.gmra.mxu1 %vm227_vm1, %v10962_v37  ;;  %9038 = vmatprep.subr.mxu1 %v9483_v39 }
0x1e78   :  { %9002 = vmatprep.mubr.msk.f32.mxu1 %vm9484_vm5, %v9483_v39  ;;  %9039 = vmatpush3.msra.mxu1 %v7359_v0 }
0x1e79   :  { %9040 = vmatprep.subr.mxu1 %v9483_v39 }
0x1e7a   :  { %9041 = vmatpush3.msra.mxu1 %v7358_v48 }
0x1e7b   :  { %9003 = vmatmul.mubr.msk.f32.gmra.mxu1 %vm227_vm1, %v10979_v61  ;;  %9082 = vmatprep.subr.mxu1 %v9483_v39 }
0x1e7c   :  { %9005 = vmatprep.mubr.msk.f32.mxu1 %vm9484_vm5, %v9483_v39 }
0x1e7f   :  { %9006 = vmatmul.mubr.msk.f32.gmra.mxu1 %vm227_vm1, %v10994_v29 }
0x1e80   :  { %9008 = vmatprep.mubr.msk.f32.mxu1 %vm9484_vm5, %v9483_v39 }
0x1e83   :  { %9009 = vmatmul.mubr.msk.f32.gmra.mxu1 %vm227_vm1, %v11006_v17 }
0x1e84   :  { %9042 = vmatprep.mubr.msk.f32.mxu1 %vm9484_vm5, %v9483_v39 }
0x1e87   :  { %9043 = vmatmul.mubr.msk.f32.vlgmr.msra.gmra.mxu1 %vm227_vm1, %v10947_v27 }
0x1e88   :  { %9045 = vmatprep.mubr.msk.f32.mxu1 %vm9484_vm5, %v9483_v39 }
0x1e8b   :  { %9046 = vmatmul.mubr.msk.f32.gmra.mxu1 %vm227_vm1, %v10962_v37 }
0x1e8c   :  { %9048 = vmatprep.mubr.msk.f32.mxu1 %vm9484_vm5, %v9483_v39 }
0x1e8f   :  { %9049 = vmatmul.mubr.msk.f32.gmra.mxu1 %vm227_vm1, %v10979_v61 }
0x1e90   :  { %9051 = vmatprep.mubr.msk.f32.mxu1 %vm9484_vm5, %v9483_v39 }
0x1e93   :  { %9052 = vmatmul.mubr.msk.f32.gmra.mxu1 %vm227_vm1, %v10994_v29 }
0x1e94   :  { %9054 = vmatprep.mubr.msk.f32.mxu1 %vm9484_vm5, %v9483_v39 }
0x1e97   :  { %9055 = vmatmul.mubr.msk.f32.gmra.mxu1 %vm227_vm1, %v11006_v17 }
0x1e98   :  { %9092 = vmatprep.mubr.msk.f32.mxu1 %vm9484_vm5, %v9483_v39 }
0x1f1f   :  { %v5628_v15 = vpop.f32.mrf.mxu1 }
0x1f20   :  { %8974 = vmatmul.mubr.msk.f32.vlgmr.msra.gmra.mxu0 %vm635_vm6, %v5628_v15  ;;  %v5032_v15 = vadd.f32 %v11470_v54, %v11535_v20  ;;  %v5047_v54 = vadd.f32 %v11494_v60, %v11541_v35 }
0x1f21   :  { %v8958_v49 = vpop.f32.mrf.mxu1  ;;  %9012 = vmatpush3.msra.mxu0 %v7350_v21  ;;  %8976 = vmatprep.mubr.msk.f32.mxu0 %vm9484_vm5, %v9483_v39 }
0x1f22   :  { %9013 = vmatprep.subr.mxu0 %v9483_v39 }
0x1f23   :  { %v5633_v2 = vpop.f32.mrf.mxu1  ;;  %9014 = vmatpush3.msra.mxu0 %v7349_v12 }
0x1f24   :  { %8977 = vmatmul.mubr.msk.f32.gmra.mxu0 %vm635_vm6, %v5633_v2  ;;  %9015 = vmatprep.subr.mxu0 %v9483_v39  ;;  %v5037_v2 = vadd.f32 %v11481_v43, %v11537_v5 }
0x1f25   :  { %v8961_v45 = vpop.f32.mrf.mxu1  ;;  %8979 = vmatprep.mubr.msk.f32.mxu0 %vm9484_vm5, %v9483_v39  ;;  %9016 = vmatpush3.msra.mxu0 %v7348_v50 }
0x1f26   :  { %9017 = vmatprep.subr.mxu0 %v9483_v39 }
0x1f27   :  { %v5638_v31 = vpop.f32.mrf.mxu1  ;;  %9018 = vmatpush3.msra.mxu0 %v7347_v53 }
0x1f28   :  { %8980 = vmatmul.mubr.msk.f32.gmra.mxu0 %vm635_vm6, %v5638_v31  ;;  %9057 = vmatprep.subr.mxu0 %v9483_v39 }
0x1f29   :  { %v8964_v63 = vpop.f32.mrf.mxu1  ;;  %8982 = vmatprep.mubr.msk.f32.mxu0 %vm9484_vm5, %v9483_v39 }
0x1f2b   :  { %v5643_v9 = vpop.f32.mrf.mxu1 }
0x1f2c   :  { %8983 = vmatmul.mubr.msk.f32.gmra.mxu0 %vm635_vm6, %v5643_v9 }
0x1f2d   :  { %v8967_v7 = vpop.f32.mrf.mxu1  ;;  %8985 = vmatprep.mubr.msk.f32.mxu0 %vm9484_vm5, %v9483_v39 }
0x1f2f   :  { %v5648_v59 = vpop.f32.mrf.mxu1 }
0x1f30   :  { %8986 = vmatmul.mubr.msk.f32.gmra.mxu0 %vm635_vm6, %v5648_v59 }
0x1f31   :  { %v8970_v36 = vpop.f32.mrf.mxu1  ;;  %9019 = vmatprep.mubr.msk.f32.mxu0 %vm9484_vm5, %v9483_v39 }
0x1f33   :  { %v11707_v47 = vpop.f32.mrf.mxu1 }
0x1f34   :  { %9020 = vmatmul.mubr.msk.f32.vlgmr.msra.gmra.mxu0 %vm227_vm1, %v10947_v27 }
0x1f35   :  { %v8998_v11 = vpop.f32.mrf.mxu1  ;;  %9022 = vmatprep.mubr.msk.f32.mxu0 %vm9484_vm5, %v9483_v39 }
0x1f37   :  { %v11713_v14 = vpop.f32.mrf.mxu1 }
0x1f38   :  { %9023 = vmatmul.mubr.msk.f32.gmra.mxu0 %vm227_vm1, %v10962_v37 }
0x1f39   :  { %v9001_v22 = vpop.f32.mrf.mxu1  ;;  %9025 = vmatprep.mubr.msk.f32.mxu0 %vm9484_vm5, %v9483_v39 }
0x1f3b   :  { %v11719_v41 = vpop.f32.mrf.mxu1 }
0x1f3c   :  { %9026 = vmatmul.mubr.msk.f32.gmra.mxu0 %vm227_vm1, %v10979_v61 }
0x1f3d   :  { %v9004_v19 = vpop.f32.mrf.mxu1  ;;  %9028 = vmatprep.mubr.msk.f32.mxu0 %vm9484_vm5, %v9483_v39 }
0x1f3f   :  { %v11725_v27 = vpop.f32.mrf.mxu1 }
0x1f40   :  { %9029 = vmatmul.mubr.msk.f32.gmra.mxu0 %vm227_vm1, %v10994_v29 }
0x1f41   :  { %v9007_v58 = vpop.f32.mrf.mxu1  ;;  %9031 = vmatprep.mubr.msk.f32.mxu0 %vm9484_vm5, %v9483_v39 }
0x1f43   :  { %v11731_v37 = vpop.f32.mrf.mxu1 }
0x1f44   :  { %9032 = vmatmul.mubr.msk.f32.gmra.mxu0 %vm227_vm1, %v11006_v17 }
0x1f45   :  { %v9010_v26 = vpop.f32.mrf.mxu1  ;;  %9067 = vmatprep.mubr.msk.f32.mxu0 %vm9484_vm5, %v9483_v39 }
0x1f47   :  { %v6049_v61 = vpop.f32.mrf.mxu1 }
0x1f48   :  { %v6050_v55 = vadd.f32 %v7363_v16, %v6049_v61 }
0x1f49   :  { %v9044_v6 = vpop.f32.mrf.mxu1 }
0x1f4b   :  { %v6054_v40 = vpop.f32.mrf.mxu1 }
0x1f4c   :  { %v6055_v34 = vadd.f32 %v7363_v16, %v6054_v40 }
0x1f4d   :  { %v9047_v38 = vpop.f32.mrf.mxu1 }
0x1f4e   :  { %v7341_v38 = vld [vmem:[%s12073_s7 + $0xf] ss:$0 sm:$0xff] }
0x1f4f   :  { %v6059_v24 = vpop.f32.mrf.mxu1 }
0x1f50   :  { %v6060_v33 = vadd.f32 %v7363_v16, %v6059_v24 }
0x1f51   :  { %v9050_v23 = vpop.f32.mrf.mxu1 }
0x1f52   :  { %v5844_v23 = vadd.f32 %v7341_v38, %v11707_v47  ;;  %v5859_v47 = vadd.f32 %v7341_v38, %v11725_v27 }
0x1f53   :  { %v6064_v29 = vpop.f32.mrf.mxu1 }
0x1f54   :  { %v6065_v17 = vadd.f32 %v7363_v16, %v6064_v29  ;;  %v5849_v29 = vadd.f32 %v7341_v38, %v11713_v14  ;;  %v5864_v14 = vadd.f32 %v7341_v38, %v11731_v37  ;;  %v9454_v37 = vld [vmem:[%s12067_s1 + $0x8] sm:$0xff] }
0x1f55   :  { %v9053_v44 = vpop.f32.mrf.mxu1 }
0x1f56   :  { %v5854_v44 = vadd.f32 %v7341_v38, %v11719_v41 }
0x1f57   :  { %v6069_v62 = vpop.f32.mrf.mxu1 }
0x1f58   :  { %v6070_v8 = vadd.f32 %v7363_v16, %v6069_v62 }
0x1f59   :  { %v9056_v30 = vpop.f32.mrf.mxu1 }
0x1f5a   :  { %9083 = vmatpush3.msk.msra.mxu1 %vm211_vm3, %v6070_v8  ;;  %v9453_v8 = vld [vmem:[%s12067_s1] sm:$0xff] }
0x1f5b   :  { %9084 = vmatprep.subr.mxu1 %v9483_v39 }
0x1f5c   :  { %9085 = vmatpush3.msra.mxu1 %v6065_v17 }
0x1f5d   :  { %9086 = vmatprep.subr.mxu1 %v9483_v39 }
0x1f5e   :  { %9087 = vmatpush3.msra.mxu1 %v6060_v33 }
0x1f5f   :  { %9088 = vmatprep.subr.mxu1 %v9483_v39 }
0x1f60   :  { %9089 = vmatpush3.msra.mxu1 %v6055_v34 }
0x1f61   :  { %9090 = vmatprep.subr.mxu1 %v9483_v39 }
0x1f62   :  { %9091 = vmatpush3.msra.mxu1 %v6050_v55 }
0x1f63   :  { %9124 = vmatprep.subr.mxu1 %v9483_v39 }
0x1fe0   :  { %v5735_v0 = vpop.f32.mrf.mxu0 }
0x1fe1   :  { %v11748_v48 = vadd.f32 %v5735_v0, %v5027_v32 }
0x1fe2   :  { %v8975_v21 = vpop.f32.mrf.mxu0 }
0x1fe4   :  { %v5740_v12 = vpop.f32.mrf.mxu0 }
0x1fe5   :  { %v11752_v49 = vadd.f32 %v5740_v12, %v5032_v15  ;;  %v9455_v12 = vld [vmem:[%s12067_s1 + $0x10] sm:$0xff] }
0x1fe6   :  { %v8978_v50 = vpop.f32.mrf.mxu0 }
0x1fe8   :  { %v5745_v53 = vpop.f32.mrf.mxu0 }
0x1fe9   :  { %v11756_v45 = vadd.f32 %v5745_v53, %v5037_v2 }
0x1fea   :  { %v8981_v31 = vpop.f32.mrf.mxu0 }
0x1fec   :  { %v5750_v10 = vpop.f32.mrf.mxu0 }
0x1fed   :  { %v11760_v63 = vadd.f32 %v5750_v10, %v5042_v52 }
0x1fee   :  { %v8984_v9 = vpop.f32.mrf.mxu0 }
0x1ff0   :  { %v5755_v20 = vpop.f32.mrf.mxu0 }
0x1ff1   :  { %v11764_v7 = vadd.f32 %v5755_v20, %v5047_v54 }
0x1ff2   :  { %v8987_v59 = vpop.f32.mrf.mxu0 }
0x1ff4   :  { %v5946_v36 = vpop.f32.mrf.mxu0 }
0x1ff5   :  { %v5947_v24 = vadd.f32 %v7352_v1, %v5946_v36 }
0x1ff6   :  { %v9021_v43 = vpop.f32.mrf.mxu0 }
0x1ff8   :  { %v5951_v5 = vpop.f32.mrf.mxu0 }
0x1ff9   :  { %v5952_v40 = vadd.f32 %v7352_v1, %v5951_v5 }
0x1ffa   :  { %v9024_v11 = vpop.f32.mrf.mxu0 }
0x1ffc   :  { %v5956_v22 = vpop.f32.mrf.mxu0 }
0x1ffd   :  { %v5957_v35 = vadd.f32 %v7352_v1, %v5956_v22 }
0x1ffe   :  { %v9027_v19 = vpop.f32.mrf.mxu0 }
0x2000   :  { %v5961_v58 = vpop.f32.mrf.mxu0 }
0x2001   :  { %v5962_v60 = vadd.f32 %v7352_v1, %v5961_v58 }
0x2002   :  { %v9030_v26 = vpop.f32.mrf.mxu0 }
0x2004   :  { %v5966_v25 = vpop.f32.mrf.mxu0 }
0x2005   :  { %v5967_v61 = vadd.f32 %v7352_v1, %v5966_v25  ;;  %v9456_v25 = vld [vmem:[%s12067_s1 + $0x18] sm:$0xff] }
0x2006   :  { %v9033_v6 = vpop.f32.mrf.mxu0 }
0x2007   :  { %9058 = vmatpush3.xpose.msk.msra.mxu0 %vm635_vm6, %v5967_v61 }
0x2008   :  { %9059 = vmatprep.subr.mxu0 %v9483_v39 }
0x200b   :  { %9060 = vmatpush3.xpose.msk.msra.mxu0 %vm635_vm6, %v5962_v60 }
0x200c   :  { %9061 = vmatprep.subr.mxu0 %v9483_v39 }
0x200f   :  { %9062 = vmatpush3.xpose.msk.msra.mxu0 %vm635_vm6, %v5957_v35 }
0x2010   :  { %9063 = vmatprep.subr.mxu0 %v9483_v39 }
0x2013   :  { %9064 = vmatpush3.xpose.msk.msra.mxu0 %vm635_vm6, %v5952_v40  ;;  %v9457_v40 = vld [vmem:[%s12067_s1 + $0x20] sm:$0x3] }
0x2014   :  { %9065 = vmatprep.subr.mxu0 %v9483_v39 }
0x2017   :  { %9066 = vmatpush3.xpose.msk.msra.mxu0 %vm635_vm6, %v5947_v24 }
0x2018   :  { %9107 = vmatprep.subr.mxu0 %v9483_v39 }
0x201a   :  { %9068 = vmatmul.mubr.msk.f32.vlgmr.msra.gmra.mxu0 %vm635_vm6, %v5844_v23 }
0x201b   :  { %9070 = vmatprep.mubr.msk.f32.mxu0 %vm9484_vm5, %v9483_v39 }
0x201e   :  { %9071 = vmatmul.mubr.msk.f32.gmra.mxu0 %vm635_vm6, %v5849_v29 }
0x201f   :  { %9073 = vmatprep.mubr.msk.f32.mxu0 %vm9484_vm5, %v9483_v39 }
0x2022   :  { %9074 = vmatmul.mubr.msk.f32.gmra.mxu0 %vm635_vm6, %v5854_v44 }
0x2023   :  { %9076 = vmatprep.mubr.msk.f32.mxu0 %vm9484_vm5, %v9483_v39 }
0x2026   :  { %9077 = vmatmul.mubr.msk.f32.gmra.mxu0 %vm635_vm6, %v5859_v47 }
0x2027   :  { %9079 = vmatprep.mubr.msk.f32.mxu0 %vm9484_vm5, %v9483_v39 }
0x202a   :  { %9080 = vmatmul.mubr.msk.f32.gmra.mxu0 %vm635_vm6, %v5864_v14 }
0x202b   :  { %9109 = vmatprep.mubr.msk.f32.mxu0 %vm9484_vm5, %v9483_v39 }
0x20da   :  { %v6169_v41 = vpop.f32.mrf.mxu0 }
0x20db   :  { %v6193_v16 = vmul.f32 0.35355338, %v6169_v41 }
0x20dc   :  { %v9069_v62 = vpop.f32.mrf.mxu0 }
0x20dd   :  { %v6198_v27 = vadd.f32 %v9453_v8, %v6193_v16 }
0x20de   :  { %v6174_v30 = vpop.f32.mrf.mxu0 }
0x20df   :  { %v6194_v17 = vmul.f32 0.35355338, %v6174_v30  ;;  %v6203_v33 = vsel %vm766_vm7, %v6198_v27, -inf }
0x20e0   :  { %6204 = vmax.xlane.f32.xlu0 %v6203_v33  ;;  %v9072_v34 = vpop.f32.mrf.mxu0 }
0x20e1   :  { %v6199_v55 = vadd.f32 %v9454_v37, %v6194_v17 }
0x20e2   :  { %v6179_v32 = vpop.f32.mrf.mxu0 }
0x20e3   :  { %v6195_v0 = vmul.f32 0.35355338, %v6179_v32  ;;  %v6206_v21 = vsel %vm766_vm7, %v6199_v55, -inf }
0x20e4   :  { %6207 = vmax.xlane.f32.xlu1 %v6206_v21  ;;  %v9075_v15 = vpop.f32.mrf.mxu0 }
0x20e5   :  { %v6200_v50 = vadd.f32 %v9455_v12, %v6195_v0 }
0x20e6   :  { %v6184_v2 = vpop.f32.mrf.mxu0 }
0x20e7   :  { %v6209_v53 = vsel %vm766_vm7, %v6200_v50, -inf  ;;  %v6196_v58 = vmul.f32 0.35355338, %v6184_v2 }
0x20e8   :  { %6210 = vmax.xlane.f32.xlu0 %v6209_v53  ;;  %v9078_v31 = vpop.f32.mrf.mxu0 }
0x20e9   :  { %v6201_v61 = vadd.f32 %v9456_v25, %v6196_v58  ;;  %v11865_v25 = vld [vmem:[%s12075_s9 + $0x8] sm:$0xff] }
0x20ea   :  { %v6189_v52 = vpop.f32.mrf.mxu0 }
0x20eb   :  { %v6197_v6 = vmul.f32 0.35355338, %v6189_v52  ;;  %v6212_v23 = vsel %vm766_vm7, %v6201_v61, -inf }
0x20ec   :  { %v9081_v10 = vpop.f32.mrf.mxu0 }
0x20ed   :  { %v6202_v38 = vadd.f32 %v9457_v40, %v6197_v6 }
0x20ef   :  { %v6215_v29 = vsel %vm779_vm8, %v6202_v38, -inf }
0x2169   :  { %v6205_v9 = vpop.xlane.xlu0 %6204 }
0x216a   :  { %v6218_v54 = vsub.f32 %v6198_v27, %v6205_v9 }
0x216c   :  { %v6223_v20 = vmul.f32 1.442695, %v6218_v54 }
0x216d   :  { %v6208_v59 = vpop.xlane.xlu1 %6207 }
0x216e   :  { %9400 = vpow2.f32 %v6223_v20  ;;  %v6219_v36 = vsub.f32 %v6199_v55, %v6208_v59 }
0x2170   :  { %v6225_v43 = vmul.f32 1.442695, %v6219_v36 }
0x2171   :  { %v6211_v5 = vpop.xlane.xlu0 %6210 }
0x2172   :  { %9402 = vpow2.f32 %v6225_v43  ;;  %v6220_v11 = vsub.f32 %v6200_v50, %v6211_v5  ;;  %v7385_v50 = vld [vmem:[%s12074_s8 + $0x38] sm:$0xff] }
0x2173   :  { %9108 = vmatpush3.msra.mxu0 %v7385_v50 }
0x2174   :  { %v6227_v22 = vmul.f32 1.442695, %v6220_v11  ;;  %9147 = vmatprep.subr.mxu0 %v9483_v39 }
0x2176   :  { %9404 = vpow2.f32 %v6227_v22 }
0x217b   :  { %v9401_v19 = vpop.eup %9400 }
0x217c   :  { %v6233_v26 = vsel %vm766_vm7, %v9401_v19, 0.0 }
0x217d   :  { %6234 = vadd.xlane.f32.xlu1 %v6233_v26 }
0x217f   :  { %v9403_v1 = vpop.eup %9402 }
0x2180   :  { %v6236_v60 = vsel %vm766_vm7, %v9403_v1, 0.0 }
0x2181   :  { %6237 = vadd.xlane.f32.xlu0 %v6236_v60 }
0x2183   :  { %v9405_v35 = vpop.eup %9404 }
0x2184   :  { %v6239_v24 = vsel %vm766_vm7, %v9405_v35, 0.0 }
0x2185   :  { %6240 = vadd.xlane.f32.xlu1 %v6239_v24  ;;  %6213 = vmax.xlane.f32.xlu0 %v6212_v23 }
0x2189   :  { %6216 = vmax.xlane.f32.xlu1 %v6215_v29 }
0x2206   :  { %v6235_v44 = vpop.xlane.xlu1 %6234 }
0x2207   :  { %9406 = vrcp.f32 %v6235_v44 }
0x220a   :  { %v6238_v47 = vpop.xlane.xlu0 %6237 }
0x220b   :  { %9408 = vrcp.f32 %v6238_v47 }
0x220e   :  { %v6241_v14 = vpop.xlane.xlu1 %6240  ;;  %v6214_v41 = vpop.xlane.xlu0 %6213 }
0x220f   :  { %9410 = vrcp.f32 %v6241_v14  ;;  %v6221_v16 = vsub.f32 %v6201_v61, %v6214_v41  ;;  %v6486_v61 = vrot.slane %v11865_v25, %v3181_v46 }
0x2211   :  { %v6229_v62 = vmul.f32 1.442695, %v6221_v16 }
0x2212   :  { %v6217_v8 = vpop.xlane.xlu1 %6216 }
0x2213   :  { %9412 = vpow2.f32 %v6229_v62  ;;  %v6222_v27 = vsub.f32 %v6202_v38, %v6217_v8 }
0x2214   :  { %v9407_v30 = vpop.eup %9406 }
0x2215   :  { %v6253_v17 = vmul.f32 %v9407_v30, %v9401_v19  ;;  %v6231_v33 = vmul.f32 1.442695, %v6222_v27 }
0x2217   :  { %9414 = vpow2.f32 %v6231_v33  ;;  %9093 = vmatmul.mubr.msk.f32.vlgmr.msra.gmra.mxu1 %vm766_vm7, %v6253_v17 }
0x2218   :  { %v9409_v34 = vpop.eup %9408  ;;  %9095 = vmatprep.mubr.msk.f32.mxu1 %vm9484_vm5, %v9483_v39 }
0x2219   :  { %v6254_v37 = vmul.f32 %v9409_v34, %v9403_v1 }
0x221b   :  { %9096 = vmatmul.mubr.msk.f32.gmra.mxu1 %vm766_vm7, %v6254_v37 }
0x221c   :  { %v9411_v55 = vpop.eup %9410  ;;  %9098 = vmatprep.mubr.msk.f32.mxu1 %vm9484_vm5, %v9483_v39 }
0x221d   :  { %v6255_v32 = vmul.f32 %v9411_v55, %v9405_v35 }
0x221f   :  { %9099 = vmatmul.mubr.msk.f32.gmra.mxu1 %vm766_vm7, %v6255_v32 }
0x2220   :  { %v9413_v0 = vpop.eup %9412  ;;  %9101 = vmatprep.mubr.msk.f32.mxu1 %vm9484_vm5, %v9483_v39 }
0x2221   :  { %v6242_v21 = vsel %vm766_vm7, %v9413_v0, 0.0 }
0x2222   :  { %6243 = vadd.xlane.f32.xlu0 %v6242_v21 }
0x2224   :  { %v9415_v15 = vpop.eup %9414 }
0x2225   :  { %v6245_v12 = vsel %vm779_vm8, %v9415_v15, 0.0 }
0x2226   :  { %6246 = vadd.xlane.f32.xlu1 %v6245_v12 }
0x22ab   :  { %v6244_v2 = vpop.xlane.xlu0 %6243 }
0x22ac   :  { %9416 = vrcp.f32 %v6244_v2 }
0x22af   :  { %v6247_v53 = vpop.xlane.xlu1 %6246 }
0x22b0   :  { %9418 = vrcp.f32 %v6247_v53 }
0x22b9   :  { %v9417_v31 = vpop.eup %9416 }
0x22ba   :  { %v6256_v52 = vmul.f32 %v9417_v31, %v9413_v0 }
0x22bc   :  { %9102 = vmatmul.mubr.msk.f32.gmra.mxu1 %vm766_vm7, %v6256_v52 }
0x22bd   :  { %v9419_v10 = vpop.eup %9418  ;;  %9104 = vmatprep.mubr.msk.f32.mxu1 %vm9484_vm5, %v9483_v39 }
0x22be   :  { %v6257_v9 = vmul.f32 %v9419_v10, %v9415_v15 }
0x22c0   :  { %9105 = vmatmul.mubr.msk.f32.gmra.mxu1 %vm766_vm7, %v6257_v9 }
0x22c1   :  { %9132 = vmatprep.mubr.msk.f32.mxu1 %vm9484_vm5, %v9483_v39 }
0x22d7   :  { %v6342_v54 = vpop.f32.mrf.mxu1 }
0x22d8   :  { %9110 = vmatmul.mubr.msk.f32.vlgmr.msra.gmra.mxu0 %vm635_vm6, %v6342_v54 }
0x22d9   :  { %v9094_v20 = vpop.f32.mrf.mxu1  ;;  %9112 = vmatprep.mubr.msk.f32.mxu0 %vm9484_vm5, %v9483_v39 }
0x22db   :  { %v6347_v59 = vpop.f32.mrf.mxu1 }
0x22dc   :  { %9113 = vmatmul.mubr.msk.f32.gmra.mxu0 %vm635_vm6, %v6347_v59 }
0x22dd   :  { %v9097_v36 = vpop.f32.mrf.mxu1  ;;  %9115 = vmatprep.mubr.msk.f32.mxu0 %vm9484_vm5, %v9483_v39 }
0x22df   :  { %v6352_v43 = vpop.f32.mrf.mxu1 }
0x22e0   :  { %9116 = vmatmul.mubr.msk.f32.gmra.mxu0 %vm635_vm6, %v6352_v43 }
0x22e1   :  { %v9100_v5 = vpop.f32.mrf.mxu1  ;;  %9118 = vmatprep.mubr.msk.f32.mxu0 %vm9484_vm5, %v9483_v39 }
0x237c   :  { %v6357_v11 = vpop.f32.mrf.mxu1 }
0x237d   :  { %9119 = vmatmul.mubr.msk.f32.gmra.mxu0 %vm635_vm6, %v6357_v11 }
0x237e   :  { %v9103_v22 = vpop.f32.mrf.mxu1  ;;  %9121 = vmatprep.mubr.msk.f32.mxu0 %vm9484_vm5, %v9483_v39 }
0x2380   :  { %v6362_v19 = vpop.f32.mrf.mxu1 }
0x2381   :  { %9122 = vmatmul.mubr.msk.f32.gmra.mxu0 %vm635_vm6, %v6362_v19 }
0x2382   :  { %v9106_v58 = vpop.f32.mrf.mxu1  ;;  %9179 = vmatprep.mubr.msk.f32.mxu0 %vm9484_vm5, %v9483_v39 }
0x2398   :  { %v6449_v26 = vpop.f32.mrf.mxu0 }
0x2399   :  { %v6473_v1 = vadd.f32 %v6449_v26, %v11748_v48 }
0x239a   :  { %v9111_v6 = vpop.f32.mrf.mxu0 }
0x239b   :  { %v6478_v60 = vadd.f32 %v6473_v1, %v10855_v51  ;;  %v11913_v1 = vrot.slane %v11865_v25, %v10760_v3  ;;  %v11917_v6 = vrot.slane %v11865_v25, %v10763_v56 }
0x239c   :  { %v6454_v35 = vpop.f32.mrf.mxu0 }
0x239d   :  { %v11871_v40 = vadd.f32 %v6486_v61, %v6478_v60  ;;  %v6474_v38 = vadd.f32 %v6454_v35, %v11752_v49 }
0x239e   :  { %v9114_v24 = vpop.f32.mrf.mxu0 }
0x239f   :  { %v6479_v48 = vadd.f32 %v6474_v38, %v10860_v28  ;;  %v6492_v23 = vsel %vm227_vm1, %v11871_v40, 0.0 }
0x23a0   :  { %6493 = vadd.xlane.f32.xlu0 %v6492_v23  ;;  %v6459_v29 = vpop.f32.mrf.mxu0 }
0x23a1   :  { %v6475_v44 = vadd.f32 %v6459_v29, %v11756_v45  ;;  %v6488_v47 = vadd.f32 %v6486_v61, %v6479_v48 }
0x23a2   :  { %v9117_v46 = vpop.f32.mrf.mxu0 }
0x23a3   :  { %v6480_v14 = vadd.f32 %v6475_v44, %v10865_v18  ;;  %v6495_v51 = vsel %vm227_vm1, %v6488_v47, 0.0 }
0x23a4   :  { %6496 = vadd.xlane.f32.xlu1 %v6495_v51 }
0x23a5   :  { %v11880_v41 = vadd.f32 %v6486_v61, %v6480_v14 }
0x23a7   :  { %v6498_v49 = vsel %vm227_vm1, %v11880_v41, 0.0 }
0x23a8   :  { %6499 = vadd.xlane.f32.xlu0 %v6498_v49 }
0x2429   :  { %v6494_v28 = vpop.xlane.xlu0 %6493 }
0x242a   :  { %v6507_v16 = vmul.f32 0.03125, %v6494_v28 }
0x242c   :  { %v6512_v62 = vsub.f32 %v11871_v40, %v6507_v16 }
0x242d   :  { %v6497_v8 = vpop.xlane.xlu1 %6496 }
0x242e   :  { %v6508_v27 = vmul.f32 0.03125, %v6497_v8  ;;  %v6517_v45 = vmul.f32 %v6512_v62, %v6512_v62 }
0x2430   :  { %v6513_v30 = vsub.f32 %v6488_v47, %v6508_v27  ;;  %v6522_v17 = vsel %vm227_vm1, %v6517_v45, 0.0 }
0x2431   :  { %6523 = vadd.xlane.f32.xlu1 %v6522_v17  ;;  %v6500_v18 = vpop.xlane.xlu0 %6499 }
0x2432   :  { %v6509_v33 = vmul.f32 0.03125, %v6500_v18  ;;  %v6518_v34 = vmul.f32 %v6513_v30, %v6513_v30  ;;  %v7417_v18 = vld [vmem:[%s12078_s12 + $0xf8] sm:$0xff] }
0x2433   :  { %9148 = vmatpush3.msra.mxu0 %v7417_v18 }
0x2434   :  { %v6514_v37 = vsub.f32 %v11880_v41, %v6509_v33  ;;  %v6525_v55 = vsel %vm227_vm1, %v6518_v34, 0.0  ;;  %v7416_v33 = vld [vmem:[%s12078_s12 + $0xf0] sm:$0xff]  ;;  %9149 = vmatprep.subr.mxu0 %v9483_v39  ;;  %v7415_v34 = vld [vmem:[%s12078_s12 + $0xe8] sm:$0xff] }
0x2435   :  { %6526 = vadd.xlane.f32.xlu0 %v6525_v55  ;;  %9150 = vmatpush3.msra.mxu0 %v7416_v33  ;;  %v7413_v55 = vld [vmem:[%s12078_s12 + $0xd8] sm:$0xff] }
0x2436   :  { %v6519_v32 = vmul.f32 %v6514_v37, %v6514_v37  ;;  %9151 = vmatprep.subr.mxu0 %v9483_v39 }
0x2437   :  { %9152 = vmatpush3.msra.mxu0 %v7415_v34 }
0x2438   :  { %v6528_v0 = vsel %vm227_vm1, %v6519_v32, 0.0  ;;  %9153 = vmatprep.subr.mxu0 %v9483_v39  ;;  %v7412_v32 = vld [vmem:[%s12078_s12 + $0xd0] sm:$0xff] }
0x2439   :  { %6529 = vadd.xlane.f32.xlu1 %v6528_v0  ;;  %v7411_v0 = vld [vmem:[%s12078_s12 + $0xc8] sm:$0xff] }
0x243d   :  { %v6464_v21 = vpop.f32.mrf.mxu0 }
0x243e   :  { %v6476_v15 = vadd.f32 %v6464_v21, %v11760_v63  ;;  %v7394_v63 = vld [vmem:[%s12076_s10 + $0x38] sm:$0xff]  ;;  %v7410_v21 = vld [vmem:[%s12078_s12 + $0xc0] sm:$0xff] }
0x243f   :  { %v9120_v12 = vpop.f32.mrf.mxu0  ;;  %9125 = vmatpush3.msra.mxu1 %v7394_v63 }
0x2440   :  { %v6481_v50 = vadd.f32 %v6476_v15, %v10870_v42  ;;  %9126 = vmatprep.subr.mxu1 %v9483_v39  ;;  %v7393_v42 = vld [vmem:[%s12076_s10 + $0x30] sm:$0xff]  ;;  %v7409_v15 = vld [vmem:[%s12078_s12 + $0xb8] sm:$0xff] }
0x2441   :  { %v6469_v2 = vpop.f32.mrf.mxu0  ;;  %9127 = vmatpush3.msra.mxu1 %v7393_v42  ;;  %v7408_v12 = vld [vmem:[%s12078_s12 + $0xb0] sm:$0xff] }
0x2442   :  { %v6477_v53 = vadd.f32 %v6469_v2, %v11764_v7  ;;  %v6490_v31 = vadd.f32 %v6486_v61, %v6481_v50  ;;  %9128 = vmatprep.subr.mxu1 %v9483_v39  ;;  %v7391_v7 = vld [vmem:[%s12076_s10 + $0x20] sm:$0xff]  ;;  %v7407_v50 = vld [vmem:[%s12078_s12 + $0xa8] sm:$0xff] }
0x2443   :  { %v9123_v52 = vpop.f32.mrf.mxu0  ;;  %v7406_v2 = vld [vmem:[%s12078_s12 + $0xa0] sm:$0xff] }
0x2444   :  { %v6482_v10 = vadd.f32 %v6477_v53, %v10875_v13  ;;  %v6501_v9 = vsel %vm227_vm1, %v6490_v31, 0.0  ;;  %v7392_v13 = vld [vmem:[%s12076_s10 + $0x28] sm:$0xff]  ;;  %v7405_v53 = vld [vmem:[%s12078_s12 + $0x98] sm:$0xff] }
0x2445   :  { %6502 = vadd.xlane.f32.xlu0 %v6501_v9  ;;  %9129 = vmatpush3.msra.mxu1 %v7392_v13  ;;  %v7403_v52 = vld [vmem:[%s12078_s12 + $0x88] sm:$0xff] }
0x2446   :  { %v6491_v54 = vadd.f32 %v6486_v61, %v6482_v10  ;;  %9130 = vmatprep.subr.mxu1 %v9483_v39  ;;  %v7402_v10 = vld [vmem:[%s12078_s12 + $0x80] sm:$0xff] }
0x2447   :  { %9131 = vmatpush3.msra.mxu1 %v7391_v7 }
0x2448   :  { %v6504_v20 = vsel %vm240_vm4, %v6491_v54, 0.0  ;;  %9194 = vmatprep.subr.mxu1 %v9483_v39 }
0x2449   :  { %6505 = vadd.xlane.f32.xlu1 %v6504_v20 }
0x24ba   :  { %v6524_v59 = vpop.xlane.xlu1 %6523 }
0x24bb   :  { %v6537_v36 = vmul.f32 0.03125, %v6524_v59 }
0x24bd   :  { %v6542_v43 = vadd.f32 1e-06, %v6537_v36 }
0x24be   :  { %v6527_v5 = vpop.xlane.xlu0 %6526 }
0x24bf   :  { %9420 = vrsqrt.f32 %v6542_v43  ;;  %v6538_v11 = vmul.f32 0.03125, %v6527_v5 }
0x24c1   :  { %v6543_v22 = vadd.f32 1e-06, %v6538_v11 }
0x24c2   :  { %v6530_v19 = vpop.xlane.xlu1 %6529 }
0x24c3   :  { %9422 = vrsqrt.f32 %v6543_v22  ;;  %v6539_v58 = vmul.f32 0.03125, %v6530_v19 }
0x24c5   :  { %v6544_v26 = vadd.f32 1e-06, %v6539_v58  ;;  %v7396_v58 = vld [vmem:[%s12077_s11 + $0x1] ss:$0 sm:$0xff] }
0x24c7   :  { %9424 = vrsqrt.f32 %v6544_v26 }
0x24cc   :  { %v9421_v61 = vpop.eup %9420 }
0x24cd   :  { %v6552_v60 = vmul.f32 %v9421_v61, %v6512_v62 }
0x24ce   :  { %v6503_v35 = vpop.xlane.xlu0 %6502 }
0x24cf   :  { %v6561_v38 = vmul.f32 %v11913_v1, %v6552_v60  ;;  %v6510_v24 = vmul.f32 0.03125, %v6503_v35 }
0x24d0   :  { %v9423_v48 = vpop.eup %9422 }
0x24d1   :  { %v6570_v23 = vadd.f32 %v11917_v6, %v6561_v38  ;;  %v6553_v29 = vmul.f32 %v9423_v48, %v6513_v30  ;;  %v11921_v44 = vsub.f32 %v6490_v31, %v6510_v24  ;;  %v7404_v31 = vld [vmem:[%s12078_s12 + $0x90] sm:$0xff] }
0x24d2   :  { %v6506_v47 = vpop.xlane.xlu1 %6505 }
0x24d3   :  { %v6511_v46 = vmul.f32 0.03125, %v6506_v47  ;;  %9133 = vmatmul.mubr.msk.f32.vlgmr.msra.gmra.mxu1 %vm227_vm1, %v6570_v23  ;;  %v6520_v14 = vmul.f32 %v11921_v44, %v11921_v44  ;;  %v6562_v51 = vmul.f32 %v11913_v1, %v6553_v29 }
0x24d4   :  { %v9425_v49 = vpop.eup %9424  ;;  %9135 = vmatprep.mubr.msk.f32.mxu1 %vm9484_vm5, %v9483_v39 }
0x24d5   :  { %v6554_v28 = vmul.f32 %v9425_v49, %v6514_v37  ;;  %v11929_v16 = vsub.f32 %v6491_v54, %v6511_v46  ;;  %v6531_v62 = vsel %vm227_vm1, %v6520_v14, 0.0  ;;  %v6571_v8 = vadd.f32 %v11917_v6, %v6562_v51  ;;  %v7414_v37 = vld [vmem:[%s12078_s12 + $0xe0] sm:$0xff] }
0x24d6   :  { %6532 = vadd.xlane.f32.xlu0 %v6531_v62  ;;  %9154 = vmatpush3.msra.mxu0 %v7414_v37 }
0x24d7   :  { %9136 = vmatmul.mubr.msk.f32.gmra.mxu1 %vm227_vm1, %v6571_v8  ;;  %v6521_v27 = vmul.f32 %v11929_v16, %v11929_v16  ;;  %v6563_v45 = vmul.f32 %v11913_v1, %v6554_v28  ;;  %9155 = vmatprep.subr.mxu0 %v9483_v39 }
0x24d8   :  { %9138 = vmatprep.mubr.msk.f32.mxu1 %vm9484_vm5, %v9483_v39  ;;  %9156 = vmatpush3.msra.mxu0 %v7413_v55 }
0x24d9   :  { %v6534_v30 = vsel %vm240_vm4, %v6521_v27, 0.0  ;;  %v6572_v17 = vadd.f32 %v11917_v6, %v6563_v45  ;;  %9157 = vmatprep.subr.mxu0 %v9483_v39 }
0x24da   :  { %6535 = vadd.xlane.f32.xlu1 %v6534_v30  ;;  %9158 = vmatpush3.msra.mxu0 %v7412_v32 }
0x24db   :  { %9139 = vmatmul.mubr.msk.f32.gmra.mxu1 %vm227_vm1, %v6572_v17  ;;  %9159 = vmatprep.subr.mxu0 %v9483_v39 }
0x24dc   :  { %9141 = vmatprep.mubr.msk.f32.mxu1 %vm9484_vm5, %v9483_v39  ;;  %9160 = vmatpush3.msra.mxu0 %v7411_v0 }
0x24dd   :  { %9161 = vmatprep.subr.mxu0 %v9483_v39 }
0x24de   :  { %9162 = vmatpush3.msra.mxu0 %v7410_v21 }
0x24df   :  { %9163 = vmatprep.subr.mxu0 %v9483_v39 }
0x24e0   :  { %9164 = vmatpush3.msra.mxu0 %v7409_v15 }
0x24e1   :  { %9165 = vmatprep.subr.mxu0 %v9483_v39 }
0x24e2   :  { %9166 = vmatpush3.msra.mxu0 %v7408_v12 }
0x24e3   :  { %9167 = vmatprep.subr.mxu0 %v9483_v39 }
0x24e4   :  { %9168 = vmatpush3.msra.mxu0 %v7407_v50 }
0x24e5   :  { %9169 = vmatprep.subr.mxu0 %v9483_v39 }
0x24e6   :  { %9170 = vmatpush3.msra.mxu0 %v7406_v2 }
0x24e7   :  { %9171 = vmatprep.subr.mxu0 %v9483_v39 }
0x24e8   :  { %9172 = vmatpush3.msra.mxu0 %v7405_v53 }
0x24e9   :  { %9173 = vmatprep.subr.mxu0 %v9483_v39 }
0x24ea   :  { %9174 = vmatpush3.msra.mxu0 %v7404_v31 }
0x24eb   :  { %9175 = vmatprep.subr.mxu0 %v9483_v39 }
0x24ec   :  { %9176 = vmatpush3.msra.mxu0 %v7403_v52 }
0x24ed   :  { %9177 = vmatprep.subr.mxu0 %v9483_v39 }
0x24ee   :  { %9178 = vmatpush3.msra.mxu0 %v7402_v10 }
0x255f   :  { %v6533_v9 = vpop.xlane.xlu0 %6532 }
0x2560   :  { %v6540_v54 = vmul.f32 0.03125, %v6533_v9 }
0x2562   :  { %v6545_v20 = vadd.f32 1e-06, %v6540_v54 }
0x2563   :  { %v6536_v63 = vpop.xlane.xlu1 %6535 }
0x2564   :  { %9426 = vrsqrt.f32 %v6545_v20  ;;  %v6541_v42 = vmul.f32 0.03125, %v6536_v63 }
0x2566   :  { %v6546_v13 = vadd.f32 1e-06, %v6541_v42  ;;  %v6827_v42 = vrot.slane %v11865_v25, %v3525_v57 }
0x2568   :  { %9428 = vrsqrt.f32 %v6546_v13 }
0x2571   :  { %v9427_v7 = vpop.eup %9426 }
0x2572   :  { %v6555_v59 = vmul.f32 %v9427_v7, %v11921_v44 }
0x2574   :  { %v6564_v36 = vmul.f32 %v11913_v1, %v6555_v59 }
0x2575   :  { %v9429_v43 = vpop.eup %9428 }
0x2576   :  { %v6556_v5 = vmul.f32 %v9429_v43, %v11929_v16  ;;  %v6573_v11 = vadd.f32 %v11917_v6, %v6564_v36 }
0x2578   :  { %9142 = vmatmul.mubr.msk.f32.gmra.mxu1 %vm227_vm1, %v6573_v11  ;;  %v6565_v22 = vmul.f32 %v11913_v1, %v6556_v5 }
0x2579   :  { %9144 = vmatprep.mubr.msk.f32.mxu1 %vm9484_vm5, %v9483_v39 }
0x257a   :  { %v6574_v19 = vadd.f32 %v11917_v6, %v6565_v22 }
0x257c   :  { %9145 = vmatmul.mubr.msk.f32.gmra.mxu1 %vm227_vm1, %v6574_v19 }
0x257d   :  { %9202 = vmatprep.mubr.msk.f32.mxu1 %vm9484_vm5, %v9483_v39 }
0x2593   :  { %v6669_v26 = vpop.f32.mrf.mxu1 }
0x2594   :  { %v6670_v61 = vadd.f32 %v7396_v58, %v6669_v26 }
0x2595   :  { %v9134_v60 = vpop.f32.mrf.mxu1 }
0x2596   :  { %v6698_v35 = vmul.f32 0.70710677, %v6670_v61  ;;  %v6693_v46 = vmul.f32 0.5, %v6670_v61  ;;  %v6856_v60 = vld [vmem:[%s12079_s13 + $0x10] sm:$0xff] }
0x2597   :  { %v6674_v38 = vpop.f32.mrf.mxu1 }
0x2598   :  { %9430 = verf.f32 %v6698_v35  ;;  %v6675_v1 = vadd.f32 %v7396_v58, %v6674_v38  ;;  %v6855_v35 = vld [vmem:[%s12079_s13 + $0x8] sm:$0xff]  ;;  %v6854_v38 = vld [vmem:[%s12079_s13] sm:$0xff] }
0x2599   :  { %v9137_v24 = vpop.f32.mrf.mxu1 }
0x259a   :  { %v6699_v48 = vmul.f32 0.70710677, %v6675_v1  ;;  %v6694_v28 = vmul.f32 0.5, %v6675_v1 }
0x259b   :  { %v6679_v23 = vpop.f32.mrf.mxu1 }
0x259c   :  { %9432 = verf.f32 %v6699_v48  ;;  %v6680_v6 = vadd.f32 %v7396_v58, %v6679_v23  ;;  %v9459_v23 = vld [vmem:[%s12070_s4] sm:$0xff]  ;;  %s9461_s4 = scalar_lea.vmem %s6943_s29, 32 }
0x259d   :  { %v9140_v29 = vpop.f32.mrf.mxu1  ;;  %p9462_p0 = scmp.ne.s32.totalorder %s6943_s29, %s9461_s4  ;;  %p9467_p2 = scmp.lt.s32.totalorder %s9461_s4, %s9461_s4 }
0x259e   :  { %v6700_v44 = vmul.f32 0.70710677, %v6680_v6  ;;  %v6695_v27 = vmul.f32 0.5, %v6680_v6  ;;  %v6847_v6 = vrot.slane %v9459_v23, %v10760_v3 }
0x259f   :  { %p9468_p3 = por %p9467_p2, %p9466_p1 }
0x25a0   :  { %9434 = verf.f32 %v6700_v44  ;;  %v6852_v44 = vrot.slane %v9459_v23, %v10763_v56 }
0x25a1   :  { %p9469_p4 = pnand %p9468_p3, %p9462_p0 }
0x25a5   :  { %v9431_v47 = vpop.eup %9430 }
0x25a6   :  { %v6708_v14 = vadd.f32 1.0, %v9431_v47 }
0x25a8   :  { %v6713_v51 = vmul.f32 %v6708_v14, %v6693_v46  ;;  %v9460_v14 = vld [vmem:[%s12069_s3] sm:$0xff] }
0x25a9   :  { %v9433_v49 = vpop.eup %9432 }
0x25aa   :  { %v6709_v16 = vadd.f32 1.0, %v9433_v49  ;;  %9180 = vmatmul.mubr.f32.vlgmr.msra.gmra.mxu0 %v6713_v51  ;;  %v6861_v51 = vrot.slane %v9460_v14, %v10760_v3 }
0x25ab   :  { %9182 = vmatprep.mubr.msk.f32.mxu0 %vm9484_vm5, %v9483_v39 }
0x25ac   :  { %v6714_v62 = vmul.f32 %v6709_v16, %v6694_v28 }
0x25ad   :  { %v9435_v8 = vpop.eup %9434 }
0x25ae   :  { %v6710_v45 = vadd.f32 1.0, %v9435_v8  ;;  %9183 = vmatmul.mubr.f32.gmra.mxu0 %v6714_v62 }
0x25af   :  { %9185 = vmatprep.mubr.msk.f32.mxu0 %vm9484_vm5, %v9483_v39 }
0x25b0   :  { %v6715_v30 = vmul.f32 %v6710_v45, %v6695_v27 }
0x25b2   :  { %9186 = vmatmul.mubr.f32.gmra.mxu0 %v6715_v30 }
0x25b3   :  { %9188 = vmatprep.mubr.msk.f32.mxu0 %vm9484_vm5, %v9483_v39 }
0x2638   :  { %v6684_v17 = vpop.f32.mrf.mxu1 }
0x2639   :  { %v6685_v18 = vadd.f32 %v7396_v58, %v6684_v17 }
0x263a   :  { %v9143_v33 = vpop.f32.mrf.mxu1 }
0x263b   :  { %v6701_v34 = vmul.f32 0.70710677, %v6685_v18  ;;  %v6696_v15 = vmul.f32 0.5, %v6685_v18 }
0x263c   :  { %v6689_v37 = vpop.f32.mrf.mxu1 }
0x263d   :  { %9436 = verf.f32 %v6701_v34  ;;  %v6690_v55 = vadd.f32 %v7396_v58, %v6689_v37 }
0x263e   :  { %v9146_v32 = vpop.f32.mrf.mxu1 }
0x263f   :  { %v6702_v0 = vmul.f32 0.70710677, %v6690_v55  ;;  %v6697_v53 = vmul.f32 0.5, %v6690_v55 }
0x2641   :  { %9438 = verf.f32 %v6702_v0 }
0x264a   :  { %v9437_v21 = vpop.eup %9436 }
0x264b   :  { %v6711_v12 = vadd.f32 1.0, %v9437_v21 }
0x264d   :  { %v6716_v50 = vmul.f32 %v6711_v12, %v6696_v15 }
0x264e   :  { %v9439_v2 = vpop.eup %9438 }
0x264f   :  { %v6712_v31 = vadd.f32 1.0, %v9439_v2  ;;  %9189 = vmatmul.mubr.f32.gmra.mxu0 %v6716_v50 }
0x2650   :  { %9191 = vmatprep.mubr.msk.f32.mxu0 %vm9484_vm5, %v9483_v39 }
0x2651   :  { %v6717_v52 = vmul.f32 %v6712_v31, %v6697_v53 }
0x2653   :  { %9192 = vmatmul.mubr.f32.gmra.mxu0 %v6717_v52 }
0x266a   :  { %v6801_v10 = vpop.f32.mrf.mxu0 }
0x266b   :  { %v6822_v63 = vadd.f32 %v6801_v10, %v11871_v40 }
0x266c   :  { %v9181_v9 = vpop.f32.mrf.mxu0 }
0x266d   :  { %v6828_v36 = vadd.f32 %v6827_v42, %v6822_v63 }
0x266e   :  { %v6806_v54 = vpop.f32.mrf.mxu0 }
0x2670   :  { %v9184_v20 = vpop.f32.mrf.mxu0 }
0x2672   :  { %v6810_v13 = vpop.f32.mrf.mxu0 }
0x2673   :  { %v6823_v7 = vadd.f32 %v6810_v13, %v11880_v41  ;;  %v6857_v41 = vld [vmem:[%s12079_s13 + $0x18] sm:$0xff] }
0x2674   :  { %v9187_v59 = vpop.f32.mrf.mxu0  ;;  %9195 = vmatpush3.msra.mxu1 %v6857_v41 }
0x2675   :  { %v6829_v43 = vadd.f32 %v6827_v42, %v6823_v7  ;;  %9196 = vmatprep.subr.mxu1 %v9483_v39 }
0x2676   :  { %9197 = vmatpush3.msra.mxu1 %v6856_v60 }
0x2677   :  { %v6830_v5 = vsel %vm202_vm2, %v6828_v36, %v6829_v43  ;;  %9198 = vmatprep.subr.mxu1 %v9483_v39 }
0x2678   :  { %v6831_v11 = vsel %vm240_vm4, %v6830_v5, 0.0  ;;  %9199 = vmatpush3.msra.mxu1 %v6855_v35 }
0x2679   :  { %6832 = vadd.xlane.f32.xlu0 %v6831_v11  ;;  %9200 = vmatprep.subr.mxu1 %v9483_v39 }
0x267a   :  { %9201 = vmatpush3.msra.mxu1 %v6854_v38 }
0x2702   :  { %v6833_v22 = vpop.xlane.xlu0 %6832 }
0x2703   :  { %v6834_v19 = vmul.f32 0.03125, %v6833_v22 }
0x2705   :  { %v6835_v58 = vsub.f32 %v6830_v5, %v6834_v19 }
0x2707   :  { %v6836_v26 = vmul.f32 %v6835_v58, %v6835_v58 }
0x2709   :  { %v6837_v40 = vsel %vm240_vm4, %v6836_v26, 0.0 }
0x270a   :  { %6838 = vadd.xlane.f32.xlu1 %v6837_v40 }
0x270f   :  { %v6815_v4 = vpop.f32.mrf.mxu0 }
0x2711   :  { %v9190_v57 = vpop.f32.mrf.mxu0 }
0x2713   :  { %v6819_v25 = vpop.f32.mrf.mxu0 }
0x2715   :  { %v9193_v61 = vpop.f32.mrf.mxu0 }
0x2793   :  { %v6839_v1 = vpop.xlane.xlu1 %6838 }
0x2794   :  { %v6840_v24 = vmul.f32 0.03125, %v6839_v1 }
0x2796   :  { %v6841_v48 = vadd.f32 1e-06, %v6840_v24 }
0x2798   :  { %9440 = vrsqrt.f32 %v6841_v48 }
0x27a5   :  { %v9441_v29 = vpop.eup %9440 }
0x27a6   :  { %v6843_v47 = vmul.f32 %v9441_v29, %v6835_v58 }
0x27a8   :  { %v6848_v39 = vmul.f32 %v6847_v6, %v6843_v47 }
0x27aa   :  { %v6853_v46 = vadd.f32 %v6852_v44, %v6848_v39 }
0x27ac   :  { %9203 = vmatmul.mubr.msk.f32.vlgmr.msra.gmra.mxu1 %vm227_vm1, %v6853_v46 }
0x286c   :  { %v6931_v49 = vpop.f32.mrf.mxu1 }
0x286d   :  { %v6932_v28 = vadd.f32 %v6931_v49, %v6861_v51 }
0x286e   :  { %v9204_v16 = vpop.f32.mrf.mxu1 }
0x286f   :  { %6935 = vst [vmem:[#allocation2] sm:$0x3] %v6932_v28 }
0x2870   :  { %9472 = shalt.err (!%p9469_p4)
}
0x2871   :  { %6945 = dma.vmem_to_hbm [thread:$0]  %s6943_s29, 32, %s12080_s14, [#allocation3]  }
0x2872   :  { %9481 = dma.done.wait [#allocation3], 32  }
0x2873   :  { %9482 = vsyncadd [#allocation3], 4294967264 }
0x2874   :  { %6949 = vsyncpa [#allocation3], 1 }

</bundles_post_ra>
